<compile_context>
chip_gen: v6e
topology: v6e:2x2x1
jax: 0.10.0
libtpu: 0.0.40
codegen_flags: <defaults>
</compile_context>

<pallas_src>
import functools

import jax
import jax.numpy as jnp
import numpy as np
from jax.experimental import pallas as pl
from jax.experimental.pallas import tpu as pltpu


def _silu(x):
    return x * jax.nn.sigmoid(x)


@functools.lru_cache(maxsize=None)
def _pltpu_roll_matches_jnp():
    """Probe pltpu.roll's shift convention (vs. jnp.roll) with a tiny kernel."""
    def probe(o_ref):
        o_ref[...] = pltpu.roll(jax.lax.broadcasted_iota(jnp.int32, (8, 128), 1), 1, axis=1)

    try:
        out = pl.pallas_call(probe, out_shape=jax.ShapeDtypeStruct((8, 128), jnp.int32))()
        return bool(np.asarray(out)[0, 0] == 127)   # jnp.roll(iota, 1)[0] == 127
    except Exception:
        return True


def _shift_lanes(x, offset, roll_like_jnp):
    """out[..., p] = x[..., (p + offset) mod n].  Wrapped values only land on positions that the
    per-tap validity masks zero out, so wrap-around is harmless."""
    if offset == 0:
        return x
    n = x.shape[-1]
    amt = ((-offset) if roll_like_jnp else offset) % n
    if amt == 0:
        return x
    return pltpu.roll(x, amt, axis=x.ndim - 1)


def _dw_col(w_all, t):
    """Depthwise-weight column t as (CEXP, 1): one-hot lane select + lane reduce (avoids
    unaligned minor-dim slicing)."""
    kk = w_all.shape[-1]
    sel = jax.lax.broadcasted_iota(jnp.int32, (1, kk), 1) == t
    return jnp.sum(jnp.where(sel, w_all, 0.0), axis=1, keepdims=True)


# ------------------------------ fused Pallas kernel ------------------------------

def mbconv_kernel(x_ref, we_ref, b1_ref, wdw_ref, b2_ref, mask_ref,
                  wse1_ref, bse1_ref, wse2t_ref, bse2_ref, wpt_ref, b3_ref,
                  o_ref, *, kh, kw, hh, ww, b_tile, roll_like_jnp):
    """One grid step == b_tile images.  Everything is channel-major (C, H*W): channels on
    sublanes, pixels on lanes -> lane-dense NCHW output, no padded scratch, no transposes."""
    hw = hh * ww
    ph, pw = (kh - 1) // 2, (kw - 1) // 2
    kcen = ph * kw + pw

    for b in range(b_tile):                                       # static unroll, b_tile small
        xb = x_ref[b]                                             # (CIN, HW) f32

        # ---- 1) expand 1x1 conv (BN folded) + bias + SiLU: bf16 MXU operands, f32 acc ----
        h1 = jnp.dot(we_ref[...], xb.astype(jnp.bfloat16),
                     preferred_element_type=jnp.float32)          # (CEXP, HW)
        h1 = _silu(h1 + b1_ref[...])

        # ---- 2) depthwise kxk, stride 1: lane shifts (XLU) + precomputed validity masks;
        #         per-channel weights broadcast over lanes.  No scratch, no masked stores. ----
        w_all = wdw_ref[...]                                      # (CEXP, KH*KW) f32
        acc = h1 * _dw_col(w_all, kcen)                           # center tap: no shift, no mask
        for di in range(kh):
            for dj in range(kw):
                t = di * kw + dj
                if t == kcen:
                    continue
                off = (di - ph) * ww + (dj - pw)
                tap = _shift_lanes(h1, off, roll_like_jnp)        # (CEXP, HW)
                acc = acc + (tap * mask_ref[t]) * _dw_col(w_all, t)
        h2 = _silu(acc + b2_ref[...])                             # (CEXP, HW)

        # ---- 3) squeeze-excitation: lane reduce + sublane reduce + tiny FCs (VPU/XLU only) ----
        pooled = jnp.sum(h2, axis=1, keepdims=True) * (1.0 / hw)                       # (CEXP, 1)
        z = _silu(jnp.sum(wse1_ref[...] * pooled, axis=0, keepdims=True)
                  + bse1_ref[...])                                                     # (1, CSQ)
        s = jax.nn.sigmoid(jnp.sum(wse2t_ref[...] * z, axis=1, keepdims=True)
                           + bse2_ref[...])                                            # (CEXP, 1)
        h3 = h2 * s

        # ---- 4) project 1x1 conv (BN folded) + residual: output already (COUT, HW) == NCHW,
        #         lane-dense unmasked stores.  StochasticDepth == identity in eval mode. ----
        y = jnp.dot(wpt_ref[...], h3.astype(jnp.bfloat16),
                    preferred_element_type=jnp.float32)           # (COUT, HW)
        o_ref[b] = y + b3_ref[...] + xb


# ------------------------------------ wrapper -------------------------------------

def _pick_batch_tile(n, max_tile=8):
    """Images per grid step: amortize per-step overhead but keep >= 2 grid steps when possible
    so v7x's two TensorCores both get work under dimension_semantics=('parallel',)."""
    best = 1
    for bt in range(1, min(n, max_tile) + 1):
        if n % bt == 0 and (n // bt >= 2 or n == 1):
            best = bt
    return best


def mbconv_forward(x_nchw, fp, *, kernel_size=3, roll_like_jnp=True):
    """MBConv forward (stride 1, cin == cout -> residual).  Input/output NCHW."""
    n, cin, hh, ww = x_nchw.shape
    hw = hh * ww
    kh = kw = kernel_size
    cexp, kk = fp["w_dw"].shape
    cout = fp["wp_t"].shape[0]
    assert kk == kh * kw
    assert cin == cout, "residual path (use_res_connect) requires stride==1 and cin == cout"

    x_chw = x_nchw.reshape(n, cin, hw)          # free reshape; single NCHW input stream

    # Host-built per-tap validity masks (1.0 where the tap lands inside the image, 0.0 where the
    # zero padding would have been).  Shape (KH*KW, 1, HW): kernel indexes the leading dim.
    ph, pw = (kh - 1) // 2, (kw - 1) // 2
    ii, jj = np.divmod(np.arange(hw, dtype=np.int64), ww)
    mask_np = np.empty((kh * kw, 1, hw), np.float32)
    for di in range(kh):
        for dj in range(kw):
            oi, oj = di - ph, dj - pw
            valid = (ii + oi >= 0) & (ii + oi < hh) & (jj + oj >= 0) & (jj + oj < ww)
            mask_np[di * kw + dj, 0, :] = valid
    dw_masks = jnp.asarray(mask_np)

    b_tile = _pick_batch_tile(n)
    grid = (n // b_tile,)

    def full_spec(a):
        nd = a.ndim
        return pl.BlockSpec(a.shape, lambda i: (0,) * nd)        # weights: resident in VMEM

    weights = [fp["we_t"], fp["b1"], fp["w_dw"], fp["b2"], dw_masks,
               fp["w_se1"], fp["b_se1"], fp["w_se2t"], fp["b_se2"],
               fp["wp_t"], fp["b3"]]

    kernel = functools.partial(mbconv_kernel, kh=kh, kw=kw, hh=hh, ww=ww,
                               b_tile=b_tile, roll_like_jnp=roll_like_jnp)

    out = pl.pallas_call(
        kernel,
        out_shape=jax.ShapeDtypeStruct((n, cout, hw), jnp.float32),
        grid_spec=pltpu.PrefetchScalarGridSpec(
            num_scalar_prefetch=0,
            grid=grid,                                            # b_tile images per step
            in_specs=[pl.BlockSpec((b_tile, cin, hw), lambda i: (i, 0, 0))]
                     + [full_spec(a) for a in weights],
            out_specs=pl.BlockSpec((b_tile, cout, hw), lambda i: (i, 0, 0)),   # lane-dense NCHW
        ),
        compiler_params=pltpu.CompilerParams(
            dimension_semantics=("parallel",),    # v7x: shard grid steps across both TCs
        ),
    )(x_chw, *weights)

    return out.reshape(n, cout, hh, ww)           # free reshape to (N, COUT, H, W)


# ----------------------- init-time param folding (BN -> conv) ----------------------

def fold_params(p):
    """Fold eval-mode BatchNorm into the conv weights and pre-arrange for the channel-major
    kernel (channels on sublanes -> per-channel vectors are (C, 1))."""
    kh, kw = p["w_dw"].shape[0], p["w_dw"].shape[1]
    cexp = p["w_dw"].shape[-1]
    cout = p["w_project"].shape[1]
    w_exp_folded = p["w_expand"] * p["bn1_scale"]                            # (CIN, CEXP)
    w_dw_folded = (p["w_dw"] * p["bn2_scale"]).reshape(kh * kw, cexp)        # (KH*KW, CEXP)
    w_proj_folded = p["w_project"] * p["bn3_scale"]                          # (CEXP, COUT)
    return {
        "we_t": jnp.transpose(w_exp_folded).astype(jnp.bfloat16),            # (CEXP, CIN) bf16
        "b1": p["bn1_bias"].reshape(cexp, 1),                                # (CEXP, 1)
        "w_dw": jnp.transpose(w_dw_folded),                                  # (CEXP, KH*KW) f32
        "b2": p["bn2_bias"].reshape(cexp, 1),                                # (CEXP, 1)
        "w_se1": p["w_se1"],                                                 # (CEXP, CSQ)
        "b_se1": p["b_se1"],                                                 # (1, CSQ)
        "w_se2t": jnp.transpose(p["w_se2"]),                                 # (CEXP, CSQ)
        "b_se2": p["b_se2"].reshape(cexp, 1),                                # (CEXP, 1)
        "wp_t": jnp.transpose(w_proj_folded).astype(jnp.bfloat16),           # (COUT, CEXP) bf16
        "b3": p["bn3_bias"].reshape(cout, 1),                                # (COUT, 1)
    }


# ------------------------------ pure-JAX f32 reference -----------------------------

def mbconv_reference(x_nchw, p):
    x = jnp.transpose(x_nchw, (0, 2, 3, 1))
    n, h, w, cin = x.shape
    h1 = _silu(jnp.einsum("nhwc,cd->nhwd", x, p["w_expand"]) * p["bn1_scale"] + p["bn1_bias"])
    kh, kw = p["w_dw"].shape[0], p["w_dw"].shape[1]
    hp = jnp.pad(h1, ((0, 0), (1, 1), (1, 1), (0, 0)))
    acc = sum(hp[:, i:i + h, j:j + w, :] * p["w_dw"][i, j]
              for i in range(kh) for j in range(kw))
    h2 = _silu(acc * p["bn2_scale"] + p["bn2_bias"])
    pooled = h2.mean(axis=(1, 2))
    s = jax.nn.sigmoid(_silu(pooled @ p["w_se1"] + p["b_se1"]) @ p["w_se2"] + p["b_se2"])
    h3 = h2 * s[:, None, None, :]
    out = jnp.einsum("nhwc,cd->nhwd", h3, p["w_project"]) * p["bn3_scale"] + p["bn3_bias"]
    out = out + x
    return jnp.transpose(out, (0, 3, 1, 2))


# ----------------------------------- param init ------------------------------------

def init_params(key, cin, cexp, csq, cout, k=3, eps=1e-5):
    ks = jax.random.split(key, 20)

    def bn_fold(kg, kb, km, kv, c):
        gamma = 1.0 + 0.1 * jax.random.normal(kg, (c,), jnp.float32)
        beta = 0.1 * jax.random.normal(kb, (c,), jnp.float32)
        mean = 0.1 * jax.random.normal(km, (c,), jnp.float32)
        var = jnp.abs(jax.random.normal(kv, (c,), jnp.float32)) + 0.5
        scale = gamma / jnp.sqrt(var + eps)
        bias = beta - mean * scale
        return scale.reshape(1, c), bias.reshape(1, c)

    bn1_scale, bn1_bias = bn_fold(ks[0], ks[1], ks[2], ks[3], cexp)
    bn2_scale, bn2_bias = bn_fold(ks[4], ks[5], ks[6], ks[7], cexp)
    bn3_scale, bn3_bias = bn_fold(ks[8], ks[9], ks[10], ks[11], cout)

    return {
        # expand 1x1 conv, PyTorch weight (cexp, cin, 1, 1) stored transposed as (cin, cexp)
        "w_expand": 0.1 * jax.random.normal(ks[12], (cin, cexp), jnp.float32),
        "bn1_scale": bn1_scale, "bn1_bias": bn1_bias,
        # depthwise conv, PyTorch weight (cexp, 1, k, k) stored as (k, k, 1, cexp)
        "w_dw": 0.1 * jax.random.normal(ks[13], (k, k, 1, cexp), jnp.float32),
        "bn2_scale": bn2_scale, "bn2_bias": bn2_bias,
        # squeeze-excitation 1x1 convs (with bias)
        "w_se1": 0.1 * jax.random.normal(ks[14], (cexp, csq), jnp.float32),
        "b_se1": 0.1 * jax.random.normal(ks[15], (1, csq), jnp.float32),
        "w_se2": 0.1 * jax.random.normal(ks[16], (csq, cexp), jnp.float32),
        "b_se2": 0.1 * jax.random.normal(ks[17], (1, cexp), jnp.float32),
        # project 1x1 conv
        "w_project": 0.1 * jax.random.normal(ks[18], (cexp, cout), jnp.float32),
        "bn3_scale": bn3_scale, "bn3_bias": bn3_bias,
    }


if __name__ == "__main__":
    # MBConvConfig(expand_ratio=4, kernel=3, stride=1, input_channels=32, out_channels=32)
    N, CIN, H, W = 2, 32, 16, 16
    CEXP, CSQ, COUT, K = 128, 8, 32, 3   # expanded = _make_divisible(32*4, 8) = 128, squeeze = 32//4

    key = jax.random.PRNGKey(0)
    kp, kx = jax.random.split(key)
    params = init_params(kp, CIN, CEXP, CSQ, COUT, k=K)
    x = jax.random.normal(kx, (N, CIN, H, W), jnp.float32)

    folded = fold_params(params)                       # one-time init cost (BN folding, casts)
    roll_like_jnp = _pltpu_roll_matches_jnp()          # tiny one-off probe kernel

    fwd = jax.jit(functools.partial(mbconv_forward, kernel_size=K, roll_like_jnp=roll_like_jnp))
    out = jax.block_until_ready(fwd(x, folded))

    ref = mbconv_reference(x, params)                  # pure-f32 reference
    # Tolerance sized for bf16 MXU operands with f32 accumulation vs. the f32 reference.
    np.testing.assert_allclose(np.asarray(out), np.asarray(ref), rtol=2e-2, atol=2e-2)
    assert out.shape == (N, COUT, H, W)

    print("KERNEL_OK")
</pallas_src>

<mosaic_0001>
module attributes {stable_mosaic.version = 11 : i64} {
  func.func @mbconv_kernel(%arg0: i32, %arg1: memref<1x32x256xf32, #tpu.memory_space<vmem>>, %arg2: memref<128x32xbf16, #tpu.memory_space<vmem>>, %arg3: memref<128x1xf32, #tpu.memory_space<vmem>>, %arg4: memref<128x9xf32, #tpu.memory_space<vmem>>, %arg5: memref<128x1xf32, #tpu.memory_space<vmem>>, %arg6: memref<9x1x256xf32, #tpu.memory_space<vmem>>, %arg7: memref<128x8xf32, #tpu.memory_space<vmem>>, %arg8: memref<1x8xf32, #tpu.memory_space<vmem>>, %arg9: memref<128x8xf32, #tpu.memory_space<vmem>>, %arg10: memref<128x1xf32, #tpu.memory_space<vmem>>, %arg11: memref<32x128xbf16, #tpu.memory_space<vmem>>, %arg12: memref<32x1xf32, #tpu.memory_space<vmem>>, %arg13: memref<1x32x256xf32, #tpu.memory_space<vmem>>) attributes {dimension_semantics = [#tpu.dimension_semantics<parallel>], iteration_bounds = array<i64: 2>, scalar_prefetch = 0 : i64, scratch_operands = 0 : i64, tpu.core_type = #tpu.core_type<tc>, window_params = [{transform_indices = @transform_0, window_bounds = array<i64: 1, 32, 256>}, {pipeline_mode = #tpu.pipeline_mode<synchronous>, transform_indices = @transform_1, window_bounds = array<i64: 128, 32>}, {pipeline_mode = #tpu.pipeline_mode<synchronous>, transform_indices = @transform_2, window_bounds = array<i64: 128, 1>}, {pipeline_mode = #tpu.pipeline_mode<synchronous>, transform_indices = @transform_3, window_bounds = array<i64: 128, 9>}, {pipeline_mode = #tpu.pipeline_mode<synchronous>, transform_indices = @transform_4, window_bounds = array<i64: 128, 1>}, {pipeline_mode = #tpu.pipeline_mode<synchronous>, transform_indices = @transform_5, window_bounds = array<i64: 9, 1, 256>}, {pipeline_mode = #tpu.pipeline_mode<synchronous>, transform_indices = @transform_6, window_bounds = array<i64: 128, 8>}, {pipeline_mode = #tpu.pipeline_mode<synchronous>, transform_indices = @transform_7, window_bounds = array<i64: 1, 8>}, {pipeline_mode = #tpu.pipeline_mode<synchronous>, transform_indices = @transform_8, window_bounds = array<i64: 128, 8>}, {pipeline_mode = #tpu.pipeline_mode<synchronous>, transform_indices = @transform_9, window_bounds = array<i64: 128, 1>}, {pipeline_mode = #tpu.pipeline_mode<synchronous>, transform_indices = @transform_10, window_bounds = array<i64: 32, 128>}, {pipeline_mode = #tpu.pipeline_mode<synchronous>, transform_indices = @transform_11, window_bounds = array<i64: 32, 1>}, {transform_indices = @transform_12, window_bounds = array<i64: 1, 32, 256>}]} {
    %c0 = arith.constant 0 : index
    %c0_0 = arith.constant 0 : index
    %c0_1 = arith.constant 0 : index
    %0 = vector.load %arg1[%c0, %c0_0, %c0_1] : memref<1x32x256xf32, #tpu.memory_space<vmem>>, vector<1x32x256xf32>
    %1 = vector.shape_cast %0 : vector<1x32x256xf32> to vector<32x256xf32>
    %c0_2 = arith.constant 0 : index
    %c0_3 = arith.constant 0 : index
    %2 = vector.load %arg2[%c0_2, %c0_3] : memref<128x32xbf16, #tpu.memory_space<vmem>>, vector<128x32xbf16>
    %3 = arith.truncf %1 : vector<32x256xf32> to vector<32x256xbf16>
    %cst = arith.constant dense<0.000000e+00> : vector<128x256xf32>
    %4 = tpu.matmul %2, %3, %cst {dimension_numbers = #tpu.dot_dimension_numbers<[1], [0], [0], [1], [0, 0, 1, 1], [], []>} : vector<128x32xbf16>, vector<32x256xbf16>, vector<128x256xf32> -> vector<128x256xf32>
    %c0_4 = arith.constant 0 : index
    %c0_5 = arith.constant 0 : index
    %5 = vector.load %arg3[%c0_4, %c0_5] : memref<128x1xf32, #tpu.memory_space<vmem>>, vector<128x1xf32>
    %6 = vector.broadcast %5 : vector<128x1xf32> to vector<128x256xf32>
    %7 = arith.addf %4, %6 : vector<128x256xf32>
    %8 = arith.negf %7 : vector<128x256xf32>
    %9 = math.exp %8 : vector<128x256xf32>
    %cst_6 = arith.constant 1.000000e+00 : f32
    %10 = vector.broadcast %cst_6 : f32 to vector<128x256xf32>
    %11 = arith.addf %10, %9 : vector<128x256xf32>
    %12 = arith.divf %10, %11 : vector<128x256xf32>
    %13 = arith.mulf %7, %12 : vector<128x256xf32>
    %c0_7 = arith.constant 0 : index
    %c0_8 = arith.constant 0 : index
    %14 = vector.load %arg4[%c0_7, %c0_8] : memref<128x9xf32, #tpu.memory_space<vmem>>, vector<128x9xf32>
    %15 = tpu.iota {dimensions = array<i32: 1>} : vector<1x9xi32>
    %c4_i32 = arith.constant 4 : i32
    %16 = vector.broadcast %c4_i32 : i32 to vector<1x9xi32>
    %17 = arith.cmpi eq, %15, %16 : vector<1x9xi32>
    %cst_9 = arith.constant 0.000000e+00 : f32
    %18 = vector.shape_cast %17 : vector<1x9xi1> to vector<1x9xi1>
    %19 = vector.broadcast %18 : vector<1x9xi1> to vector<128x9xi1>
    %20 = vector.broadcast %cst_9 : f32 to vector<128x9xf32>
    %21 = arith.select %19, %14, %20 : vector<128x9xi1>, vector<128x9xf32>
    %cst_10 = arith.constant dense<0.000000e+00> : vector<128xf32>
    %22 = vector.multi_reduction <add>, %21, %cst_10 [1] : vector<128x9xf32> to vector<128xf32>
    %23 = vector.shape_cast %22 : vector<128xf32> to vector<128x1xf32>
    %24 = vector.broadcast %23 : vector<128x1xf32> to vector<128x256xf32>
    %25 = arith.mulf %13, %24 : vector<128x256xf32>
    %c17_i32 = arith.constant 17 : i32
    %26 = tpu.dynamic_rotate %13 by %c17_i32 dim 1 : vector<128x256xf32>, i32 -> vector<128x256xf32>
    %c0_11 = arith.constant 0 : index
    %c0_12 = arith.constant 0 : index
    %c0_13 = arith.constant 0 : index
    %27 = vector.load %arg6[%c0_11, %c0_12, %c0_13] : memref<9x1x256xf32, #tpu.memory_space<vmem>>, vector<1x1x256xf32>
    %28 = vector.shape_cast %27 : vector<1x1x256xf32> to vector<1x256xf32>
    %29 = vector.broadcast %28 : vector<1x256xf32> to vector<128x256xf32>
    %30 = arith.mulf %26, %29 : vector<128x256xf32>
    %31 = tpu.iota {dimensions = array<i32: 1>} : vector<1x9xi32>
    %c0_i32 = arith.constant 0 : i32
    %32 = vector.broadcast %c0_i32 : i32 to vector<1x9xi32>
    %33 = arith.cmpi eq, %31, %32 : vector<1x9xi32>
    %cst_14 = arith.constant 0.000000e+00 : f32
    %34 = vector.shape_cast %33 : vector<1x9xi1> to vector<1x9xi1>
    %35 = vector.broadcast %34 : vector<1x9xi1> to vector<128x9xi1>
    %36 = vector.broadcast %cst_14 : f32 to vector<128x9xf32>
    %37 = arith.select %35, %14, %36 : vector<128x9xi1>, vector<128x9xf32>
    %cst_15 = arith.constant dense<0.000000e+00> : vector<128xf32>
    %38 = vector.multi_reduction <add>, %37, %cst_15 [1] : vector<128x9xf32> to vector<128xf32>
    %39 = vector.shape_cast %38 : vector<128xf32> to vector<128x1xf32>
    %40 = vector.broadcast %39 : vector<128x1xf32> to vector<128x256xf32>
    %41 = arith.mulf %30, %40 : vector<128x256xf32>
    %42 = arith.addf %25, %41 : vector<128x256xf32>
    %c16_i32 = arith.constant 16 : i32
    %43 = tpu.dynamic_rotate %13 by %c16_i32 dim 1 : vector<128x256xf32>, i32 -> vector<128x256xf32>
    %c1 = arith.constant 1 : index
    %c0_16 = arith.constant 0 : index
    %c0_17 = arith.constant 0 : index
    %44 = vector.load %arg6[%c1, %c0_16, %c0_17] : memref<9x1x256xf32, #tpu.memory_space<vmem>>, vector<1x1x256xf32>
    %45 = vector.shape_cast %44 : vector<1x1x256xf32> to vector<1x256xf32>
    %46 = vector.broadcast %45 : vector<1x256xf32> to vector<128x256xf32>
    %47 = arith.mulf %43, %46 : vector<128x256xf32>
    %48 = tpu.iota {dimensions = array<i32: 1>} : vector<1x9xi32>
    %c1_i32 = arith.constant 1 : i32
    %49 = vector.broadcast %c1_i32 : i32 to vector<1x9xi32>
    %50 = arith.cmpi eq, %48, %49 : vector<1x9xi32>
    %cst_18 = arith.constant 0.000000e+00 : f32
    %51 = vector.shape_cast %50 : vector<1x9xi1> to vector<1x9xi1>
    %52 = vector.broadcast %51 : vector<1x9xi1> to vector<128x9xi1>
    %53 = vector.broadcast %cst_18 : f32 to vector<128x9xf32>
    %54 = arith.select %52, %14, %53 : vector<128x9xi1>, vector<128x9xf32>
    %cst_19 = arith.constant dense<0.000000e+00> : vector<128xf32>
    %55 = vector.multi_reduction <add>, %54, %cst_19 [1] : vector<128x9xf32> to vector<128xf32>
    %56 = vector.shape_cast %55 : vector<128xf32> to vector<128x1xf32>
    %57 = vector.broadcast %56 : vector<128x1xf32> to vector<128x256xf32>
    %58 = arith.mulf %47, %57 : vector<128x256xf32>
    %59 = arith.addf %42, %58 : vector<128x256xf32>
    %c15_i32 = arith.constant 15 : i32
    %60 = tpu.dynamic_rotate %13 by %c15_i32 dim 1 : vector<128x256xf32>, i32 -> vector<128x256xf32>
    %c2 = arith.constant 2 : index
    %c0_20 = arith.constant 0 : index
    %c0_21 = arith.constant 0 : index
    %61 = vector.load %arg6[%c2, %c0_20, %c0_21] : memref<9x1x256xf32, #tpu.memory_space<vmem>>, vector<1x1x256xf32>
    %62 = vector.shape_cast %61 : vector<1x1x256xf32> to vector<1x256xf32>
    %63 = vector.broadcast %62 : vector<1x256xf32> to vector<128x256xf32>
    %64 = arith.mulf %60, %63 : vector<128x256xf32>
    %65 = tpu.iota {dimensions = array<i32: 1>} : vector<1x9xi32>
    %c2_i32 = arith.constant 2 : i32
    %66 = vector.broadcast %c2_i32 : i32 to vector<1x9xi32>
    %67 = arith.cmpi eq, %65, %66 : vector<1x9xi32>
    %cst_22 = arith.constant 0.000000e+00 : f32
    %68 = vector.shape_cast %67 : vector<1x9xi1> to vector<1x9xi1>
    %69 = vector.broadcast %68 : vector<1x9xi1> to vector<128x9xi1>
    %70 = vector.broadcast %cst_22 : f32 to vector<128x9xf32>
    %71 = arith.select %69, %14, %70 : vector<128x9xi1>, vector<128x9xf32>
    %cst_23 = arith.constant dense<0.000000e+00> : vector<128xf32>
    %72 = vector.multi_reduction <add>, %71, %cst_23 [1] : vector<128x9xf32> to vector<128xf32>
    %73 = vector.shape_cast %72 : vector<128xf32> to vector<128x1xf32>
    %74 = vector.broadcast %73 : vector<128x1xf32> to vector<128x256xf32>
    %75 = arith.mulf %64, %74 : vector<128x256xf32>
    %76 = arith.addf %59, %75 : vector<128x256xf32>
    %c1_i32_24 = arith.constant 1 : i32
    %77 = tpu.dynamic_rotate %13 by %c1_i32_24 dim 1 : vector<128x256xf32>, i32 -> vector<128x256xf32>
    %c3 = arith.constant 3 : index
    %c0_25 = arith.constant 0 : index
    %c0_26 = arith.constant 0 : index
    %78 = vector.load %arg6[%c3, %c0_25, %c0_26] : memref<9x1x256xf32, #tpu.memory_space<vmem>>, vector<1x1x256xf32>
    %79 = vector.shape_cast %78 : vector<1x1x256xf32> to vector<1x256xf32>
    %80 = vector.broadcast %79 : vector<1x256xf32> to vector<128x256xf32>
    %81 = arith.mulf %77, %80 : vector<128x256xf32>
    %82 = tpu.iota {dimensions = array<i32: 1>} : vector<1x9xi32>
    %c3_i32 = arith.constant 3 : i32
    %83 = vector.broadcast %c3_i32 : i32 to vector<1x9xi32>
    %84 = arith.cmpi eq, %82, %83 : vector<1x9xi32>
    %cst_27 = arith.constant 0.000000e+00 : f32
    %85 = vector.shape_cast %84 : vector<1x9xi1> to vector<1x9xi1>
    %86 = vector.broadcast %85 : vector<1x9xi1> to vector<128x9xi1>
    %87 = vector.broadcast %cst_27 : f32 to vector<128x9xf32>
    %88 = arith.select %86, %14, %87 : vector<128x9xi1>, vector<128x9xf32>
    %cst_28 = arith.constant dense<0.000000e+00> : vector<128xf32>
    %89 = vector.multi_reduction <add>, %88, %cst_28 [1] : vector<128x9xf32> to vector<128xf32>
    %90 = vector.shape_cast %89 : vector<128xf32> to vector<128x1xf32>
    %91 = vector.broadcast %90 : vector<128x1xf32> to vector<128x256xf32>
    %92 = arith.mulf %81, %91 : vector<128x256xf32>
    %93 = arith.addf %76, %92 : vector<128x256xf32>
    %c255_i32 = arith.constant 255 : i32
    %94 = tpu.dynamic_rotate %13 by %c255_i32 dim 1 : vector<128x256xf32>, i32 -> vector<128x256xf32>
    %c5 = arith.constant 5 : index
    %c0_29 = arith.constant 0 : index
    %c0_30 = arith.constant 0 : index
    %95 = vector.load %arg6[%c5, %c0_29, %c0_30] : memref<9x1x256xf32, #tpu.memory_space<vmem>>, vector<1x1x256xf32>
    %96 = vector.shape_cast %95 : vector<1x1x256xf32> to vector<1x256xf32>
    %97 = vector.broadcast %96 : vector<1x256xf32> to vector<128x256xf32>
    %98 = arith.mulf %94, %97 : vector<128x256xf32>
    %99 = tpu.iota {dimensions = array<i32: 1>} : vector<1x9xi32>
    %c5_i32 = arith.constant 5 : i32
    %100 = vector.broadcast %c5_i32 : i32 to vector<1x9xi32>
    %101 = arith.cmpi eq, %99, %100 : vector<1x9xi32>
    %cst_31 = arith.constant 0.000000e+00 : f32
    %102 = vector.shape_cast %101 : vector<1x9xi1> to vector<1x9xi1>
    %103 = vector.broadcast %102 : vector<1x9xi1> to vector<128x9xi1>
    %104 = vector.broadcast %cst_31 : f32 to vector<128x9xf32>
    %105 = arith.select %103, %14, %104 : vector<128x9xi1>, vector<128x9xf32>
    %cst_32 = arith.constant dense<0.000000e+00> : vector<128xf32>
    %106 = vector.multi_reduction <add>, %105, %cst_32 [1] : vector<128x9xf32> to vector<128xf32>
    %107 = vector.shape_cast %106 : vector<128xf32> to vector<128x1xf32>
    %108 = vector.broadcast %107 : vector<128x1xf32> to vector<128x256xf32>
    %109 = arith.mulf %98, %108 : vector<128x256xf32>
    %110 = arith.addf %93, %109 : vector<128x256xf32>
    %c241_i32 = arith.constant 241 : i32
    %111 = tpu.dynamic_rotate %13 by %c241_i32 dim 1 : vector<128x256xf32>, i32 -> vector<128x256xf32>
    %c6 = arith.constant 6 : index
    %c0_33 = arith.constant 0 : index
    %c0_34 = arith.constant 0 : index
    %112 = vector.load %arg6[%c6, %c0_33, %c0_34] : memref<9x1x256xf32, #tpu.memory_space<vmem>>, vector<1x1x256xf32>
    %113 = vector.shape_cast %112 : vector<1x1x256xf32> to vector<1x256xf32>
    %114 = vector.broadcast %113 : vector<1x256xf32> to vector<128x256xf32>
    %115 = arith.mulf %111, %114 : vector<128x256xf32>
    %116 = tpu.iota {dimensions = array<i32: 1>} : vector<1x9xi32>
    %c6_i32 = arith.constant 6 : i32
    %117 = vector.broadcast %c6_i32 : i32 to vector<1x9xi32>
    %118 = arith.cmpi eq, %116, %117 : vector<1x9xi32>
    %cst_35 = arith.constant 0.000000e+00 : f32
    %119 = vector.shape_cast %118 : vector<1x9xi1> to vector<1x9xi1>
    %120 = vector.broadcast %119 : vector<1x9xi1> to vector<128x9xi1>
    %121 = vector.broadcast %cst_35 : f32 to vector<128x9xf32>
    %122 = arith.select %120, %14, %121 : vector<128x9xi1>, vector<128x9xf32>
    %cst_36 = arith.constant dense<0.000000e+00> : vector<128xf32>
    %123 = vector.multi_reduction <add>, %122, %cst_36 [1] : vector<128x9xf32> to vector<128xf32>
    %124 = vector.shape_cast %123 : vector<128xf32> to vector<128x1xf32>
    %125 = vector.broadcast %124 : vector<128x1xf32> to vector<128x256xf32>
    %126 = arith.mulf %115, %125 : vector<128x256xf32>
    %127 = arith.addf %110, %126 : vector<128x256xf32>
    %c240_i32 = arith.constant 240 : i32
    %128 = tpu.dynamic_rotate %13 by %c240_i32 dim 1 : vector<128x256xf32>, i32 -> vector<128x256xf32>
    %c7 = arith.constant 7 : index
    %c0_37 = arith.constant 0 : index
    %c0_38 = arith.constant 0 : index
    %129 = vector.load %arg6[%c7, %c0_37, %c0_38] : memref<9x1x256xf32, #tpu.memory_space<vmem>>, vector<1x1x256xf32>
    %130 = vector.shape_cast %129 : vector<1x1x256xf32> to vector<1x256xf32>
    %131 = vector.broadcast %130 : vector<1x256xf32> to vector<128x256xf32>
    %132 = arith.mulf %128, %131 : vector<128x256xf32>
    %133 = tpu.iota {dimensions = array<i32: 1>} : vector<1x9xi32>
    %c7_i32 = arith.constant 7 : i32
    %134 = vector.broadcast %c7_i32 : i32 to vector<1x9xi32>
    %135 = arith.cmpi eq, %133, %134 : vector<1x9xi32>
    %cst_39 = arith.constant 0.000000e+00 : f32
    %136 = vector.shape_cast %135 : vector<1x9xi1> to vector<1x9xi1>
    %137 = vector.broadcast %136 : vector<1x9xi1> to vector<128x9xi1>
    %138 = vector.broadcast %cst_39 : f32 to vector<128x9xf32>
    %139 = arith.select %137, %14, %138 : vector<128x9xi1>, vector<128x9xf32>
    %cst_40 = arith.constant dense<0.000000e+00> : vector<128xf32>
    %140 = vector.multi_reduction <add>, %139, %cst_40 [1] : vector<128x9xf32> to vector<128xf32>
    %141 = vector.shape_cast %140 : vector<128xf32> to vector<128x1xf32>
    %142 = vector.broadcast %141 : vector<128x1xf32> to vector<128x256xf32>
    %143 = arith.mulf %132, %142 : vector<128x256xf32>
    %144 = arith.addf %127, %143 : vector<128x256xf32>
    %c239_i32 = arith.constant 239 : i32
    %145 = tpu.dynamic_rotate %13 by %c239_i32 dim 1 : vector<128x256xf32>, i32 -> vector<128x256xf32>
    %c8 = arith.constant 8 : index
    %c0_41 = arith.constant 0 : index
    %c0_42 = arith.constant 0 : index
    %146 = vector.load %arg6[%c8, %c0_41, %c0_42] : memref<9x1x256xf32, #tpu.memory_space<vmem>>, vector<1x1x256xf32>
    %147 = vector.shape_cast %146 : vector<1x1x256xf32> to vector<1x256xf32>
    %148 = vector.broadcast %147 : vector<1x256xf32> to vector<128x256xf32>
    %149 = arith.mulf %145, %148 : vector<128x256xf32>
    %150 = tpu.iota {dimensions = array<i32: 1>} : vector<1x9xi32>
    %c8_i32 = arith.constant 8 : i32
    %151 = vector.broadcast %c8_i32 : i32 to vector<1x9xi32>
    %152 = arith.cmpi eq, %150, %151 : vector<1x9xi32>
    %cst_43 = arith.constant 0.000000e+00 : f32
    %153 = vector.shape_cast %152 : vector<1x9xi1> to vector<1x9xi1>
    %154 = vector.broadcast %153 : vector<1x9xi1> to vector<128x9xi1>
    %155 = vector.broadcast %cst_43 : f32 to vector<128x9xf32>
    %156 = arith.select %154, %14, %155 : vector<128x9xi1>, vector<128x9xf32>
    %cst_44 = arith.constant dense<0.000000e+00> : vector<128xf32>
    %157 = vector.multi_reduction <add>, %156, %cst_44 [1] : vector<128x9xf32> to vector<128xf32>
    %158 = vector.shape_cast %157 : vector<128xf32> to vector<128x1xf32>
    %159 = vector.broadcast %158 : vector<128x1xf32> to vector<128x256xf32>
    %160 = arith.mulf %149, %159 : vector<128x256xf32>
    %161 = arith.addf %144, %160 : vector<128x256xf32>
    %c0_45 = arith.constant 0 : index
    %c0_46 = arith.constant 0 : index
    %162 = vector.load %arg5[%c0_45, %c0_46] : memref<128x1xf32, #tpu.memory_space<vmem>>, vector<128x1xf32>
    %163 = vector.broadcast %162 : vector<128x1xf32> to vector<128x256xf32>
    %164 = arith.addf %161, %163 : vector<128x256xf32>
    %165 = arith.negf %164 : vector<128x256xf32>
    %166 = math.exp %165 : vector<128x256xf32>
    %cst_47 = arith.constant 1.000000e+00 : f32
    %167 = vector.broadcast %cst_47 : f32 to vector<128x256xf32>
    %168 = arith.addf %167, %166 : vector<128x256xf32>
    %169 = arith.divf %167, %168 : vector<128x256xf32>
    %170 = arith.mulf %164, %169 : vector<128x256xf32>
    %cst_48 = arith.constant dense<0.000000e+00> : vector<128xf32>
    %171 = vector.multi_reduction <add>, %170, %cst_48 [1] : vector<128x256xf32> to vector<128xf32>
    %172 = vector.shape_cast %171 : vector<128xf32> to vector<128x1xf32>
    %cst_49 = arith.constant 3.906250e-03 : f32
    %173 = vector.broadcast %cst_49 : f32 to vector<128x1xf32>
    %174 = arith.mulf %172, %173 : vector<128x1xf32>
    %c0_50 = arith.constant 0 : index
    %c0_51 = arith.constant 0 : index
    %175 = vector.load %arg7[%c0_50, %c0_51] : memref<128x8xf32, #tpu.memory_space<vmem>>, vector<128x8xf32>
    %176 = vector.broadcast %174 : vector<128x1xf32> to vector<128x8xf32>
    %177 = arith.mulf %175, %176 : vector<128x8xf32>
    %cst_52 = arith.constant dense<0.000000e+00> : vector<8xf32>
    %178 = vector.multi_reduction <add>, %177, %cst_52 [0] : vector<128x8xf32> to vector<8xf32>
    %179 = vector.shape_cast %178 : vector<8xf32> to vector<1x8xf32>
    %c0_53 = arith.constant 0 : index
    %c0_54 = arith.constant 0 : index
    %180 = vector.load %arg8[%c0_53, %c0_54] : memref<1x8xf32, #tpu.memory_space<vmem>>, vector<1x8xf32>
    %181 = arith.addf %179, %180 : vector<1x8xf32>
    %182 = arith.negf %181 : vector<1x8xf32>
    %183 = math.exp %182 : vector<1x8xf32>
    %cst_55 = arith.constant 1.000000e+00 : f32
    %184 = vector.broadcast %cst_55 : f32 to vector<1x8xf32>
    %185 = arith.addf %184, %183 : vector<1x8xf32>
    %186 = arith.divf %184, %185 : vector<1x8xf32>
    %187 = arith.mulf %181, %186 : vector<1x8xf32>
    %c0_56 = arith.constant 0 : index
    %c0_57 = arith.constant 0 : index
    %188 = vector.load %arg9[%c0_56, %c0_57] : memref<128x8xf32, #tpu.memory_space<vmem>>, vector<128x8xf32>
    %189 = vector.broadcast %187 : vector<1x8xf32> to vector<128x8xf32>
    %190 = arith.mulf %188, %189 : vector<128x8xf32>
    %cst_58 = arith.constant dense<0.000000e+00> : vector<128xf32>
    %191 = vector.multi_reduction <add>, %190, %cst_58 [1] : vector<128x8xf32> to vector<128xf32>
    %192 = vector.shape_cast %191 : vector<128xf32> to vector<128x1xf32>
    %c0_59 = arith.constant 0 : index
    %c0_60 = arith.constant 0 : index
    %193 = vector.load %arg10[%c0_59, %c0_60] : memref<128x1xf32, #tpu.memory_space<vmem>>, vector<128x1xf32>
    %194 = arith.addf %192, %193 : vector<128x1xf32>
    %195 = arith.negf %194 : vector<128x1xf32>
    %196 = math.exp %195 : vector<128x1xf32>
    %cst_61 = arith.constant 1.000000e+00 : f32
    %197 = vector.broadcast %cst_61 : f32 to vector<128x1xf32>
    %198 = arith.addf %197, %196 : vector<128x1xf32>
    %199 = arith.divf %197, %198 : vector<128x1xf32>
    %200 = vector.broadcast %199 : vector<128x1xf32> to vector<128x256xf32>
    %201 = arith.mulf %170, %200 : vector<128x256xf32>
    %c0_62 = arith.constant 0 : index
    %c0_63 = arith.constant 0 : index
    %202 = vector.load %arg11[%c0_62, %c0_63] : memref<32x128xbf16, #tpu.memory_space<vmem>>, vector<32x128xbf16>
    %203 = arith.truncf %201 : vector<128x256xf32> to vector<128x256xbf16>
    %cst_64 = arith.constant dense<0.000000e+00> : vector<32x256xf32>
    %204 = tpu.matmul %202, %203, %cst_64 {dimension_numbers = #tpu.dot_dimension_numbers<[1], [0], [0], [1], [0, 0, 1, 1], [], []>} : vector<32x128xbf16>, vector<128x256xbf16>, vector<32x256xf32> -> vector<32x256xf32>
    %c0_65 = arith.constant 0 : index
    %c0_66 = arith.constant 0 : index
    %205 = vector.load %arg12[%c0_65, %c0_66] : memref<32x1xf32, #tpu.memory_space<vmem>>, vector<32x1xf32>
    %206 = vector.broadcast %205 : vector<32x1xf32> to vector<32x256xf32>
    %207 = arith.addf %204, %206 : vector<32x256xf32>
    %208 = arith.addf %207, %1 : vector<32x256xf32>
    %c0_67 = arith.constant 0 : index
    %c0_68 = arith.constant 0 : index
    %c0_69 = arith.constant 0 : index
    %209 = vector.load %arg13[%c0_67, %c0_68, %c0_69] : memref<1x32x256xf32, #tpu.memory_space<vmem>>, vector<1x32x256xf32>
    %210 = vector.shape_cast %209 : vector<1x32x256xf32> to vector<32x256xf32>
    %211 = vector.shape_cast %208 : vector<32x256xf32> to vector<1x32x256xf32>
    tpu.vector_store %arg13[%c0_67, %c0_68, %c0_69], %211 {strides = array<i32>} : memref<1x32x256xf32, #tpu.memory_space<vmem>>, vector<1x32x256xf32>,
    return
  }
  func.func @transform_0(%arg0: i32) -> (i32, i32, i32) {
    %c0_i32 = arith.constant 0 : i32
    %c0_i32_0 = arith.constant 0 : i32
    %c0_i32_1 = arith.constant 0 : i32
    return %arg0, %c0_i32, %c0_i32_0 : i32, i32, i32
  }
  func.func @transform_1(%arg0: i32) -> (i32, i32) {
    %c0_i32 = arith.constant 0 : i32
    %c0_i32_0 = arith.constant 0 : i32
    %c0_i32_1 = arith.constant 0 : i32
    return %c0_i32, %c0_i32_0 : i32, i32
  }
  func.func @transform_2(%arg0: i32) -> (i32, i32) {
    %c0_i32 = arith.constant 0 : i32
    %c0_i32_0 = arith.constant 0 : i32
    %c0_i32_1 = arith.constant 0 : i32
    return %c0_i32, %c0_i32_0 : i32, i32
  }
  func.func @transform_3(%arg0: i32) -> (i32, i32) {
    %c0_i32 = arith.constant 0 : i32
    %c0_i32_0 = arith.constant 0 : i32
    %c0_i32_1 = arith.constant 0 : i32
    return %c0_i32, %c0_i32_0 : i32, i32
  }
  func.func @transform_4(%arg0: i32) -> (i32, i32) {
    %c0_i32 = arith.constant 0 : i32
    %c0_i32_0 = arith.constant 0 : i32
    %c0_i32_1 = arith.constant 0 : i32
    return %c0_i32, %c0_i32_0 : i32, i32
  }
  func.func @transform_5(%arg0: i32) -> (i32, i32, i32) {
    %c0_i32 = arith.constant 0 : i32
    %c0_i32_0 = arith.constant 0 : i32
    %c0_i32_1 = arith.constant 0 : i32
    %c0_i32_2 = arith.constant 0 : i32
    return %c0_i32, %c0_i32_0, %c0_i32_1 : i32, i32, i32
  }
  func.func @transform_6(%arg0: i32) -> (i32, i32) {
    %c0_i32 = arith.constant 0 : i32
    %c0_i32_0 = arith.constant 0 : i32
    %c0_i32_1 = arith.constant 0 : i32
    return %c0_i32, %c0_i32_0 : i32, i32
  }
  func.func @transform_7(%arg0: i32) -> (i32, i32) {
    %c0_i32 = arith.constant 0 : i32
    %c0_i32_0 = arith.constant 0 : i32
    %c0_i32_1 = arith.constant 0 : i32
    return %c0_i32, %c0_i32_0 : i32, i32
  }
  func.func @transform_8(%arg0: i32) -> (i32, i32) {
    %c0_i32 = arith.constant 0 : i32
    %c0_i32_0 = arith.constant 0 : i32
    %c0_i32_1 = arith.constant 0 : i32
    return %c0_i32, %c0_i32_0 : i32, i32
  }
  func.func @transform_9(%arg0: i32) -> (i32, i32) {
    %c0_i32 = arith.constant 0 : i32
    %c0_i32_0 = arith.constant 0 : i32
    %c0_i32_1 = arith.constant 0 : i32
    return %c0_i32, %c0_i32_0 : i32, i32
  }
  func.func @transform_10(%arg0: i32) -> (i32, i32) {
    %c0_i32 = arith.constant 0 : i32
    %c0_i32_0 = arith.constant 0 : i32
    %c0_i32_1 = arith.constant 0 : i32
    return %c0_i32, %c0_i32_0 : i32, i32
  }
  func.func @transform_11(%arg0: i32) -> (i32, i32) {
    %c0_i32 = arith.constant 0 : i32
    %c0_i32_0 = arith.constant 0 : i32
    %c0_i32_1 = arith.constant 0 : i32
    return %c0_i32, %c0_i32_0 : i32, i32
  }
  func.func @transform_12(%arg0: i32) -> (i32, i32, i32) {
    %c0_i32 = arith.constant 0 : i32
    %c0_i32_0 = arith.constant 0 : i32
    %c0_i32_1 = arith.constant 0 : i32
    return %arg0, %c0_i32, %c0_i32_0 : i32, i32, i32
  }
}

</mosaic_0001>

<bundles_post_ra>
// kernel: mbconv_forward.1
= control target key start
LH: loop header
LB: loop body
LE: loop exit
PB: predicated region body
PF: predicated region fallthrough
CT: control target
= control target key end

     0   :  { %s4835_s21 = smov 0   ;;  %s9937_s0 = inlined_call_operand.vmem [shape: f32[2,32,256], index: 0, kind: input, shape index: {}]   ;;  %s9938_s1 = inlined_call_operand.vmem [shape: bf16[128,32], index: 1, kind: input, shape index: {}]   ;;  %s9939_s2 = inlined_call_operand.vmem [shape: f32[128,1], index: 2, kind: input, shape index: {}]   ;;  %s9940_s3 = inlined_call_operand.vmem [shape: f32[128,9], index: 3, kind: input, shape index: {}]   ;;  %s9941_s4 = inlined_call_operand.vmem [shape: f32[128,1], index: 4, kind: input, shape index: {}]   ;;  %s9942_s5 = inlined_call_operand.vmem [shape: f32[9,1,256], index: 5, kind: input, shape index: {}]   ;;  %s9943_s6 = inlined_call_operand.vmem [shape: f32[128,8], index: 6, kind: input, shape index: {}]   ;;  %s9944_s7 = inlined_call_operand.vmem [shape: f32[1,8], index: 7, kind: input, shape index: {}]   ;;  %s9945_s8 = inlined_call_operand.vmem [shape: f32[128,8], index: 8, kind: input, shape index: {}]   ;;  %s9946_s9 = inlined_call_operand.vmem [shape: f32[128,1], index: 9, kind: input, shape index: {}]   ;;  %s9947_s10 = inlined_call_operand.vmem [shape: bf16[32,128], index: 10, kind: input, shape index: {}]   ;;  %s9948_s11 = inlined_call_operand.vmem [shape: f32[32,1], index: 11, kind: input, shape index: {}]   ;;  %s9949_s12 = inlined_call_operand.vmem [shape: f32[2,32,256], index: 12, kind: output, shape index: {}]  }
   0x1 LB: > { %s4241_s22 = sadd.s32 4294967295, %s4759_s21   ;;  %p4245_p0 = scmp.ge.s32.totalorder %s4759_s21, 1  ;;  %s4759_s21 = sphi %s4835_s21, %s22_s21  }
   0x2   : > { %p362_p1 = scmp.lt.s32.totalorder %s4759_s21, 3 }
   0x4   : > { %p363_p2 = pnand %p4245_p0, %p362_p1 }
   0x6   : > { %366 = sbr.rel (%p363_p2) target bundleno = 2656 (0xa60), region = 68 }
   0xb   : > { %v9951_v0 = vlaneseq  ;;  %p404_p3 = scmp.lt.s32.totalorder %s4241_s22, 1  ;;  %v9950_v1 = vmov 0   ;;  %v4848_v2 = vld [vmem:[%s9940_s3] sm:$0xff]  ;;  %v4858_v4 = vld [vmem:[%s9940_s3 + $0x10] sm:$0xff]  ;;  %v4863_v5 = vld [vmem:[%s9940_s3 + $0x8] sm:$0xff]  ;;  %vm978_vm0 = vcmask 72704  }
   0xc   : > { %636 = vmatprep.mubr.bf16.mxu0 %v9950_v1  ;;  %4377 = vset.pattern.permute.xlu1 %v9950_v1  ;;  %v4872_v6 = vld [vmem:[%s9940_s3 + $0x20] sm:$0xff]  ;;  %v4893_v10 = vld [vmem:[%s9940_s3 + $0x18] sm:$0xff]  ;;  %v4898_v11 = vld [vmem:[%s9940_s3 + $0x30] sm:$0xff]  ;;  %vm579_vm2 = vcmask 261120   ;;  %s4762_s19 = smov 17   ;;  %s4763_s20 = smov 16  }
   0xd   : > { %v4851_v3 = vand.u32 127, %v9951_v0  ;;  %s11152_s22 = smov (!%p404_p3, %s4241_s22), 1  ;;  %4378 = vset.pattern.permute.xlu0 %v9950_v1  ;;  %4149 = vmatprep.mubr.bf16.mxu1 %v9950_v1  ;;  %v4921_v30 = vld [vmem:[%s9940_s3 + $0x28] sm:$0xff]  ;;  %v4929_v32 = vld [vmem:[%s9940_s3 + $0x40] sm:$0xff]  ;;  %v4942_v37 = vld [vmem:[%s9940_s3 + $0x38] sm:$0xff]  ;;  %s4764_s27 = smov 15  }
   0xe   : > { %s4358_s29 = sshll.u32 %s11152_s22, 6  ;;  %v4379_v34 = vld [vmem:[%s9938_s1] sm:$0xff]   ;;  %v4950_v39 = vld [vmem:[%s9940_s3 + $0x50] sm:$0xff]  ;;  %v4962_v43 = vld [vmem:[%s9940_s3 + $0x48] sm:$0xff]  ;;  %s4765_s28 = smov 1  }
   0xf   : > { %vm959_vm1 = vcmp.eq.s32.totalorder %v4851_v3, 4  ;;  %s4882_s16 = scalar_lea.vmem %s9937_s0, %s4358_s29  ;;  %v4970_v45 = vld [vmem:[%s9940_s3 + $0x60] sm:$0xff]  ;;  %v4380_v47 = vld [vmem:[%s9938_s1 + $0x8] sm:$0xff]   ;;  %v4983_v50 = vld [vmem:[%s9940_s3 + $0x58] sm:$0xff]  ;;  %vm1200_vm3 = vcmp.eq.s32.totalorder %v4851_v3, 0  ;;  %vm1473_vm4 = vcmp.eq.s32.totalorder %v4851_v3, 1 }
  0x10   : > { %v962_v7 = vsel %vm959_vm1, %v4848_v2, 0.0  ;;  %v964_v8 = vsel %vm959_vm1, %v4858_v4, 0.0  ;;  %v963_v9 = vsel %vm959_vm1, %v4863_v5, 0.0  ;;  %v420_v13 = vld [vmem:[%s4882_s16 + $0x28] sm:$0xff]  ;;  %v422_v14 = vld [vmem:[%s4882_s16 + $0x38] sm:$0xff]  ;;  %v419_v15 = vld [vmem:[%s4882_s16 + $0x20] sm:$0xff] }
  0x11   : > { %v979_v12 = vsel %vm978_vm0, %v962_v7, 0.0  ;;  %v982_v16 = vsel %vm978_vm0, %v963_v9, 0.0  ;;  %v442_v17 = vpack.c.bf16 %v422_v14, %v420_v13  ;;  %v421_v18 = vld [vmem:[%s4882_s16 + $0x30] sm:$0xff]  ;;  %v416_v19 = vld [vmem:[%s4882_s16 + $0x8] sm:$0xff]  ;;  %v418_v20 = vld [vmem:[%s4882_s16 + $0x18] sm:$0xff]  ;;  %v966_v21 = vsel %vm959_vm1, %v4872_v6, 0.0 }
  0x12   : > { %980 = vadd.xlane.f32.xlu0 %v979_v12  ;;  %983 = vadd.xlane.f32.xlu1 %v982_v16  ;;  %v441_v22 = vpack.c.bf16 %v421_v18, %v419_v15  ;;  %v985_v23 = vsel %vm978_vm0, %v964_v8, 0.0  ;;  %v440_v24 = vpack.c.bf16 %v418_v20, %v416_v19  ;;  %v415_v25 = vld [vmem:[%s4882_s16] sm:$0xff]  ;;  %v417_v26 = vld [vmem:[%s4882_s16 + $0x10] sm:$0xff]  ;;  %v965_v27 = vsel %vm959_vm1, %v4893_v10, 0.0  ;;  %v5002_v56 = vld [vmem:[%s9940_s3 + $0x68] sm:$0xff]  ;;  %s4766_s14 = smov 127  }
  0x13   : > { %616 = vmatprep.subr.bf16.mxu0 %v442_v17  ;;  %v991_v28 = vsel %vm978_vm0, %v966_v21, 0.0  ;;  %v439_v29 = vpack.c.bf16 %v417_v26, %v415_v25  ;;  %v968_v31 = vsel %vm959_vm1, %v4898_v11, 0.0  ;;  %v988_v33 = vsel %vm978_vm0, %v965_v27, 0.0  ;;  %v4991_v52 = vld [vmem:[%s9940_s3 + $0x70] sm:$0xff]  ;;  %v5020_v62 = vld [vmem:[%s9940_s3 + $0x78] sm:$0xff]  ;;  %v4383_v19 = vld [vmem:[%s9938_s1 + $0x20] sm:$0xff]  }
  0x14   : > { %617 = vmatpush1.bf16.msra.mxu0 %v441_v22  ;;  %v967_v35 = vsel %vm959_vm1, %v4921_v30, 0.0  ;;  %v997_v36 = vsel %vm978_vm0, %v968_v31, 0.0  ;;  %v970_v38 = vsel %vm959_vm1, %v4929_v32, 0.0  ;;  %v969_v41 = vsel %vm959_vm1, %v4942_v37, 0.0  ;;  %v4381_v59 = vld [vmem:[%s9938_s1 + $0x10] sm:$0xff]   ;;  %v4382_v13 = vld [vmem:[%s9938_s1 + $0x18] sm:$0xff]  }
  0x15   : > { %618 = vmatprep.subr.bf16.mxu0 %v440_v24  ;;  %v994_v40 = vsel %vm978_vm0, %v967_v35, 0.0  ;;  %v1003_v42 = vsel %vm978_vm0, %v970_v38, 0.0  ;;  %v972_v44 = vsel %vm959_vm1, %v4950_v39, 0.0  ;;  %v1000_v46 = vsel %vm978_vm0, %v969_v41, 0.0  ;;  %v4384_v26 = vld [vmem:[%s9938_s1 + $0x28] sm:$0xff]   ;;  %s4767_s25 = smov 113  }
  0x16   : > { %986 = vadd.xlane.f32.xlu0 %v985_v23  ;;  %992 = vadd.xlane.f32.xlu1 %v991_v28  ;;  %v971_v48 = vsel %vm959_vm1, %v4962_v43, 0.0  ;;  %v1009_v49 = vsel %vm978_vm0, %v972_v44, 0.0  ;;  %v974_v51 = vsel %vm959_vm1, %v4970_v45, 0.0  ;;  %v973_v54 = vsel %vm959_vm1, %v4983_v50, 0.0  ;;  %v448_v44 = vld [vmem:[%s9939_s2 + $0x28] sm:$0xff]  ;;  %s4769_s15 = smov 111  }
  0x17   : > { %v1006_v53 = vsel %vm978_vm0, %v971_v48, 0.0  ;;  %v1015_v55 = vsel %vm978_vm0, %v974_v51, 0.0  ;;  %v976_v57 = vsel %vm959_vm1, %v4991_v52, 0.0  ;;  %v1012_v58 = vsel %vm978_vm0, %v973_v54, 0.0  ;;  %v454_v48 = vld [vmem:[%s9939_s2 + $0x58] sm:$0xff]  ;;  %v447_v51 = vld [vmem:[%s9939_s2 + $0x20] sm:$0xff] }
  0x18   : > { %619 = vmatpush1.bf16.msra.mxu0 %v439_v29  ;;  %v975_v60 = vsel %vm959_vm1, %v5002_v56, 0.0  ;;  %v1021_v61 = vsel %vm978_vm0, %v976_v57, 0.0  ;;  %v1204_v63 = vsel %vm1200_vm3, %v4863_v5, 0.0  ;;  %v977_v8 = vsel %vm959_vm1, %v5020_v62, 0.0  ;;  %v451_v54 = vld [vmem:[%s9939_s2 + $0x40] sm:$0xff]  ;;  %v457_v57 = vld [vmem:[%s9939_s2 + $0x70] sm:$0xff] }
  0x19   : > { %v1018_v7 = vsel %vm978_vm0, %v975_v60, 0.0  ;;  %v1222_v9 = vsel %vm978_vm0, %v1204_v63, 0.0  ;;  %v1207_v12 = vsel %vm1200_vm3, %v4872_v6, 0.0  ;;  %v1024_v5 = vsel %vm978_vm0, %v977_v8, 0.0 }
  0x1a   : > { %989 = vadd.xlane.f32.xlu0 %v988_v33  ;;  %998 = vadd.xlane.f32.xlu1 %v997_v36  ;;  %v1203_v14 = vsel %vm1200_vm3, %v4848_v2, 0.0  ;;  %v1231_v15 = vsel %vm978_vm0, %v1207_v12, 0.0  ;;  %v1209_v16 = vsel %vm1200_vm3, %v4898_v11, 0.0  ;;  %v1205_v17 = vsel %vm1200_vm3, %v4858_v4, 0.0 }
  0x1b   : > { %4258 = vmatmul.mubr.msk.bf16.vlgmr.msra.gmra.mxu0 %vm579_vm2, %v4379_v34  ;;  %v1219_v6 = vsel %vm978_vm0, %v1203_v14, 0.0  ;;  %v1237_v18 = vsel %vm978_vm0, %v1209_v16, 0.0  ;;  %v1211_v2 = vsel %vm1200_vm3, %v4929_v32, 0.0  ;;  %v1225_v11 = vsel %vm978_vm0, %v1205_v17, 0.0  ;;  %v4385_v34 = vld [vmem:[%s9938_s1 + $0x30] sm:$0xff]  }
  0x1c   : > { %646 = vmatprep.mubr.bf16.mxu0 %v9950_v1  ;;  %v1206_v4 = vsel %vm1200_vm3, %v4893_v10, 0.0  ;;  %v1243_v20 = vsel %vm978_vm0, %v1211_v2, 0.0  ;;  %v1213_v21 = vsel %vm1200_vm3, %v4950_v39, 0.0  ;;  %v1208_v23 = vsel %vm1200_vm3, %v4921_v30, 0.0  ;;  %v4386_v39 = vld [vmem:[%s9938_s1 + $0x38] sm:$0xff]  }
  0x1d   : > { %v1228_v22 = vsel %vm978_vm0, %v1206_v4, 0.0  ;;  %v1249_v24 = vsel %vm978_vm0, %v1213_v21, 0.0  ;;  %v1215_v10 = vsel %vm1200_vm3, %v4970_v45, 0.0  ;;  %v1234_v25 = vsel %vm978_vm0, %v1208_v23, 0.0  ;;  %v450_v45 = vld [vmem:[%s9939_s2 + $0x38] sm:$0xff] }
  0x1e   : > { %995 = vadd.xlane.f32.xlu0 %v994_v40  ;;  %1004 = vadd.xlane.f32.xlu1 %v1003_v42  ;;  %v1210_v27 = vsel %vm1200_vm3, %v4942_v37, 0.0  ;;  %v1255_v28 = vsel %vm978_vm0, %v1215_v10, 0.0  ;;  %v1217_v29 = vsel %vm1200_vm3, %v4991_v52, 0.0  ;;  %v1212_v31 = vsel %vm1200_vm3, %v4962_v43, 0.0  ;;  %v445_v42 = vld [vmem:[%s9939_s2 + $0x10] sm:$0xff]  ;;  %v446_v43 = vld [vmem:[%s9939_s2 + $0x18] sm:$0xff] }
  0x1f   : > { %v1240_v30 = vsel %vm978_vm0, %v1210_v27, 0.0  ;;  %v1261_v32 = vsel %vm978_vm0, %v1217_v29, 0.0  ;;  %v1246_v33 = vsel %vm978_vm0, %v1212_v31, 0.0  ;;  %v1214_v35 = vsel %vm1200_vm3, %v4983_v50, 0.0  ;;  %v456_v50 = vld [vmem:[%s9939_s2 + $0x68] sm:$0xff]  ;;  %v458_v52 = vld [vmem:[%s9939_s2 + $0x78] sm:$0xff] }
  0x20   : > { %v1252_v36 = vsel %vm978_vm0, %v1214_v35, 0.0  ;;  %v1216_v37 = vsel %vm1200_vm3, %v5002_v56, 0.0  ;;  %v1218_v40 = vsel %vm1200_vm3, %v5020_v62, 0.0  ;;  %v455_v56 = vld [vmem:[%s9939_s2 + $0x60] sm:$0xff]  ;;  %vm1746_vm5 = vcmp.eq.s32.totalorder %v4851_v3, 2 }
  0x21   : > { %v1258_v38 = vsel %vm978_vm0, %v1216_v37, 0.0  ;;  %v1264_v41 = vsel %vm978_vm0, %v1218_v40, 0.0  ;;  %vm1668_vm6 = vcmp.lt.s32.totalorder %v4851_v3, 15  ;;  %vm2019_vm7 = vcmp.eq.s32.totalorder %v4851_v3, 3 }
  0x22   : > { %1001 = vadd.xlane.f32.xlu0 %v1000_v46  ;;  %1010 = vadd.xlane.f32.xlu1 %v1009_v49  ;;  %v452_v46 = vld [vmem:[%s9939_s2 + $0x48] sm:$0xff]  ;;  %vm1941_vm8 = vcmp.lt.s32.totalorder %v4851_v3, 1  ;;  %vm1123_vm9 = vcmp.lt.s32.totalorder %v4851_v3, 17  ;;  %vm1395_vm10 = vcmp.lt.s32.totalorder %v4851_v3, 16  ;;  %vm2292_vm11 = vcmp.eq.s32.totalorder %v4851_v3, 5 }
  0x23   : > { %4259 = vmatmul.mubr.msk.bf16.gmra.mxu0 %vm579_vm2, %v4380_v47  ;;  %v443_v47 = vld [vmem:[%s9939_s2] sm:$0xff]  ;;  %v444_v49 = vld [vmem:[%s9939_s2 + $0x8] sm:$0xff]  ;;  %vm2565_vm12 = vcmp.eq.s32.totalorder %v4851_v3, 6  ;;  %vm2838_vm13 = vcmp.eq.s32.totalorder %v4851_v3, 7  ;;  %vm3111_vm14 = vcmp.eq.s32.totalorder %v4851_v3, 8  ;;  %vm2214_vm15 = vcmp.lt.s32.totalorder %v4851_v3, 127 }
  0x24   : > { %656 = vmatprep.mubr.bf16.mxu0 %v9950_v1  ;;  %vm2760_vm1 = vcmp.lt.s32.totalorder %v4851_v3, 112  ;;  %vm3690_vm3 = vcmask 64512  }
  0x26   : > { %1007 = vadd.xlane.f32.xlu0 %v1006_v53  ;;  %1016 = vadd.xlane.f32.xlu1 %v1015_v55  ;;  %v449_v53 = vld [vmem:[%s9939_s2 + $0x30] sm:$0xff] }
  0x27   : > { %v453_v55 = vld [vmem:[%s9939_s2 + $0x50] sm:$0xff] }
  0x2a   : > { %1013 = vadd.xlane.f32.xlu0 %v1012_v58  ;;  %1022 = vadd.xlane.f32.xlu1 %v1021_v61 }
  0x2b   : > { %4260 = vmatmul.mubr.msk.bf16.gmra.mxu0 %vm579_vm2, %v4381_v59 }
  0x2c   : > { %666 = vmatprep.mubr.bf16.mxu0 %v9950_v1 }
  0x2e   : > { %1019 = vadd.xlane.f32.xlu0 %v1018_v7  ;;  %1223 = vadd.xlane.f32.xlu1 %v1222_v9 }
  0x32   : > { %1025 = vadd.xlane.f32.xlu0 %v1024_v5  ;;  %1232 = vadd.xlane.f32.xlu1 %v1231_v15 }
  0x33   : > { %4261 = vmatmul.mubr.msk.bf16.gmra.mxu0 %vm579_vm2, %v4382_v13 }
  0x34   : > { %676 = vmatprep.mubr.bf16.mxu0 %v9950_v1 }
  0x36   : > { %1220 = vadd.xlane.f32.xlu0 %v1219_v6  ;;  %1238 = vadd.xlane.f32.xlu1 %v1237_v18 }
  0x3a   : > { %1226 = vadd.xlane.f32.xlu0 %v1225_v11  ;;  %1244 = vadd.xlane.f32.xlu1 %v1243_v20 }
  0x3b   : > { %4262 = vmatmul.mubr.msk.bf16.gmra.mxu0 %vm579_vm2, %v4383_v19 }
  0x3c   : > { %686 = vmatprep.mubr.bf16.mxu0 %v9950_v1 }
  0x3e   : > { %1229 = vadd.xlane.f32.xlu0 %v1228_v22  ;;  %1250 = vadd.xlane.f32.xlu1 %v1249_v24 }
  0x42   : > { %1235 = vadd.xlane.f32.xlu0 %v1234_v25  ;;  %1256 = vadd.xlane.f32.xlu1 %v1255_v28 }
  0x43   : > { %4263 = vmatmul.mubr.msk.bf16.gmra.mxu0 %vm579_vm2, %v4384_v26 }
  0x44   : > { %696 = vmatprep.mubr.bf16.mxu0 %v9950_v1 }
  0x46   : > { %1241 = vadd.xlane.f32.xlu0 %v1240_v30  ;;  %1262 = vadd.xlane.f32.xlu1 %v1261_v32 }
  0x4a   : > { %1247 = vadd.xlane.f32.xlu0 %v1246_v33 }
  0x4b   : > { %4264 = vmatmul.mubr.msk.bf16.gmra.mxu0 %vm579_vm2, %v4385_v34 }
  0x4c   : > { %706 = vmatprep.mubr.bf16.mxu0 %v9950_v1 }
  0x4e   : > { %1253 = vadd.xlane.f32.xlu0 %v1252_v36 }
  0x52   : > { %1259 = vadd.xlane.f32.xlu0 %v1258_v38 }
  0x53   : > { %4265 = vmatmul.mubr.msk.bf16.gmra.mxu0 %vm579_vm2, %v4386_v39  ;;  %vm3033_vm2 = vcmp.lt.s32.totalorder %v4851_v3, 111 }
  0x56   : > { %1265 = vadd.xlane.f32.xlu0 %v1264_v41 }
  0x57   : > { %471 = vperm.xlu1 %4377, %v445_v42  }
  0x5b   : > { %476 = vperm.xlu1 %4377, %v446_v43  }
  0x5f   : > { %486 = vperm.xlu1 %4377, %v448_v44  }
  0x63   : > { %496 = vperm.xlu1 %4377, %v450_v45  }
  0x67   : > { %506 = vperm.xlu1 %4377, %v452_v46  }
  0x6b   : > { %516 = vperm.xlu1 %4377, %v454_v48  }
  0x6c   : > { %461 = vperm.xlu0 %4378, %v443_v47  }
  0x6f   : > { %526 = vperm.xlu1 %4377, %v456_v50  }
  0x70   : > { %466 = vperm.xlu0 %4378, %v444_v49  }
  0x73   : > { %536 = vperm.xlu1 %4377, %v458_v52  }
  0x74   : > { %481 = vperm.xlu0 %4378, %v447_v51  }
  0x78   : > { %491 = vperm.xlu0 %4378, %v449_v53  }
  0x7c   : > { %501 = vperm.xlu0 %4378, %v451_v54  }
  0x80   : > { %511 = vperm.xlu0 %4378, %v453_v55  }
  0x84   : > { %521 = vperm.xlu0 %4378, %v455_v56  }
  0x88   : > { %531 = vperm.xlu0 %4378, %v457_v57  }
  0x9b   : > { %v5165_v58 = vpop.xlane.xlu0 %980  ;;  %v5167_v59 = vpop.xlane.xlu1 %983 }
  0x9c   : > { %10305 = vst [vmem:[#allocation2_spill] sm:$0xff] %v5165_v58  ;;  %10306 = vst [vmem:[#allocation3_spill] sm:$0xff] %v5167_v59 }
  0x9f   : > { %v5169_v60 = vpop.xlane.xlu0 %986  ;;  %v5171_v61 = vpop.xlane.xlu1 %992 }
  0xa0   : > { %10307 = vst [vmem:[#allocation4_spill] sm:$0xff] %v5169_v60  ;;  %10308 = vst [vmem:[#allocation5_spill] sm:$0xff] %v5171_v61 }
  0xa3   : > { %v5173_v62 = vpop.xlane.xlu0 %989  ;;  %v5175_v63 = vpop.xlane.xlu1 %998 }
  0xa4   : > { %10309 = vst [vmem:[#allocation6_spill] sm:$0xff] %v5173_v62  ;;  %10310 = vst [vmem:[#allocation7_spill] sm:$0xff] %v5175_v63 }
  0xa7   : > { %v5177_v7 = vpop.xlane.xlu0 %995  ;;  %v5181_v9 = vpop.xlane.xlu1 %1004 }
  0xa8   : > { %10311 = vst [vmem:[#allocation8_spill] sm:$0xff] %v5177_v7  ;;  %10313 = vst [vmem:[#allocation10_spill] sm:$0xff] %v5181_v9  ;;  %v5718_v9 = vld [vmem:[%s9940_s3 + $0x50] sm:$0xff] }
  0xab   : > { %v5179_v8 = vpop.xlane.xlu0 %1001  ;;  %v5185_v5 = vpop.xlane.xlu1 %1010 }
  0xac   : > { %10312 = vst [vmem:[#allocation9_spill] sm:$0xff] %v5179_v8  ;;  %10315 = vst [vmem:[#allocation12_spill] sm:$0xff] %v5185_v5 }
  0xaf   : > { %v5183_v12 = vpop.xlane.xlu0 %1007  ;;  %v5189_v14 = vpop.xlane.xlu1 %1016 }
  0xb0   : > { %10314 = vst [vmem:[#allocation11_spill] sm:$0xff] %v5183_v12  ;;  %10317 = vst [vmem:[#allocation14_spill] sm:$0xff] %v5189_v14  ;;  %v5696_v14 = vld [vmem:[%s9940_s3 + $0x78] sm:$0xff]  ;;  %v1486_v12 = vsel %vm1473_vm4, %v5718_v9, 0.0 }
  0xb3   : > { %v5187_v13 = vpop.xlane.xlu0 %1013  ;;  %v5195_v6 = vpop.xlane.xlu1 %1022 }
  0xb4   : > { %10316 = vst [vmem:[#allocation13_spill] sm:$0xff] %v5187_v13  ;;  %10320 = vst [vmem:[#allocation17_spill] sm:$0xff] %v5195_v6  ;;  %v1491_v13 = vsel %vm1473_vm4, %v5696_v14, 0.0 }
  0xb7   : > { %v5191_v15 = vpop.xlane.xlu0 %1019  ;;  %v5199_v18 = vpop.xlane.xlu1 %1223 }
  0xb8   : > { %10318 = vst [vmem:[#allocation15_spill] sm:$0xff] %v5191_v15  ;;  %10322 = vst [vmem:[#allocation19_spill] sm:$0xff] %v5199_v18 }
  0xbb   : > { %v5193_v16 = vpop.xlane.xlu0 %1025  ;;  %v5205_v19 = vpop.xlane.xlu1 %1232 }
  0xbc   : > { %10319 = vst [vmem:[#allocation16_spill] sm:$0xff] %v5193_v16  ;;  %10325 = vst [vmem:[#allocation22_spill] sm:$0xff] %v5205_v19 }
  0xbf   : > { %v5197_v17 = vpop.xlane.xlu0 %1220  ;;  %v5209_v20 = vpop.xlane.xlu1 %1238 }
  0xc0   : > { %10321 = vst [vmem:[#allocation18_spill] sm:$0xff] %v5197_v17  ;;  %10327 = vst [vmem:[#allocation24_spill] sm:$0xff] %v5209_v20 }
  0xc3   : > { %v5201_v2 = vpop.xlane.xlu0 %1226  ;;  %v5215_v23 = vpop.xlane.xlu1 %1244 }
  0xc4   : > { %10323 = vst [vmem:[#allocation20_spill] sm:$0xff] %v5201_v2  ;;  %10330 = vst [vmem:[#allocation27_spill] sm:$0xff] %v5215_v23  ;;  %v5654_v2 = vld [vmem:[%s9940_s3 + $0x58] sm:$0xff] }
  0xc7   : > { %v5203_v11 = vpop.xlane.xlu0 %1229  ;;  %v5219_v10 = vpop.xlane.xlu1 %1250 }
  0xc8   : > { %10324 = vst [vmem:[#allocation21_spill] sm:$0xff] %v5203_v11  ;;  %10332 = vst [vmem:[#allocation29_spill] sm:$0xff] %v5219_v10 }
  0xcb   : > { %v5207_v4 = vpop.xlane.xlu0 %1235  ;;  %v5223_v29 = vpop.xlane.xlu1 %1256 }
  0xcc   : > { %10326 = vst [vmem:[#allocation23_spill] sm:$0xff] %v5207_v4  ;;  %10334 = vst [vmem:[#allocation31_spill] sm:$0xff] %v5223_v29 }
  0xcf   : > { %v5211_v21 = vpop.xlane.xlu0 %1241  ;;  %v5227_v34 = vpop.xlane.xlu1 %1262 }
  0xd0   : > { %10328 = vst [vmem:[#allocation25_spill] sm:$0xff] %v5211_v21  ;;  %10336 = vst [vmem:[#allocation33_spill] sm:$0xff] %v5227_v34 }
  0xd3   : > { %v5213_v22 = vpop.xlane.xlu0 %1247  ;;  %v472_v45 = vpop.permute.xlu1 %471 }
  0xd4   : > { %10329 = vst [vmem:[#allocation26_spill] sm:$0xff] %v5213_v22 }
  0xd7   : > { %v5217_v24 = vpop.xlane.xlu0 %1253  ;;  %v477_v55 = vpop.permute.xlu1 %476 }
  0xd8   : > { %10331 = vst [vmem:[#allocation28_spill] sm:$0xff] %v5217_v24 }
  0xdb   : > { %v638_v25 = vpop.f32.mrf.mxu0  ;;  %v5221_v26 = vpop.xlane.xlu0 %1259 }
  0xdc   : > { %10333 = vst [vmem:[#allocation30_spill] sm:$0xff] %v5221_v26  ;;  %v487_v1 = vpop.permute.xlu1 %486 }
  0xdd   : > { %v640_v27 = vpop.f32.mrf.mxu0 }
  0xdf   : > { %v642_v28 = vpop.f32.mrf.mxu0  ;;  %v5225_v31 = vpop.xlane.xlu0 %1265 }
  0xe0   : > { %10335 = vst [vmem:[#allocation32_spill] sm:$0xff] %v5225_v31 }
  0xe1   : > { %v644_v30 = vpop.f32.mrf.mxu0 }
  0xe3   : > { %v648_v32 = vpop.f32.mrf.mxu0 }
  0xe4   : > { %v5239_v46 = vadd.f32 %v648_v32, %v472_v45 }
  0xe5   : > { %v650_v33 = vpop.f32.mrf.mxu0 }
  0xe6   : > { %v5243_v50 = vadd.f32 %v650_v33, %v472_v45  ;;  %v4270_v51 = vmul.f32 -1.442695, %v5239_v46 }
  0xe7   : > { %v462_v35 = vpop.permute.xlu0 %461  ;;  %v652_v38 = vpop.f32.mrf.mxu0 }
  0xe8   : > { %v5229_v36 = vadd.f32 %v638_v25, %v462_v35  ;;  %v5231_v37 = vadd.f32 %v640_v27, %v462_v35  ;;  %v4271_v53 = vmul.f32 -1.442695, %v5243_v50  ;;  %v5247_v56 = vadd.f32 %v652_v38, %v477_v55 }
  0xe9   : > { %v654_v41 = vpop.f32.mrf.mxu0 }
  0xea   : > { %v4266_v39 = vmul.f32 -1.442695, %v5229_v36  ;;  %v4267_v40 = vmul.f32 -1.442695, %v5231_v37  ;;  %v4272_v32 = vmul.f32 -1.442695, %v5247_v56  ;;  %v5253_v38 = vadd.f32 %v654_v41, %v477_v55 }
  0xeb   : > { %v467_v42 = vpop.permute.xlu0 %466  ;;  %v658_v49 = vpop.f32.mrf.mxu0 }
  0xec   : > { %4389 = vpow2.f32 %v4266_v39  ;;  %v5235_v43 = vadd.f32 %v642_v28, %v467_v42  ;;  %v5237_v44 = vadd.f32 %v644_v30, %v467_v42 }
  0xed   : > { %4391 = vpow2.f32 %v4267_v40  ;;  %v660_v52 = vpop.f32.mrf.mxu0 }
  0xee   : > { %v4268_v47 = vmul.f32 -1.442695, %v5235_v43  ;;  %v4269_v48 = vmul.f32 -1.442695, %v5237_v44 }
  0xef   : > { %v482_v54 = vpop.permute.xlu0 %481  ;;  %v662_v57 = vpop.f32.mrf.mxu0 }
  0xf0   : > { %4393 = vpow2.f32 %v4268_v47  ;;  %v5249_v25 = vadd.f32 %v658_v49, %v482_v54  ;;  %v5255_v49 = vadd.f32 %v660_v52, %v482_v54  ;;  %v5259_v41 = vadd.f32 %v662_v57, %v487_v1 }
  0xf1   : > { %4395 = vpow2.f32 %v4269_v48  ;;  %v664_v33 = vpop.f32.mrf.mxu0 }
  0xf2   : > { %4397 = vpow2.f32 %v4270_v51  ;;  %v4274_v39 = vmul.f32 -1.442695, %v5249_v25  ;;  %v4273_v51 = vmul.f32 -1.442695, %v5253_v38 }
  0xf3   : > { %4399 = vpow2.f32 %v4271_v53  ;;  %v668_v45 = vpop.f32.mrf.mxu0 }
  0xf5   : > { %v670_v53 = vpop.f32.mrf.mxu0 }
  0xf7   : > { %v672_v55 = vpop.f32.mrf.mxu0 }
  0xf9   : > { %v4390_v27 = vpop.eup %4389 }
  0xfa   : > { %v4392_v28 = vpop.eup %4391  ;;  %v813_v30 = vadd.f32 1.0, %v4390_v27 }
  0xfb   : > { %v814_v35 = vadd.f32 1.0, %v4392_v28  ;;  %v4275_v28 = vmul.f32 -1.442695, %v5255_v49 }
  0xfc   : > { %4401 = vrcp.f32 %v813_v30 }
  0xfd   : > { %v4394_v40 = vpop.eup %4393  ;;  %4403 = vrcp.f32 %v814_v35  ;;  %v492_v35 = vpop.permute.xlu0 %491 }
  0xfe   : > { %v4396_v42 = vpop.eup %4395  ;;  %4405 = vpow2.f32 %v4272_v32  ;;  %v815_v47 = vadd.f32 1.0, %v4394_v40  ;;  %v5261_v52 = vadd.f32 %v668_v45, %v492_v35  ;;  %v5275_v45 = vadd.f32 %v664_v33, %v487_v1 }
  0xff   : > { %v816_v48 = vadd.f32 1.0, %v4396_v42  ;;  %4407 = vpow2.f32 %v4274_v39  ;;  %v4398_v27 = vpop.eup %4397 }
 0x100   : > { %v4400_v30 = vpop.eup %4399  ;;  %v817_v32 = vadd.f32 1.0, %v4398_v27  ;;  %v4278_v57 = vmul.f32 -1.442695, %v5261_v52  ;;  %v4277_v1 = vmul.f32 -1.442695, %v5275_v45 }
 0x101   : > { %4409 = vrcp.f32 %v816_v48  ;;  %v818_v40 = vadd.f32 1.0, %v4400_v30  ;;  %v674_v48 = vpop.f32.mrf.mxu0 }
 0x102   : > { %4411 = vrcp.f32 %v815_v47  ;;  %v4276_v47 = vmul.f32 -1.442695, %v5259_v41 }
 0x103   : > { %4413 = vpow2.f32 %v4273_v51 }
 0x104   : > { %4415 = vpow2.f32 %v4275_v28  ;;  %v678_v28 = vpop.f32.mrf.mxu0 }
 0x105   : > { %4417 = vrcp.f32 %v817_v32 }
 0x106   : > { %4419 = vrcp.f32 %v818_v40  ;;  %v680_v33 = vpop.f32.mrf.mxu0 }
 0x107   : > { %4421 = vpow2.f32 %v4276_v47  ;;  %v497_v47 = vpop.permute.xlu1 %496 }
 0x108   : > { %4423 = vpow2.f32 %v4278_v57  ;;  %v502_v57 = vpop.permute.xlu0 %501 }
 0x109   : > { %v4402_v54 = vpop.eup %4401 }
 0x10a   : > { %v4404_v39 = vpop.eup %4403  ;;  %v5264_v42 = vmul.f32 %v4402_v54, %v5229_v36 }
 0x10b   : > { %v4406_v0 = vpop.eup %4405  ;;  %v5268_v51 = vmul.f32 %v4404_v39, %v5231_v37  ;;  %v5277_v37 = vadd.f32 %v670_v53, %v492_v35 }
 0x10c   : > { %10337 = vst [vmem:[#allocation34_spill] sm:$0xff] %v5264_v42  ;;  %v4408_v27 = vpop.eup %4407  ;;  %1059 = vrot.lane.b32.xlu1 %v5264_v42, %s4762_s19  ;;  %v819_v36 = vadd.f32 1.0, %v4406_v0 }
 0x10d   : > { %10338 = vst [vmem:[#allocation35_spill] sm:$0xff] %v5268_v51  ;;  %1091 = vrot.lane.b32.xlu0 %v5268_v51, %s4762_s19  ;;  %v821_v32 = vadd.f32 1.0, %v4408_v27  ;;  %v4279_v53 = vmul.f32 -1.442695, %v5277_v37  ;;  %v5295_v27 = vadd.f32 %v672_v55, %v497_v47 }
 0x10e   : > { %v4410_v30 = vpop.eup %4409  ;;  %4425 = vrcp.f32 %v819_v36  ;;  %v682_v36 = vpop.f32.mrf.mxu0 }
 0x10f   : > { %v4412_v40 = vpop.eup %4411  ;;  %v5284_v0 = vmul.f32 %v4410_v30, %v5237_v44  ;;  %4427 = vrcp.f32 %v821_v32  ;;  %v5297_v32 = vadd.f32 %v678_v28, %v502_v57  ;;  %v4280_v55 = vmul.f32 -1.442695, %v5295_v27 }
 0x110   : > { %1331 = vrot.lane.b32.xlu1 %v5264_v42, %s4763_s20  ;;  %v4414_v54 = vpop.eup %4413  ;;  %v5288_v39 = vmul.f32 %v4412_v40, %v5235_v43  ;;  %4429 = vpow2.f32 %v4277_v1  ;;  %v684_v1 = vpop.f32.mrf.mxu0 }
 0x111   : > { %1363 = vrot.lane.b32.xlu0 %v5268_v51, %s4763_s20  ;;  %10339 = vst [vmem:[#allocation36_spill] sm:$0xff] %v5284_v0  ;;  %v4416_v35 = vpop.eup %4415  ;;  %v820_v44 = vadd.f32 1.0, %v4414_v54  ;;  %4431 = vpow2.f32 %v4279_v53  ;;  %v4282_v28 = vmul.f32 -1.442695, %v5297_v32 }
 0x112   : > { %10340 = vst [vmem:[#allocation37_spill] sm:$0xff] %v5288_v39  ;;  %v4418_v30 = vpop.eup %4417  ;;  %v822_v43 = vadd.f32 1.0, %v4416_v35 }
 0x113   : > { %v4420_v40 = vpop.eup %4419  ;;  %v5304_v18 = vmul.f32 %v4418_v30, %v5239_v46  ;;  %4433 = vrcp.f32 %v820_v44  ;;  %v5315_v44 = vadd.f32 %v674_v48, %v497_v47  ;;  %v688_v30 = vpop.f32.mrf.mxu0 }
 0x114   : > { %1093 = vrot.lane.b32.xlu1 %v5284_v0, %s4762_s19  ;;  %v4422_v54 = vpop.eup %4421  ;;  %v5308_v35 = vmul.f32 %v4420_v40, %v5243_v50  ;;  %4435 = vrcp.f32 %v822_v43  ;;  %v5317_v50 = vadd.f32 %v680_v33, %v502_v57 }
 0x115   : > { %1061 = vrot.lane.b32.xlu0 %v5288_v39, %s4762_s19  ;;  %10341 = vst [vmem:[#allocation38_spill] sm:$0xff] %v5304_v18  ;;  %v4424_v53 = vpop.eup %4423  ;;  %v823_v46 = vadd.f32 1.0, %v4422_v54  ;;  %4437 = vpow2.f32 %v4280_v55  ;;  %v4281_v48 = vmul.f32 -1.442695, %v5315_v44  ;;  %v690_v47 = vpop.f32.mrf.mxu0 }
 0x116   : > { %10342 = vst [vmem:[#allocation39_spill] sm:$0xff] %v5308_v35  ;;  %v825_v59 = vadd.f32 1.0, %v4424_v53  ;;  %4439 = vpow2.f32 %v4282_v28  ;;  %v4283_v33 = vmul.f32 -1.442695, %v5317_v50  ;;  %v507_v28 = vpop.permute.xlu1 %506 }
 0x117   : > { %4441 = vrcp.f32 %v823_v46  ;;  %v5335_v53 = vadd.f32 %v682_v36, %v507_v28  ;;  %v692_v46 = vpop.f32.mrf.mxu0 }
 0x118   : > { %1365 = vrot.lane.b32.xlu1 %v5284_v0, %s4763_s20  ;;  %4443 = vrcp.f32 %v825_v59 }
 0x119   : > { %1333 = vrot.lane.b32.xlu0 %v5288_v39, %s4763_s20  ;;  %4445 = vpow2.f32 %v4281_v48  ;;  %v4284_v36 = vmul.f32 -1.442695, %v5335_v53  ;;  %v694_v48 = vpop.f32.mrf.mxu0 }
 0x11a   : > { %4447 = vpow2.f32 %v4283_v33 }
 0x11b   : > { %v4426_v17 = vpop.eup %4425 }
 0x11c   : > { %1063 = vrot.lane.b32.xlu1 %v5304_v18, %s4762_s19  ;;  %v4428_v43 = vpop.eup %4427  ;;  %v5324_v40 = vmul.f32 %v4426_v17, %v5247_v56  ;;  %v512_v56 = vpop.permute.xlu0 %511 }
 0x11d   : > { %1095 = vrot.lane.b32.xlu0 %v5308_v35, %s4762_s19  ;;  %v4430_v55 = vpop.eup %4429  ;;  %v5328_v54 = vmul.f32 %v4428_v43, %v5249_v25  ;;  %v5337_v59 = vadd.f32 %v688_v30, %v512_v56 }
 0x11e   : > { %10343 = vst [vmem:[#allocation40_spill] sm:$0xff] %v5324_v40  ;;  %v4432_v57 = vpop.eup %4431  ;;  %v824_v17 = vadd.f32 1.0, %v4430_v55 }
 0x11f   : > { %10344 = vst [vmem:[#allocation41_spill] sm:$0xff] %v5328_v54  ;;  %v826_v25 = vadd.f32 1.0, %v4432_v57  ;;  %v4286_v30 = vmul.f32 -1.442695, %v5337_v59 }
 0x120   : > { %1335 = vrot.lane.b32.xlu1 %v5304_v18, %s4763_s20  ;;  %v4434_v58 = vpop.eup %4433  ;;  %4449 = vrcp.f32 %v824_v17  ;;  %v698_v17 = vpop.f32.mrf.mxu0 }
 0x121   : > { %1367 = vrot.lane.b32.xlu0 %v5308_v35, %s4763_s20  ;;  %v4436_v43 = vpop.eup %4435  ;;  %v5344_v6 = vmul.f32 %v4434_v58, %v5253_v38  ;;  %4451 = vrcp.f32 %v826_v25  ;;  %v5355_v38 = vadd.f32 %v684_v1, %v507_v28 }
 0x122   : > { %v4438_v55 = vpop.eup %4437  ;;  %v5348_v57 = vmul.f32 %v4436_v43, %v5255_v49  ;;  %4453 = vpow2.f32 %v4284_v36  ;;  %v5357_v49 = vadd.f32 %v690_v47, %v512_v56  ;;  %v700_v28 = vpop.f32.mrf.mxu0 }
 0x123   : > { %10345 = vst [vmem:[#allocation42_spill] sm:$0xff] %v5344_v6  ;;  %v4440_v33 = vpop.eup %4439  ;;  %v827_v58 = vadd.f32 1.0, %v4438_v55  ;;  %4455 = vpow2.f32 %v4286_v30  ;;  %v4285_v1 = vmul.f32 -1.442695, %v5355_v38  ;;  %v517_v30 = vpop.permute.xlu1 %516 }
 0x124   : > { %1065 = vrot.lane.b32.xlu1 %v5324_v40, %s4762_s19  ;;  %10346 = vst [vmem:[#allocation43_spill] sm:$0xff] %v5348_v57  ;;  %v4442_v34 = vpop.eup %4441  ;;  %v829_v31 = vadd.f32 1.0, %v4440_v33  ;;  %v4287_v47 = vmul.f32 -1.442695, %v5357_v49  ;;  %v5373_v33 = vadd.f32 %v692_v46, %v517_v30 }
 0x125   : > { %1067 = vrot.lane.b32.xlu0 %v5328_v54, %s4762_s19  ;;  %v4444_v25 = vpop.eup %4443  ;;  %v5364_v43 = vmul.f32 %v4442_v34, %v5259_v41  ;;  %4457 = vrcp.f32 %v827_v58  ;;  %v522_v41 = vpop.permute.xlu0 %521 }
 0x126   : > { %v4446_v36 = vpop.eup %4445  ;;  %v5368_v55 = vmul.f32 %v4444_v25, %v5261_v52  ;;  %4459 = vrcp.f32 %v829_v31  ;;  %v702_v58 = vpop.f32.mrf.mxu0  ;;  %v5377_v31 = vadd.f32 %v698_v17, %v522_v41  ;;  %v4288_v29 = vmul.f32 -1.442695, %v5373_v33 }
 0x127   : > { %10347 = vst [vmem:[#allocation44_spill] sm:$0xff] %v5364_v43  ;;  %v4448_v56 = vpop.eup %4447  ;;  %v828_v34 = vadd.f32 1.0, %v4446_v36  ;;  %4461 = vpow2.f32 %v4285_v1 }
 0x128   : > { %1337 = vrot.lane.b32.xlu1 %v5324_v40, %s4763_s20  ;;  %10348 = vst [vmem:[#allocation45_spill] sm:$0xff] %v5368_v55  ;;  %v830_v52 = vadd.f32 1.0, %v4448_v56  ;;  %4463 = vpow2.f32 %v4287_v47  ;;  %v704_v1 = vpop.f32.mrf.mxu0  ;;  %v4290_v17 = vmul.f32 -1.442695, %v5377_v31 }
 0x129   : > { %1339 = vrot.lane.b32.xlu0 %v5328_v54, %s4763_s20  ;;  %4465 = vrcp.f32 %v828_v34 }
 0x12a   : > { %4467 = vrcp.f32 %v830_v52 }
 0x12b   : > { %4469 = vpow2.f32 %v4288_v29 }
 0x12c   : > { %1097 = vrot.lane.b32.xlu1 %v5344_v6, %s4762_s19  ;;  %4471 = vpow2.f32 %v4290_v17  ;;  %v527_v17 = vpop.permute.xlu1 %526 }
 0x12d   : > { %1099 = vrot.lane.b32.xlu0 %v5348_v57, %s4762_s19  ;;  %v4450_v26 = vpop.eup %4449 }
 0x12e   : > { %v4452_v25 = vpop.eup %4451  ;;  %v5385_v46 = vmul.f32 %v4450_v26, %v5275_v45  ;;  %v5395_v26 = vadd.f32 %v694_v48, %v517_v30  ;;  %v708_v45 = vpop.f32.mrf.mxu0 }
 0x12f   : > { %v4454_v36 = vpop.eup %4453  ;;  %v5388_v56 = vmul.f32 %v4452_v25, %v5277_v37  ;;  %v5397_v37 = vadd.f32 %v700_v28, %v522_v41  ;;  %v532_v25 = vpop.permute.xlu0 %531 }
 0x130   : > { %1369 = vrot.lane.b32.xlu1 %v5344_v6, %s4763_s20  ;;  %10349 = vst [vmem:[#allocation46_spill] sm:$0xff] %v5385_v46  ;;  %v4456_v47 = vpop.eup %4455  ;;  %v831_v24 = vadd.f32 1.0, %v4454_v36  ;;  %v5401_v22 = vadd.f32 %v708_v45, %v532_v25  ;;  %v4289_v48 = vmul.f32 -1.442695, %v5395_v26 }
 0x131   : > { %1371 = vrot.lane.b32.xlu0 %v5348_v57, %s4763_s20  ;;  %10350 = vst [vmem:[#allocation47_spill] sm:$0xff] %v5388_v56  ;;  %v833_v10 = vadd.f32 1.0, %v4456_v47  ;;  %v4291_v41 = vmul.f32 -1.442695, %v5397_v37 }
 0x132   : > { %v4458_v34 = vpop.eup %4457  ;;  %4473 = vrcp.f32 %v831_v24  ;;  %v4294_v47 = vmul.f32 -1.442695, %v5401_v22 }
 0x133   : > { %v4460_v52 = vpop.eup %4459  ;;  %v5406_v29 = vmul.f32 %v4458_v34, %v5295_v27  ;;  %4475 = vrcp.f32 %v833_v10  ;;  %v5418_v27 = vadd.f32 %v702_v58, %v527_v17  ;;  %v710_v10 = vpop.f32.mrf.mxu0 }
 0x134   : > { %1069 = vrot.lane.b32.xlu1 %v5364_v43, %s4762_s19  ;;  %v4462_v30 = vpop.eup %4461  ;;  %v5410_v28 = vmul.f32 %v4460_v52, %v5297_v32  ;;  %4477 = vpow2.f32 %v4289_v48  ;;  %v5428_v48 = vadd.f32 %v710_v10, %v532_v25 }
 0x135   : > { %1071 = vrot.lane.b32.xlu0 %v5368_v55, %s4762_s19  ;;  %10351 = vst [vmem:[#allocation48_spill] sm:$0xff] %v5406_v29  ;;  %v4464_v36 = vpop.eup %4463  ;;  %v832_v24 = vadd.f32 1.0, %v4462_v30  ;;  %4479 = vpow2.f32 %v4291_v41  ;;  %v4292_v58 = vmul.f32 -1.442695, %v5418_v27  ;;  %v712_v10 = vpop.f32.mrf.mxu0 }
 0x136   : > { %10352 = vst [vmem:[#allocation49_spill] sm:$0xff] %v5410_v28  ;;  %v4466_v45 = vpop.eup %4465  ;;  %v834_v32 = vadd.f32 1.0, %v4464_v36  ;;  %4481 = vpow2.f32 %v4294_v47  ;;  %v4295_v47 = vmul.f32 -1.442695, %v5428_v48 }
 0x137   : > { %v4468_v34 = vpop.eup %4467  ;;  %v5425_v23 = vmul.f32 %v4466_v45, %v5315_v44  ;;  %4483 = vrcp.f32 %v832_v24  ;;  %v5437_v44 = vadd.f32 %v704_v1, %v527_v17 }
 0x138   : > { %1341 = vrot.lane.b32.xlu1 %v5364_v43, %s4763_s20  ;;  %v4470_v52 = vpop.eup %4469  ;;  %v5431_v30 = vmul.f32 %v4468_v34, %v5317_v50  ;;  %4485 = vrcp.f32 %v834_v32 }
 0x139   : > { %1343 = vrot.lane.b32.xlu0 %v5368_v55, %s4763_s20  ;;  %10353 = vst [vmem:[#allocation50_spill] sm:$0xff] %v5425_v23  ;;  %v4472_v41 = vpop.eup %4471  ;;  %v835_v36 = vadd.f32 1.0, %v4470_v52  ;;  %4487 = vpow2.f32 %v4292_v58  ;;  %v4293_v32 = vmul.f32 -1.442695, %v5437_v44  ;;  %v537_v52 = vpop.permute.xlu1 %536 }
 0x13a   : > { %10354 = vst [vmem:[#allocation51_spill] sm:$0xff] %v5431_v30  ;;  %v837_v25 = vadd.f32 1.0, %v4472_v41  ;;  %v5455_v41 = vadd.f32 %v712_v10, %v537_v52  ;;  %v714_v10 = vpop.f32.mrf.mxu0 }
 0x13b   : > { %4489 = vrcp.f32 %v835_v36 }
 0x13c   : > { %1101 = vrot.lane.b32.xlu1 %v5385_v46, %s4762_s19  ;;  %4491 = vpow2.f32 %v4295_v47 }
 0x13d   : > { %1103 = vrot.lane.b32.xlu0 %v5388_v56, %s4762_s19  ;;  %4493 = vrcp.f32 %v837_v25  ;;  %v4296_v25 = vmul.f32 -1.442695, %v5455_v41 }
 0x13e   : > { %4495 = vpow2.f32 %v4293_v32 }
 0x13f   : > { %v4474_v24 = vpop.eup %4473 }
 0x140   : > { %1373 = vrot.lane.b32.xlu1 %v5385_v46, %s4763_s20  ;;  %v4476_v45 = vpop.eup %4475  ;;  %v5445_v50 = vmul.f32 %v4474_v24, %v5335_v53 }
 0x141   : > { %1375 = vrot.lane.b32.xlu0 %v5388_v56, %s4763_s20  ;;  %v4478_v1 = vpop.eup %4477  ;;  %v5449_v17 = vmul.f32 %v4476_v45, %v5337_v59 }
 0x142   : > { %10355 = vst [vmem:[#allocation52_spill] sm:$0xff] %v5445_v50  ;;  %v4480_v34 = vpop.eup %4479  ;;  %v836_v53 = vadd.f32 1.0, %v4478_v1 }
 0x143   : > { %10356 = vst [vmem:[#allocation53_spill] sm:$0xff] %v5449_v17  ;;  %v4482_v58 = vpop.eup %4481  ;;  %v838_v47 = vadd.f32 1.0, %v4480_v34 }
 0x144   : > { %1073 = vrot.lane.b32.xlu1 %v5406_v29, %s4762_s19  ;;  %v4484_v36 = vpop.eup %4483  ;;  %4497 = vrcp.f32 %v836_v53  ;;  %v841_v1 = vadd.f32 1.0, %v4482_v58 }
 0x145   : > { %1075 = vrot.lane.b32.xlu0 %v5410_v28, %s4762_s19  ;;  %v4486_v24 = vpop.eup %4485  ;;  %v5462_v59 = vmul.f32 %v4484_v36, %v5355_v38  ;;  %4499 = vrcp.f32 %v838_v47  ;;  %v715_v38 = vadd.f32 %v714_v10, %v537_v52 }
 0x146   : > { %v4488_v45 = vpop.eup %4487  ;;  %v5466_v32 = vmul.f32 %v4486_v24, %v5357_v49  ;;  %4501 = vpow2.f32 %v4296_v25 }
 0x147   : > { %10357 = vst [vmem:[#allocation54_spill] sm:$0xff] %v5462_v59  ;;  %v839_v21 = vadd.f32 1.0, %v4488_v45  ;;  %4503 = vrcp.f32 %v841_v1  ;;  %v4297_v58 = vmul.f32 -1.442695, %v715_v38 }
 0x148   : > { %1345 = vrot.lane.b32.xlu1 %v5406_v29, %s4763_s20  ;;  %10358 = vst [vmem:[#allocation55_spill] sm:$0xff] %v5466_v32  ;;  %v4490_v34 = vpop.eup %4489 }
 0x149   : > { %1347 = vrot.lane.b32.xlu0 %v5410_v28, %s4763_s20  ;;  %v4492_v53 = vpop.eup %4491  ;;  %v5477_v49 = vmul.f32 %v4490_v34, %v5373_v33  ;;  %4505 = vrcp.f32 %v839_v21 }
 0x14a   : > { %v4494_v36 = vpop.eup %4493  ;;  %v842_v25 = vadd.f32 1.0, %v4492_v53  ;;  %4507 = vpow2.f32 %v4297_v58 }
 0x14b   : > { %10359 = vst [vmem:[#allocation56_spill] sm:$0xff] %v5477_v49  ;;  %v4496_v47 = vpop.eup %4495  ;;  %v5480_v24 = vmul.f32 %v4494_v36, %v5377_v31 }
 0x14c   : > { %1105 = vrot.lane.b32.xlu1 %v5425_v23, %s4762_s19  ;;  %v840_v52 = vadd.f32 1.0, %v4496_v47  ;;  %4509 = vrcp.f32 %v842_v25 }
 0x14d   : > { %1107 = vrot.lane.b32.xlu0 %v5431_v30, %s4762_s19  ;;  %10360 = vst [vmem:[#allocation57_spill] sm:$0xff] %v5480_v24 }
 0x14e   : > { %4511 = vrcp.f32 %v840_v52 }
 0x150   : > { %1377 = vrot.lane.b32.xlu1 %v5425_v23, %s4763_s20 }
 0x151   : > { %1379 = vrot.lane.b32.xlu0 %v5431_v30, %s4763_s20  ;;  %v4498_v45 = vpop.eup %4497 }
 0x152   : > { %v4500_v1 = vpop.eup %4499  ;;  %v5491_v21 = vmul.f32 %v4498_v45, %v5395_v26 }
 0x153   : > { %v4502_v33 = vpop.eup %4501  ;;  %v5494_v31 = vmul.f32 %v4500_v1, %v5397_v37 }
 0x154   : > { %1077 = vrot.lane.b32.xlu1 %v5445_v50, %s4762_s19  ;;  %10361 = vst [vmem:[#allocation58_spill] sm:$0xff] %v5491_v21  ;;  %v4504_v10 = vpop.eup %4503  ;;  %v843_v34 = vadd.f32 1.0, %v4502_v33 }
 0x155   : > { %1079 = vrot.lane.b32.xlu0 %v5449_v17, %s4762_s19  ;;  %10362 = vst [vmem:[#allocation59_spill] sm:$0xff] %v5494_v31  ;;  %v5501_v36 = vmul.f32 %v4504_v10, %v5401_v22 }
 0x156   : > { %v4506_v53 = vpop.eup %4505  ;;  %4513 = vrcp.f32 %v843_v34 }
 0x157   : > { %10363 = vst [vmem:[#allocation60_spill] sm:$0xff] %v5501_v36  ;;  %v5508_v26 = vmul.f32 %v4506_v53, %v5418_v27  ;;  %v4508_v37 = vpop.eup %4507 }
 0x158   : > { %1349 = vrot.lane.b32.xlu1 %v5445_v50, %s4763_s20  ;;  %v844_v22 = vadd.f32 1.0, %v4508_v37 }
 0x159   : > { %1351 = vrot.lane.b32.xlu0 %v5449_v17, %s4763_s20  ;;  %10364 = vst [vmem:[#allocation61_spill] sm:$0xff] %v5508_v26  ;;  %v4510_v58 = vpop.eup %4509 }
 0x15a   : > { %v5515_v25 = vmul.f32 %v4510_v58, %v5428_v48  ;;  %4515 = vrcp.f32 %v844_v22 }
 0x15b   : > { %v4512_v47 = vpop.eup %4511 }
 0x15c   : > { %1109 = vrot.lane.b32.xlu1 %v5462_v59, %s4762_s19  ;;  %10365 = vst [vmem:[#allocation62_spill] sm:$0xff] %v5515_v25  ;;  %v5522_v27 = vmul.f32 %v4512_v47, %v5437_v44 }
 0x15d   : > { %1111 = vrot.lane.b32.xlu0 %v5466_v32, %s4762_s19 }
 0x15e   : > { %10366 = vst [vmem:[#allocation63_spill] sm:$0xff] %v5522_v27 }
 0x160   : > { %1381 = vrot.lane.b32.xlu1 %v5462_v59, %s4763_s20 }
 0x161   : > { %1383 = vrot.lane.b32.xlu0 %v5466_v32, %s4763_s20 }
 0x163   : > { %v4514_v48 = vpop.eup %4513 }
 0x164   : > { %1081 = vrot.lane.b32.xlu1 %v5477_v49, %s4762_s19  ;;  %v5537_v44 = vmul.f32 %v4514_v48, %v5455_v41 }
 0x165   : > { %1083 = vrot.lane.b32.xlu0 %v5480_v24, %s4762_s19 }
 0x166   : > { %10369 = vst [vmem:[#allocation66_spill] sm:$0xff] %v5537_v44 }
 0x167   : > { %v4516_v34 = vpop.eup %4515 }
 0x168   : > { %1353 = vrot.lane.b32.xlu1 %v5477_v49, %s4763_s20  ;;  %v5551_v37 = vmul.f32 %v4516_v34, %v715_v38  ;;  %v5575_v34 = vld [vmem:[%s9940_s3] sm:$0xff] }
 0x169   : > { %1355 = vrot.lane.b32.xlu0 %v5480_v24, %s4763_s20 }
 0x16a   : > { %10374 = vst [vmem:[#allocation71_spill] sm:$0xff] %v5551_v37 }
 0x16c   : > { %1113 = vrot.lane.b32.xlu1 %v5491_v21, %s4762_s19 }
 0x16d   : > { %1115 = vrot.lane.b32.xlu0 %v5494_v31, %s4762_s19 }
 0x170   : > { %1385 = vrot.lane.b32.xlu1 %v5491_v21, %s4763_s20 }
 0x171   : > { %1087 = vrot.lane.b32.xlu0 %v5501_v36, %s4762_s19 }
 0x174   : > { %1085 = vrot.lane.b32.xlu1 %v5508_v26, %s4762_s19 }
 0x175   : > { %1359 = vrot.lane.b32.xlu0 %v5501_v36, %s4763_s20 }
 0x178   : > { %1357 = vrot.lane.b32.xlu1 %v5508_v26, %s4763_s20 }
 0x179   : > { %1119 = vrot.lane.b32.xlu0 %v5515_v25, %s4762_s19 }
 0x17c   : > { %1117 = vrot.lane.b32.xlu1 %v5522_v27, %s4762_s19 }
 0x17d   : > { %1387 = vrot.lane.b32.xlu0 %v5494_v31, %s4763_s20 }
 0x17e   : > { %v5528_v52 = vpop.permute.xlu1 %1059 }
 0x17f   : > { %10367 = vst [vmem:[#allocation64_spill] sm:$0xff] %v5528_v52  ;;  %v5530_v45 = vpop.permute.xlu0 %1091 }
 0x180   : > { %10368 = vst [vmem:[#allocation65_spill] sm:$0xff] %v5530_v45  ;;  %1389 = vrot.lane.b32.xlu1 %v5522_v27, %s4763_s20 }
 0x181   : > { %1391 = vrot.lane.b32.xlu0 %v5515_v25, %s4763_s20 }
 0x182   : > { %v5539_v1 = vpop.permute.xlu1 %1331 }
 0x183   : > { %10370 = vst [vmem:[#allocation67_spill] sm:$0xff] %v5539_v1  ;;  %v5541_v33 = vpop.permute.xlu0 %1363 }
 0x184   : > { %10371 = vst [vmem:[#allocation68_spill] sm:$0xff] %v5541_v33  ;;  %1089 = vrot.lane.b32.xlu1 %v5537_v44, %s4762_s19 }
 0x186   : > { %v5545_v10 = vpop.permute.xlu1 %1093 }
 0x187   : > { %10372 = vst [vmem:[#allocation69_spill] sm:$0xff] %v5545_v10  ;;  %v5547_v53 = vpop.permute.xlu0 %1061 }
 0x188   : > { %10373 = vst [vmem:[#allocation70_spill] sm:$0xff] %v5547_v53  ;;  %1361 = vrot.lane.b32.xlu1 %v5537_v44, %s4763_s20  ;;  %v5588_v53 = vld [vmem:[%s9940_s3 + $0x10] sm:$0xff] }
 0x189   : > { %v1478_v52 = vsel %vm1473_vm4, %v5588_v53, 0.0 }
 0x18a   : > { %v5553_v58 = vpop.permute.xlu1 %1365  ;;  %v1498_v20 = vsel %vm978_vm0, %v1478_v52, 0.0 }
 0x18b   : > { %10375 = vst [vmem:[#allocation72_spill] sm:$0xff] %v5553_v58  ;;  %v5555_v41 = vpop.permute.xlu0 %1333  ;;  %v1476_v58 = vsel %vm1473_vm4, %v5575_v34, 0.0 }
 0x18c   : > { %10376 = vst [vmem:[#allocation73_spill] sm:$0xff] %v5555_v41  ;;  %1121 = vrot.lane.b32.xlu1 %v5551_v37, %s4762_s19  ;;  %v1492_v1 = vsel %vm978_vm0, %v1476_v58, 0.0  ;;  %v5599_v58 = vld [vmem:[%s9940_s3 + $0x18] sm:$0xff] }
 0x18d   : > { %v1479_v4 = vsel %vm1473_vm4, %v5599_v58, 0.0 }
 0x18e   : > { %v5559_v22 = vpop.permute.xlu1 %1063  ;;  %v1501_v11 = vsel %vm978_vm0, %v1479_v4, 0.0  ;;  %v5623_v4 = vld [vmem:[%s9940_s3 + $0x38] sm:$0xff] }
 0x18f   : > { %10377 = vst [vmem:[#allocation74_spill] sm:$0xff] %v5559_v22  ;;  %v5561_v47 = vpop.permute.xlu0 %1095 }
 0x190   : > { %10378 = vst [vmem:[#allocation75_spill] sm:$0xff] %v5561_v47  ;;  %1393 = vrot.lane.b32.xlu1 %v5551_v37, %s4763_s20 }
 0x192   : > { %v5565_v48 = vpop.permute.xlu1 %1335 }
 0x193   : > { %10379 = vst [vmem:[#allocation76_spill] sm:$0xff] %v5565_v48  ;;  %v5567_v33 = vpop.permute.xlu0 %1367 }
 0x194   : > { %10380 = vst [vmem:[#allocation77_spill] sm:$0xff] %v5567_v33 }
 0x196   : > { %v5570_v38 = vpop.permute.xlu1 %1065 }
 0x197   : > { %10381 = vst [vmem:[#allocation78_spill] sm:$0xff] %v5570_v38  ;;  %v5580_v41 = vpop.permute.xlu0 %1067  ;;  %v1487_v38 = vsel %vm1473_vm4, %v5654_v2, 0.0 }
 0x198   : > { %10382 = vst [vmem:[#allocation79_spill] sm:$0xff] %v5580_v41 }
 0x19a   : > { %v5583_v10 = vpop.permute.xlu1 %1337 }
 0x19b   : > { %10383 = vst [vmem:[#allocation80_spill] sm:$0xff] %v5583_v10  ;;  %v5593_v45 = vpop.permute.xlu0 %1339 }
 0x19c   : > { %10384 = vst [vmem:[#allocation81_spill] sm:$0xff] %v5593_v45 }
 0x19e   : > { %v5604_v10 = vpop.permute.xlu1 %1097 }
 0x19f   : > { %10385 = vst [vmem:[#allocation82_spill] sm:$0xff] %v5604_v10  ;;  %v5615_v45 = vpop.permute.xlu0 %1099 }
 0x1a0   : > { %1493 = vadd.xlane.f32.xlu0 %v1492_v1  ;;  %v5610_v1 = vld [vmem:[%s9940_s3 + $0x28] sm:$0xff]  ;;  %10386 = vst [vmem:[#allocation83_spill] sm:$0xff] %v5615_v45 }
 0x1a1   : > { %v1481_v52 = vsel %vm1473_vm4, %v5610_v1, 0.0 }
 0x1a2   : > { %v1507_v19 = vsel %vm978_vm0, %v1481_v52, 0.0  ;;  %v5618_v16 = vpop.permute.xlu1 %1369 }
 0x1a3   : > { %10387 = vst [vmem:[#allocation84_spill] sm:$0xff] %v5618_v16  ;;  %v5628_v15 = vpop.permute.xlu0 %1371  ;;  %v5642_v16 = vld [vmem:[%s9940_s3 + $0x8] sm:$0xff] }
 0x1a4   : > { %1499 = vadd.xlane.f32.xlu0 %v1498_v20  ;;  %v1483_v20 = vsel %vm1473_vm4, %v5623_v4, 0.0  ;;  %10388 = vst [vmem:[#allocation85_spill] sm:$0xff] %v5628_v15 }
 0x1a5   : > { %v1513_v48 = vsel %vm978_vm0, %v1483_v20, 0.0 }
 0x1a6   : > { %v5647_v15 = vpop.permute.xlu1 %1069 }
 0x1a7   : > { %10389 = vst [vmem:[#allocation86_spill] sm:$0xff] %v5647_v15  ;;  %v5659_v10 = vpop.permute.xlu0 %1071  ;;  %v5664_v15 = vld [vmem:[%s9940_s3 + $0x20] sm:$0xff] }
 0x1a8   : > { %1502 = vadd.xlane.f32.xlu0 %v1501_v11  ;;  %v5634_v11 = vld [vmem:[%s9940_s3 + $0x48] sm:$0xff]  ;;  %10390 = vst [vmem:[#allocation87_spill] sm:$0xff] %v5659_v10 }
 0x1a9   : > { %v1485_v52 = vsel %vm1473_vm4, %v5634_v11, 0.0  ;;  %v5676_v10 = vld [vmem:[%s9940_s3 + $0x68] sm:$0xff] }
 0x1aa   : > { %v1519_v20 = vsel %vm978_vm0, %v1485_v52, 0.0  ;;  %v1525_v52 = vsel %vm978_vm0, %v1487_v38, 0.0  ;;  %v1489_v45 = vsel %vm1473_vm4, %v5676_v10, 0.0 }
 0x1ab   : > { %v5689_v38 = vpop.permute.xlu0 %1343 }
 0x1ac   : > { %1508 = vadd.xlane.f32.xlu0 %v1507_v19  ;;  %v1477_v19 = vsel %vm1473_vm4, %v5642_v16, 0.0  ;;  %10392 = vst [vmem:[#allocation89_spill] sm:$0xff] %v5689_v38 }
 0x1ad   : > { %v1495_v33 = vsel %vm978_vm0, %v1477_v19, 0.0  ;;  %v5670_v19 = vpop.permute.xlu1 %1341 }
 0x1ae   : > { %10391 = vst [vmem:[#allocation88_spill] sm:$0xff] %v5670_v19 }
 0x1af   : > { %v5713_v5 = vpop.permute.xlu0 %1103 }
 0x1b0   : > { %1514 = vadd.xlane.f32.xlu0 %v1513_v48  ;;  %v1480_v48 = vsel %vm1473_vm4, %v5664_v15, 0.0  ;;  %10394 = vst [vmem:[#allocation91_spill] sm:$0xff] %v5713_v5 }
 0x1b1   : > { %v1504_v41 = vsel %vm978_vm0, %v1480_v48, 0.0  ;;  %v1531_v48 = vsel %vm978_vm0, %v1489_v45, 0.0 }
 0x1b4   : > { %1520 = vadd.xlane.f32.xlu0 %v1519_v20  ;;  %1496 = vadd.xlane.f32.xlu1 %v1495_v33  ;;  %v5684_v20 = vld [vmem:[%s9940_s3 + $0x30] sm:$0xff] }
 0x1b5   : > { %v1482_v33 = vsel %vm1473_vm4, %v5684_v20, 0.0 }
 0x1b6   : > { %v1510_v19 = vsel %vm978_vm0, %v1482_v33, 0.0  ;;  %v1537_v33 = vsel %vm978_vm0, %v1491_v13, 0.0  ;;  %v5729_v13 = vld [vmem:[%s9940_s3 + $0x60] sm:$0xff] }
 0x1b7   : > { %10396 = vst [vmem:[#allocation93_spill] sm:$0xff] %v5729_v13 }
 0x1b8   : > { %1526 = vadd.xlane.f32.xlu0 %v1525_v52  ;;  %1505 = vadd.xlane.f32.xlu1 %v1504_v41  ;;  %v5704_v52 = vld [vmem:[%s9940_s3 + $0x40] sm:$0xff]  ;;  %v5709_v41 = vpop.permute.xlu1 %1101 }
 0x1b9   : > { %v1484_v45 = vsel %vm1473_vm4, %v5704_v52, 0.0  ;;  %10393 = vst [vmem:[#allocation90_spill] sm:$0xff] %v5709_v41 }
 0x1ba   : > { %v1516_v38 = vsel %vm978_vm0, %v1484_v45, 0.0  ;;  %v5734_v45 = vpop.permute.xlu0 %1375 }
 0x1bb   : > { %10397 = vst [vmem:[#allocation94_spill] sm:$0xff] %v5734_v45 }
 0x1bc   : > { %1532 = vadd.xlane.f32.xlu0 %v1531_v48  ;;  %1511 = vadd.xlane.f32.xlu1 %v1510_v19  ;;  %v5723_v41 = vpop.permute.xlu1 %1373  ;;  %v1522_v19 = vsel %vm978_vm0, %v1486_v12, 0.0  ;;  %v1488_v48 = vsel %vm1473_vm4, %v5729_v13, 0.0 }
 0x1bd   : > { %10395 = vst [vmem:[#allocation92_spill] sm:$0xff] %v5723_v41  ;;  %v1528_v5 = vsel %vm978_vm0, %v1488_v48, 0.0 }
 0x1be   : > { %v5748_v63 = vpop.permute.xlu0 %1075 }
 0x1bf   : > { %10400 = vst [vmem:[#allocation97_spill] sm:$0xff] %v5748_v63 }
 0x1c0   : > { %1538 = vadd.xlane.f32.xlu0 %v1537_v33  ;;  %1517 = vadd.xlane.f32.xlu1 %v1516_v38  ;;  %v5740_v38 = vld [vmem:[%s9940_s3 + $0x70] sm:$0xff]  ;;  %v5745_v33 = vpop.permute.xlu1 %1073 }
 0x1c1   : > { %10398 = vst [vmem:[#allocation95_spill] sm:$0xff] %v5740_v38  ;;  %v1490_v12 = vsel %vm1473_vm4, %v5740_v38, 0.0  ;;  %10399 = vst [vmem:[#allocation96_spill] sm:$0xff] %v5745_v33 }
 0x1c2   : > { %v1534_v41 = vsel %vm978_vm0, %v1490_v12, 0.0  ;;  %v5752_v48 = vpop.permute.xlu0 %1347 }
 0x1c3   : > { %10402 = vst [vmem:[#allocation99_spill] sm:$0xff] %v5752_v48 }
 0x1c4   : > { %1523 = vadd.xlane.f32.xlu1 %v1522_v19  ;;  %v5750_v19 = vpop.permute.xlu1 %1345 }
 0x1c5   : > { %10401 = vst [vmem:[#allocation98_spill] sm:$0xff] %v5750_v19 }
 0x1c6   : > { %v5758_v8 = vpop.permute.xlu0 %1107 }
 0x1c7   : > { %10404 = vst [vmem:[#allocation101_spill] sm:$0xff] %v5758_v8 }
 0x1c8   : > { %1529 = vadd.xlane.f32.xlu1 %v1528_v5  ;;  %v5754_v45 = vpop.permute.xlu1 %1105 }
 0x1c9   : > { %10403 = vst [vmem:[#allocation100_spill] sm:$0xff] %v5754_v45  ;;  %v1752_v45 = vsel %vm1746_vm5, %v5599_v58, 0.0 }
 0x1ca   : > { %v5764_v5 = vpop.permute.xlu0 %1379 }
 0x1cb   : > { %10406 = vst [vmem:[#allocation103_spill] sm:$0xff] %v5764_v5 }
 0x1cc   : > { %1535 = vadd.xlane.f32.xlu1 %v1534_v41  ;;  %v5760_v22 = vpop.permute.xlu1 %1377 }
 0x1cd   : > { %10405 = vst [vmem:[#allocation102_spill] sm:$0xff] %v5760_v22 }
 0x1ce   : > { %v5776_v12 = vpop.permute.xlu0 %1079 }
 0x1cf   : > { %10408 = vst [vmem:[#allocation105_spill] sm:$0xff] %v5776_v12 }
 0x1d0   : > { %v5770_v41 = vpop.permute.xlu1 %1077 }
 0x1d1   : > { %10407 = vst [vmem:[#allocation104_spill] sm:$0xff] %v5770_v41 }
 0x1d2   : > { %v5784_v22 = vpop.permute.xlu0 %1351 }
 0x1d3   : > { %10410 = vst [vmem:[#allocation107_spill] sm:$0xff] %v5784_v22 }
 0x1d4   : > { %v5778_v19 = vpop.permute.xlu1 %1349 }
 0x1d5   : > { %10409 = vst [vmem:[#allocation106_spill] sm:$0xff] %v5778_v19 }
 0x1d6   : > { %1606 = vrot.lane.b32.xlu0 %v5288_v39, %s4764_s27  ;;  %v5796_v19 = vpop.permute.xlu0 %1111 }
 0x1d7   : > { %10412 = vst [vmem:[#allocation109_spill] sm:$0xff] %v5796_v19 }
 0x1d8   : > { %v5790_v41 = vpop.permute.xlu1 %1109 }
 0x1d9   : > { %10411 = vst [vmem:[#allocation108_spill] sm:$0xff] %v5790_v41 }
 0x1da   : > { %1612 = vrot.lane.b32.xlu0 %v5328_v54, %s4764_s27  ;;  %v5804_v22 = vpop.permute.xlu0 %1383 }
 0x1db   : > { %10414 = vst [vmem:[#allocation111_spill] sm:$0xff] %v5804_v22 }
 0x1dc   : > { %v5798_v12 = vpop.permute.xlu1 %1381 }
 0x1dd   : > { %1604 = vrot.lane.b32.xlu1 %v5264_v42, %s4764_s27  ;;  %10413 = vst [vmem:[#allocation110_spill] sm:$0xff] %v5798_v12 }
 0x1de   : > { %1616 = vrot.lane.b32.xlu0 %v5368_v55, %s4764_s27  ;;  %v5816_v12 = vpop.permute.xlu0 %1083 }
 0x1df   : > { %10416 = vst [vmem:[#allocation113_spill] sm:$0xff] %v5816_v12 }
 0x1e0   : > { %v5810_v41 = vpop.permute.xlu1 %1081 }
 0x1e1   : > { %1608 = vrot.lane.b32.xlu1 %v5304_v18, %s4764_s27  ;;  %10415 = vst [vmem:[#allocation112_spill] sm:$0xff] %v5810_v41 }
 0x1e2   : > { %1620 = vrot.lane.b32.xlu0 %v5410_v28, %s4764_s27  ;;  %v5824_v22 = vpop.permute.xlu0 %1355 }
 0x1e3   : > { %10418 = vst [vmem:[#allocation115_spill] sm:$0xff] %v5824_v22 }
 0x1e4   : > { %v5818_v19 = vpop.permute.xlu1 %1353 }
 0x1e5   : > { %1610 = vrot.lane.b32.xlu1 %v5324_v40, %s4764_s27  ;;  %10417 = vst [vmem:[#allocation114_spill] sm:$0xff] %v5818_v19 }
 0x1e6   : > { %1624 = vrot.lane.b32.xlu0 %v5449_v17, %s4764_s27  ;;  %v5836_v19 = vpop.permute.xlu0 %1115 }
 0x1e7   : > { %10420 = vst [vmem:[#allocation117_spill] sm:$0xff] %v5836_v19 }
 0x1e8   : > { %v5830_v41 = vpop.permute.xlu1 %1113 }
 0x1e9   : > { %1614 = vrot.lane.b32.xlu1 %v5364_v43, %s4764_s27  ;;  %10419 = vst [vmem:[#allocation116_spill] sm:$0xff] %v5830_v41 }
 0x1ea   : > { %1628 = vrot.lane.b32.xlu0 %v5480_v24, %s4764_s27  ;;  %v5844_v22 = vpop.permute.xlu0 %1087 }
 0x1eb   : > { %10422 = vst [vmem:[#allocation119_spill] sm:$0xff] %v5844_v22 }
 0x1ec   : > { %v5838_v12 = vpop.permute.xlu1 %1385 }
 0x1ed   : > { %1618 = vrot.lane.b32.xlu1 %v5406_v29, %s4764_s27  ;;  %10421 = vst [vmem:[#allocation118_spill] sm:$0xff] %v5838_v12 }
 0x1ee   : > { %1632 = vrot.lane.b32.xlu0 %v5501_v36, %s4764_s27  ;;  %v5854_v12 = vpop.permute.xlu0 %1359 }
 0x1ef   : > { %10424 = vst [vmem:[#allocation121_spill] sm:$0xff] %v5854_v12 }
 0x1f0   : > { %v5850_v41 = vpop.permute.xlu1 %1085 }
 0x1f1   : > { %1622 = vrot.lane.b32.xlu1 %v5445_v50, %s4764_s27  ;;  %10423 = vst [vmem:[#allocation120_spill] sm:$0xff] %v5850_v41 }
 0x1f2   : > { %1636 = vrot.lane.b32.xlu0 %v5268_v51, %s4764_s27  ;;  %v5860_v5 = vpop.permute.xlu0 %1119 }
 0x1f3   : > { %10426 = vst [vmem:[#allocation123_spill] sm:$0xff] %v5860_v5 }
 0x1f4   : > { %v5856_v19 = vpop.permute.xlu1 %1357 }
 0x1f5   : > { %1626 = vrot.lane.b32.xlu1 %v5477_v49, %s4764_s27  ;;  %10425 = vst [vmem:[#allocation122_spill] sm:$0xff] %v5856_v19  ;;  %v1749_v19 = vsel %vm1746_vm5, %v5575_v34, 0.0 }
 0x1f6   : > { %1640 = vrot.lane.b32.xlu0 %v5308_v35, %s4764_s27  ;;  %v5868_v41 = vpop.permute.xlu0 %1387 }
 0x1f7   : > { %10428 = vst [vmem:[#allocation125_spill] sm:$0xff] %v5868_v41  ;;  %v1751_v41 = vsel %vm1746_vm5, %v5588_v53, 0.0 }
 0x1f8   : > { %v5864_v22 = vpop.permute.xlu1 %1117 }
 0x1f9   : > { %1630 = vrot.lane.b32.xlu1 %v5508_v26, %s4764_s27  ;;  %10427 = vst [vmem:[#allocation124_spill] sm:$0xff] %v5864_v22  ;;  %v1765_v22 = vsel %vm978_vm0, %v1749_v19, 0.0  ;;  %v1774_v19 = vsel %vm978_vm0, %v1752_v45, 0.0 }
 0x1fa   : > { %1644 = vrot.lane.b32.xlu0 %v5348_v57, %s4764_s27  ;;  %v5873_v12 = vpop.permute.xlu0 %1391 }
 0x1fb   : > { %10430 = vst [vmem:[#allocation127_spill] sm:$0xff] %v5873_v12  ;;  %v1771_v12 = vsel %vm978_vm0, %v1751_v41, 0.0 }
 0x1fc   : > { %v5870_v48 = vpop.permute.xlu1 %1389 }
 0x1fd   : > { %1634 = vrot.lane.b32.xlu1 %v5537_v44, %s4764_s27  ;;  %10429 = vst [vmem:[#allocation126_spill] sm:$0xff] %v5870_v48 }
 0x1fe   : > { %1648 = vrot.lane.b32.xlu0 %v5388_v56, %s4764_s27 }
 0x200   : > { %v5878_v5 = vpop.permute.xlu1 %1089 }
 0x201   : > { %1638 = vrot.lane.b32.xlu1 %v5284_v0, %s4764_s27  ;;  %10431 = vst [vmem:[#allocation128_spill] sm:$0xff] %v5878_v5 }
 0x202   : > { %1652 = vrot.lane.b32.xlu0 %v5431_v30, %s4764_s27 }
 0x204   : > { %v5888_v63 = vpop.permute.xlu1 %1361 }
 0x205   : > { %1642 = vrot.lane.b32.xlu1 %v5344_v6, %s4764_s27  ;;  %10434 = vst [vmem:[#allocation131_spill] sm:$0xff] %v5888_v63  ;;  %v1756_v63 = vsel %vm1746_vm5, %v5623_v4, 0.0 }
 0x206   : > { %1656 = vrot.lane.b32.xlu0 %v5466_v32, %s4764_s27  ;;  %v1786_v45 = vsel %vm978_vm0, %v1756_v63, 0.0  ;;  %v1760_v63 = vsel %vm1746_vm5, %v5654_v2, 0.0 }
 0x209   : > { %1646 = vrot.lane.b32.xlu1 %v5385_v46, %s4764_s27 }
 0x20a   : > { %1660 = vrot.lane.b32.xlu0 %v5494_v31, %s4764_s27 }
 0x20d   : > { %1650 = vrot.lane.b32.xlu1 %v5425_v23, %s4764_s27 }
 0x20e   : > { %1664 = vrot.lane.b32.xlu0 %v5515_v25, %s4764_s27 }
 0x211   : > { %1654 = vrot.lane.b32.xlu1 %v5462_v59, %s4764_s27 }
 0x215   : > { %1658 = vrot.lane.b32.xlu1 %v5491_v21, %s4764_s27 }
 0x219   : > { %1662 = vrot.lane.b32.xlu1 %v5522_v27, %s4764_s27 }
 0x21d   : > { %1666 = vrot.lane.b32.xlu1 %v5551_v37, %s4764_s27 }
 0x229   : > { %v5880_v8 = vpop.xlane.xlu0 %1493 }
 0x22a   : > { %10432 = vst [vmem:[#allocation129_spill] sm:$0xff] %v5880_v8  ;;  %v1754_v8 = vsel %vm1746_vm5, %v5610_v1, 0.0 }
 0x22b   : > { %v1780_v41 = vsel %vm978_vm0, %v1754_v8, 0.0 }
 0x22d   : > { %1766 = vadd.xlane.f32.xlu0 %v1765_v22  ;;  %v5886_v48 = vpop.xlane.xlu0 %1499  ;;  %v5900_v22 = vpop.permute.xlu1 %1121 }
 0x22e   : > { %10433 = vst [vmem:[#allocation130_spill] sm:$0xff] %v5886_v48  ;;  %10436 = vst [vmem:[#allocation133_spill] sm:$0xff] %v5900_v22  ;;  %v1758_v22 = vsel %vm1746_vm5, %v5634_v11, 0.0 }
 0x231   : > { %1772 = vadd.xlane.f32.xlu0 %v1771_v12  ;;  %v5894_v5 = vpop.xlane.xlu0 %1502 }
 0x232   : > { %10435 = vst [vmem:[#allocation132_spill] sm:$0xff] %v5894_v5  ;;  %v5910_v5 = vpop.permute.xlu1 %1393 }
 0x233   : > { %10439 = vst [vmem:[#allocation136_spill] sm:$0xff] %v5910_v5  ;;  %v1753_v5 = vsel %vm1746_vm5, %v5664_v15, 0.0 }
 0x235   : > { %1775 = vadd.xlane.f32.xlu0 %v1774_v19  ;;  %v5902_v48 = vpop.xlane.xlu0 %1508  ;;  %v1750_v19 = vsel %vm1746_vm5, %v5642_v16, 0.0 }
 0x236   : > { %10437 = vst [vmem:[#allocation134_spill] sm:$0xff] %v5902_v48 }
 0x239   : > { %1781 = vadd.xlane.f32.xlu0 %v1780_v41  ;;  %v5908_v12 = vpop.xlane.xlu0 %1514  ;;  %v1792_v41 = vsel %vm978_vm0, %v1758_v22, 0.0  ;;  %v1777_v22 = vsel %vm978_vm0, %v1753_v5, 0.0  ;;  %v1764_v5 = vsel %vm1746_vm5, %v5696_v14, 0.0 }
 0x23a   : > { %10438 = vst [vmem:[#allocation135_spill] sm:$0xff] %v5908_v12  ;;  %v1768_v12 = vsel %vm978_vm0, %v1750_v19, 0.0  ;;  %v1762_v19 = vsel %vm1746_vm5, %v5676_v10, 0.0 }
 0x23d   : > { %1787 = vadd.xlane.f32.xlu0 %v1786_v45  ;;  %v5919_v8 = vpop.xlane.xlu0 %1520  ;;  %v5921_v48 = vpop.xlane.xlu1 %1496 }
 0x23e   : > { %10440 = vst [vmem:[#allocation137_spill] sm:$0xff] %v5919_v8  ;;  %10441 = vst [vmem:[#allocation138_spill] sm:$0xff] %v5921_v48  ;;  %v1798_v48 = vsel %vm978_vm0, %v1760_v63, 0.0  ;;  %v1755_v8 = vsel %vm1746_vm5, %v5684_v20, 0.0 }
 0x23f   : > { %v1783_v63 = vsel %vm978_vm0, %v1755_v8, 0.0  ;;  %v1759_v8 = vsel %vm1746_vm5, %v5718_v9, 0.0 }
 0x241   : > { %1793 = vadd.xlane.f32.xlu0 %v1792_v41  ;;  %v5931_v33 = vpop.xlane.xlu0 %1526  ;;  %1769 = vadd.xlane.f32.xlu1 %v1768_v12  ;;  %v5933_v45 = vpop.xlane.xlu1 %1505  ;;  %v1804_v12 = vsel %vm978_vm0, %v1762_v19, 0.0 }
 0x242   : > { %10442 = vst [vmem:[#allocation139_spill] sm:$0xff] %v5931_v33  ;;  %10443 = vst [vmem:[#allocation140_spill] sm:$0xff] %v5933_v45  ;;  %v1757_v45 = vsel %vm1746_vm5, %v5704_v52, 0.0 }
 0x243   : > { %v1789_v19 = vsel %vm978_vm0, %v1757_v45, 0.0 }
 0x245   : > { %1799 = vadd.xlane.f32.xlu0 %v1798_v48  ;;  %v5943_v47 = vpop.xlane.xlu0 %1532  ;;  %1778 = vadd.xlane.f32.xlu1 %v1777_v22  ;;  %v5945_v41 = vpop.xlane.xlu1 %1511  ;;  %v1810_v22 = vsel %vm978_vm0, %v1764_v5, 0.0 }
 0x246   : > { %10444 = vst [vmem:[#allocation141_spill] sm:$0xff] %v5943_v47  ;;  %10445 = vst [vmem:[#allocation142_spill] sm:$0xff] %v5945_v41 }
 0x249   : > { %1805 = vadd.xlane.f32.xlu0 %v1804_v12  ;;  %v5955_v33 = vpop.xlane.xlu0 %1538  ;;  %1784 = vadd.xlane.f32.xlu1 %v1783_v63  ;;  %v5957_v48 = vpop.xlane.xlu1 %1517  ;;  %v1795_v12 = vsel %vm978_vm0, %v1759_v8, 0.0  ;;  %v1761_v63 = vsel %vm1746_vm5, %v5729_v13, 0.0 }
 0x24a   : > { %10446 = vst [vmem:[#allocation143_spill] sm:$0xff] %v5955_v33  ;;  %10447 = vst [vmem:[#allocation144_spill] sm:$0xff] %v5957_v48  ;;  %v1801_v45 = vsel %vm978_vm0, %v1761_v63, 0.0 }
 0x24d   : > { %1811 = vadd.xlane.f32.xlu0 %v1810_v22  ;;  %v5964_v41 = vpop.permute.xlu0 %1606  ;;  %1790 = vadd.xlane.f32.xlu1 %v1789_v19  ;;  %v5966_v47 = vpop.xlane.xlu1 %1523  ;;  %v1763_v22 = vsel %vm1746_vm5, %v5740_v38, 0.0 }
 0x24e   : > { %10448 = vst [vmem:[#allocation145_spill] sm:$0xff] %v5964_v41  ;;  %10449 = vst [vmem:[#allocation146_spill] sm:$0xff] %v5966_v47  ;;  %v1807_v8 = vsel %vm978_vm0, %v1763_v22, 0.0 }
 0x251   : > { %v1613_v48 = vpop.permute.xlu0 %1612  ;;  %1796 = vadd.xlane.f32.xlu1 %v1795_v12  ;;  %v5972_v5 = vpop.xlane.xlu1 %1529 }
 0x252   : > { %10450 = vst [vmem:[#allocation147_spill] sm:$0xff] %v5972_v5 }
 0x255   : > { %v1617_v41 = vpop.permute.xlu0 %1616  ;;  %1802 = vadd.xlane.f32.xlu1 %v1801_v45  ;;  %v5978_v19 = vpop.xlane.xlu1 %1535 }
 0x256   : > { %10451 = vst [vmem:[#allocation148_spill] sm:$0xff] %v5978_v19  ;;  %v10453_v19 = vlaneseq }
 0x258   : > { %v1159_v62 = vshrl.u32 %v10453_v19, 7 }
 0x259   : > { %v1621_v47 = vpop.permute.xlu0 %1620  ;;  %1808 = vadd.xlane.f32.xlu1 %v1807_v8  ;;  %v5981_v33 = vpop.permute.xlu1 %1604  ;;  %v4299_v8 = vld [vmem:[%s9942_s5 + $0x4] sm:$0x3] }
 0x25a   : > { %10452 = vst [vmem:[#allocation149_spill] sm:$0xff] %v5981_v33  ;;  %v6001_v60 = vsub.s32 0, %v1159_v62 }
 0x25c   : > { %10455 = vst [vmem:[#allocation151_spill] sm:$0xff] %v6001_v60  ;;  %v6011_v19 = vrot.slane %v4299_v8, %v6001_v60 }
 0x25d   : > { %v1625_v61 = vpop.permute.xlu0 %1624  ;;  %v1609_v12 = vpop.permute.xlu1 %1608 }
 0x25e   : > { %10457 = vst [vmem:[#allocation153_spill] sm:$0xff] %v6011_v19 }
 0x261   : > { %v1629_v7 = vpop.permute.xlu0 %1628  ;;  %v5983_v5 = vpop.permute.xlu1 %1610 }
 0x263   : > { %1879 = vrot.lane.b32.xlu0 %v5288_v39, %s4765_s28  ;;  %v6003_v39 = vsub.s32 1, %v1159_v62 }
 0x265   : > { %v5987_v63 = vpop.permute.xlu0 %1632  ;;  %v5989_v45 = vpop.permute.xlu1 %1614  ;;  %10456 = vst [vmem:[#allocation152_spill] sm:$0xff] %v6003_v39 }
 0x267   : > { %1885 = vrot.lane.b32.xlu0 %v5328_v54, %s4765_s28 }
 0x269   : > { %v5994_v22 = vpop.permute.xlu0 %1636  ;;  %v5999_v33 = vpop.permute.xlu1 %1618 }
 0x26a   : > { %10454 = vst [vmem:[#allocation150_spill] sm:$0xff] %v5994_v22  ;;  %1877 = vrot.lane.b32.xlu1 %v5264_v42, %s4765_s28  ;;  %v6014_v22 = vrot.slane %v4299_v8, %v6003_v39 }
 0x26b   : > { %1889 = vrot.lane.b32.xlu0 %v5368_v55, %s4765_s28 }
 0x26c   : > { %10458 = vst [vmem:[#allocation154_spill] sm:$0xff] %v6014_v22 }
 0x26d   : > { %v1641_v54 = vpop.permute.xlu0 %1640  ;;  %v6020_v13 = vpop.permute.xlu1 %1622 }
 0x26e   : > { %v1671_v38 = vsel %vm1668_vm6, %v1609_v12, %v1641_v54  ;;  %v1687_v62 = vsel %vm1668_vm6, %v1641_v54, %v1609_v12  ;;  %1881 = vrot.lane.b32.xlu1 %v5304_v18, %s4765_s28 }
 0x26f   : > { %v6023_v55 = vmul.f32 %v6011_v19, %v1687_v62  ;;  %v6026_v42 = vmul.f32 %v6014_v22, %v1671_v38  ;;  %1893 = vrot.lane.b32.xlu0 %v5410_v28, %s4765_s28 }
 0x271   : > { %10459 = vst [vmem:[#allocation155_spill] sm:$0xff] %v6023_v55  ;;  %10460 = vst [vmem:[#allocation156_spill] sm:$0xff] %v6026_v42  ;;  %v1645_v8 = vpop.permute.xlu0 %1644  ;;  %v6036_v12 = vpop.permute.xlu1 %1626 }
 0x272   : > { %v1673_v39 = vsel %vm1668_vm6, %v1613_v48, %v1645_v8  ;;  %v1689_v54 = vsel %vm1668_vm6, %v1645_v8, %v1613_v48  ;;  %1883 = vrot.lane.b32.xlu1 %v5324_v40, %s4765_s28 }
 0x273   : > { %v6039_v62 = vmul.f32 %v6011_v19, %v1689_v54  ;;  %v6042_v38 = vmul.f32 %v6014_v22, %v1673_v39  ;;  %1897 = vrot.lane.b32.xlu0 %v5449_v17, %s4765_s28 }
 0x275   : > { %10461 = vst [vmem:[#allocation157_spill] sm:$0xff] %v6039_v62  ;;  %10462 = vst [vmem:[#allocation158_spill] sm:$0xff] %v6042_v38  ;;  %v1649_v42 = vpop.permute.xlu0 %1648  ;;  %v6052_v8 = vpop.permute.xlu1 %1630 }
 0x276   : > { %v1675_v55 = vsel %vm1668_vm6, %v1617_v41, %v1649_v42  ;;  %v1691_v48 = vsel %vm1668_vm6, %v1649_v42, %v1617_v41  ;;  %1887 = vrot.lane.b32.xlu1 %v5364_v43, %s4765_s28 }
 0x277   : > { %v6055_v54 = vmul.f32 %v6011_v19, %v1691_v48  ;;  %v6058_v39 = vmul.f32 %v6014_v22, %v1675_v55  ;;  %1901 = vrot.lane.b32.xlu0 %v5480_v24, %s4765_s28 }
 0x279   : > { %10463 = vst [vmem:[#allocation159_spill] sm:$0xff] %v6055_v54  ;;  %10464 = vst [vmem:[#allocation160_spill] sm:$0xff] %v6058_v39  ;;  %v1653_v38 = vpop.permute.xlu0 %1652  ;;  %v6068_v41 = vpop.permute.xlu1 %1634 }
 0x27a   : > { %v1677_v62 = vsel %vm1668_vm6, %v1621_v47, %v1653_v38  ;;  %v1693_v42 = vsel %vm1668_vm6, %v1653_v38, %v1621_v47  ;;  %1891 = vrot.lane.b32.xlu1 %v5406_v29, %s4765_s28 }
 0x27b   : > { %v6071_v48 = vmul.f32 %v6011_v19, %v1693_v42  ;;  %v6074_v55 = vmul.f32 %v6014_v22, %v1677_v62  ;;  %1905 = vrot.lane.b32.xlu0 %v5501_v36, %s4765_s28 }
 0x27d   : > { %10465 = vst [vmem:[#allocation161_spill] sm:$0xff] %v6071_v48  ;;  %10466 = vst [vmem:[#allocation162_spill] sm:$0xff] %v6074_v55  ;;  %v1657_v39 = vpop.permute.xlu0 %1656  ;;  %v6084_v38 = vpop.permute.xlu1 %1638 }
 0x27e   : > { %v1679_v54 = vsel %vm1668_vm6, %v1625_v61, %v1657_v39  ;;  %v1695_v47 = vsel %vm1668_vm6, %v1657_v39, %v1625_v61  ;;  %10467 = vst [vmem:[#allocation163_spill] sm:$0xff] %v6084_v38  ;;  %1895 = vrot.lane.b32.xlu1 %v5445_v50, %s4765_s28 }
 0x27f   : > { %v6087_v42 = vmul.f32 %v6011_v19, %v1695_v47  ;;  %v6090_v62 = vmul.f32 %v6014_v22, %v1679_v54  ;;  %1909 = vrot.lane.b32.xlu0 %v5268_v51, %s4765_s28 }
 0x281   : > { %10468 = vst [vmem:[#allocation164_spill] sm:$0xff] %v6087_v42  ;;  %10469 = vst [vmem:[#allocation165_spill] sm:$0xff] %v6090_v62  ;;  %v1661_v55 = vpop.permute.xlu0 %1660  ;;  %v1643_v39 = vpop.permute.xlu1 %1642 }
 0x282   : > { %v1681_v48 = vsel %vm1668_vm6, %v1629_v7, %v1661_v55  ;;  %v1697_v61 = vsel %vm1668_vm6, %v1661_v55, %v1629_v7  ;;  %v1672_v38 = vsel %vm1668_vm6, %v5983_v5, %v1643_v39  ;;  %v1688_v62 = vsel %vm1668_vm6, %v1643_v39, %v5983_v5  ;;  %1899 = vrot.lane.b32.xlu1 %v5477_v49, %s4765_s28 }
 0x283   : > { %v6101_v47 = vmul.f32 %v6011_v19, %v1697_v61  ;;  %v6104_v54 = vmul.f32 %v6014_v22, %v1681_v48  ;;  %1913 = vrot.lane.b32.xlu0 %v5308_v35, %s4765_s28  ;;  %v6115_v7 = vmul.f32 %v6011_v19, %v1688_v62  ;;  %v6118_v55 = vmul.f32 %v6014_v22, %v1672_v38 }
 0x285   : > { %10470 = vst [vmem:[#allocation166_spill] sm:$0xff] %v6101_v47  ;;  %10471 = vst [vmem:[#allocation167_spill] sm:$0xff] %v6104_v54  ;;  %v1665_v48 = vpop.permute.xlu0 %1664  ;;  %v1647_v39 = vpop.permute.xlu1 %1646 }
 0x286   : > { %10472 = vst [vmem:[#allocation168_spill] sm:$0xff] %v6115_v7  ;;  %10473 = vst [vmem:[#allocation169_spill] sm:$0xff] %v6118_v55  ;;  %v1683_v61 = vsel %vm1668_vm6, %v5987_v63, %v1665_v48  ;;  %v1699_v5 = vsel %vm1668_vm6, %v1665_v48, %v5987_v63  ;;  %v1674_v38 = vsel %vm1668_vm6, %v5989_v45, %v1647_v39  ;;  %1903 = vrot.lane.b32.xlu1 %v5508_v26, %s4765_s28 }
 0x287   : > { %v6129_v54 = vmul.f32 %v6011_v19, %v1699_v5  ;;  %v6132_v62 = vmul.f32 %v6014_v22, %v1683_v61  ;;  %v1690_v47 = vsel %vm1668_vm6, %v1647_v39, %v5989_v45  ;;  %1917 = vrot.lane.b32.xlu0 %v5348_v57, %s4765_s28  ;;  %v6146_v48 = vmul.f32 %v6014_v22, %v1674_v38 }
 0x288   : > { %v6143_v63 = vmul.f32 %v6011_v19, %v1690_v47 }
 0x289   : > { %10474 = vst [vmem:[#allocation170_spill] sm:$0xff] %v6129_v54  ;;  %10475 = vst [vmem:[#allocation171_spill] sm:$0xff] %v6132_v62  ;;  %v1651_v61 = vpop.permute.xlu1 %1650 }
 0x28a   : > { %10476 = vst [vmem:[#allocation172_spill] sm:$0xff] %v6143_v63  ;;  %10477 = vst [vmem:[#allocation173_spill] sm:$0xff] %v6146_v48  ;;  %v1676_v5 = vsel %vm1668_vm6, %v5999_v33, %v1651_v61  ;;  %v1692_v45 = vsel %vm1668_vm6, %v1651_v61, %v5999_v33  ;;  %1907 = vrot.lane.b32.xlu1 %v5537_v44, %s4765_s28  ;;  %v10525_v63 = vld [vmem:[#allocation74_spill] sm:$0xff] }
 0x28b   : > { %1921 = vrot.lane.b32.xlu0 %v5388_v56, %s4765_s28  ;;  %v6159_v47 = vmul.f32 %v6011_v19, %v1692_v45  ;;  %v6162_v39 = vmul.f32 %v6014_v22, %v1676_v5 }
 0x28d   : > { %10478 = vst [vmem:[#allocation174_spill] sm:$0xff] %v6159_v47  ;;  %10479 = vst [vmem:[#allocation175_spill] sm:$0xff] %v6162_v39  ;;  %v1655_v38 = vpop.permute.xlu1 %1654  ;;  %v10523_v47 = vld [vmem:[#allocation5_spill] sm:$0xff] }
 0x28e   : > { %v1678_v62 = vsel %vm1668_vm6, %v6020_v13, %v1655_v38  ;;  %v1694_v33 = vsel %vm1668_vm6, %v1655_v38, %v6020_v13  ;;  %1911 = vrot.lane.b32.xlu1 %v5284_v0, %s4765_s28 }
 0x28f   : > { %1925 = vrot.lane.b32.xlu0 %v5431_v30, %s4765_s28  ;;  %v6175_v61 = vmul.f32 %v6011_v19, %v1694_v33  ;;  %v6178_v5 = vmul.f32 %v6014_v22, %v1678_v62 }
 0x291   : > { %10480 = vst [vmem:[#allocation176_spill] sm:$0xff] %v6175_v61  ;;  %10481 = vst [vmem:[#allocation177_spill] sm:$0xff] %v6178_v5  ;;  %v1659_v45 = vpop.permute.xlu1 %1658 }
 0x292   : > { %v1680_v54 = vsel %vm1668_vm6, %v6036_v12, %v1659_v45  ;;  %v1696_v13 = vsel %vm1668_vm6, %v1659_v45, %v6036_v12  ;;  %1915 = vrot.lane.b32.xlu1 %v5344_v6, %s4765_s28 }
 0x293   : > { %1929 = vrot.lane.b32.xlu0 %v5466_v32, %s4765_s28  ;;  %v6191_v38 = vmul.f32 %v6011_v19, %v1696_v13  ;;  %v6194_v62 = vmul.f32 %v6014_v22, %v1680_v54 }
 0x295   : > { %10482 = vst [vmem:[#allocation178_spill] sm:$0xff] %v6191_v38  ;;  %10483 = vst [vmem:[#allocation179_spill] sm:$0xff] %v6194_v62  ;;  %v1663_v33 = vpop.permute.xlu1 %1662 }
 0x296   : > { %v1682_v42 = vsel %vm1668_vm6, %v6052_v8, %v1663_v33  ;;  %v1698_v12 = vsel %vm1668_vm6, %v1663_v33, %v6052_v8  ;;  %1919 = vrot.lane.b32.xlu1 %v5385_v46, %s4765_s28 }
 0x297   : > { %1933 = vrot.lane.b32.xlu0 %v5494_v31, %s4765_s28  ;;  %v6207_v45 = vmul.f32 %v6011_v19, %v1698_v12  ;;  %v6210_v54 = vmul.f32 %v6014_v22, %v1682_v42 }
 0x299   : > { %10484 = vst [vmem:[#allocation180_spill] sm:$0xff] %v6207_v45  ;;  %10485 = vst [vmem:[#allocation181_spill] sm:$0xff] %v6210_v54  ;;  %v1667_v13 = vpop.permute.xlu1 %1666 }
 0x29a   : > { %v1684_v62 = vsel %vm1668_vm6, %v6068_v41, %v1667_v13  ;;  %v1700_v8 = vsel %vm1668_vm6, %v1667_v13, %v6068_v41  ;;  %1923 = vrot.lane.b32.xlu1 %v5425_v23, %s4765_s28  ;;  %v2022_v41 = vsel %vm2019_vm7, %v5575_v34, 0.0  ;;  %v2024_v13 = vsel %vm2019_vm7, %v5588_v53, 0.0 }
 0x29b   : > { %1937 = vrot.lane.b32.xlu0 %v5515_v25, %s4765_s28  ;;  %v6223_v33 = vmul.f32 %v6011_v19, %v1700_v8  ;;  %v6226_v42 = vmul.f32 %v6014_v22, %v1684_v62  ;;  %v2038_v12 = vsel %vm978_vm0, %v2022_v41, 0.0  ;;  %v2044_v22 = vsel %vm978_vm0, %v2024_v13, 0.0 }
 0x29c   : > { %v2025_v19 = vsel %vm2019_vm7, %v5599_v58, 0.0  ;;  %v2027_v41 = vsel %vm2019_vm7, %v5610_v1, 0.0  ;;  %v2029_v13 = vsel %vm2019_vm7, %v5623_v4, 0.0 }
 0x29d   : > { %10486 = vst [vmem:[#allocation182_spill] sm:$0xff] %v6223_v33  ;;  %10487 = vst [vmem:[#allocation183_spill] sm:$0xff] %v6226_v42  ;;  %v2047_v34 = vsel %vm978_vm0, %v2025_v19, 0.0  ;;  %v2031_v19 = vsel %vm2019_vm7, %v5634_v11, 0.0  ;;  %v2026_v11 = vsel %vm2019_vm7, %v5664_v15, 0.0  ;;  %v10503_v42 = vld [vmem:[#allocation93_spill] sm:$0xff] }
 0x29e   : > { %1927 = vrot.lane.b32.xlu1 %v5462_v59, %s4765_s28  ;;  %v2065_v4 = vsel %vm978_vm0, %v2031_v19, 0.0  ;;  %v2035_v19 = vsel %vm2019_vm7, %v5676_v10, 0.0  ;;  %v10511_v33 = vld [vmem:[#allocation45_spill] sm:$0xff] }
 0x29f   : > { %v2077_v15 = vsel %vm978_vm0, %v2035_v19, 0.0 }
 0x2a2   : > { %1931 = vrot.lane.b32.xlu1 %v5491_v21, %s4765_s28 }
 0x2a6   : > { %1935 = vrot.lane.b32.xlu1 %v5522_v27, %s4765_s28 }
 0x2aa   : > { %1939 = vrot.lane.b32.xlu1 %v5551_v37, %s4765_s28  ;;  %s4768_s28 = smov 112  }
 0x2b6   : > { %v6242_v62 = vpop.xlane.xlu0 %1766 }
 0x2b7   : > { %10488 = vst [vmem:[#allocation184_spill] sm:$0xff] %v6242_v62 }
 0x2ba   : > { %2039 = vadd.xlane.f32.xlu0 %v2038_v12  ;;  %v6248_v8 = vpop.xlane.xlu0 %1772  ;;  %v2053_v12 = vsel %vm978_vm0, %v2027_v41, 0.0 }
 0x2bb   : > { %10489 = vst [vmem:[#allocation185_spill] sm:$0xff] %v6248_v8 }
 0x2be   : > { %2045 = vadd.xlane.f32.xlu0 %v2044_v22  ;;  %v6254_v25 = vpop.xlane.xlu0 %1775  ;;  %v2059_v22 = vsel %vm978_vm0, %v2029_v13, 0.0 }
 0x2bf   : > { %10490 = vst [vmem:[#allocation186_spill] sm:$0xff] %v6254_v25 }
 0x2c2   : > { %2048 = vadd.xlane.f32.xlu0 %v2047_v34  ;;  %v6260_v53 = vpop.xlane.xlu0 %1781  ;;  %v2023_v34 = vsel %vm2019_vm7, %v5642_v16, 0.0 }
 0x2c3   : > { %10491 = vst [vmem:[#allocation187_spill] sm:$0xff] %v6260_v53  ;;  %v2041_v13 = vsel %vm978_vm0, %v2023_v34, 0.0 }
 0x2c6   : > { %2054 = vadd.xlane.f32.xlu0 %v2053_v12  ;;  %v6266_v58 = vpop.xlane.xlu0 %1787  ;;  %v2033_v12 = vsel %vm2019_vm7, %v5654_v2, 0.0  ;;  %v2050_v2 = vsel %vm978_vm0, %v2026_v11, 0.0  ;;  %v2030_v11 = vsel %vm2019_vm7, %v5704_v52, 0.0 }
 0x2c7   : > { %10492 = vst [vmem:[#allocation188_spill] sm:$0xff] %v6266_v58  ;;  %v2071_v16 = vsel %vm978_vm0, %v2033_v12, 0.0  ;;  %v2037_v12 = vsel %vm2019_vm7, %v5696_v14, 0.0  ;;  %v2062_v19 = vsel %vm978_vm0, %v2030_v11, 0.0  ;;  %v2032_v14 = vsel %vm2019_vm7, %v5718_v9, 0.0 }
 0x2ca   : > { %2060 = vadd.xlane.f32.xlu0 %v2059_v22  ;;  %v6272_v1 = vpop.xlane.xlu0 %1793  ;;  %v6277_v41 = vpop.xlane.xlu1 %1769 }
 0x2cb   : > { %10493 = vst [vmem:[#allocation189_spill] sm:$0xff] %v6272_v1  ;;  %10494 = vst [vmem:[#allocation190_spill] sm:$0xff] %v6277_v41 }
 0x2ce   : > { %2066 = vadd.xlane.f32.xlu0 %v2065_v4  ;;  %v6284_v62 = vpop.xlane.xlu0 %1799  ;;  %v6289_v22 = vpop.xlane.xlu1 %1778  ;;  %2042 = vadd.xlane.f32.xlu1 %v2041_v13  ;;  %v2028_v4 = vsel %vm2019_vm7, %v5684_v20, 0.0  ;;  %v2083_v20 = vsel %vm978_vm0, %v2037_v12, 0.0  ;;  %v2034_v12 = vsel %vm2019_vm7, %v10503_v42, 0.0 }
 0x2cf   : > { %10495 = vst [vmem:[#allocation191_spill] sm:$0xff] %v6284_v62  ;;  %10496 = vst [vmem:[#allocation192_spill] sm:$0xff] %v6289_v22  ;;  %v2056_v10 = vsel %vm978_vm0, %v2028_v4, 0.0  ;;  %v2074_v11 = vsel %vm978_vm0, %v2034_v12, 0.0 }
 0x2d2   : > { %2072 = vadd.xlane.f32.xlu0 %v2071_v16  ;;  %v6296_v34 = vpop.xlane.xlu0 %1805  ;;  %v6301_v41 = vpop.xlane.xlu1 %1784  ;;  %2051 = vadd.xlane.f32.xlu1 %v2050_v2 }
 0x2d3   : > { %10497 = vst [vmem:[#allocation193_spill] sm:$0xff] %v6296_v34  ;;  %10498 = vst [vmem:[#allocation194_spill] sm:$0xff] %v6301_v41  ;;  %v10512_v41 = vld [vmem:[#allocation34_spill] sm:$0xff]  ;;  %v10514_v34 = vld [vmem:[#allocation152_spill] sm:$0xff] }
 0x2d6   : > { %2078 = vadd.xlane.f32.xlu0 %v2077_v15  ;;  %v6308_v13 = vpop.xlane.xlu0 %1811  ;;  %v6313_v16 = vpop.xlane.xlu1 %1790  ;;  %2057 = vadd.xlane.f32.xlu1 %v2056_v10  ;;  %v2068_v15 = vsel %vm978_vm0, %v2032_v14, 0.0 }
 0x2d7   : > { %10499 = vst [vmem:[#allocation195_spill] sm:$0xff] %v6308_v13  ;;  %10500 = vst [vmem:[#allocation196_spill] sm:$0xff] %v6313_v16 }
 0x2da   : > { %2084 = vadd.xlane.f32.xlu0 %v2083_v20  ;;  %v6317_v2 = vpop.permute.xlu0 %1879  ;;  %v6322_v4 = vpop.xlane.xlu1 %1796  ;;  %2063 = vadd.xlane.f32.xlu1 %v2062_v19 }
 0x2db   : > { %10501 = vst [vmem:[#allocation197_spill] sm:$0xff] %v6317_v2  ;;  %10502 = vst [vmem:[#allocation198_spill] sm:$0xff] %v6322_v4  ;;  %v10505_v2 = vld [vmem:[#allocation95_spill] sm:$0xff] }
 0x2dc   : > { %v2036_v9 = vsel %vm2019_vm7, %v10505_v2, 0.0  ;;  %v10508_v2 = vld [vmem:[#allocation37_spill] sm:$0xff] }
 0x2dd   : > { %v2080_v19 = vsel %vm978_vm0, %v2036_v9, 0.0  ;;  %v10509_v9 = vld [vmem:[#allocation41_spill] sm:$0xff] }
 0x2de   : > { %v1886_v52 = vpop.permute.xlu0 %1885  ;;  %v6328_v10 = vpop.xlane.xlu1 %1802  ;;  %2069 = vadd.xlane.f32.xlu1 %v2068_v15  ;;  %v6432_v48 = vmul.f32 %v10523_v47, %v10509_v9 }
 0x2df   : > { %10504 = vst [vmem:[#allocation93_spill] sm:$0xff] %v6328_v10 }
 0x2e2   : > { %v6331_v20 = vpop.permute.xlu0 %1889  ;;  %v6336_v4 = vpop.xlane.xlu1 %1808  ;;  %2075 = vadd.xlane.f32.xlu1 %v2074_v11 }
 0x2e3   : > { %10506 = vst [vmem:[#allocation95_spill] sm:$0xff] %v6336_v4 }
 0x2e6   : > { %v6339_v14 = vpop.permute.xlu0 %1893  ;;  %v6341_v16 = vpop.permute.xlu1 %1877  ;;  %2081 = vadd.xlane.f32.xlu1 %v2080_v19  ;;  %v4300_v19 = vld [vmem:[%s9942_s5 + $0x6] sm:$0x3] }
 0x2e7   : > { %10507 = vst [vmem:[#allocation199_spill] sm:$0xff] %v6341_v16  ;;  %v6376_v54 = vrot.slane %v4300_v19, %v6001_v60  ;;  %v6379_v45 = vrot.slane %v4300_v19, %v10514_v34 }
 0x2e9   : > { %10513 = vst [vmem:[#allocation201_spill] sm:$0xff] %v6376_v54  ;;  %10515 = vst [vmem:[#allocation202_spill] sm:$0xff] %v6379_v45 }
 0x2ea   : > { %v6343_v42 = vpop.permute.xlu0 %1897  ;;  %v1882_v15 = vpop.permute.xlu1 %1881 }
 0x2ee   : > { %v6345_v12 = vpop.permute.xlu0 %1901  ;;  %v6347_v10 = vpop.permute.xlu1 %1883 }
 0x2f0   : > { %2152 = vrot.lane.b32.xlu0 %v10508_v2, %s4766_s14  ;;  %v1156_v2 = vld [vmem:[%s9942_s5] sm:$0x3] }
 0x2f1   : > { %v6389_v5 = vrot.slane %v1156_v2, %v6001_v60  ;;  %v6392_v1 = vrot.slane %v1156_v2, %v10514_v34 }
 0x2f2   : > { %v6351_v4 = vpop.permute.xlu0 %1905  ;;  %v6353_v11 = vpop.permute.xlu1 %1887 }
 0x2f3   : > { %10516 = vst [vmem:[#allocation203_spill] sm:$0xff] %v6389_v5  ;;  %10517 = vst [vmem:[#allocation204_spill] sm:$0xff] %v6392_v1 }
 0x2f4   : > { %2158 = vrot.lane.b32.xlu0 %v10509_v9, %s4766_s14  ;;  %v10524_v9 = vld [vmem:[#allocation75_spill] sm:$0xff] }
 0x2f6   : > { %v6357_v16 = vpop.permute.xlu0 %1909  ;;  %v6362_v13 = vpop.permute.xlu1 %1891 }
 0x2f7   : > { %10510 = vst [vmem:[#allocation200_spill] sm:$0xff] %v6357_v16  ;;  %2150 = vrot.lane.b32.xlu1 %v10512_v41, %s4766_s14  ;;  %v4298_v16 = vld [vmem:[%s9942_s5 + $0x2] sm:$0x3] }
 0x2f8   : > { %2162 = vrot.lane.b32.xlu0 %v10511_v33, %s4766_s14  ;;  %v6403_v39 = vrot.slane %v4298_v16, %v6001_v60 }
 0x2fa   : > { %v1914_v22 = vpop.permute.xlu0 %1913  ;;  %v6386_v38 = vpop.permute.xlu1 %1895 }
 0x2fb   : > { %v1944_v62 = vsel %vm1941_vm8, %v1882_v15, %v1914_v22  ;;  %v1960_v41 = vsel %vm1941_vm8, %v1914_v22, %v1882_v15  ;;  %v6406_v22 = vrot.slane %v4298_v16, %v10514_v34  ;;  %v10520_v15 = vld [vmem:[#allocation4_spill] sm:$0xff]  ;;  %2154 = vrot.lane.b32.xlu1 %v5304_v18, %s4766_s14 }
 0x2fc   : > { %v6395_v19 = vmul.f32 %v6376_v54, %v1960_v41  ;;  %v6398_v61 = vmul.f32 %v6379_v45, %v1944_v62  ;;  %2166 = vrot.lane.b32.xlu0 %v5410_v28, %s4766_s14  ;;  %v6410_v58 = vmul.f32 %v10520_v15, %v5304_v18  ;;  %v6414_v41 = vmul.f32 %v10520_v15, %v5308_v35  ;;  %v10521_v62 = vld [vmem:[#allocation6_spill] sm:$0xff]  ;;  %v10522_v16 = vld [vmem:[#allocation8_spill] sm:$0xff] }
 0x2fd   : > { %v6420_v2 = vmul.f32 %v10521_v62, %v5324_v40  ;;  %v6424_v60 = vmul.f32 %v10521_v62, %v5344_v6  ;;  %v6428_v34 = vmul.f32 %v10522_v16, %v5364_v43  ;;  %v6437_v18 = vmul.f32 %v10522_v16, %v5385_v46 }
 0x2fe   : > { %10518 = vst [vmem:[#allocation205_spill] sm:$0xff] %v6395_v19  ;;  %10519 = vst [vmem:[#allocation206_spill] sm:$0xff] %v6398_v61  ;;  %v1918_v15 = vpop.permute.xlu0 %1917  ;;  %v6441_v35 = vmul.f32 %v10523_v47, %v5348_v57  ;;  %v6447_v53 = vpop.permute.xlu1 %1899  ;;  %v1126_v61 = vsel %vm1123_vm9, %v10525_v63, %v10524_v9  ;;  %v1142_v16 = vsel %vm1123_vm9, %v10524_v9, %v10525_v63  ;;  %v10529_v19 = vld [vmem:[#allocation7_spill] sm:$0xff] }
 0x2ff   : > { %v1946_v62 = vsel %vm1941_vm8, %v1886_v52, %v1918_v15  ;;  %v1962_v6 = vsel %vm1941_vm8, %v1918_v15, %v1886_v52  ;;  %v10528_v52 = vld [vmem:[#allocation9_spill] sm:$0xff]  ;;  %v6475_v63 = vmul.f32 %v10529_v19, %v10511_v33  ;;  %2156 = vrot.lane.b32.xlu1 %v5324_v40, %s4766_s14  ;;  %v10530_v9 = vld [vmem:[#allocation11_spill] sm:$0xff]  ;;  %v1173_v40 = vmul.f32 %v6392_v1, %v1126_v61 }
 0x300   : > { %v6458_v47 = vmul.f32 %v6376_v54, %v1962_v6  ;;  %v6461_v46 = vmul.f32 %v6379_v45, %v1946_v62  ;;  %2170 = vrot.lane.b32.xlu0 %v5449_v17, %s4766_s14  ;;  %v6467_v15 = vmul.f32 %v10528_v52, %v5406_v29  ;;  %v6471_v57 = vmul.f32 %v10528_v52, %v5425_v23  ;;  %v10531_v52 = vld [vmem:[#allocation10_spill] sm:$0xff] }
 0x301   : > { %v6479_v6 = vmul.f32 %v10529_v19, %v5388_v56  ;;  %v6485_v62 = vmul.f32 %v10530_v9, %v5445_v50  ;;  %v6493_v23 = vmul.f32 %v10531_v52, %v5410_v28  ;;  %v6497_v33 = vmul.f32 %v10531_v52, %v5431_v30  ;;  %v10532_v28 = vld [vmem:[#allocation12_spill] sm:$0xff]  ;;  %v10541_v30 = vld [vmem:[#allocation79_spill] sm:$0xff] }
 0x302   : > { %10526 = vst [vmem:[#allocation4_spill] sm:$0xff] %v6458_v47  ;;  %10527 = vst [vmem:[#allocation6_spill] sm:$0xff] %v6461_v46  ;;  %v6489_v46 = vmul.f32 %v10530_v9, %v5462_v59  ;;  %v1922_v19 = vpop.permute.xlu0 %1921  ;;  %v1172_v56 = vmul.f32 %v6389_v5, %v1142_v16  ;;  %v6507_v59 = vpop.permute.xlu1 %1903  ;;  %v6511_v55 = vmul.f32 %v10532_v28, %v5449_v17 }
 0x303   : > { %v1948_v47 = vsel %vm1941_vm8, %v6331_v20, %v1922_v19  ;;  %v1964_v9 = vsel %vm1941_vm8, %v1922_v19, %v6331_v20  ;;  %v6515_v52 = vmul.f32 %v10532_v28, %v5466_v32  ;;  %v10535_v20 = vld [vmem:[#allocation13_spill] sm:$0xff]  ;;  %v10537_v28 = vld [vmem:[#allocation14_spill] sm:$0xff]  ;;  %2160 = vrot.lane.b32.xlu1 %v5364_v43, %s4766_s14  ;;  %v10544_v43 = vld [vmem:[#allocation20_spill] sm:$0xff] }
 0x304   : > { %v6518_v61 = vmul.f32 %v6376_v54, %v1964_v9  ;;  %v6521_v16 = vmul.f32 %v6379_v45, %v1948_v47  ;;  %2174 = vrot.lane.b32.xlu0 %v5480_v24, %s4766_s14  ;;  %v6527_v19 = vmul.f32 %v10535_v20, %v5477_v49  ;;  %v6531_v17 = vmul.f32 %v10535_v20, %v5491_v21  ;;  %v10540_v47 = vld [vmem:[#allocation83_spill] sm:$0xff]  ;;  %v10542_v21 = vld [vmem:[#allocation82_spill] sm:$0xff] }
 0x305   : > { %v6535_v32 = vmul.f32 %v10537_v28, %v5480_v24  ;;  %v6539_v9 = vmul.f32 %v10537_v28, %v5494_v31  ;;  %v1144_v20 = vsel %vm1123_vm9, %v10540_v47, %v10541_v30  ;;  %v10543_v24 = vld [vmem:[#allocation78_spill] sm:$0xff]  ;;  %v1271_v25 = vmul.f32 %v10544_v43, %v1172_v56 }
 0x306   : > { %10533 = vst [vmem:[#allocation8_spill] sm:$0xff] %v6518_v61  ;;  %10534 = vst [vmem:[#allocation5_spill] sm:$0xff] %v6521_v16  ;;  %v1128_v16 = vsel %vm1123_vm9, %v10541_v30, %v10540_v47  ;;  %v1127_v61 = vsel %vm1123_vm9, %v10543_v24, %v10542_v21  ;;  %v1143_v28 = vsel %vm1123_vm9, %v10542_v21, %v10543_v24  ;;  %v1926_v31 = vpop.permute.xlu0 %1925  ;;  %v6567_v47 = vpop.permute.xlu1 %1907 }
 0x307   : > { %10536 = vst [vmem:[#allocation75_spill] sm:$0xff] %v6531_v17  ;;  %10538 = vst [vmem:[#allocation74_spill] sm:$0xff] %v6535_v32  ;;  %v1272_v7 = vmul.f32 %v10544_v43, %v1173_v40  ;;  %v1950_v8 = vsel %vm1941_vm8, %v6339_v14, %v1926_v31  ;;  %v1966_v30 = vsel %vm1941_vm8, %v1926_v31, %v6339_v14  ;;  %v10546_v32 = vld [vmem:[#allocation76_spill] sm:$0xff]  ;;  %2164 = vrot.lane.b32.xlu1 %v5406_v29, %s4766_s14 }
 0x308   : > { %10539 = vst [vmem:[#allocation9_spill] sm:$0xff] %v6539_v9  ;;  %v10545_v9 = vld [vmem:[#allocation77_spill] sm:$0xff]  ;;  %v6578_v43 = vmul.f32 %v6376_v54, %v1966_v30  ;;  %v6581_v56 = vmul.f32 %v6379_v45, %v1950_v8  ;;  %2178 = vrot.lane.b32.xlu0 %v5501_v36, %s4766_s14  ;;  %v1176_v21 = vmul.f32 %v6389_v5, %v1144_v20  ;;  %v10550_v30 = vld [vmem:[#allocation16_spill] sm:$0xff] }
 0x309   : > { %v1398_v24 = vsel %vm1395_vm10, %v10546_v32, %v10545_v9  ;;  %v1414_v40 = vsel %vm1395_vm10, %v10545_v9, %v10546_v32  ;;  %v1177_v31 = vmul.f32 %v6392_v1, %v1128_v16  ;;  %v1174_v14 = vmul.f32 %v6389_v5, %v1143_v28  ;;  %v10549_v32 = vld [vmem:[#allocation15_spill] sm:$0xff] }
 0x30a   : > { %10547 = vst [vmem:[#allocation7_spill] sm:$0xff] %v6578_v43  ;;  %10548 = vst [vmem:[#allocation11_spill] sm:$0xff] %v6581_v56  ;;  %v1175_v17 = vmul.f32 %v6392_v1, %v1127_v61  ;;  %v6593_v9 = vmul.f32 %v10549_v32, %v5508_v26  ;;  %v6597_v8 = vmul.f32 %v10549_v32, %v5522_v27  ;;  %v1930_v61 = vpop.permute.xlu0 %1929  ;;  %v6619_v36 = vpop.permute.xlu1 %1911  ;;  %v10554_v56 = vld [vmem:[#allocation22_spill] sm:$0xff] }
 0x30b   : > { %v6601_v20 = vmul.f32 %v10550_v30, %v5537_v44  ;;  %v6605_v16 = vmul.f32 %v10550_v30, %v5551_v37  ;;  %v6608_v28 = vmul.f32 %v6403_v39, %v1414_v40  ;;  %v6611_v29 = vmul.f32 %v6406_v22, %v1398_v24  ;;  %10551 = vst [vmem:[#allocation10_spill] sm:$0xff] %v6619_v36 }
 0x30c   : > { %v1952_v32 = vsel %vm1941_vm8, %v6343_v42, %v1930_v61  ;;  %v1968_v27 = vsel %vm1941_vm8, %v1930_v61, %v6343_v42  ;;  %v6622_v30 = vadd.f32 %v1271_v25, %v6410_v58  ;;  %v6625_v37 = vadd.f32 %v1272_v7, %v6414_v41  ;;  %2182 = vrot.lane.b32.xlu0 %v5268_v51, %s4766_s14  ;;  %v10555_v61 = vld [vmem:[#allocation21_spill] sm:$0xff] }
 0x30d   : > { %v6628_v40 = vmul.f32 %v6376_v54, %v1968_v27  ;;  %v6631_v24 = vmul.f32 %v6379_v45, %v1952_v32  ;;  %v1275_v43 = vmul.f32 %v10554_v56, %v1176_v21  ;;  %v1276_v42 = vmul.f32 %v10554_v56, %v1177_v31  ;;  %2168 = vrot.lane.b32.xlu1 %v5445_v50, %s4766_s14  ;;  %v10556_v7 = vld [vmem:[#allocation85_spill] sm:$0xff]  ;;  %v10558_v21 = vld [vmem:[#allocation84_spill] sm:$0xff] }
 0x30e   : > { %v1273_v36 = vmul.f32 %v10555_v61, %v1174_v14  ;;  %v1274_v25 = vmul.f32 %v10555_v61, %v1175_v17  ;;  %v10557_v27 = vld [vmem:[#allocation81_spill] sm:$0xff]  ;;  %v10559_v32 = vld [vmem:[#allocation80_spill] sm:$0xff]  ;;  %v1934_v31 = vpop.permute.xlu0 %1933  ;;  %v10560_v14 = vld [vmem:[#allocation90_spill] sm:$0xff] }
 0x30f   : > { %10552 = vst [vmem:[#allocation12_spill] sm:$0xff] %v6628_v40  ;;  %10553 = vst [vmem:[#allocation13_spill] sm:$0xff] %v6631_v24  ;;  %v1400_v58 = vsel %vm1395_vm10, %v10557_v27, %v10556_v7  ;;  %v1416_v41 = vsel %vm1395_vm10, %v10556_v7, %v10557_v27  ;;  %v1399_v56 = vsel %vm1395_vm10, %v10559_v32, %v10558_v21  ;;  %v10561_v61 = vld [vmem:[#allocation86_spill] sm:$0xff] }
 0x310   : > { %v1415_v17 = vsel %vm1395_vm10, %v10558_v21, %v10559_v32  ;;  %v1129_v50 = vsel %vm1123_vm9, %v10561_v61, %v10560_v14  ;;  %v1145_v7 = vsel %vm1123_vm9, %v10560_v14, %v10561_v61  ;;  %v1954_v27 = vsel %vm1941_vm8, %v6345_v12, %v1934_v31  ;;  %v1916_v21 = vpop.permute.xlu1 %1915 }
 0x311   : > { %v1970_v51 = vsel %vm1941_vm8, %v1934_v31, %v6345_v12  ;;  %v6675_v24 = vmul.f32 %v6379_v45, %v1954_v27  ;;  %v1945_v40 = vsel %vm1941_vm8, %v6347_v10, %v1916_v21  ;;  %v1961_v14 = vsel %vm1941_vm8, %v1916_v21, %v6347_v10  ;;  %2172 = vrot.lane.b32.xlu1 %v5477_v49, %s4766_s14  ;;  %v10567_v21 = vld [vmem:[#allocation87_spill] sm:$0xff] }
 0x312   : > { %v6672_v32 = vmul.f32 %v6376_v54, %v1970_v51  ;;  %v6684_v61 = vmul.f32 %v6403_v39, %v1415_v17  ;;  %v6687_v12 = vmul.f32 %v6406_v22, %v1399_v56  ;;  %v6690_v51 = vmul.f32 %v6376_v54, %v1961_v14  ;;  %v10566_v17 = vld [vmem:[#allocation91_spill] sm:$0xff]  ;;  %v1938_v14 = vpop.permute.xlu0 %1937 }
 0x313   : > { %10563 = vst [vmem:[#allocation83_spill] sm:$0xff] %v6675_v24  ;;  %v6693_v31 = vmul.f32 %v6379_v45, %v1945_v40  ;;  %v6698_v27 = vmul.f32 %v6403_v39, %v1416_v41  ;;  %v6701_v10 = vmul.f32 %v6406_v22, %v1400_v58  ;;  %v1130_v56 = vsel %vm1123_vm9, %v10567_v21, %v10566_v17 }
 0x314   : > { %10562 = vst [vmem:[#allocation14_spill] sm:$0xff] %v6672_v32  ;;  %10564 = vst [vmem:[#allocation79_spill] sm:$0xff] %v6690_v51  ;;  %v1146_v40 = vsel %vm1123_vm9, %v10566_v17, %v10567_v21  ;;  %v1178_v24 = vmul.f32 %v6389_v5, %v1145_v7  ;;  %v1179_v49 = vmul.f32 %v6392_v1, %v1129_v50  ;;  %v1920_v32 = vpop.permute.xlu1 %1919 }
 0x315   : > { %10565 = vst [vmem:[#allocation82_spill] sm:$0xff] %v6693_v31  ;;  %v1956_v58 = vsel %vm1941_vm8, %v6351_v4, %v1938_v14  ;;  %v1972_v41 = vsel %vm1941_vm8, %v1938_v14, %v6351_v4  ;;  %v1947_v7 = vsel %vm1941_vm8, %v6353_v11, %v1920_v32  ;;  %v1963_v50 = vsel %vm1941_vm8, %v1920_v32, %v6353_v11 }
 0x316   : > { %v6720_v31 = vmul.f32 %v6376_v54, %v1972_v41  ;;  %v6723_v51 = vmul.f32 %v6379_v45, %v1956_v58  ;;  %v1180_v17 = vmul.f32 %v6389_v5, %v1146_v40  ;;  %v6733_v21 = vadd.f32 %v1273_v36, %v6420_v2  ;;  %2176 = vrot.lane.b32.xlu1 %v5508_v26, %s4766_s14  ;;  %v10573_v2 = vld [vmem:[#allocation23_spill] sm:$0xff] }
 0x317   : > { %v6736_v4 = vmul.f32 %v6376_v54, %v1963_v50  ;;  %v6739_v14 = vmul.f32 %v6379_v45, %v1947_v7  ;;  %v1181_v58 = vmul.f32 %v6392_v1, %v1130_v56  ;;  %v6745_v41 = vadd.f32 %v1274_v25, %v6424_v60  ;;  %v10574_v7 = vld [vmem:[#allocation92_spill] sm:$0xff] }
 0x318   : > { %10568 = vst [vmem:[#allocation78_spill] sm:$0xff] %v6720_v31  ;;  %10569 = vst [vmem:[#allocation20_spill] sm:$0xff] %v6723_v51  ;;  %v6748_v11 = vadd.f32 %v1275_v43, %v6432_v48  ;;  %v6751_v36 = vadd.f32 %v1276_v42, %v6441_v35  ;;  %v1277_v32 = vmul.f32 %v10573_v2, %v1178_v24  ;;  %v10575_v50 = vld [vmem:[#allocation88_spill] sm:$0xff]  ;;  %v1924_v25 = vpop.permute.xlu1 %1923  ;;  %v10576_v48 = vld [vmem:[#allocation89_spill] sm:$0xff] }
 0x319   : > { %10570 = vst [vmem:[#allocation77_spill] sm:$0xff] %v6736_v4  ;;  %10571 = vst [vmem:[#allocation76_spill] sm:$0xff] %v6739_v14  ;;  %v1278_v40 = vmul.f32 %v10573_v2, %v1179_v49  ;;  %v1401_v26 = vsel %vm1395_vm10, %v10575_v50, %v10574_v7  ;;  %v1417_v60 = vsel %vm1395_vm10, %v10574_v7, %v10575_v50  ;;  %v10577_v43 = vld [vmem:[#allocation94_spill] sm:$0xff]  ;;  %v10578_v42 = vld [vmem:[#allocation96_spill] sm:$0xff] }
 0x31a   : > { %10572 = vst [vmem:[#allocation15_spill] sm:$0xff] %v6751_v36  ;;  %v1418_v35 = vsel %vm1395_vm10, %v10577_v43, %v10576_v48  ;;  %v10579_v24 = vld [vmem:[#allocation100_spill] sm:$0xff]  ;;  %v1949_v56 = vsel %vm1941_vm8, %v6362_v13, %v1924_v25  ;;  %v1965_v2 = vsel %vm1941_vm8, %v1924_v25, %v6362_v13  ;;  %v1402_v51 = vsel %vm1395_vm10, %v10576_v48, %v10577_v43  ;;  %v10584_v25 = vld [vmem:[#allocation101_spill] sm:$0xff] }
 0x31b   : > { %v1147_v49 = vsel %vm1123_vm9, %v10579_v24, %v10578_v42  ;;  %v10580_v7 = vld [vmem:[#allocation24_spill] sm:$0xff]  ;;  %v6783_v31 = vmul.f32 %v6376_v54, %v1965_v2  ;;  %v6786_v14 = vmul.f32 %v6379_v45, %v1949_v56  ;;  %2180 = vrot.lane.b32.xlu1 %v5537_v44, %s4766_s14  ;;  %v6792_v13 = vmul.f32 %v6403_v39, %v1417_v60 }
 0x31c   : > { %v1279_v50 = vmul.f32 %v10580_v7, %v1180_v17  ;;  %v1280_v4 = vmul.f32 %v10580_v7, %v1181_v58  ;;  %v10583_v17 = vld [vmem:[#allocation97_spill] sm:$0xff]  ;;  %v1131_v48 = vsel %vm1123_vm9, %v10578_v42, %v10579_v24  ;;  %v6803_v43 = vmul.f32 %v6403_v39, %v1418_v35  ;;  %v1928_v2 = vpop.permute.xlu1 %1927 }
 0x31d   : > { %10581 = vst [vmem:[#allocation16_spill] sm:$0xff] %v6783_v31  ;;  %10582 = vst [vmem:[#allocation22_spill] sm:$0xff] %v6786_v14  ;;  %v1148_v36 = vsel %vm1123_vm9, %v10584_v25, %v10583_v17  ;;  %v6806_v56 = vmul.f32 %v6406_v22, %v1401_v26  ;;  %v1132_v58 = vsel %vm1123_vm9, %v10583_v17, %v10584_v25  ;;  %v10588_v17 = vld [vmem:[#allocation25_spill] sm:$0xff] }
 0x31e   : > { %v1182_v60 = vmul.f32 %v6389_v5, %v1147_v49  ;;  %v6814_v7 = vmul.f32 %v6406_v22, %v1402_v51  ;;  %v6817_v44 = vadd.f32 %v1277_v32, %v6428_v34  ;;  %v1951_v35 = vsel %vm1941_vm8, %v6386_v38, %v1928_v2 }
 0x31f   : > { %v1967_v26 = vsel %vm1941_vm8, %v1928_v2, %v6386_v38  ;;  %v1184_v42 = vmul.f32 %v6389_v5, %v1148_v36  ;;  %v1183_v24 = vmul.f32 %v6392_v1, %v1131_v48  ;;  %v6831_v51 = vmul.f32 %v6379_v45, %v1951_v35  ;;  %2184 = vrot.lane.b32.xlu1 %v5284_v0, %s4766_s14  ;;  %v10589_v48 = vld [vmem:[#allocation99_spill] sm:$0xff]  ;;  %v10592_v0 = vld [vmem:[#allocation98_spill] sm:$0xff] }
 0x320   : > { %v6828_v49 = vmul.f32 %v6376_v54, %v1967_v26  ;;  %v1185_v34 = vmul.f32 %v6392_v1, %v1132_v58  ;;  %v6837_v32 = vadd.f32 %v1278_v40, %v6437_v18  ;;  %v6840_v38 = vadd.f32 %v1279_v50, %v6475_v63  ;;  %v10590_v2 = vld [vmem:[#allocation103_spill] sm:$0xff]  ;;  %v10591_v26 = vld [vmem:[#allocation102_spill] sm:$0xff]  ;;  %v1932_v63 = vpop.permute.xlu1 %1931 }
 0x321   : > { %10586 = vst [vmem:[#allocation85_spill] sm:$0xff] %v6831_v51  ;;  %v6843_v36 = vadd.f32 %v1280_v4, %v6479_v6  ;;  %v1281_v25 = vmul.f32 %v10588_v17, %v1182_v60  ;;  %v1420_v35 = vsel %vm1395_vm10, %v10590_v2, %v10589_v48  ;;  %v1403_v58 = vsel %vm1395_vm10, %v10592_v0, %v10591_v26  ;;  %v10593_v6 = vld [vmem:[#allocation108_spill] sm:$0xff] }
 0x322   : > { %10585 = vst [vmem:[#allocation21_spill] sm:$0xff] %v6828_v49  ;;  %v1419_v18 = vsel %vm1395_vm10, %v10591_v26, %v10592_v0  ;;  %v10594_v4 = vld [vmem:[#allocation104_spill] sm:$0xff]  ;;  %v1953_v60 = vsel %vm1941_vm8, %v6447_v53, %v1932_v63  ;;  %v1969_v51 = vsel %vm1941_vm8, %v1932_v63, %v6447_v53  ;;  %v10595_v0 = vld [vmem:[#allocation27_spill] sm:$0xff]  ;;  %v1282_v49 = vmul.f32 %v10588_v17, %v1183_v24  ;;  %v10598_v17 = vld [vmem:[#allocation109_spill] sm:$0xff] }
 0x323   : > { %10587 = vst [vmem:[#allocation81_spill] sm:$0xff] %v6843_v36  ;;  %v1133_v40 = vsel %vm1123_vm9, %v10594_v4, %v10593_v6  ;;  %v1149_v50 = vsel %vm1123_vm9, %v10593_v6, %v10594_v4  ;;  %v1283_v26 = vmul.f32 %v10595_v0, %v1184_v42  ;;  %v6875_v14 = vmul.f32 %v6376_v54, %v1969_v51  ;;  %v10599_v63 = vld [vmem:[#allocation105_spill] sm:$0xff] }
 0x324   : > { %v6878_v31 = vmul.f32 %v6379_v45, %v1953_v60  ;;  %v1284_v6 = vmul.f32 %v10595_v0, %v1185_v34  ;;  %v1404_v4 = vsel %vm1395_vm10, %v10589_v48, %v10590_v2  ;;  %v6886_v36 = vmul.f32 %v6403_v39, %v1419_v18  ;;  %v1936_v34 = vpop.permute.xlu1 %1935  ;;  %v6923_v60 = vld [vmem:[%s9940_s3] sm:$0xff] }
 0x325   : > { %10596 = vst [vmem:[#allocation84_spill] sm:$0xff] %v6875_v14  ;;  %v6890_v53 = vmul.f32 %v6403_v39, %v1420_v35  ;;  %v6893_v42 = vmul.f32 %v6406_v22, %v1403_v58  ;;  %v1186_v24 = vmul.f32 %v6389_v5, %v1149_v50  ;;  %v1187_v51 = vmul.f32 %v6392_v1, %v1133_v40 }
 0x326   : > { %10597 = vst [vmem:[#allocation80_spill] sm:$0xff] %v6878_v31  ;;  %v1134_v48 = vsel %vm1123_vm9, %v10599_v63, %v10598_v17  ;;  %v1150_v2 = vsel %vm1123_vm9, %v10598_v17, %v10599_v63  ;;  %v1955_v35 = vsel %vm1941_vm8, %v6507_v59, %v1936_v34  ;;  %v1971_v58 = vsel %vm1941_vm8, %v1936_v34, %v6507_v59 }
 0x327   : > { %v6912_v18 = vmul.f32 %v6406_v22, %v1404_v4  ;;  %v6915_v40 = vmul.f32 %v6376_v54, %v1971_v58  ;;  %v6918_v50 = vmul.f32 %v6379_v45, %v1955_v35  ;;  %v2295_v0 = vsel %vm2292_vm11, %v6923_v60, 0.0  ;;  %v10605_v58 = vld [vmem:[#allocation26_spill] sm:$0xff] }
 0x328   : > { %v6929_v59 = vadd.f32 %v1281_v25, %v6467_v15  ;;  %v6932_v4 = vadd.f32 %v1282_v49, %v6471_v57  ;;  %v6935_v34 = vadd.f32 %v1283_v26, %v6493_v23  ;;  %v6938_v17 = vadd.f32 %v1284_v6, %v6497_v33  ;;  %v1940_v31 = vpop.permute.xlu1 %1939  ;;  %v10606_v15 = vld [vmem:[#allocation112_spill] sm:$0xff] }
 0x329   : > { %10600 = vst [vmem:[#allocation90_spill] sm:$0xff] %v6912_v18  ;;  %10601 = vst [vmem:[#allocation86_spill] sm:$0xff] %v6915_v40  ;;  %v1188_v63 = vmul.f32 %v6389_v5, %v1150_v2  ;;  %v1189_v35 = vmul.f32 %v6392_v1, %v1134_v48  ;;  %v1286_v40 = vmul.f32 %v10605_v58, %v1187_v51  ;;  %v10607_v25 = vld [vmem:[#allocation116_spill] sm:$0xff]  ;;  %v2311_v49 = vsel %vm978_vm0, %v2295_v0, 0.0  ;;  %v10611_v48 = vld [vmem:[#allocation106_spill] sm:$0xff] }
 0x32a   : > { %10602 = vst [vmem:[#allocation91_spill] sm:$0xff] %v6918_v50  ;;  %10603 = vst [vmem:[#allocation87_spill] sm:$0xff] %v6935_v34  ;;  %v1285_v50 = vmul.f32 %v10605_v58, %v1186_v24  ;;  %v1151_v57 = vsel %vm1123_vm9, %v10607_v25, %v10606_v15  ;;  %v1957_v23 = vsel %vm1941_vm8, %v6567_v47, %v1940_v31  ;;  %v6968_v51 = vld [vmem:[%s9940_s3 + $0x10] sm:$0xff]  ;;  %v10612_v58 = vld [vmem:[#allocation113_spill] sm:$0xff] }
 0x32b   : > { %10604 = vst [vmem:[#allocation23_spill] sm:$0xff] %v6938_v17  ;;  %v1973_v33 = vsel %vm1941_vm8, %v1940_v31, %v6567_v47  ;;  %v1135_v26 = vsel %vm1123_vm9, %v10606_v15, %v10607_v25  ;;  %v6963_v24 = vmul.f32 %v6379_v45, %v1957_v23  ;;  %v2297_v47 = vsel %vm2292_vm11, %v6968_v51, 0.0  ;;  %v10610_v31 = vld [vmem:[#allocation110_spill] sm:$0xff]  ;;  %v10613_v15 = vld [vmem:[#allocation117_spill] sm:$0xff]  ;;  %v10614_v23 = vld [vmem:[#allocation111_spill] sm:$0xff]  ;;  %2312 = vadd.xlane.f32.xlu0 %v2311_v49 }
 0x32c   : > { %v6960_v6 = vmul.f32 %v6376_v54, %v1973_v33  ;;  %v1405_v2 = vsel %vm1395_vm10, %v10611_v48, %v10610_v31  ;;  %v1421_v0 = vsel %vm1395_vm10, %v10610_v31, %v10611_v48  ;;  %v1152_v25 = vsel %vm1123_vm9, %v10613_v15, %v10612_v58  ;;  %v10615_v33 = vld [vmem:[#allocation107_spill] sm:$0xff] }
 0x32d   : > { %10609 = vst [vmem:[#allocation88_spill] sm:$0xff] %v6963_v24  ;;  %v1406_v45 = vsel %vm1395_vm10, %v10615_v33, %v10614_v23  ;;  %v1422_v54 = vsel %vm1395_vm10, %v10614_v23, %v10615_v33  ;;  %v1136_v31 = vsel %vm1123_vm9, %v10612_v58, %v10613_v15  ;;  %v1190_v48 = vmul.f32 %v6389_v5, %v1151_v57  ;;  %v10616_v24 = vld [vmem:[#allocation29_spill] sm:$0xff] }
 0x32e   : > { %10608 = vst [vmem:[#allocation92_spill] sm:$0xff] %v6960_v6  ;;  %v1287_v6 = vmul.f32 %v10616_v24, %v1188_v63  ;;  %v1288_v14 = vmul.f32 %v10616_v24, %v1189_v35  ;;  %v1191_v17 = vmul.f32 %v6392_v1, %v1135_v26  ;;  %v2317_v34 = vsel %vm978_vm0, %v2297_v47, 0.0  ;;  %v10619_v24 = vld [vmem:[#allocation28_spill] sm:$0xff] }
 0x32f   : > { %v7004_v18 = vmul.f32 %v6403_v39, %v1421_v0  ;;  %v7007_v23 = vmul.f32 %v6406_v22, %v1405_v2  ;;  %v1192_v33 = vmul.f32 %v6389_v5, %v1152_v25  ;;  %v2568_v57 = vsel %vm2565_vm12, %v6923_v60, 0.0  ;;  %v10620_v2 = vld [vmem:[#allocation118_spill] sm:$0xff]  ;;  %2318 = vadd.xlane.f32.xlu0 %v2317_v34 }
 0x330   : > { %v7014_v63 = vmul.f32 %v6403_v39, %v1422_v54  ;;  %v7017_v35 = vmul.f32 %v6406_v22, %v1406_v45  ;;  %v1193_v49 = vmul.f32 %v6392_v1, %v1136_v31  ;;  %v7021_v26 = vadd.f32 %v1285_v50, %v6485_v62  ;;  %v10621_v0 = vld [vmem:[#allocation114_spill] sm:$0xff]  ;;  %v10624_v31 = vld [vmem:[#allocation31_spill] sm:$0xff] }
 0x331   : > { %v1289_v47 = vmul.f32 %v10619_v24, %v1190_v48  ;;  %v1407_v58 = vsel %vm1395_vm10, %v10621_v0, %v10620_v2  ;;  %v1423_v54 = vsel %vm1395_vm10, %v10620_v2, %v10621_v0  ;;  %v7033_v45 = vadd.f32 %v1286_v40, %v6489_v46 }
 0x332   : > { %10617 = vst [vmem:[#allocation89_spill] sm:$0xff] %v7014_v63  ;;  %10618 = vst [vmem:[#allocation94_spill] sm:$0xff] %v7017_v35  ;;  %v1290_v15 = vmul.f32 %v10619_v24, %v1191_v17  ;;  %v7037_v62 = vadd.f32 %v1287_v6, %v6511_v55  ;;  %v7040_v50 = vadd.f32 %v1288_v14, %v6515_v52  ;;  %v2584_v25 = vsel %vm978_vm0, %v2568_v57, 0.0  ;;  %v10625_v35 = vld [vmem:[#allocation124_spill] sm:$0xff]  ;;  %v7055_v55 = vld [vmem:[%s9940_s3 + $0x18] sm:$0xff] }
 0x333   : > { %v1291_v48 = vmul.f32 %v10624_v31, %v1192_v33  ;;  %v10626_v63 = vld [vmem:[#allocation120_spill] sm:$0xff]  ;;  %v2298_v52 = vsel %vm2292_vm11, %v7055_v55, 0.0  ;;  %v1292_v14 = vmul.f32 %v10624_v31, %v1193_v49  ;;  %v7062_v40 = vmul.f32 %v6403_v39, %v1423_v54  ;;  %v10627_v17 = vld [vmem:[#allocation123_spill] sm:$0xff]  ;;  %2585 = vadd.xlane.f32.xlu0 %v2584_v25 }
 0x334   : > { %10622 = vst [vmem:[#allocation96_spill] sm:$0xff] %v7037_v62  ;;  %10623 = vst [vmem:[#allocation100_spill] sm:$0xff] %v7040_v50  ;;  %v1137_v2 = vsel %vm1123_vm9, %v10626_v63, %v10625_v35  ;;  %v1153_v46 = vsel %vm1123_vm9, %v10625_v35, %v10626_v63  ;;  %v7065_v34 = vmul.f32 %v6406_v22, %v1407_v58  ;;  %v10628_v6 = vld [vmem:[#allocation119_spill] sm:$0xff]  ;;  %v10629_v63 = vld [vmem:[#allocation128_spill] sm:$0xff]  ;;  %v2320_v31 = vsel %vm978_vm0, %v2298_v52, 0.0 }
 0x335   : > { %v1138_v33 = vsel %vm1123_vm9, %v10628_v6, %v10627_v17  ;;  %v1154_v57 = vsel %vm1123_vm9, %v10627_v17, %v10628_v6  ;;  %v10630_v35 = vld [vmem:[#allocation133_spill] sm:$0xff]  ;;  %v7081_v24 = vadd.f32 %v1289_v47, %v6527_v19  ;;  %v1194_v0 = vmul.f32 %v6389_v5, %v1153_v46  ;;  %v10631_v17 = vld [vmem:[#allocation115_spill] sm:$0xff]  ;;  %v10634_v47 = vld [vmem:[#allocation74_spill] sm:$0xff] }
 0x336   : > { %v1155_v49 = vsel %vm1123_vm9, %v10630_v35, %v10629_v63  ;;  %v1195_v58 = vmul.f32 %v6392_v1, %v1137_v2  ;;  %v1139_v54 = vsel %vm1123_vm9, %v10629_v63, %v10630_v35  ;;  %v10632_v6 = vld [vmem:[#allocation125_spill] sm:$0xff]  ;;  %v10633_v62 = vld [vmem:[#allocation75_spill] sm:$0xff]  ;;  %v7098_v25 = vadd.f32 %v1291_v48, %v10634_v47  ;;  %v10640_v48 = vld [vmem:[#allocation126_spill] sm:$0xff] }
 0x337   : > { %v1424_v50 = vsel %vm1395_vm10, %v10632_v6, %v10631_v17  ;;  %v7095_v19 = vadd.f32 %v1290_v15, %v10633_v62  ;;  %v2841_v2 = vsel %vm2838_vm13, %v6923_v60, 0.0  ;;  %v7104_v46 = vmul.f32 %v6389_v5, %v1154_v57  ;;  %v10637_v35 = vld [vmem:[#allocation9_spill] sm:$0xff]  ;;  %v10641_v47 = vld [vmem:[#allocation122_spill] sm:$0xff]  ;;  %2321 = vadd.xlane.f32.xlu0 %v2320_v31  ;;  %v10649_v31 = vld [vmem:[#allocation136_spill] sm:$0xff] }
 0x338   : > { %10635 = vst [vmem:[#allocation24_spill] sm:$0xff] %v7098_v25  ;;  %v1408_v52 = vsel %vm1395_vm10, %v10631_v17, %v10632_v6  ;;  %v1198_v63 = vmul.f32 %v6389_v5, %v1155_v49  ;;  %v7112_v15 = vadd.f32 %v1292_v14, %v10637_v35  ;;  %v7115_v62 = vmul.f32 %v6392_v1, %v1138_v33  ;;  %v10643_v14 = vld [vmem:[#allocation30_spill] sm:$0xff] }
 0x339   : > { %10636 = vst [vmem:[#allocation97_spill] sm:$0xff] %v7104_v46  ;;  %v1409_v25 = vsel %vm1395_vm10, %v10641_v47, %v10640_v48  ;;  %v1425_v57 = vsel %vm1395_vm10, %v10640_v48, %v10641_v47  ;;  %v1199_v17 = vmul.f32 %v6392_v1, %v1139_v54  ;;  %v7127_v49 = vmul.f32 %v6403_v39, %v1424_v50  ;;  %v10648_v54 = vld [vmem:[#allocation131_spill] sm:$0xff] }
 0x33a   : > { %10638 = vst [vmem:[#allocation101_spill] sm:$0xff] %v7112_v15  ;;  %10639 = vst [vmem:[#allocation25_spill] sm:$0xff] %v7115_v62  ;;  %v1293_v6 = vmul.f32 %v10643_v14, %v1194_v0  ;;  %v1294_v33 = vmul.f32 %v10643_v14, %v1195_v58  ;;  %v2857_v35 = vsel %vm978_vm0, %v2841_v2, 0.0  ;;  %v7133_v5 = vmul.f32 %v6406_v22, %v1408_v52  ;;  %v10645_v15 = vld [vmem:[#allocation127_spill] sm:$0xff]  ;;  %v10646_v62 = vld [vmem:[#allocation121_spill] sm:$0xff] }
 0x33b   : > { %10642 = vst [vmem:[#allocation99_spill] sm:$0xff] %v7127_v49  ;;  %v7139_v48 = vsel %vm1395_vm10, %v10646_v62, %v10645_v15  ;;  %v1427_v50 = vsel %vm1395_vm10, %v10649_v31, %v10648_v54  ;;  %v7148_v0 = vld [vmem:[%s9940_s3 + $0x20] sm:$0xff]  ;;  %v7157_v2 = vsel %vm1395_vm10, %v10645_v15, %v10646_v62  ;;  %v7160_v52 = vmul.f32 %v6403_v39, %v1425_v57  ;;  %v10650_v14 = vld [vmem:[#allocation32_spill] sm:$0xff]  ;;  %v4733_v15 = vld [vmem:[%s9940_s3 + $0x8] sm:$0xff] }
 0x33c   : > { %10644 = vst [vmem:[#allocation103_spill] sm:$0xff] %v7133_v5  ;;  %10647 = vst [vmem:[#allocation102_spill] sm:$0xff] %v7139_v48  ;;  %v2299_v58 = vsel %vm2292_vm11, %v7148_v0, 0.0  ;;  %v7163_v47 = vmul.f32 %v6406_v22, %v1409_v25  ;;  %v1297_v1 = vmul.f32 %v10650_v14, %v1198_v63  ;;  %v1298_v48 = vmul.f32 %v10650_v14, %v1199_v17  ;;  %v10651_v49 = vld [vmem:[#allocation130_spill] sm:$0xff] }
 0x33d   : > { %v1411_v5 = vsel %vm1395_vm10, %v10648_v54, %v10649_v31  ;;  %v1544_v46 = vmul.f32 %v10651_v49, %v6608_v28  ;;  %2858 = vadd.xlane.f32.xlu0 %v2857_v35  ;;  %v2296_v25 = vsel %vm2292_vm11, %v4733_v15, 0.0  ;;  %v7179_v63 = vmul.f32 %v6403_v39, %v1427_v50  ;;  %v10652_v35 = vld [vmem:[#allocation132_spill] sm:$0xff] }
 0x33e   : > { %v7182_v62 = vadd.f32 %v1293_v6, %v6593_v9  ;;  %v7185_v57 = vadd.f32 %v1294_v33, %v6597_v8  ;;  %v2323_v17 = vsel %vm978_vm0, %v2299_v58, 0.0  ;;  %v1545_v28 = vmul.f32 %v10651_v49, %v6611_v29 }
 0x33f   : > { %v1546_v54 = vmul.f32 %v10652_v35, %v6684_v61  ;;  %v1547_v31 = vmul.f32 %v10652_v35, %v6687_v12  ;;  %v2843_v50 = vsel %vm2838_vm13, %v6968_v51, 0.0  ;;  %v7198_v9 = vmul.f32 %v6406_v22, %v1411_v5  ;;  %v10653_v61 = vld [vmem:[#allocation134_spill] sm:$0xff]  ;;  %v10659_v35 = vld [vmem:[#allocation156_spill] sm:$0xff] }
 0x340   : > { %v7201_v8 = vadd.f32 %v1297_v1, %v6601_v20  ;;  %v2314_v6 = vsel %vm978_vm0, %v2296_v25, 0.0  ;;  %v1576_v29 = vadd.f32 %v1544_v46, %v6622_v30  ;;  %v1550_v49 = vmul.f32 %v10653_v61, %v6792_v13  ;;  %v10654_v20 = vld [vmem:[#allocation135_spill] sm:$0xff] }
 0x341   : > { %v7209_v12 = vadd.f32 %v1298_v48, %v6605_v16  ;;  %2324 = vadd.xlane.f32.xlu0 %v2323_v17  ;;  %v2569_v5 = vsel %vm2565_vm12, %v4733_v15, 0.0  ;;  %v1551_v1 = vmul.f32 %v10653_v61, %v6806_v56  ;;  %v1554_v33 = vmul.f32 %v10654_v20, %v6886_v36  ;;  %v10655_v56 = vld [vmem:[#allocation137_spill] sm:$0xff]  ;;  %v10660_v61 = vld [vmem:[#allocation140_spill] sm:$0xff] }
 0x342   : > { %v1555_v58 = vmul.f32 %v10654_v20, %v6893_v42  ;;  %v2863_v30 = vsel %vm978_vm0, %v2843_v50, 0.0  ;;  %v1577_v13 = vadd.f32 %v1545_v28, %v6625_v37  ;;  %v1578_v16 = vadd.f32 %v1546_v54, %v6733_v21  ;;  %v10656_v42 = vld [vmem:[#allocation139_spill] sm:$0xff]  ;;  %v10658_v28 = vld [vmem:[#allocation185_spill] sm:$0xff] }
 0x343   : > { %v1579_v46 = vadd.f32 %v1547_v31, %v6745_v41  ;;  %2315 = vadd.xlane.f32.xlu1 %v2314_v6  ;;  %v3115_v48 = vsel %vm3111_vm14, %v4733_v15, 0.0  ;;  %v1558_v14 = vmul.f32 %v10655_v56, %v7004_v18  ;;  %v1559_v36 = vmul.f32 %v10655_v56, %v7007_v23  ;;  %v10657_v21 = vld [vmem:[#allocation155_spill] sm:$0xff]  ;;  %v7237_v31 = vpop.xlane.xlu0 %2039 }
 0x344   : > { %v1562_v25 = vmul.f32 %v10656_v42, %v7062_v40  ;;  %v2587_v17 = vsel %vm978_vm0, %v2569_v5, 0.0  ;;  %v1582_v37 = vadd.f32 %v1550_v49, %v6817_v44  ;;  %v1817_v41 = vmul.f32 %v10658_v28, %v10657_v21  ;;  %v10667_v21 = vld [vmem:[#allocation141_spill] sm:$0xff] }
 0x345   : > { %v1818_v54 = vmul.f32 %v10658_v28, %v10659_v35  ;;  %2864 = vadd.xlane.f32.xlu0 %v2863_v30  ;;  %v2570_v18 = vsel %vm2565_vm12, %v6968_v51, 0.0  ;;  %v1583_v23 = vadd.f32 %v1551_v1, %v6837_v32  ;;  %v7244_v40 = vadd.f32 %v1554_v33, %v6929_v59  ;;  %v10661_v33 = vld [vmem:[#allocation168_spill] sm:$0xff] }
 0x346   : > { %v7247_v44 = vadd.f32 %v1555_v58, %v6932_v4  ;;  %v3133_v50 = vsel %vm978_vm0, %v3115_v48, 0.0  ;;  %v1563_v6 = vmul.f32 %v10656_v42, %v7065_v34  ;;  %v1548_v49 = vmul.f32 %v10660_v61, %v6698_v27 }
 0x347   : > { %v1549_v5 = vmul.f32 %v10660_v61, %v6701_v10  ;;  %2588 = vadd.xlane.f32.xlu1 %v2587_v17  ;;  %v2572_v32 = vsel %vm2565_vm12, %v7148_v0, 0.0  ;;  %v7260_v59 = vadd.f32 %v1558_v14, %v7021_v26  ;;  %v7263_v4 = vadd.f32 %v1559_v36, %v7033_v45  ;;  %v10662_v10 = vld [vmem:[#allocation186_spill] sm:$0xff]  ;;  %v2046_v30 = vpop.xlane.xlu0 %2045  ;;  %v10663_v26 = vld [vmem:[#allocation169_spill] sm:$0xff] }
 0x348   : > { %v7266_v1 = vadd.f32 %v1562_v25, %v7081_v24  ;;  %v2590_v34 = vsel %vm978_vm0, %v2570_v18, 0.0  ;;  %v1849_v27 = vadd.f32 %v1817_v41, %v1576_v29  ;;  %v1850_v20 = vadd.f32 %v1818_v54, %v1577_v13  ;;  %v10664_v45 = vld [vmem:[#allocation205_spill] sm:$0xff]  ;;  %v10665_v36 = vld [vmem:[#allocation206_spill] sm:$0xff]  ;;  %v10666_v25 = vld [vmem:[#allocation15_spill] sm:$0xff] }
 0x349   : > { %v1819_v58 = vmul.f32 %v10662_v10, %v10661_v33  ;;  %3134 = vadd.xlane.f32.xlu0 %v3133_v50  ;;  %v2842_v48 = vsel %vm2838_vm13, %v4733_v15, 0.0  ;;  %v1820_v56 = vmul.f32 %v10662_v10, %v10663_v26  ;;  %v2090_v14 = vmul.f32 %v2046_v30, %v10664_v45  ;;  %v10669_v18 = vld [vmem:[#allocation187_spill] sm:$0xff]  ;;  %v10673_v33 = vld [vmem:[#allocation142_spill] sm:$0xff] }
 0x34a   : > { %v2091_v24 = vmul.f32 %v2046_v30, %v10665_v36  ;;  %v2596_v42 = vsel %vm978_vm0, %v2572_v32, 0.0  ;;  %v7279_v29 = vadd.f32 %v1563_v6, %v7095_v19  ;;  %v7282_v13 = vadd.f32 %v1548_v49, %v6748_v11  ;;  %v10668_v11 = vld [vmem:[#allocation172_spill] sm:$0xff]  ;;  %v10670_v6 = vld [vmem:[#allocation173_spill] sm:$0xff]  ;;  %v10676_v45 = vld [vmem:[#allocation174_spill] sm:$0xff] }
 0x34b   : > { %v7285_v17 = vadd.f32 %v1549_v5, %v10666_v25  ;;  %2591 = vadd.xlane.f32.xlu1 %v2590_v34  ;;  %v3116_v15 = vsel %vm3111_vm14, %v6968_v51, 0.0  ;;  %v1566_v28 = vmul.f32 %v10667_v21, %v7160_v52  ;;  %v7292_v41 = vadd.f32 %v2090_v14, %v1849_v27  ;;  %v2049_v49 = vpop.xlane.xlu0 %2048  ;;  %v10671_v5 = vld [vmem:[#allocation79_spill] sm:$0xff]  ;;  %v10672_v34 = vld [vmem:[#allocation82_spill] sm:$0xff]  ;;  %v10677_v14 = vld [vmem:[#allocation188_spill] sm:$0xff] }
 0x34c   : > { %v7294_v35 = vadd.f32 %v2091_v24, %v1850_v20  ;;  %v2860_v19 = vsel %vm978_vm0, %v2842_v48, 0.0  ;;  %v1851_v54 = vadd.f32 %v1819_v58, %v1578_v16  ;;  %v1823_v50 = vmul.f32 %v10669_v18, %v10668_v11  ;;  %v10678_v25 = vld [vmem:[#allocation175_spill] sm:$0xff] }
 0x34d   : > { %v1824_v61 = vmul.f32 %v10669_v18, %v10670_v6  ;;  %2597 = vadd.xlane.f32.xlu0 %v2596_v42  ;;  %v2571_v51 = vsel %vm2565_vm12, %v7055_v55, 0.0  ;;  %v1852_v52 = vadd.f32 %v1820_v56, %v1579_v46  ;;  %v2092_v32 = vmul.f32 %v2049_v49, %v10671_v5  ;;  %v7316_v46 = vld [vmem:[%s9940_s3 + $0x28] sm:$0xff]  ;;  %v10683_v6 = vld [vmem:[#allocation189_spill] sm:$0xff] }
 0x34e   : > { %v2093_v27 = vmul.f32 %v2049_v49, %v10672_v34  ;;  %v3136_v20 = vsel %vm978_vm0, %v3116_v15, 0.0  ;;  %v1567_v16 = vmul.f32 %v10667_v21, %v7163_v47  ;;  %v1552_v10 = vmul.f32 %v10673_v33, %v6803_v43  ;;  %v10679_v15 = vld [vmem:[#allocation77_spill] sm:$0xff]  ;;  %v10681_v11 = vld [vmem:[#allocation143_spill] sm:$0xff] }
 0x34f   : > { %v1553_v58 = vmul.f32 %v10673_v33, %v6814_v7  ;;  %2861 = vadd.xlane.f32.xlu1 %v2860_v19  ;;  %v2573_v30 = vsel %vm2565_vm12, %v7316_v46, 0.0  ;;  %v7322_v48 = vadd.f32 %v1566_v28, %v7182_v62  ;;  %v7324_v47 = vadd.f32 %v2092_v32, %v1851_v54  ;;  %v2055_v24 = vpop.xlane.xlu0 %2054  ;;  %v10680_v28 = vld [vmem:[#allocation76_spill] sm:$0xff] }
 0x350   : > { %v7326_v26 = vadd.f32 %v2093_v27, %v1852_v52  ;;  %v2593_v43 = vsel %vm978_vm0, %v2571_v51, 0.0  ;;  %v1855_v7 = vadd.f32 %v1823_v50, %v1582_v37  ;;  %v1856_v56 = vadd.f32 %v1824_v61, %v1583_v23  ;;  %v10682_v50 = vld [vmem:[#allocation176_spill] sm:$0xff]  ;;  %v10686_v52 = vld [vmem:[#allocation81_spill] sm:$0xff] }
 0x351   : > { %10674 = vst [vmem:[#allocation98_spill] sm:$0xff] %v7324_v47  ;;  %v1827_v36 = vmul.f32 %v10677_v14, %v10676_v45  ;;  %3137 = vadd.xlane.f32.xlu0 %v3136_v20  ;;  %v3114_v42 = vsel %vm3111_vm14, %v6923_v60, 0.0  ;;  %v1828_v62 = vmul.f32 %v10677_v14, %v10678_v25  ;;  %v2096_v21 = vmul.f32 %v2055_v24, %v10679_v15  ;;  %v10691_v45 = vld [vmem:[#allocation90_spill] sm:$0xff]  ;;  %v10696_v15 = vld [vmem:[#allocation179_spill] sm:$0xff] }
 0x352   : > { %10675 = vst [vmem:[#allocation108_spill] sm:$0xff] %v7326_v26  ;;  %v2097_v19 = vmul.f32 %v2055_v24, %v10680_v28  ;;  %v2599_v54 = vsel %vm978_vm0, %v2573_v30, 0.0  ;;  %v7340_v37 = vadd.f32 %v1567_v16, %v7185_v57  ;;  %v7343_v23 = vadd.f32 %v1552_v10, %v6840_v38  ;;  %v10688_v16 = vld [vmem:[#allocation16_spill] sm:$0xff]  ;;  %v10689_v10 = vld [vmem:[#allocation22_spill] sm:$0xff]  ;;  %v10697_v28 = vld [vmem:[#allocation157_spill] sm:$0xff] }
 0x353   : > { %v1570_v18 = vmul.f32 %v10681_v11, %v7179_v63  ;;  %2594 = vadd.xlane.f32.xlu1 %v2593_v43  ;;  %v3117_v60 = vsel %vm3111_vm14, %v7055_v55, 0.0  ;;  %v1831_v61 = vmul.f32 %v10683_v6, %v10682_v50  ;;  %v7352_v49 = vadd.f32 %v2096_v21, %v1855_v7  ;;  %v10687_v63 = vld [vmem:[#allocation177_spill] sm:$0xff]  ;;  %v2061_v34 = vpop.xlane.xlu0 %2060  ;;  %v10690_v7 = vld [vmem:[#allocation144_spill] sm:$0xff]  ;;  %v10694_v25 = vld [vmem:[#allocation178_spill] sm:$0xff] }
 0x354   : > { %v7354_v51 = vadd.f32 %v2097_v19, %v1856_v56  ;;  %v3130_v57 = vsel %vm978_vm0, %v3114_v42, 0.0  ;;  %v7358_v38 = vadd.f32 %v1553_v58, %v10686_v52  ;;  %v1859_v5 = vadd.f32 %v1827_v36, %v7244_v40  ;;  %v10698_v19 = vld [vmem:[#allocation192_spill] sm:$0xff]  ;;  %v10701_v50 = vld [vmem:[#allocation85_spill] sm:$0xff] }
 0x355   : > { %10684 = vst [vmem:[#allocation104_spill] sm:$0xff] %v7352_v49  ;;  %v1832_v32 = vmul.f32 %v10683_v6, %v10687_v63  ;;  %2600 = vadd.xlane.f32.xlu0 %v2599_v54  ;;  %v2300_v27 = vsel %vm2292_vm11, %v7316_v46, 0.0  ;;  %v1860_v20 = vadd.f32 %v1828_v62, %v7247_v44  ;;  %v2100_v33 = vmul.f32 %v2061_v34, %v10688_v16 }
 0x356   : > { %10685 = vst [vmem:[#allocation27_spill] sm:$0xff] %v7354_v51  ;;  %v2101_v30 = vmul.f32 %v2061_v34, %v10689_v10  ;;  %v3139_v58 = vsel %vm978_vm0, %v3117_v60, 0.0  ;;  %v1571_v40 = vmul.f32 %v10681_v11, %v7198_v9  ;;  %v7373_v43 = vadd.f32 %v1570_v18, %v7201_v8  ;;  %v10695_v8 = vld [vmem:[#allocation191_spill] sm:$0xff]  ;;  %v10699_v11 = vld [vmem:[#allocation158_spill] sm:$0xff]  ;;  %v10700_v60 = vld [vmem:[#allocation21_spill] sm:$0xff] }
 0x357   : > { %v1556_v56 = vmul.f32 %v10690_v7, %v6890_v53  ;;  %v1557_v14 = vmul.f32 %v10690_v7, %v10691_v45  ;;  %3131 = vadd.xlane.f32.xlu1 %v3130_v57  ;;  %v1863_v44 = vadd.f32 %v1831_v61, %v7260_v59  ;;  %v7380_v36 = vadd.f32 %v2100_v33, %v1859_v5  ;;  %v2067_v21 = vpop.xlane.xlu0 %2066  ;;  %v10702_v57 = vld [vmem:[#allocation87_spill] sm:$0xff]  ;;  %v10705_v34 = vld [vmem:[#allocation193_spill] sm:$0xff]  ;;  %v10710_v45 = vld [vmem:[#allocation194_spill] sm:$0xff] }
 0x358   : > { %v7382_v24 = vadd.f32 %v2101_v30, %v1860_v20  ;;  %v2326_v42 = vsel %vm978_vm0, %v2300_v27, 0.0  ;;  %v1864_v9 = vadd.f32 %v1832_v32, %v7263_v4  ;;  %v1835_v62 = vmul.f32 %v10695_v8, %v10694_v25  ;;  %v10703_v5 = vld [vmem:[#allocation23_spill] sm:$0xff]  ;;  %v10704_v32 = vld [vmem:[#allocation180_spill] sm:$0xff] }
 0x359   : > { %10692 = vst [vmem:[#allocation109_spill] sm:$0xff] %v7380_v36  ;;  %v1836_v53 = vmul.f32 %v10695_v8, %v10696_v15  ;;  %3140 = vadd.xlane.f32.xlu0 %v3139_v58  ;;  %v2844_v59 = vsel %vm2838_vm13, %v7055_v55, 0.0  ;;  %v1821_v54 = vmul.f32 %v10698_v19, %v10697_v28  ;;  %v1822_v18 = vmul.f32 %v10698_v19, %v10699_v11  ;;  %v7404_v55 = vpop.xlane.xlu1 %2042  ;;  %v10711_v25 = vld [vmem:[#allocation84_spill] sm:$0xff]  ;;  %v10717_v11 = vld [vmem:[#allocation6_spill] sm:$0xff] }
 0x35a   : > { %10693 = vst [vmem:[#allocation105_spill] sm:$0xff] %v7382_v24  ;;  %v2104_v4 = vmul.f32 %v2067_v21, %v10700_v60  ;;  %v2105_v6 = vmul.f32 %v2067_v21, %v10701_v50  ;;  %v1603_v61 = vadd.f32 %v1571_v40, %v7209_v12  ;;  %v1588_v52 = vadd.f32 %v1556_v56, %v10702_v57  ;;  %v7414_v12 = vld [vmem:[%s9940_s3 + $0x30] sm:$0xff]  ;;  %v10708_v40 = vld [vmem:[#allocation181_spill] sm:$0xff]  ;;  %v10709_v56 = vld [vmem:[#allocation159_spill] sm:$0xff] }
 0x35b   : > { %v1589_v63 = vadd.f32 %v1557_v14, %v10703_v5  ;;  %v1839_v27 = vmul.f32 %v10705_v34, %v10704_v32  ;;  %2327 = vadd.xlane.f32.xlu1 %v2326_v42  ;;  %v2866_v33 = vsel %vm978_vm0, %v2844_v59, 0.0  ;;  %v2301_v10 = vsel %vm2292_vm11, %v7414_v12, 0.0  ;;  %v10712_v15 = vld [vmem:[#allocation80_spill] sm:$0xff]  ;;  %v10719_v50 = vld [vmem:[#allocation195_spill] sm:$0xff] }
 0x35c   : > { %v7406_v20 = vadd.f32 %v2104_v4, %v1863_v44  ;;  %v7408_v16 = vadd.f32 %v2105_v6, %v1864_v9  ;;  %v1867_v30 = vadd.f32 %v1835_v62, %v7266_v1  ;;  %v1868_v58 = vadd.f32 %v1836_v53, %v7279_v29  ;;  %v2073_v44 = vpop.xlane.xlu0 %2072  ;;  %v10713_v1 = vld [vmem:[#allocation160_spill] sm:$0xff]  ;;  %v10718_v4 = vld [vmem:[#allocation182_spill] sm:$0xff]  ;;  %v10720_v57 = vld [vmem:[#allocation183_spill] sm:$0xff] }
 0x35d   : > { %v1840_v7 = vmul.f32 %v10705_v34, %v10708_v40  ;;  %v1825_v14 = vmul.f32 %v10710_v45, %v10709_v56  ;;  %v1853_v42 = vadd.f32 %v1821_v54, %v7282_v13  ;;  %v1854_v9 = vadd.f32 %v1822_v18, %v7285_v17  ;;  %v2052_v62 = vpop.xlane.xlu1 %2051  ;;  %v10716_v19 = vld [vmem:[#allocation4_spill] sm:$0xff]  ;;  %v10727_v56 = vld [vmem:[#allocation162_spill] sm:$0xff] }
 0x35e   : > { %10706 = vst [vmem:[#allocation26_spill] sm:$0xff] %v7406_v20  ;;  %10707 = vst [vmem:[#allocation112_spill] sm:$0xff] %v7408_v16  ;;  %v2108_v8 = vmul.f32 %v2073_v44, %v10711_v25  ;;  %v2109_v21 = vmul.f32 %v2073_v44, %v10712_v15  ;;  %v1871_v59 = vadd.f32 %v1839_v27, %v7322_v48  ;;  %v2329_v53 = vsel %vm978_vm0, %v2301_v10, 0.0  ;;  %v10730_v25 = vld [vmem:[#allocation8_spill] sm:$0xff]  ;;  %v10731_v15 = vld [vmem:[#allocation5_spill] sm:$0xff] }
 0x35f   : > { %v1826_v29 = vmul.f32 %v10710_v45, %v10713_v1  ;;  %2867 = vadd.xlane.f32.xlu1 %v2866_v33  ;;  %v2845_v28 = vsel %vm2838_vm13, %v7148_v0, 0.0  ;;  %v2094_v54 = vmul.f32 %v2052_v62, %v10716_v19  ;;  %v2095_v18 = vmul.f32 %v2052_v62, %v10717_v11  ;;  %v10723_v33 = vld [vmem:[#allocation86_spill] sm:$0xff]  ;;  %v10732_v1 = vld [vmem:[#allocation89_spill] sm:$0xff] }
 0x360   : > { %v7436_v13 = vadd.f32 %v2108_v8, %v1867_v30  ;;  %v7438_v17 = vadd.f32 %v2109_v21, %v1868_v58  ;;  %v1872_v48 = vadd.f32 %v1840_v7, %v7340_v37  ;;  %v1857_v60 = vadd.f32 %v1825_v14, %v7343_v23  ;;  %v2079_v32 = vpop.xlane.xlu0 %2078  ;;  %v10724_v30 = vld [vmem:[#allocation91_spill] sm:$0xff]  ;;  %v10725_v37 = vld [vmem:[#allocation161_spill] sm:$0xff]  ;;  %v10726_v7 = vld [vmem:[#allocation196_spill] sm:$0xff] }
 0x361   : > { %v1843_v6 = vmul.f32 %v10719_v50, %v10718_v4  ;;  %v1844_v5 = vmul.f32 %v10719_v50, %v10720_v57  ;;  %v7448_v34 = vadd.f32 %v2094_v54, %v1853_v42  ;;  %v7450_v27 = vadd.f32 %v2095_v18, %v1854_v9  ;;  %v2058_v14 = vpop.xlane.xlu1 %2057  ;;  %v10734_v62 = vld [vmem:[#allocation94_spill] sm:$0xff]  ;;  %v10738_v4 = vld [vmem:[#allocation88_spill] sm:$0xff] }
 0x362   : > { %10714 = vst [vmem:[#allocation116_spill] sm:$0xff] %v7436_v13  ;;  %10715 = vst [vmem:[#allocation110_spill] sm:$0xff] %v7438_v17  ;;  %v2112_v10 = vmul.f32 %v2079_v32, %v10723_v33  ;;  %v2113_v58 = vmul.f32 %v2079_v32, %v10724_v30  ;;  %v1858_v40 = vadd.f32 %v1826_v29, %v7358_v38  ;;  %v2869_v44 = vsel %vm978_vm0, %v2845_v28, 0.0  ;;  %v10733_v38 = vld [vmem:[#allocation146_spill] sm:$0xff]  ;;  %v10737_v28 = vld [vmem:[#allocation92_spill] sm:$0xff] }
 0x363   : > { %10721 = vst [vmem:[#allocation106_spill] sm:$0xff] %v7448_v34  ;;  %10722 = vst [vmem:[#allocation113_spill] sm:$0xff] %v7450_v27  ;;  %v1829_v23 = vmul.f32 %v10726_v7, %v10725_v37  ;;  %v1830_v45 = vmul.f32 %v10726_v7, %v10727_v56  ;;  %2330 = vadd.xlane.f32.xlu1 %v2329_v53  ;;  %v2098_v8 = vmul.f32 %v2058_v14, %v10730_v25  ;;  %v10739_v33 = vld [vmem:[#allocation164_spill] sm:$0xff]  ;;  %v10746_v56 = vld [vmem:[#allocation97_spill] sm:$0xff] }
 0x364   : > { %v7460_v42 = vadd.f32 %v2112_v10, %v1871_v59  ;;  %v7462_v9 = vadd.f32 %v2113_v58, %v1872_v48  ;;  %v2099_v21 = vmul.f32 %v2058_v14, %v10731_v15  ;;  %v1560_v29 = vmul.f32 %v10733_v38, %v10732_v1  ;;  %v2085_v11 = vpop.xlane.xlu0 %2084  ;;  %v10740_v10 = vld [vmem:[#allocation198_spill] sm:$0xff]  ;;  %v10741_v58 = vld [vmem:[#allocation165_spill] sm:$0xff]  ;;  %v10750_v25 = vld [vmem:[#allocation147_spill] sm:$0xff] }
 0x365   : > { %v1561_v19 = vmul.f32 %v10733_v38, %v10734_v62  ;;  %v1875_v54 = vadd.f32 %v1843_v6, %v7373_v43  ;;  %v1876_v53 = vadd.f32 %v1844_v5, %v1603_v61  ;;  %v7471_v18 = vadd.f32 %v2098_v8, %v1857_v60  ;;  %v2064_v43 = vpop.xlane.xlu1 %2063  ;;  %v10744_v6 = vld [vmem:[#allocation7_spill] sm:$0xff]  ;;  %v10747_v14 = vld [vmem:[#allocation33_spill] sm:$0xff]  ;;  %v10753_v38 = vld [vmem:[#allocation100_spill] sm:$0xff] }
 0x366   : > { %10728 = vst [vmem:[#allocation117_spill] sm:$0xff] %v7460_v42  ;;  %10729 = vst [vmem:[#allocation111_spill] sm:$0xff] %v7462_v9  ;;  %v7473_v59 = vadd.f32 %v2099_v21, %v1858_v40  ;;  %v2116_v48 = vmul.f32 %v2085_v11, %v10737_v28  ;;  %v2117_v50 = vmul.f32 %v2085_v11, %v10738_v4  ;;  %v10745_v40 = vld [vmem:[#allocation11_spill] sm:$0xff]  ;;  %v10752_v21 = vld [vmem:[#allocation96_spill] sm:$0xff] }
 0x367   : > { %10735 = vst [vmem:[#allocation107_spill] sm:$0xff] %v7471_v18  ;;  %v1861_v57 = vadd.f32 %v1829_v23, %v1588_v52  ;;  %v1862_v32 = vadd.f32 %v1830_v45, %v1589_v63  ;;  %v1833_v30 = vmul.f32 %v10740_v10, %v10739_v33  ;;  %v1834_v37 = vmul.f32 %v10740_v10, %v10741_v58  ;;  %v10748_v63 = vld [vmem:[#allocation25_spill] sm:$0xff]  ;;  %v10749_v45 = vld [vmem:[#allocation99_spill] sm:$0xff]  ;;  %v10756_v28 = vld [vmem:[#allocation102_spill] sm:$0xff] }
 0x368   : > { %10736 = vst [vmem:[#allocation29_spill] sm:$0xff] %v7473_v59  ;;  %2870 = vadd.xlane.f32.xlu1 %v2869_v44  ;;  %v7481_v61 = vadd.f32 %v2116_v48, %v1875_v54  ;;  %v7483_v60 = vadd.f32 %v2117_v50, %v1876_v53  ;;  %v2102_v5 = vmul.f32 %v2064_v43, %v10744_v6  ;;  %v10751_v15 = vld [vmem:[#allocation103_spill] sm:$0xff]  ;;  %v10757_v4 = vld [vmem:[#allocation166_spill] sm:$0xff]  ;;  %v10758_v50 = vld [vmem:[#allocation93_spill] sm:$0xff] }
 0x369   : > { %v2103_v7 = vmul.f32 %v2064_v43, %v10745_v40  ;;  %v1295_v52 = vmul.f32 %v10747_v14, %v10746_v56  ;;  %v1296_v23 = vmul.f32 %v10747_v14, %v10748_v63  ;;  %v1564_v8 = vmul.f32 %v10750_v25, %v10749_v45  ;;  %v10759_v10 = vld [vmem:[#allocation167_spill] sm:$0xff]  ;;  %v2070_v43 = vpop.xlane.xlu1 %2069  ;;  %v10762_v40 = vld [vmem:[#allocation24_spill] sm:$0xff]  ;;  %v10763_v56 = vld [vmem:[#allocation101_spill] sm:$0xff] }
 0x36a   : > { %10742 = vst [vmem:[#allocation28_spill] sm:$0xff] %v7481_v61  ;;  %10743 = vst [vmem:[#allocation118_spill] sm:$0xff] %v7483_v60  ;;  %v1565_v44 = vmul.f32 %v10750_v25, %v10751_v15  ;;  %v1592_v1 = vadd.f32 %v1560_v29, %v10752_v21  ;;  %v1593_v62 = vadd.f32 %v1561_v19, %v10753_v38  ;;  %v10760_v19 = vld [vmem:[#allocation12_spill] sm:$0xff]  ;;  %v10765_v63 = vld [vmem:[#allocation17_spill] sm:$0xff] }
 0x36b   : > { %v7497_v54 = vadd.f32 %v2102_v5, %v1861_v57  ;;  %v7499_v53 = vadd.f32 %v2103_v7, %v1862_v32  ;;  %v1469_v11 = vmul.f32 %v6403_v39, %v7157_v2  ;;  %v1470_v48 = vmul.f32 %v6406_v22, %v10756_v28  ;;  %v10761_v5 = vld [vmem:[#allocation13_spill] sm:$0xff]  ;;  %v10764_v14 = vld [vmem:[#allocation60_spill] sm:$0xff]  ;;  %v10766_v25 = vld [vmem:[#allocation62_spill] sm:$0xff] }
 0x36c   : > { %v1837_v33 = vmul.f32 %v10758_v50, %v10757_v4  ;;  %v1838_v58 = vmul.f32 %v10758_v50, %v10759_v10  ;;  %v1865_v29 = vadd.f32 %v1833_v30, %v1592_v1  ;;  %v1866_v6 = vadd.f32 %v1834_v37, %v1593_v62  ;;  %v10767_v21 = vld [vmem:[#allocation148_spill] sm:$0xff]  ;;  %v10771_v10 = vld [vmem:[#allocation170_spill] sm:$0xff]  ;;  %v7796_v60 = vld [vmem:[%s9940_s3 + $0x68] sm:$0xff] }
 0x36d   : > { %10754 = vst [vmem:[#allocation114_spill] sm:$0xff] %v7497_v54  ;;  %10755 = vst [vmem:[#allocation31_spill] sm:$0xff] %v7499_v53  ;;  %v2106_v57 = vmul.f32 %v2070_v43, %v10760_v19  ;;  %v2107_v32 = vmul.f32 %v2070_v43, %v10761_v5  ;;  %v1596_v7 = vadd.f32 %v1564_v8, %v10762_v40  ;;  %v2076_v50 = vpop.xlane.xlu1 %2075  ;;  %v10772_v43 = vld [vmem:[#allocation95_spill] sm:$0xff]  ;;  %v10778_v40 = vld [vmem:[#allocation36_spill] sm:$0xff]  ;;  %v2308_v61 = vsel %vm2292_vm11, %v7796_v60, 0.0 }
 0x36e   : > { %v1597_v2 = vadd.f32 %v1565_v44, %v10763_v56  ;;  %v1055_v45 = vmul.f32 %v10765_v63, %v10764_v14  ;;  %v1056_v15 = vmul.f32 %v10765_v63, %v10766_v25  ;;  %v1568_v38 = vmul.f32 %v10767_v21, %v1469_v11  ;;  %v10770_v44 = vld [vmem:[#allocation34_spill] sm:$0xff]  ;;  %v10773_v5 = vld [vmem:[#allocation171_spill] sm:$0xff] }
 0x36f   : > { %v1569_v28 = vmul.f32 %v10767_v21, %v1470_v48  ;;  %v7519_v30 = vadd.f32 %v2106_v57, %v1865_v29  ;;  %v7521_v37 = vadd.f32 %v2107_v32, %v1866_v6  ;;  %v1869_v4 = vadd.f32 %v1837_v33, %v1596_v7  ;;  %2423 = vrot.lane.b32.xlu0 %v10770_v44, %s4767_s25  ;;  %v10774_v48 = vld [vmem:[#allocation14_spill] sm:$0xff]  ;;  %v10775_v57 = vld [vmem:[#allocation83_spill] sm:$0xff] }
 0x370   : > { %v1327_v1 = vadd.f32 %v1295_v52, %v1055_v45  ;;  %v1328_v62 = vadd.f32 %v1296_v23, %v1056_v15  ;;  %v1870_v8 = vadd.f32 %v1838_v58, %v1597_v2  ;;  %v1841_v19 = vmul.f32 %v10772_v43, %v10771_v10  ;;  %v10779_v2 = vld [vmem:[#allocation78_spill] sm:$0xff]  ;;  %v10780_v45 = vld [vmem:[#allocation20_spill] sm:$0xff] }
 0x371   : > { %10768 = vst [vmem:[#allocation124_spill] sm:$0xff] %v7519_v30  ;;  %10769 = vst [vmem:[#allocation120_spill] sm:$0xff] %v7521_v37  ;;  %v1842_v11 = vmul.f32 %v10772_v43, %v10773_v5  ;;  %v2110_v29 = vmul.f32 %v2076_v50, %v10774_v48  ;;  %v2111_v6 = vmul.f32 %v2076_v50, %v10775_v57  ;;  %v2082_v58 = vpop.xlane.xlu1 %2081  ;;  %v7560_v43 = vld [vmem:[%s9940_s3 + $0x38] sm:$0xff]  ;;  %v10787_v57 = vld [vmem:[#allocation38_spill] sm:$0xff]  ;;  %v2581_v20 = vsel %vm2565_vm12, %v7796_v60, 0.0 }
 0x372   : > { %v1600_v32 = vadd.f32 %v1568_v38, %v1327_v1  ;;  %v1601_v52 = vadd.f32 %v1569_v28, %v1328_v62  ;;  %v2114_v63 = vmul.f32 %v2082_v58, %v10779_v2  ;;  %v2115_v15 = vmul.f32 %v2082_v58, %v10780_v45  ;;  %v10783_v38 = vld [vmem:[#allocation39_spill] sm:$0xff]  ;;  %v10784_v28 = vld [vmem:[#allocation37_spill] sm:$0xff]  ;;  %v10788_v45 = vld [vmem:[#allocation40_spill] sm:$0xff] }
 0x373   : > { %v7531_v23 = vadd.f32 %v2110_v29, %v1869_v4  ;;  %v7533_v33 = vadd.f32 %v2111_v6, %v1870_v8  ;;  %2457 = vrot.lane.b32.xlu0 %v10778_v40, %s4767_s25  ;;  %v10785_v1 = vld [vmem:[#allocation35_spill] sm:$0xff]  ;;  %v2574_v62 = vsel %vm2565_vm12, %v7414_v12, 0.0  ;;  %v2846_v8 = vsel %vm2838_vm13, %v7316_v46, 0.0  ;;  %v10786_v29 = vld [vmem:[#allocation42_spill] sm:$0xff] }
 0x374   : > { %v1873_v7 = vadd.f32 %v1841_v19, %v1600_v32  ;;  %v1874_v56 = vadd.f32 %v1842_v11, %v1601_v52  ;;  %v2602_v4 = vsel %vm978_vm0, %v2574_v62, 0.0  ;;  %v2872_v50 = vsel %vm978_vm0, %v2846_v8, 0.0 }
 0x375   : > { %10776 = vst [vmem:[#allocation123_spill] sm:$0xff] %v7531_v23  ;;  %10777 = vst [vmem:[#allocation119_spill] sm:$0xff] %v7533_v33  ;;  %v2302_v19 = vsel %vm2292_vm11, %v7560_v43, 0.0  ;;  %v3118_v11 = vsel %vm3111_vm14, %v7148_v0, 0.0  ;;  %v7587_v0 = vld [vmem:[%s9940_s3 + $0x40] sm:$0xff]  ;;  %v2847_v52 = vsel %vm2838_vm13, %v7414_v12, 0.0 }
 0x376   : > { %v7539_v21 = vadd.f32 %v2114_v63, %v1873_v7  ;;  %v7541_v10 = vadd.f32 %v2115_v15, %v1874_v56  ;;  %v2332_v5 = vsel %vm978_vm0, %v2302_v19, 0.0  ;;  %v3142_v48 = vsel %vm978_vm0, %v3118_v11, 0.0 }
 0x377   : > { %v2303_v6 = vsel %vm2292_vm11, %v7587_v0, 0.0  ;;  %v2875_v58 = vsel %vm978_vm0, %v2847_v52, 0.0  ;;  %v3119_v7 = vsel %vm3111_vm14, %v7316_v46, 0.0  ;;  %v2575_v2 = vsel %vm2565_vm12, %v7560_v43, 0.0  ;;  %v10789_v46 = vld [vmem:[#allocation43_spill] sm:$0xff] }
 0x378   : > { %10781 = vst [vmem:[#allocation128_spill] sm:$0xff] %v7539_v21  ;;  %10782 = vst [vmem:[#allocation133_spill] sm:$0xff] %v7541_v10  ;;  %v2335_v32 = vsel %vm978_vm0, %v2303_v6, 0.0  ;;  %v3145_v56 = vsel %vm978_vm0, %v3119_v7, 0.0  ;;  %v2605_v63 = vsel %vm978_vm0, %v2575_v2, 0.0  ;;  %v2576_v15 = vsel %vm2565_vm12, %v7587_v0, 0.0 }
 0x379   : > { %2186 = vrot.lane.b32.xlu1 %v10783_v38, %s4766_s14  ;;  %v2608_v62 = vsel %vm978_vm0, %v2576_v15, 0.0  ;;  %v3120_v11 = vsel %vm3111_vm14, %v7414_v12, 0.0  ;;  %v10790_v6 = vld [vmem:[#allocation46_spill] sm:$0xff]  ;;  %v7661_v12 = vld [vmem:[%s9940_s3 + $0x50] sm:$0xff] }
 0x37a   : > { %v10792_v15 = vld [vmem:[#allocation44_spill] sm:$0xff]  ;;  %v3124_v23 = vsel %vm3111_vm14, %v7661_v12, 0.0 }
 0x37b   : > { %v7863_v21 = vld [vmem:[%s9940_s3 + $0x70] sm:$0xff] }
 0x37d   : > { %2425 = vrot.lane.b32.xlu1 %v10784_v28, %s4767_s25 }
 0x381   : > { %2455 = vrot.lane.b32.xlu1 %v10785_v1, %s4767_s25 }
 0x392   : > { %2603 = vadd.xlane.f32.xlu0 %v2602_v4  ;;  %v2848_v4 = vsel %vm2838_vm13, %v7560_v43, 0.0 }
 0x393   : > { %v2878_v8 = vsel %vm978_vm0, %v2848_v4, 0.0 }
 0x396   : > { %2873 = vadd.xlane.f32.xlu0 %v2872_v50  ;;  %v7634_v50 = vld [vmem:[%s9940_s3 + $0x48] sm:$0xff] }
 0x397   : > { %v2304_v19 = vsel %vm2292_vm11, %v7634_v50, 0.0  ;;  %v2577_v2 = vsel %vm2565_vm12, %v7634_v50, 0.0 }
 0x3a5   : > { %2333 = vadd.xlane.f32.xlu1 %v2332_v5  ;;  %v2338_v5 = vsel %vm978_vm0, %v2304_v19, 0.0 }
 0x3a9   : > { %3143 = vadd.xlane.f32.xlu1 %v3142_v48  ;;  %v3148_v48 = vsel %vm978_vm0, %v3120_v11, 0.0  ;;  %v2578_v11 = vsel %vm2565_vm12, %v7661_v12, 0.0 }
 0x3ac   : > { %2188 = vrot.lane.b32.xlu0 %v10786_v29, %s4766_s14 }
 0x3b0   : > { %2696 = vrot.lane.b32.xlu0 %v10770_v44, %s4768_s28 }
 0x3b4   : > { %2728 = vrot.lane.b32.xlu0 %v10785_v1, %s4768_s28 }
 0x3ba   : > { %2427 = vrot.lane.b32.xlu1 %v10787_v57, %s4767_s25 }
 0x3be   : > { %2459 = vrot.lane.b32.xlu1 %v10783_v38, %s4767_s25 }
 0x3c2   : > { %2698 = vrot.lane.b32.xlu1 %v10784_v28, %s4768_s28 }
 0x3c6   : > { %2730 = vrot.lane.b32.xlu1 %v10778_v40, %s4768_s28 }
 0x3d3   : > { %2336 = vadd.xlane.f32.xlu0 %v2335_v32  ;;  %v10791_v32 = vld [vmem:[#allocation41_spill] sm:$0xff] }
 0x3d7   : > { %2876 = vadd.xlane.f32.xlu0 %v2875_v58  ;;  %v2849_v58 = vsel %vm2838_vm13, %v7587_v0, 0.0 }
 0x3d8   : > { %v2881_v7 = vsel %vm978_vm0, %v2849_v58, 0.0 }
 0x3db   : > { %3146 = vadd.xlane.f32.xlu0 %v3145_v56 }
 0x3ea   : > { %2606 = vadd.xlane.f32.xlu1 %v2605_v63  ;;  %v2611_v63 = vsel %vm978_vm0, %v2577_v2, 0.0 }
 0x3f1   : > { %2429 = vrot.lane.b32.xlu0 %v10788_v45, %s4767_s25 }
 0x3f5   : > { %2732 = vrot.lane.b32.xlu0 %v10783_v38, %s4768_s28 }
 0x3f9   : > { %2971 = vrot.lane.b32.xlu0 %v10784_v28, %s4769_s15 }
 0x3fb   : > { %2190 = vrot.lane.b32.xlu1 %v10789_v46, %s4766_s14 }
 0x3fd   : > { %3003 = vrot.lane.b32.xlu0 %v10778_v40, %s4769_s15 }
 0x3ff   : > { %2461 = vrot.lane.b32.xlu1 %v10786_v29, %s4767_s25 }
 0x403   : > { %2700 = vrot.lane.b32.xlu1 %v10787_v57, %s4768_s28 }
 0x407   : > { %2969 = vrot.lane.b32.xlu1 %v10770_v44, %s4769_s15 }
 0x40b   : > { %3001 = vrot.lane.b32.xlu1 %v10785_v1, %s4769_s15 }
 0x41c   : > { %2609 = vadd.xlane.f32.xlu0 %v2608_v62  ;;  %v7696_v62 = vld [vmem:[%s9940_s3 + $0x58] sm:$0xff] }
 0x41d   : > { %v2852_v42 = vsel %vm2838_vm13, %v7696_v62, 0.0  ;;  %v3125_v54 = vsel %vm3111_vm14, %v7696_v62, 0.0 }
 0x41e   : > { %v3163_v24 = vsel %vm978_vm0, %v3125_v54, 0.0 }
 0x420   : > { %2879 = vadd.xlane.f32.xlu0 %v2878_v8  ;;  %v2850_v8 = vsel %vm2838_vm13, %v7634_v50, 0.0 }
 0x421   : > { %v2884_v19 = vsel %vm978_vm0, %v2850_v8, 0.0  ;;  %v3123_v8 = vsel %vm3111_vm14, %v7634_v50, 0.0  ;;  %v10802_v50 = vld [vmem:[#allocation48_spill] sm:$0xff] }
 0x42f   : > { %2339 = vadd.xlane.f32.xlu1 %v2338_v5 }
 0x433   : > { %3149 = vadd.xlane.f32.xlu1 %v3148_v48  ;;  %v2614_v48 = vsel %vm978_vm0, %v2578_v11, 0.0 }
 0x436   : > { %2192 = vrot.lane.b32.xlu0 %v10790_v6, %s4766_s14 }
 0x43a   : > { %2702 = vrot.lane.b32.xlu0 %v10788_v45, %s4768_s28 }
 0x43e   : > { %2973 = vrot.lane.b32.xlu0 %v10787_v57, %s4769_s15  ;;  %v2305_v57 = vsel %vm2292_vm11, %v7661_v12, 0.0 }
 0x43f   : > { %v2341_v52 = vsel %vm978_vm0, %v2305_v57, 0.0  ;;  %v10794_v57 = vld [vmem:[#allocation45_spill] sm:$0xff] }
 0x444   : > { %2431 = vrot.lane.b32.xlu1 %v10791_v32, %s4767_s25 }
 0x448   : > { %2463 = vrot.lane.b32.xlu1 %v10789_v46, %s4767_s25 }
 0x44c   : > { %2734 = vrot.lane.b32.xlu1 %v10786_v29, %s4768_s28 }
 0x450   : > { %3005 = vrot.lane.b32.xlu1 %v10783_v38, %s4769_s15  ;;  %v3121_v38 = vsel %vm3111_vm14, %v7560_v43, 0.0  ;;  %v10793_v43 = vld [vmem:[#allocation47_spill] sm:$0xff] }
 0x451   : > { %v3151_v56 = vsel %vm978_vm0, %v3121_v38, 0.0 }
 0x45d   : > { %2342 = vadd.xlane.f32.xlu0 %v2341_v52  ;;  %v7716_v52 = vpop.permute.xlu0 %2152 }
 0x461   : > { %2882 = vadd.xlane.f32.xlu0 %v2881_v7  ;;  %v7722_v58 = vpop.permute.xlu0 %2158  ;;  %v7728_v7 = vpop.permute.xlu1 %2150 }
 0x462   : > { %10796 = vst [vmem:[#allocation115_spill] sm:$0xff] %v7722_v58 }
 0x465   : > { %3152 = vadd.xlane.f32.xlu0 %v3151_v56  ;;  %v7732_v38 = vpop.permute.xlu1 %2154  ;;  %v7739_v56 = vld [vmem:[%s9940_s3 + $0x60] sm:$0xff]  ;;  %v7744_v2 = vpop.permute.xlu0 %2162 }
 0x466   : > { %10797 = vst [vmem:[#allocation125_spill] sm:$0xff] %v7744_v2  ;;  %v2580_v17 = vsel %vm2565_vm12, %v7739_v56, 0.0  ;;  %v2853_v16 = vsel %vm2838_vm13, %v7739_v56, 0.0  ;;  %v3126_v2 = vsel %vm3111_vm14, %v7739_v56, 0.0 }
 0x467   : > { %v2620_v13 = vsel %vm978_vm0, %v2580_v17, 0.0  ;;  %v2893_v53 = vsel %vm978_vm0, %v2853_v16, 0.0 }
 0x474   : > { %2612 = vadd.xlane.f32.xlu1 %v2611_v63 }
 0x47b   : > { %2433 = vrot.lane.b32.xlu0 %v10792_v15, %s4767_s25 }
 0x47f   : > { %2736 = vrot.lane.b32.xlu0 %v10789_v46, %s4768_s28 }
 0x483   : > { %3007 = vrot.lane.b32.xlu0 %v10786_v29, %s4769_s15  ;;  %v2306_v29 = vsel %vm2292_vm11, %v7696_v62, 0.0 }
 0x484   : > { %v2344_v4 = vsel %vm978_vm0, %v2306_v29, 0.0  ;;  %v2851_v29 = vsel %vm2838_vm13, %v7661_v12, 0.0 }
 0x485   : > { %2194 = vrot.lane.b32.xlu1 %v10793_v43, %s4766_s14 }
 0x489   : > { %2465 = vrot.lane.b32.xlu1 %v10790_v6, %s4767_s25 }
 0x48d   : > { %2704 = vrot.lane.b32.xlu1 %v10791_v32, %s4768_s28 }
 0x491   : > { %2975 = vrot.lane.b32.xlu1 %v10788_v45, %s4769_s15  ;;  %v3122_v45 = vsel %vm3111_vm14, %v7587_v0, 0.0  ;;  %v10795_v0 = vld [vmem:[#allocation50_spill] sm:$0xff] }
 0x492   : > { %v3154_v5 = vsel %vm978_vm0, %v3122_v45, 0.0 }
 0x4a2   : > { %2345 = vadd.xlane.f32.xlu0 %v2344_v4  ;;  %v7751_v4 = vpop.permute.xlu0 %2166 }
 0x4a3   : > { %10798 = vst [vmem:[#allocation75_spill] sm:$0xff] %v7751_v4 }
 0x4a6   : > { %2885 = vadd.xlane.f32.xlu0 %v2884_v19  ;;  %v3157_v19 = vsel %vm978_vm0, %v3123_v8, 0.0  ;;  %v7757_v45 = vpop.permute.xlu0 %2170 }
 0x4a7   : > { %10799 = vst [vmem:[#allocation74_spill] sm:$0xff] %v7757_v45 }
 0x4aa   : > { %3155 = vadd.xlane.f32.xlu0 %v3154_v5  ;;  %v2579_v5 = vsel %vm2565_vm12, %v7696_v62, 0.0 }
 0x4ab   : > { %v2617_v11 = vsel %vm978_vm0, %v2579_v5, 0.0 }
 0x4b5   : > { %2615 = vadd.xlane.f32.xlu1 %v2614_v48  ;;  %v7763_v48 = vpop.permute.xlu1 %2156 }
 0x4c0   : > { %2435 = vrot.lane.b32.xlu0 %v10794_v57, %s4767_s25 }
 0x4c4   : > { %2738 = vrot.lane.b32.xlu0 %v10790_v6, %s4768_s28 }
 0x4c6   : > { %2196 = vrot.lane.b32.xlu1 %v10795_v0, %s4766_s14 }
 0x4c8   : > { %3009 = vrot.lane.b32.xlu0 %v10789_v46, %s4769_s15  ;;  %v2307_v46 = vsel %vm2292_vm11, %v7739_v56, 0.0  ;;  %v10845_v56 = vld [vmem:[#allocation58_spill] sm:$0xff] }
 0x4c9   : > { %v2347_v63 = vsel %vm978_vm0, %v2307_v46, 0.0  ;;  %v7765_v46 = vpop.permute.xlu1 %2160 }
 0x4ca   : > { %2467 = vrot.lane.b32.xlu1 %v10793_v43, %s4767_s25  ;;  %10800 = vst [vmem:[#allocation9_spill] sm:$0xff] %v7765_v46 }
 0x4ce   : > { %2706 = vrot.lane.b32.xlu1 %v10792_v15, %s4768_s28 }
 0x4d2   : > { %2977 = vrot.lane.b32.xlu1 %v10791_v32, %s4769_s15  ;;  %v2887_v32 = vsel %vm978_vm0, %v2851_v29, 0.0  ;;  %v7771_v29 = vpop.permute.xlu1 %2164 }
 0x4d3   : > { %10803 = vst [vmem:[#allocation122_spill] sm:$0xff] %v7771_v29 }
 0x4e7   : > { %2348 = vadd.xlane.f32.xlu0 %v2347_v63  ;;  %v7767_v63 = vpop.permute.xlu0 %2174 }
 0x4e8   : > { %10801 = vst [vmem:[#allocation126_spill] sm:$0xff] %v7767_v63 }
 0x4eb   : > { %2888 = vadd.xlane.f32.xlu0 %v2887_v32  ;;  %v10804_v32 = vld [vmem:[#allocation51_spill] sm:$0xff]  ;;  %v7775_v8 = vpop.permute.xlu0 %2178 }
 0x4ec   : > { %10805 = vst [vmem:[#allocation30_spill] sm:$0xff] %v7775_v8 }
 0x4ef   : > { %3158 = vadd.xlane.f32.xlu0 %v3157_v19  ;;  %v7781_v19 = vpop.permute.xlu1 %2168  ;;  %v7783_v5 = vpop.permute.xlu0 %2182 }
 0x4f0   : > { %10806 = vst [vmem:[#allocation127_spill] sm:$0xff] %v7781_v19  ;;  %v2623_v19 = vsel %vm978_vm0, %v2581_v20, 0.0  ;;  %v10827_v20 = vld [vmem:[#allocation55_spill] sm:$0xff] }
 0x4f3   : > { %v7801_v9 = vpop.xlane.xlu0 %2312 }
 0x4f6   : > { %2618 = vadd.xlane.f32.xlu1 %v2617_v11  ;;  %v7789_v11 = vpop.permute.xlu1 %2172 }
 0x4f7   : > { %10807 = vst [vmem:[#allocation121_spill] sm:$0xff] %v7789_v11  ;;  %v7808_v33 = vpop.xlane.xlu0 %2318 }
 0x4fb   : > { %v7818_v63 = vpop.xlane.xlu0 %2585 }
 0x4fc   : > { %10808 = vst [vmem:[#allocation131_spill] sm:$0xff] %v7818_v63 }
 0x505   : > { %2437 = vrot.lane.b32.xlu0 %v10802_v50, %s4767_s25 }
 0x507   : > { %2198 = vrot.lane.b32.xlu1 %v10804_v32, %s4766_s14 }
 0x509   : > { %2740 = vrot.lane.b32.xlu0 %v10793_v43, %s4768_s28 }
 0x50b   : > { %2469 = vrot.lane.b32.xlu1 %v10795_v0, %s4767_s25 }
 0x50d   : > { %3011 = vrot.lane.b32.xlu0 %v10790_v6, %s4769_s15  ;;  %v2350_v6 = vsel %vm978_vm0, %v2308_v61, 0.0  ;;  %v3160_v61 = vsel %vm978_vm0, %v3124_v23, 0.0  ;;  %v10814_v23 = vld [vmem:[#allocation49_spill] sm:$0xff] }
 0x50f   : > { %2708 = vrot.lane.b32.xlu1 %v10794_v57, %s4768_s28 }
 0x513   : > { %2979 = vrot.lane.b32.xlu1 %v10792_v15, %s4769_s15  ;;  %v2890_v15 = vsel %vm978_vm0, %v2852_v42, 0.0  ;;  %v7822_v42 = vpop.xlane.xlu0 %2321 }
 0x514   : > { %10810 = vst [vmem:[#allocation32_spill] sm:$0xff] %v7822_v42  ;;  %v10932_v42 = vld [vmem:[#allocation3_spill] sm:$0xff] }
 0x517   : > { %v7826_v12 = vpop.xlane.xlu0 %2858 }
 0x518   : > { %10812 = vst [vmem:[#allocation132_spill] sm:$0xff] %v7826_v12  ;;  %v10931_v12 = vld [vmem:[#allocation72_spill] sm:$0xff] }
 0x51b   : > { %v7834_v17 = vpop.xlane.xlu0 %2324 }
 0x51c   : > { %10815 = vst [vmem:[#allocation134_spill] sm:$0xff] %v7834_v17 }
 0x52c   : > { %2351 = vadd.xlane.f32.xlu0 %v2350_v6  ;;  %v7820_v6 = vpop.permute.xlu1 %2176 }
 0x52d   : > { %10809 = vst [vmem:[#allocation136_spill] sm:$0xff] %v7820_v6 }
 0x530   : > { %2891 = vadd.xlane.f32.xlu0 %v2890_v15  ;;  %v7824_v37 = vpop.permute.xlu1 %2180  ;;  %v10813_v15 = vld [vmem:[#allocation54_spill] sm:$0xff] }
 0x531   : > { %10811 = vst [vmem:[#allocation130_spill] sm:$0xff] %v7824_v37 }
 0x534   : > { %3161 = vadd.xlane.f32.xlu0 %v3160_v61  ;;  %v7830_v30 = vpop.permute.xlu1 %2184  ;;  %v7844_v61 = vpop.xlane.xlu0 %2864 }
 0x535   : > { %10816 = vst [vmem:[#allocation135_spill] sm:$0xff] %v7844_v61 }
 0x537   : > { %2621 = vadd.xlane.f32.xlu1 %v2620_v13 }
 0x538   : > { %v7838_v13 = vpop.xlane.xlu1 %2315  ;;  %v7852_v6 = vpop.xlane.xlu0 %3134 }
 0x539   : > { %10817 = vst [vmem:[#allocation137_spill] sm:$0xff] %v7852_v6 }
 0x53c   : > { %v7848_v37 = vpop.xlane.xlu1 %2588  ;;  %v7854_v11 = vpop.xlane.xlu0 %2597 }
 0x53d   : > { %10818 = vst [vmem:[#allocation139_spill] sm:$0xff] %v7854_v11 }
 0x540   : > { %v7856_v45 = vpop.xlane.xlu0 %3137  ;;  %v7885_v36 = vpop.xlane.xlu1 %2591 }
 0x541   : > { %10819 = vst [vmem:[#allocation155_spill] sm:$0xff] %v7856_v45  ;;  %10822 = vst [vmem:[#allocation140_spill] sm:$0xff] %v7885_v36  ;;  %v10930_v36 = vld [vmem:[#allocation73_spill] sm:$0xff] }
 0x542   : > { %v1413_v58 = vsel %vm1395_vm10, %v10931_v12, %v10930_v36 }
 0x544   : > { %v7858_v10 = vpop.xlane.xlu0 %2600  ;;  %v7891_v16 = vpop.xlane.xlu1 %2861 }
 0x545   : > { %10820 = vst [vmem:[#allocation185_spill] sm:$0xff] %v7858_v10  ;;  %10824 = vst [vmem:[#allocation186_spill] sm:$0xff] %v7891_v16 }
 0x548   : > { %2200 = vrot.lane.b32.xlu1 %v10813_v15, %s4766_s14  ;;  %v7895_v62 = vpop.xlane.xlu1 %2594 }
 0x549   : > { %10826 = vst [vmem:[#allocation205_spill] sm:$0xff] %v7895_v62 }
 0x54a   : > { %2439 = vrot.lane.b32.xlu0 %v10814_v23, %s4767_s25 }
 0x54c   : > { %2471 = vrot.lane.b32.xlu1 %v10804_v32, %s4767_s25  ;;  %v7903_v54 = vpop.xlane.xlu1 %3131 }
 0x54d   : > { %10828 = vst [vmem:[#allocation206_spill] sm:$0xff] %v7903_v54 }
 0x54e   : > { %2742 = vrot.lane.b32.xlu0 %v10795_v0, %s4768_s28 }
 0x550   : > { %2710 = vrot.lane.b32.xlu1 %v10802_v50, %s4768_s28 }
 0x552   : > { %3013 = vrot.lane.b32.xlu0 %v10793_v43, %s4769_s15  ;;  %v2309_v43 = vsel %vm2292_vm11, %v7863_v21, 0.0 }
 0x553   : > { %v2353_v8 = vsel %vm978_vm0, %v2309_v43, 0.0 }
 0x554   : > { %2981 = vrot.lane.b32.xlu1 %v10794_v57, %s4769_s15  ;;  %v7869_v57 = vpop.xlane.xlu0 %3140 }
 0x555   : > { %10821 = vst [vmem:[#allocation156_spill] sm:$0xff] %v7869_v57 }
 0x558   : > { %v7882_v43 = vpop.permute.xlu0 %2423 }
 0x571   : > { %2354 = vadd.xlane.f32.xlu0 %v2353_v8  ;;  %v7887_v8 = vpop.permute.xlu0 %2457 }
 0x575   : > { %2894 = vadd.xlane.f32.xlu0 %v2893_v53  ;;  %v7889_v4 = vpop.xlane.xlu0 %2603 }
 0x576   : > { %10823 = vst [vmem:[#allocation168_spill] sm:$0xff] %v7889_v4 }
 0x578   : > { %2624 = vadd.xlane.f32.xlu1 %v2623_v19 }
 0x579   : > { %3164 = vadd.xlane.f32.xlu0 %v3163_v24  ;;  %v7893_v57 = vpop.xlane.xlu0 %2873  ;;  %v10829_v24 = vld [vmem:[#allocation52_spill] sm:$0xff] }
 0x57a   : > { %10825 = vst [vmem:[#allocation169_spill] sm:$0xff] %v7893_v57  ;;  %v7913_v57 = vpop.xlane.xlu1 %2327 }
 0x57b   : > { %10830 = vst [vmem:[#allocation15_spill] sm:$0xff] %v7913_v57 }
 0x57d   : > { %v7899_v53 = vpop.permute.xlu0 %2188 }
 0x57e   : > { %v7923_v18 = vpop.xlane.xlu1 %2867 }
 0x57f   : > { %10832 = vst [vmem:[#allocation172_spill] sm:$0xff] %v7923_v18  ;;  %v2854_v18 = vsel %vm2838_vm13, %v7796_v60, 0.0 }
 0x580   : > { %v2896_v57 = vsel %vm978_vm0, %v2854_v18, 0.0 }
 0x581   : > { %v7909_v19 = vpop.permute.xlu0 %2696 }
 0x582   : > { %v7927_v10 = vpop.xlane.xlu1 %2330 }
 0x583   : > { %10834 = vst [vmem:[#allocation173_spill] sm:$0xff] %v7927_v10 }
 0x585   : > { %v7917_v4 = vpop.permute.xlu0 %2728 }
 0x586   : > { %v7931_v51 = vpop.xlane.xlu1 %2870 }
 0x587   : > { %10836 = vst [vmem:[#allocation82_spill] sm:$0xff] %v7931_v51 }
 0x589   : > { %2202 = vrot.lane.b32.xlu1 %v10827_v20, %s4766_s14  ;;  %v7921_v59 = vpop.xlane.xlu0 %2336 }
 0x58a   : > { %10831 = vst [vmem:[#allocation141_spill] sm:$0xff] %v7921_v59 }
 0x58d   : > { %2473 = vrot.lane.b32.xlu1 %v10813_v15, %s4767_s25  ;;  %v7925_v29 = vpop.xlane.xlu0 %2876 }
 0x58e   : > { %10833 = vst [vmem:[#allocation187_spill] sm:$0xff] %v7925_v29  ;;  %v2582_v29 = vsel %vm2565_vm12, %v7863_v21, 0.0 }
 0x58f   : > { %2441 = vrot.lane.b32.xlu0 %v10829_v24, %s4767_s25  ;;  %v2626_v11 = vsel %vm978_vm0, %v2582_v29, 0.0 }
 0x591   : > { %2712 = vrot.lane.b32.xlu1 %v10814_v23, %s4768_s28  ;;  %v7929_v45 = vpop.xlane.xlu0 %3146 }
 0x592   : > { %10835 = vst [vmem:[#allocation79_spill] sm:$0xff] %v7929_v45 }
 0x593   : > { %2744 = vrot.lane.b32.xlu0 %v10804_v32, %s4768_s28 }
 0x595   : > { %2983 = vrot.lane.b32.xlu1 %v10802_v50, %s4769_s15  ;;  %v7933_v49 = vpop.permute.xlu0 %2429  ;;  %v7935_v50 = vpop.permute.xlu1 %2186 }
 0x596   : > { %10837 = vst [vmem:[#allocation142_spill] sm:$0xff] %v7933_v49  ;;  %v10927_v49 = vld [vmem:[#allocation68_spill] sm:$0xff] }
 0x597   : > { %3015 = vrot.lane.b32.xlu0 %v10795_v0, %s4769_s15  ;;  %v7940_v0 = vld [vmem:[%s9940_s3 + $0x78] sm:$0xff] }
 0x598   : > { %v2310_v59 = vsel %vm2292_vm11, %v7940_v0, 0.0 }
 0x599   : > { %v7948_v45 = vpop.permute.xlu0 %2732  ;;  %v2356_v51 = vsel %vm978_vm0, %v2310_v59, 0.0  ;;  %v7951_v10 = vpop.permute.xlu1 %2425  ;;  %v3166_v59 = vsel %vm978_vm0, %v3126_v2, 0.0 }
 0x59a   : > { %10838 = vst [vmem:[#allocation174_spill] sm:$0xff] %v7948_v45 }
 0x59d   : > { %v7961_v54 = vpop.permute.xlu0 %2971  ;;  %v7963_v61 = vpop.permute.xlu1 %2455 }
 0x59e   : > { %10839 = vst [vmem:[#allocation188_spill] sm:$0xff] %v7961_v54  ;;  %v10940_v54 = vld [vmem:[#allocation129_spill] sm:$0xff] }
 0x5a1   : > { %v7966_v27 = vpop.xlane.xlu1 %2333  ;;  %v7968_v34 = vpop.permute.xlu0 %3003 }
 0x5a2   : > { %10840 = vst [vmem:[#allocation175_spill] sm:$0xff] %v7966_v27  ;;  %10841 = vst [vmem:[#allocation77_spill] sm:$0xff] %v7968_v34 }
 0x5a5   : > { %v7972_v18 = vpop.xlane.xlu1 %3143 }
 0x5a6   : > { %10843 = vst [vmem:[#allocation143_spill] sm:$0xff] %v7972_v18 }
 0x5b6   : > { %2357 = vadd.xlane.f32.xlu0 %v2356_v51  ;;  %v7970_v51 = vpop.xlane.xlu0 %2609 }
 0x5b7   : > { %10842 = vst [vmem:[#allocation76_spill] sm:$0xff] %v7970_v51 }
 0x5b9   : > { %2627 = vadd.xlane.f32.xlu1 %v2626_v11  ;;  %v7978_v11 = vpop.permute.xlu1 %2427 }
 0x5ba   : > { %2897 = vadd.xlane.f32.xlu0 %v2896_v57  ;;  %v7974_v29 = vpop.xlane.xlu0 %2879 }
 0x5bb   : > { %10844 = vst [vmem:[#allocation176_spill] sm:$0xff] %v7974_v29 }
 0x5bd   : > { %v7984_v57 = vpop.permute.xlu1 %2459 }
 0x5be   : > { %3167 = vadd.xlane.f32.xlu0 %v3166_v59  ;;  %v7982_v2 = vpop.permute.xlu0 %2192  ;;  %v10847_v59 = vld [vmem:[#allocation53_spill] sm:$0xff] }
 0x5bf   : > { %10846 = vst [vmem:[#allocation189_spill] sm:$0xff] %v7982_v2 }
 0x5c1   : > { %v7994_v29 = vpop.permute.xlu1 %2698 }
 0x5c2   : > { %v7990_v51 = vpop.permute.xlu0 %2702  ;;  %10849 = vst [vmem:[#allocation177_spill] sm:$0xff] %v7994_v29 }
 0x5c3   : > { %10848 = vst [vmem:[#allocation81_spill] sm:$0xff] %v7990_v51 }
 0x5c5   : > { %v8000_v27 = vpop.permute.xlu1 %2730 }
 0x5c6   : > { %v7998_v18 = vpop.permute.xlu0 %2973  ;;  %10851 = vst [vmem:[#allocation22_spill] sm:$0xff] %v8000_v27 }
 0x5c7   : > { %10850 = vst [vmem:[#allocation16_spill] sm:$0xff] %v7998_v18 }
 0x5c9   : > { %v8006_v2 = vpop.xlane.xlu1 %2606 }
 0x5ca   : > { %2204 = vrot.lane.b32.xlu1 %v10845_v56, %s4766_s14  ;;  %v8004_v46 = vpop.xlane.xlu0 %2342  ;;  %10853 = vst [vmem:[#allocation90_spill] sm:$0xff] %v8006_v2 }
 0x5cb   : > { %10852 = vst [vmem:[#allocation144_spill] sm:$0xff] %v8004_v46  ;;  %v2583_v46 = vsel %vm2565_vm12, %v7940_v0, 0.0 }
 0x5cd   : > { %v8010_v62 = vpop.permute.xlu1 %2190 }
 0x5ce   : > { %2475 = vrot.lane.b32.xlu1 %v10827_v20, %s4767_s25  ;;  %v8008_v51 = vpop.xlane.xlu0 %2882  ;;  %10855 = vst [vmem:[#allocation191_spill] sm:$0xff] %v8010_v62 }
 0x5cf   : > { %10854 = vst [vmem:[#allocation178_spill] sm:$0xff] %v8008_v51 }
 0x5d1   : > { %v8014_v45 = vpop.permute.xlu1 %2461 }
 0x5d2   : > { %2714 = vrot.lane.b32.xlu1 %v10829_v24, %s4768_s28  ;;  %10857 = vst [vmem:[#allocation157_spill] sm:$0xff] %v8014_v45 }
 0x5d4   : > { %2443 = vrot.lane.b32.xlu0 %v10847_v59, %s4767_s25 }
 0x5d5   : > { %v8018_v18 = vpop.permute.xlu1 %2700 }
 0x5d6   : > { %2985 = vrot.lane.b32.xlu1 %v10814_v23, %s4769_s15  ;;  %v8012_v23 = vpop.xlane.xlu0 %3152  ;;  %10859 = vst [vmem:[#allocation158_spill] sm:$0xff] %v8018_v18 }
 0x5d7   : > { %10856 = vst [vmem:[#allocation179_spill] sm:$0xff] %v8012_v23  ;;  %v2629_v23 = vsel %vm978_vm0, %v2583_v46, 0.0 }
 0x5d8   : > { %2746 = vrot.lane.b32.xlu0 %v10813_v15, %s4768_s28 }
 0x5d9   : > { %v8029_v26 = vpop.permute.xlu1 %2969 }
 0x5da   : > { %v8016_v17 = vpop.permute.xlu0 %2433  ;;  %10861 = vst [vmem:[#allocation85_spill] sm:$0xff] %v8029_v26 }
 0x5db   : > { %10858 = vst [vmem:[#allocation192_spill] sm:$0xff] %v8016_v17  ;;  %v3127_v17 = vsel %vm3111_vm14, %v7796_v60, 0.0 }
 0x5dc   : > { %3017 = vrot.lane.b32.xlu0 %v10804_v32, %s4769_s15  ;;  %v2855_v32 = vsel %vm2838_vm13, %v7863_v21, 0.0  ;;  %v3169_v18 = vsel %vm978_vm0, %v3127_v17, 0.0 }
 0x5dd   : > { %v2899_v51 = vsel %vm978_vm0, %v2855_v32, 0.0  ;;  %v8038_v6 = vpop.permute.xlu1 %3001 }
 0x5de   : > { %v8027_v2 = vpop.permute.xlu0 %2736  ;;  %10863 = vst [vmem:[#allocation23_spill] sm:$0xff] %v8038_v6 }
 0x5df   : > { %10860 = vst [vmem:[#allocation21_spill] sm:$0xff] %v8027_v2 }
 0x5e1   : > { %v8042_v2 = vpop.xlane.xlu1 %2339 }
 0x5e2   : > { %v8036_v47 = vpop.permute.xlu0 %3007  ;;  %10865 = vst [vmem:[#allocation193_spill] sm:$0xff] %v8042_v2 }
 0x5e3   : > { %10862 = vst [vmem:[#allocation87_spill] sm:$0xff] %v8036_v47 }
 0x5e5   : > { %v8046_v46 = vpop.xlane.xlu1 %3149 }
 0x5e6   : > { %v8040_v32 = vpop.xlane.xlu0 %2345  ;;  %10867 = vst [vmem:[#allocation159_spill] sm:$0xff] %v8046_v46 }
 0x5e7   : > { %10864 = vst [vmem:[#allocation180_spill] sm:$0xff] %v8040_v32  ;;  %v10873_v32 = vld [vmem:[#allocation59_spill] sm:$0xff] }
 0x5ea   : > { %v8044_v26 = vpop.xlane.xlu0 %2885 }
 0x5eb   : > { %10866 = vst [vmem:[#allocation181_spill] sm:$0xff] %v8044_v26 }
 0x5ee   : > { %v8050_v60 = vpop.xlane.xlu0 %3155 }
 0x5ef   : > { %10869 = vst [vmem:[#allocation194_spill] sm:$0xff] %v8050_v60 }
 0x5f2   : > { %v8058_v17 = vpop.permute.xlu0 %2435 }
 0x5f3   : > { %10871 = vst [vmem:[#allocation80_spill] sm:$0xff] %v8058_v17 }
 0x5f6   : > { %v8066_v26 = vpop.permute.xlu0 %2738 }
 0x5f7   : > { %10874 = vst [vmem:[#allocation4_spill] sm:$0xff] %v8066_v26 }
 0x5fa   : > { %2900 = vadd.xlane.f32.xlu1 %v2899_v51  ;;  %v10868_v51 = vld [vmem:[#allocation56_spill] sm:$0xff]  ;;  %v8074_v46 = vpop.permute.xlu0 %3009 }
 0x5fb   : > { %2630 = vadd.xlane.f32.xlu0 %v2629_v23  ;;  %v8052_v23 = vpop.permute.xlu1 %2431  ;;  %10876 = vst [vmem:[#allocation182_spill] sm:$0xff] %v8074_v46 }
 0x5fc   : > { %10870 = vst [vmem:[#allocation84_spill] sm:$0xff] %v8052_v23 }
 0x5fe   : > { %v8078_v17 = vpop.xlane.xlu0 %2348 }
 0x5ff   : > { %3170 = vadd.xlane.f32.xlu0 %v3169_v18  ;;  %v8060_v18 = vpop.permute.xlu1 %2463  ;;  %10878 = vst [vmem:[#allocation183_spill] sm:$0xff] %v8078_v17  ;;  %v3128_v17 = vsel %vm3111_vm14, %v7863_v21, 0.0  ;;  %v10893_v21 = vld [vmem:[#allocation57_spill] sm:$0xff] }
 0x600   : > { %10872 = vst [vmem:[#allocation160_spill] sm:$0xff] %v8060_v18 }
 0x602   : > { %v8082_v23 = vpop.xlane.xlu0 %2888 }
 0x603   : > { %v8070_v60 = vpop.permute.xlu1 %2734  ;;  %10880 = vst [vmem:[#allocation91_spill] sm:$0xff] %v8082_v23 }
 0x604   : > { %10875 = vst [vmem:[#allocation6_spill] sm:$0xff] %v8070_v60 }
 0x606   : > { %v8086_v26 = vpop.xlane.xlu0 %3158 }
 0x607   : > { %v8076_v2 = vpop.permute.xlu1 %3005  ;;  %10882 = vst [vmem:[#allocation196_spill] sm:$0xff] %v8086_v26 }
 0x608   : > { %10877 = vst [vmem:[#allocation195_spill] sm:$0xff] %v8076_v2 }
 0x60a   : > { %v8093_v60 = vpop.permute.xlu0 %2437 }
 0x60b   : > { %2445 = vrot.lane.b32.xlu1 %v10868_v51, %s4767_s25  ;;  %v8080_v47 = vpop.xlane.xlu1 %2612  ;;  %10884 = vst [vmem:[#allocation8_spill] sm:$0xff] %v8093_v60 }
 0x60c   : > { %10879 = vst [vmem:[#allocation86_spill] sm:$0xff] %v8080_v47  ;;  %v3172_v47 = vsel %vm978_vm0, %v3128_v17, 0.0 }
 0x60e   : > { %v8102_v26 = vpop.permute.xlu0 %2740 }
 0x60f   : > { %2477 = vrot.lane.b32.xlu1 %v10845_v56, %s4767_s25  ;;  %10886 = vst [vmem:[#allocation89_spill] sm:$0xff] %v8102_v26 }
 0x612   : > { %v8108_v2 = vpop.permute.xlu0 %3011 }
 0x613   : > { %2748 = vrot.lane.b32.xlu1 %v10827_v20, %s4768_s28  ;;  %10889 = vst [vmem:[#allocation92_spill] sm:$0xff] %v8108_v2 }
 0x615   : > { %2206 = vrot.lane.b32.xlu0 %v10873_v32, %s4766_s14 }
 0x616   : > { %v8110_v60 = vpop.xlane.xlu0 %2351 }
 0x617   : > { %3019 = vrot.lane.b32.xlu1 %v10813_v15, %s4769_s15  ;;  %v8084_v15 = vpop.permute.xlu1 %2194  ;;  %10890 = vst [vmem:[#allocation88_spill] sm:$0xff] %v8110_v60 }
 0x618   : > { %10881 = vst [vmem:[#allocation161_spill] sm:$0xff] %v8084_v15 }
 0x619   : > { %2716 = vrot.lane.b32.xlu0 %v10847_v59, %s4768_s28 }
 0x61a   : > { %v8114_v6 = vpop.xlane.xlu0 %2891 }
 0x61b   : > { %v8088_v18 = vpop.permute.xlu1 %2465  ;;  %10892 = vst [vmem:[#allocation198_spill] sm:$0xff] %v8114_v6  ;;  %v3250_v6 = vld [vmem:[%s9941_s4 + $0x40] sm:$0xff] }
 0x61c   : > { %10883 = vst [vmem:[#allocation162_spill] sm:$0xff] %v8088_v18 }
 0x61d   : > { %2987 = vrot.lane.b32.xlu0 %v10829_v24, %s4769_s15  ;;  %v2856_v24 = vsel %vm2838_vm13, %v7940_v0, 0.0 }
 0x61e   : > { %v2902_v23 = vsel %vm978_vm0, %v2856_v24, 0.0 }
 0x61f   : > { %v8095_v46 = vpop.permute.xlu1 %2704 }
 0x620   : > { %10885 = vst [vmem:[#allocation5_spill] sm:$0xff] %v8095_v46 }
 0x623   : > { %v8104_v18 = vpop.permute.xlu1 %2975 }
 0x624   : > { %10887 = vst [vmem:[#allocation146_spill] sm:$0xff] %v8104_v18 }
 0x627   : > { %v8106_v15 = vpop.xlane.xlu1 %2615 }
 0x628   : > { %10888 = vst [vmem:[#allocation94_spill] sm:$0xff] %v8106_v15 }
 0x62b   : > { %v8112_v46 = vpop.permute.xlu1 %2196 }
 0x62c   : > { %10891 = vst [vmem:[#allocation164_spill] sm:$0xff] %v8112_v46  ;;  %v10925_v46 = vld [vmem:[#allocation204_spill] sm:$0xff] }
 0x62f   : > { %v8118_v17 = vpop.permute.xlu1 %2467 }
 0x630   : > { %10894 = vst [vmem:[#allocation165_spill] sm:$0xff] %v8118_v17 }
 0x633   : > { %v8127_v24 = vpop.permute.xlu1 %2706 }
 0x634   : > { %10896 = vst [vmem:[#allocation11_spill] sm:$0xff] %v8127_v24  ;;  %v10924_v24 = vld [vmem:[#allocation203_spill] sm:$0xff] }
 0x637   : > { %v8138_v15 = vpop.permute.xlu1 %2977 }
 0x638   : > { %10898 = vst [vmem:[#allocation33_spill] sm:$0xff] %v8138_v15 }
 0x63b   : > { %2903 = vadd.xlane.f32.xlu1 %v2902_v23  ;;  %v8125_v23 = vpop.xlane.xlu0 %3161  ;;  %v8142_v2 = vpop.xlane.xlu1 %2618 }
 0x63c   : > { %3173 = vadd.xlane.f32.xlu0 %v3172_v47  ;;  %v3242_v47 = vld [vmem:[%s9941_s4] sm:$0xff]  ;;  %10895 = vst [vmem:[#allocation7_spill] sm:$0xff] %v8125_v23  ;;  %v10899_v23 = vld [vmem:[#allocation63_spill] sm:$0xff]  ;;  %10900 = vst [vmem:[#allocation25_spill] sm:$0xff] %v8142_v2 }
 0x63f   : > { %v8134_v60 = vpop.permute.xlu0 %2439  ;;  %v8148_v26 = vpop.permute.xlu1 %2198 }
 0x640   : > { %10897 = vst [vmem:[#allocation97_spill] sm:$0xff] %v8134_v60  ;;  %10902 = vst [vmem:[#allocation147_spill] sm:$0xff] %v8148_v26 }
 0x643   : > { %v8159_v2 = vpop.permute.xlu1 %2469 }
 0x644   : > { %10905 = vst [vmem:[#allocation100_spill] sm:$0xff] %v8159_v2 }
 0x647   : > { %v8165_v26 = vpop.permute.xlu1 %2708 }
 0x648   : > { %10907 = vst [vmem:[#allocation166_spill] sm:$0xff] %v8165_v26 }
 0x64c   : > { %2447 = vrot.lane.b32.xlu1 %v10893_v21, %s4767_s25 }
 0x650   : > { %2479 = vrot.lane.b32.xlu1 %v10873_v32, %s4767_s25 }
 0x652   : > { %3260 = vperm.xlu0 %4378, %v3242_v47   ;;  %v8144_v47 = vpop.permute.xlu0 %2742 }
 0x653   : > { %10901 = vst [vmem:[#allocation99_spill] sm:$0xff] %v8144_v47 }
 0x654   : > { %2750 = vrot.lane.b32.xlu1 %v10845_v56, %s4768_s28 }
 0x656   : > { %3300 = vperm.xlu0 %4378, %v3250_v6   ;;  %v8152_v6 = vpop.permute.xlu0 %3013 }
 0x657   : > { %10903 = vst [vmem:[#allocation103_spill] sm:$0xff] %v8152_v6 }
 0x658   : > { %3021 = vrot.lane.b32.xlu1 %v10827_v20, %s4769_s15  ;;  %v3251_v20 = vld [vmem:[%s9941_s4 + $0x48] sm:$0xff] }
 0x65a   : > { %2208 = vrot.lane.b32.xlu0 %v10899_v23, %s4766_s14  ;;  %v8157_v60 = vpop.xlane.xlu0 %2354 }
 0x65b   : > { %10904 = vst [vmem:[#allocation96_spill] sm:$0xff] %v8157_v60  ;;  %v3129_v60 = vsel %vm3111_vm14, %v7940_v0, 0.0  ;;  %v3252_v0 = vld [vmem:[%s9941_s4 + $0x50] sm:$0xff] }
 0x65c   : > { %v3175_v26 = vsel %vm978_vm0, %v3129_v60, 0.0  ;;  %vm2487_vm0 = vcmp.lt.s32.totalorder %v4851_v3, 113 }
 0x65e   : > { %2718 = vrot.lane.b32.xlu0 %v10868_v51, %s4768_s28  ;;  %v8163_v47 = vpop.xlane.xlu0 %2894 }
 0x65f   : > { %10906 = vst [vmem:[#allocation102_spill] sm:$0xff] %v8163_v47 }
 0x662   : > { %2989 = vrot.lane.b32.xlu0 %v10847_v59, %s4769_s15  ;;  %v10908_v59 = vld [vmem:[#allocation61_spill] sm:$0xff]  ;;  %v8171_v6 = vpop.xlane.xlu0 %3164 }
 0x663   : > { %10909 = vst [vmem:[#allocation93_spill] sm:$0xff] %v8171_v6 }
 0x666   : > { %3305 = vperm.xlu0 %4378, %v3251_v20   ;;  %v8173_v20 = vpop.permute.xlu1 %2979  ;;  %v8183_v2 = vpop.permute.xlu0 %2441 }
 0x667   : > { %10910 = vst [vmem:[#allocation167_spill] sm:$0xff] %v8173_v20  ;;  %10912 = vst [vmem:[#allocation13_spill] sm:$0xff] %v8183_v2  ;;  %v10918_v2 = vld [vmem:[#allocation65_spill] sm:$0xff] }
 0x66a   : > { %2210 = vrot.lane.b32.xlu0 %v10766_v25, %s4766_s14  ;;  %v8180_v47 = vpop.xlane.xlu1 %2621  ;;  %v8191_v20 = vpop.permute.xlu0 %2744 }
 0x66b   : > { %10911 = vst [vmem:[#allocation12_spill] sm:$0xff] %v8180_v47  ;;  %10914 = vst [vmem:[#allocation101_spill] sm:$0xff] %v8191_v20  ;;  %v10919_v20 = vld [vmem:[#allocation64_spill] sm:$0xff] }
 0x66e   : > { %2449 = vrot.lane.b32.xlu0 %v10908_v59, %s4767_s25  ;;  %v8187_v6 = vpop.permute.xlu1 %2200  ;;  %v8200_v47 = vpop.permute.xlu0 %3015 }
 0x66f   : > { %10913 = vst [vmem:[#allocation24_spill] sm:$0xff] %v8187_v6  ;;  %10916 = vst [vmem:[#allocation17_spill] sm:$0xff] %v8200_v47  ;;  %v1140_v6 = vsel %vm1123_vm9, %v10918_v2, %v10919_v20  ;;  %v10923_v47 = vld [vmem:[#allocation69_spill] sm:$0xff] }
 0x670   : > { %v1168_v17 = vmul.f32 %v10924_v24, %v1140_v6 }
 0x672   : > { %2481 = vrot.lane.b32.xlu0 %v10899_v23, %s4767_s25  ;;  %v8198_v60 = vpop.permute.xlu1 %2471 }
 0x673   : > { %10915 = vst [vmem:[#allocation60_spill] sm:$0xff] %v8198_v60 }
 0x676   : > { %2720 = vrot.lane.b32.xlu0 %v10893_v21, %s4768_s28  ;;  %v8215_v60 = vpop.permute.xlu1 %2710 }
 0x677   : > { %10920 = vst [vmem:[#allocation148_spill] sm:$0xff] %v8215_v60  ;;  %v10926_v60 = vld [vmem:[#allocation67_spill] sm:$0xff] }
 0x678   : > { %v1412_v45 = vsel %vm1395_vm10, %v10927_v49, %v10926_v60  ;;  %v1396_v6 = vsel %vm1395_vm10, %v10926_v60, %v10927_v49  ;;  %v1029_v49 = vmul.f32 %v10932_v42, %v10784_v28 }
 0x679   : > { %v1442_v28 = vmul.f32 %v6406_v22, %v1396_v6 }
 0x67a   : > { %2752 = vrot.lane.b32.xlu0 %v10873_v32, %s4768_s28  ;;  %v8256_v60 = vpop.permute.xlu1 %2981 }
 0x67b   : > { %10933 = vst [vmem:[#allocation170_spill] sm:$0xff] %v8256_v60  ;;  %v1030_v60 = vmul.f32 %v10932_v42, %v10778_v40  ;;  %v10944_v42 = vld [vmem:[#allocation154_spill] sm:$0xff] }
 0x67c   : > { %3176 = vadd.xlane.f32.xlu1 %v3175_v26  ;;  %v8202_v26 = vpop.xlane.xlu0 %2357 }
 0x67d   : > { %10917 = vst [vmem:[#allocation62_spill] sm:$0xff] %v8202_v26  ;;  %v10922_v26 = vld [vmem:[#allocation70_spill] sm:$0xff] }
 0x67e   : > { %2991 = vrot.lane.b32.xlu0 %v10868_v51, %s4769_s15  ;;  %v3243_v51 = vld [vmem:[%s9941_s4 + $0x8] sm:$0xff]  ;;  %v1141_v15 = vsel %vm1123_vm9, %v10923_v47, %v10922_v26  ;;  %v8295_v32 = vpop.xlane.xlu1 %2624 }
 0x67f   : > { %10941 = vst [vmem:[#allocation95_spill] sm:$0xff] %v8295_v32 }
 0x682   : > { %3023 = vrot.lane.b32.xlu0 %v10845_v56, %s4769_s15  ;;  %v1124_v56 = vsel %vm1123_vm9, %v10919_v20, %v10918_v2  ;;  %v1125_v2 = vsel %vm1123_vm9, %v10922_v26, %v10923_v47  ;;  %v3244_v20 = vld [vmem:[%s9941_s4 + $0x10] sm:$0xff]  ;;  %v10928_v47 = vld [vmem:[#allocation2_spill] sm:$0xff] }
 0x683   : > { %v1169_v18 = vmul.f32 %v10925_v46, %v1124_v56  ;;  %v1027_v26 = vmul.f32 %v10928_v47, %v10770_v44  ;;  %v8245_v56 = vpop.xlane.xlu0 %2897  ;;  %v1171_v16 = vmul.f32 %v10925_v46, %v1125_v2  ;;  %v1028_v62 = vmul.f32 %v10928_v47, %v10785_v1  ;;  %v3245_v1 = vld [vmem:[%s9941_s4 + $0x18] sm:$0xff]  ;;  %v10935_v47 = vld [vmem:[#allocation150_spill] sm:$0xff] }
 0x684   : > { %10929 = vst [vmem:[#allocation34_spill] sm:$0xff] %v8245_v56  ;;  %v1441_v46 = vmul.f32 %v6403_v39, %v1412_v45  ;;  %v1397_v2 = vsel %vm1395_vm10, %v10930_v36, %v10931_v12  ;;  %v10936_v56 = vld [vmem:[#allocation149_spill] sm:$0xff]  ;;  %v10939_v12 = vld [vmem:[#allocation19_spill] sm:$0xff] }
 0x685   : > { %v1685_v45 = vsel %vm1668_vm6, %v10935_v47, %v10936_v56  ;;  %v1444_v63 = vmul.f32 %v6406_v22, %v1397_v2  ;;  %v3246_v22 = vld [vmem:[%s9941_s4 + $0x20] sm:$0xff] }
 0x686   : > { %3310 = vperm.xlu0 %4378, %v3252_v0   ;;  %v10921_v0 = vld [vmem:[#allocation71_spill] sm:$0xff]  ;;  %v1540_v34 = vmul.f32 %v10940_v54, %v1441_v46 }
 0x68a   : > { %2212 = vrot.lane.b32.xlu0 %v10921_v0, %s4766_s14 }
 0x68d   : > { %3265 = vperm.xlu1 %4377, %v3243_v51   ;;  %v1170_v51 = vmul.f32 %v10924_v24, %v1141_v15  ;;  %v10934_v15 = vld [vmem:[#allocation18_spill] sm:$0xff] }
 0x68e   : > { %2483 = vrot.lane.b32.xlu0 %v10766_v25, %s4767_s25  ;;  %v1267_v44 = vmul.f32 %v10934_v15, %v1168_v17  ;;  %v1268_v24 = vmul.f32 %v10934_v15, %v1169_v18  ;;  %v1669_v17 = vsel %vm1668_vm6, %v10936_v56, %v10935_v47  ;;  %v10937_v18 = vld [vmem:[#allocation145_spill] sm:$0xff]  ;;  %v1443_v15 = vmul.f32 %v6403_v39, %v1413_v58  ;;  %v10942_v39 = vld [vmem:[#allocation138_spill] sm:$0xff] }
 0x68f   : > { %v1269_v6 = vmul.f32 %v10939_v12, %v1170_v51  ;;  %v1270_v47 = vmul.f32 %v10939_v12, %v1171_v16  ;;  %v10943_v51 = vld [vmem:[#allocation153_spill] sm:$0xff]  ;;  %v1715_v29 = vmul.f32 %v10944_v42, %v1669_v17 }
 0x690   : > { %v1542_v58 = vmul.f32 %v10942_v39, %v1443_v15  ;;  %v1714_v40 = vmul.f32 %v10943_v51, %v1685_v45  ;;  %v1299_v16 = vadd.f32 %v1267_v44, %v1027_v26  ;;  %v1300_v46 = vadd.f32 %v1268_v24, %v1028_v62  ;;  %v10949_v44 = vld [vmem:[#allocation199_spill] sm:$0xff] }
 0x691   : > { %3270 = vperm.xlu1 %4377, %v3244_v20   ;;  %v10938_v20 = vld [vmem:[#allocation163_spill] sm:$0xff]  ;;  %v1302_v15 = vadd.f32 %v1270_v47, %v1030_v60  ;;  %v10951_v60 = vld [vmem:[#allocation197_spill] sm:$0xff]  ;;  %v8337_v47 = vpop.permute.xlu1 %2202 }
 0x692   : > { %v1686_v36 = vsel %vm1668_vm6, %v10938_v20, %v10937_v18  ;;  %2722 = vrot.lane.b32.xlu0 %v10908_v59, %s4768_s28  ;;  %v1670_v56 = vsel %vm1668_vm6, %v10937_v18, %v10938_v20  ;;  %v1541_v59 = vmul.f32 %v10940_v54, %v1442_v28  ;;  %v8301_v18 = vpop.xlane.xlu0 %3167  ;;  %v1543_v54 = vmul.f32 %v10942_v39, %v1444_v63  ;;  %v10946_v28 = vld [vmem:[#allocation184_spill] sm:$0xff]  ;;  %v10947_v20 = vld [vmem:[#allocation190_spill] sm:$0xff] }
 0x693   : > { %v1716_v27 = vmul.f32 %v10943_v51, %v1686_v36  ;;  %10945 = vst [vmem:[#allocation171_spill] sm:$0xff] %v8301_v18  ;;  %v1717_v2 = vmul.f32 %v10944_v42, %v1670_v56  ;;  %v1813_v17 = vmul.f32 %v10946_v28, %v1714_v40  ;;  %v1814_v45 = vmul.f32 %v10946_v28, %v1715_v29  ;;  %v10948_v63 = vld [vmem:[#allocation200_spill] sm:$0xff]  ;;  %v10954_v28 = vld [vmem:[#allocation151_spill] sm:$0xff] }
 0x694   : > { %v1572_v12 = vadd.f32 %v1540_v34, %v1299_v16  ;;  %v1573_v62 = vadd.f32 %v1541_v59, %v1300_v46  ;;  %v1942_v24 = vsel %vm1941_vm8, %v10949_v44, %v10948_v63  ;;  %v4301_v34 = vld [vmem:[%s9942_s5 + $0xa] sm:$0x3]  ;;  %v1575_v29 = vadd.f32 %v1543_v54, %v1302_v15  ;;  %v10950_v59 = vld [vmem:[#allocation10_spill] sm:$0xff]  ;;  %v10952_v46 = vld [vmem:[#allocation201_spill] sm:$0xff] }
 0x695   : > { %3275 = vperm.xlu1 %4377, %v3245_v1   ;;  %v1301_v1 = vadd.f32 %v1269_v6, %v1029_v49  ;;  %v1815_v36 = vmul.f32 %v10947_v20, %v1716_v27  ;;  %v1816_v51 = vmul.f32 %v10947_v20, %v1717_v2  ;;  %v1958_v49 = vsel %vm1941_vm8, %v10948_v63, %v10949_v44  ;;  %v3247_v27 = vld [vmem:[%s9941_s4 + $0x28] sm:$0xff]  ;;  %v10953_v2 = vld [vmem:[#allocation202_spill] sm:$0xff] }
 0x696   : > { %2754 = vrot.lane.b32.xlu0 %v10899_v23, %s4768_s28  ;;  %v1943_v6 = vsel %vm1941_vm8, %v10951_v60, %v10950_v59  ;;  %v1959_v56 = vsel %vm1941_vm8, %v10950_v59, %v10951_v60  ;;  %v1845_v39 = vadd.f32 %v1813_v17, %v1572_v12  ;;  %v8341_v42 = vpop.permute.xlu0 %2443  ;;  %v1987_v54 = vmul.f32 %v10952_v46, %v1958_v49  ;;  %v4302_v15 = vld [vmem:[%s9942_s5 + $0xc] sm:$0x3] }
 0x697   : > { %v1574_v26 = vadd.f32 %v1542_v58, %v1301_v1  ;;  %v1846_v58 = vadd.f32 %v1814_v45, %v1573_v62  ;;  %v1848_v16 = vadd.f32 %v1816_v51, %v1575_v29  ;;  %v1988_v1 = vmul.f32 %v10953_v2, %v1942_v24  ;;  %v10955_v45 = vld [vmem:[#allocation152_spill] sm:$0xff] }
 0x698   : > { %v8349_v20 = vrot.slane %v4301_v34, %v10954_v28  ;;  %v1990_v17 = vmul.f32 %v10953_v2, %v1943_v6  ;;  %v2215_v12 = vsel %vm2214_vm15, %v7728_v7, %v7783_v5  ;;  %v3248_v51 = vld [vmem:[%s9941_s4 + $0x30] sm:$0xff]  ;;  %v2231_v62 = vsel %vm2214_vm15, %v7783_v5, %v7728_v7 }
 0x699   : > { %3280 = vperm.xlu1 %4377, %v3246_v22   ;;  %v1847_v40 = vadd.f32 %v1815_v36, %v1574_v26  ;;  %v3253_v22 = vld [vmem:[%s9941_s4 + $0x58] sm:$0xff]  ;;  %v8354_v36 = vrot.slane %v4301_v34, %v10955_v45  ;;  %v2216_v26 = vsel %vm2214_vm15, %v7716_v52, %v7830_v30  ;;  %v2232_v63 = vsel %vm2214_vm15, %v7830_v30, %v7716_v52 }
 0x69a   : > { %2993 = vrot.lane.b32.xlu0 %v10893_v21, %s4769_s15  ;;  %v1989_v21 = vmul.f32 %v10952_v46, %v1959_v56  ;;  %v2217_v44 = vsel %vm2214_vm15, %v7732_v38, %v7935_v50  ;;  %v2086_v24 = vmul.f32 %v7237_v31, %v1987_v54  ;;  %v2087_v7 = vmul.f32 %v7237_v31, %v1988_v1  ;;  %v8401_v59 = vpop.permute.xlu0 %2746 }
 0x69b   : > { %v2233_v5 = vsel %vm2214_vm15, %v7935_v50, %v7732_v38  ;;  %v2089_v30 = vmul.f32 %v7404_v55, %v1990_v17  ;;  %v2260_v52 = vmul.f32 %v8349_v20, %v2215_v12  ;;  %v8393_v34 = vrot.slane %v4302_v15, %v10954_v28 }
 0x69c   : > { %v2088_v49 = vmul.f32 %v7404_v55, %v1989_v21  ;;  %v2261_v31 = vmul.f32 %v8354_v36, %v2231_v62  ;;  %v2262_v29 = vmul.f32 %v8349_v20, %v2216_v26  ;;  %v2263_v38 = vmul.f32 %v8354_v36, %v2232_v63  ;;  %v3249_v55 = vld [vmem:[%s9941_s4 + $0x38] sm:$0xff]  ;;  %v4303_v21 = vld [vmem:[%s9942_s5 + $0xe] sm:$0x3] }
 0x69d   : > { %3285 = vperm.xlu1 %4377, %v3247_v27   ;;  %v8395_v27 = vpop.permute.xlu1 %2473  ;;  %v2264_v50 = vmul.f32 %v8349_v20, %v2217_v44  ;;  %v2359_v60 = vmul.f32 %v7801_v9, %v2260_v52  ;;  %v2265_v6 = vmul.f32 %v8354_v36, %v2233_v5  ;;  %v8409_v56 = vrot.slane %v4302_v15, %v10955_v45 }
 0x69e   : > { %3315 = vperm.xlu0 %4378, %v3253_v22   ;;  %v2489_v22 = vsel %vm2487_vm0, %v7951_v10, %v7887_v8  ;;  %v2360_v46 = vmul.f32 %v7801_v9, %v2261_v31  ;;  %v2361_v54 = vmul.f32 %v7838_v13, %v2262_v29  ;;  %v2362_v2 = vmul.f32 %v7838_v13, %v2263_v38  ;;  %v4304_v13 = vld [vmem:[%s9942_s5 + $0x10] sm:$0x3] }
 0x69f   : > { %v2505_v1 = vsel %vm2487_vm0, %v7887_v8, %v7951_v10  ;;  %v2118_v17 = vadd.f32 %v2086_v24, %v1845_v39  ;;  %v2119_v12 = vadd.f32 %v2087_v7, %v1846_v58  ;;  %v2120_v15 = vadd.f32 %v2088_v49, %v1847_v40 }
 0x6a0   : > { %v2363_v9 = vmul.f32 %v7808_v33, %v2264_v50  ;;  %v2535_v62 = vmul.f32 %v8393_v34, %v2489_v22  ;;  %v2364_v10 = vmul.f32 %v7808_v33, %v2265_v6  ;;  %v2536_v8 = vmul.f32 %v8409_v56, %v2505_v1  ;;  %v8449_v33 = vpop.permute.xlu0 %3017  ;;  %v10959_v6 = vld [vmem:[#allocation59_spill] sm:$0xff] }
 0x6a1   : > { %3290 = vperm.xlu1 %4377, %v3248_v51   ;;  %v2121_v51 = vadd.f32 %v2089_v30, %v1848_v16  ;;  %v8436_v39 = vrot.slane %v4303_v21, %v10954_v28  ;;  %v8439_v58 = vrot.slane %v4303_v21, %v10955_v45  ;;  %v8441_v40 = vpop.permute.xlu1 %2712  ;;  %v8445_v16 = vadd.f32 %v2359_v60, %v2118_v17 }
 0x6a2   : > { %2485 = vrot.lane.b32.xlu0 %v10921_v0, %s4767_s25  ;;  %v8447_v26 = vadd.f32 %v2360_v46, %v2119_v12  ;;  %v2393_v63 = vadd.f32 %v2361_v54, %v2120_v15  ;;  %v2488_v24 = vsel %vm2487_vm0, %v7882_v43, %v7963_v61  ;;  %v8457_v7 = vrot.slane %v4304_v13, %v10954_v28  ;;  %v10960_v54 = vld [vmem:[#allocation77_spill] sm:$0xff]  ;;  %v10962_v15 = vld [vmem:[#allocation66_spill] sm:$0xff] }
 0x6a3   : > { %v2394_v44 = vadd.f32 %v2362_v2, %v2121_v51  ;;  %v8460_v5 = vrot.slane %v4304_v13, %v10955_v45  ;;  %v8465_v49 = vadd.f32 %v2363_v9, %v7292_v41  ;;  %v2634_v30 = vmul.f32 %v7848_v37, %v2535_v62  ;;  %v10961_v2 = vld [vmem:[#allocation188_spill] sm:$0xff]  ;;  %v10963_v51 = vld [vmem:[#allocation131_spill] sm:$0xff] }
 0x6a4   : > { %v2504_v52 = vsel %vm2487_vm0, %v7963_v61, %v7882_v43  ;;  %v2218_v31 = vsel %vm2214_vm15, %v7763_v48, %v7899_v53  ;;  %v8477_v45 = vadd.f32 %v2364_v10, %v7294_v35  ;;  %v2635_v29 = vmul.f32 %v7848_v37, %v2536_v8  ;;  %v8503_v50 = vpop.xlane.xlu0 %2630 }
 0x6a5   : > { %3295 = vperm.xlu1 %4377, %v3249_v55   ;;  %v2234_v41 = vsel %vm2214_vm15, %v7899_v53, %v7763_v48  ;;  %v2761_v61 = vsel %vm2760_vm1, %v7909_v19, %v7917_v4  ;;  %v2533_v43 = vmul.f32 %v8393_v34, %v2488_v24  ;;  %v2777_v35 = vsel %vm2760_vm1, %v7917_v4, %v7909_v19  ;;  %v10956_v48 = vld [vmem:[#allocation22_spill] sm:$0xff]  ;;  %v10957_v53 = vld [vmem:[#allocation177_spill] sm:$0xff]  ;;  %v8515_v60 = vpop.permute.xlu1 %2983 }
 0x6a6   : > { %2756 = vrot.lane.b32.xlu0 %v10766_v25, %s4768_s28  ;;  %v2490_v37 = vsel %vm2487_vm0, %v7978_v11, %v7984_v57  ;;  %v2762_v38 = vsel %vm2760_vm1, %v10957_v53, %v10956_v48  ;;  %10958 = vst [vmem:[#allocation14_spill] sm:$0xff] %v8503_v50  ;;  %v2266_v55 = vmul.f32 %v8349_v20, %v2218_v31  ;;  %v10966_v31 = vld [vmem:[#allocation115_spill] sm:$0xff]  ;;  %v11005_v50 = vld [vmem:[#allocation192_spill] sm:$0xff] }
 0x6a7   : > { %v2506_v4 = vsel %vm2487_vm0, %v7984_v57, %v7978_v11  ;;  %v2778_v19 = vsel %vm2760_vm1, %v10956_v48, %v10957_v53  ;;  %v2267_v22 = vmul.f32 %v8354_v36, %v2234_v41  ;;  %v2806_v46 = vmul.f32 %v8436_v39, %v2761_v61 }
 0x6a8   : > { %v3035_v1 = vsel %vm3033_vm2, %v10961_v2, %v10960_v54  ;;  %v2666_v11 = vadd.f32 %v2634_v30, %v2393_v63  ;;  %v2807_v57 = vmul.f32 %v8439_v58, %v2777_v35  ;;  %v2537_v21 = vmul.f32 %v8393_v34, %v2490_v37  ;;  %v10964_v63 = vld [vmem:[#allocation32_spill] sm:$0xff]  ;;  %v8555_v48 = vpop.xlane.xlu0 %3170 }
 0x6a9   : > { %2451 = vrot.lane.b32.xlu1 %v10764_v14, %s4767_s25  ;;  %v2808_v17 = vmul.f32 %v8436_v39, %v2762_v38  ;;  %v3051_v12 = vsel %vm3033_vm2, %v10960_v54, %v10961_v2  ;;  %v2632_v9 = vmul.f32 %v10963_v51, %v2533_v43  ;;  %v2538_v62 = vmul.f32 %v8409_v56, %v2506_v4  ;;  %v8544_v61 = vpop.xlane.xlu1 %2627  ;;  %v10968_v35 = vld [vmem:[#allocation132_spill] sm:$0xff] }
 0x6aa   : > { %3027 = vrot.lane.b32.xlu0 %v10899_v23, %s4769_s15  ;;  %v2534_v23 = vmul.f32 %v8409_v56, %v2504_v52  ;;  %v2809_v13 = vmul.f32 %v8439_v58, %v2778_v19  ;;  %v2667_v10 = vadd.f32 %v2635_v29, %v2394_v44  ;;  %v2365_v24 = vmul.f32 %v10964_v63, %v2266_v55  ;;  %v10965_v52 = vld [vmem:[#allocation191_spill] sm:$0xff]  ;;  %v10970_v38 = vld [vmem:[#allocation140_spill] sm:$0xff]  ;;  %v10971_v55 = vld [vmem:[#allocation186_spill] sm:$0xff] }
 0x6ab   : > { %v3081_v30 = vmul.f32 %v8457_v7, %v3035_v1  ;;  %v2219_v41 = vsel %vm2214_vm15, %v10966_v31, %v10965_v52  ;;  %10967 = vst [vmem:[#allocation83_spill] sm:$0xff] %v8544_v61  ;;  %v2366_v43 = vmul.f32 %v10964_v63, %v2267_v22  ;;  %v2905_v44 = vmul.f32 %v10968_v35, %v2806_v46  ;;  %v10972_v19 = vld [vmem:[#allocation157_spill] sm:$0xff] }
 0x6ac   : > { %v2633_v8 = vmul.f32 %v10963_v51, %v2534_v23  ;;  %v3082_v29 = vmul.f32 %v8460_v5, %v3051_v12  ;;  %v2235_v37 = vsel %vm2214_vm15, %v10965_v52, %v10966_v31  ;;  %10969 = vst [vmem:[#allocation36_spill] sm:$0xff] %v8555_v48  ;;  %v2906_v53 = vmul.f32 %v10968_v35, %v2807_v57  ;;  %v3255_v57 = vld [vmem:[%s9941_s4 + $0x68] sm:$0xff]  ;;  %v10974_v51 = vld [vmem:[#allocation137_spill] sm:$0xff]  ;;  %v10976_v52 = vld [vmem:[#allocation108_spill] sm:$0xff] }
 0x6ad   : > { %3025 = vrot.lane.b32.xlu1 %v10959_v6, %s4769_s15  ;;  %v2636_v23 = vmul.f32 %v10970_v38, %v2537_v21  ;;  %v2907_v4 = vmul.f32 %v10971_v55, %v2808_v17  ;;  %v10973_v6 = vld [vmem:[#allocation142_spill] sm:$0xff]  ;;  %v2637_v46 = vmul.f32 %v10970_v38, %v2538_v62  ;;  %v2908_v54 = vmul.f32 %v10971_v55, %v2809_v13  ;;  %v11006_v48 = vld [vmem:[#allocation104_spill] sm:$0xff] }
 0x6ae   : > { %2726 = vrot.lane.b32.xlu0 %v10962_v15, %s4768_s28  ;;  %v2491_v22 = vsel %vm2487_vm0, %v10973_v6, %v10972_v19  ;;  %v2268_v2 = vmul.f32 %v8349_v20, %v2219_v41  ;;  %v2507_v1 = vsel %vm2487_vm0, %v10972_v19, %v10973_v6  ;;  %v2664_v21 = vadd.f32 %v2632_v9, %v8445_v16  ;;  %v10975_v13 = vld [vmem:[#allocation98_spill] sm:$0xff]  ;;  %v8587_v16 = vpop.permute.xlu1 %2204 }
 0x6af   : > { %v2665_v17 = vadd.f32 %v2633_v8, %v8447_v26  ;;  %v2269_v12 = vmul.f32 %v8354_v36, %v2235_v37  ;;  %v3180_v62 = vmul.f32 %v10974_v51, %v3081_v30  ;;  %v2397_v63 = vadd.f32 %v2365_v24, %v10975_v13  ;;  %v10977_v8 = vld [vmem:[#allocation134_spill] sm:$0xff]  ;;  %v8594_v37 = vpop.permute.xlu0 %2206 }
 0x6b0   : > { %v2398_v31 = vadd.f32 %v2366_v43, %v10976_v52  ;;  %v2539_v41 = vmul.f32 %v8393_v34, %v2491_v22  ;;  %v3181_v35 = vmul.f32 %v10974_v51, %v3082_v29  ;;  %v2540_v38 = vmul.f32 %v8409_v56, %v2507_v1  ;;  %v10978_v19 = vld [vmem:[#allocation174_spill] sm:$0xff]  ;;  %v10988_v51 = vld [vmem:[#allocation160_spill] sm:$0xff] }
 0x6b1   : > { %2453 = vrot.lane.b32.xlu1 %v10962_v15, %s4767_s25  ;;  %v8589_v26 = vadd.f32 %v2905_v44, %v2664_v21  ;;  %v8591_v9 = vadd.f32 %v2906_v53, %v2665_v17  ;;  %v2367_v30 = vmul.f32 %v10977_v8, %v2268_v2  ;;  %v2940_v24 = vadd.f32 %v2908_v54, %v2667_v10  ;;  %v10979_v6 = vld [vmem:[#allocation158_spill] sm:$0xff]  ;;  %v10980_v53 = vld [vmem:[#allocation61_spill] sm:$0xff] }
 0x6b2   : > { %2997 = vrot.lane.b32.xlu0 %v10764_v14, %s4769_s15  ;;  %v2668_v43 = vadd.f32 %v2636_v23, %v8465_v49  ;;  %v8598_v55 = vadd.f32 %v2637_v46, %v8477_v45  ;;  %v2368_v29 = vmul.f32 %v10977_v8, %v2269_v12  ;;  %v2763_v44 = vsel %vm2760_vm1, %v10979_v6, %v10978_v19  ;;  %v10982_v49 = vld [vmem:[#allocation205_spill] sm:$0xff]  ;;  %v10983_v23 = vld [vmem:[#allocation23_spill] sm:$0xff]  ;;  %v3254_v54 = vld [vmem:[%s9941_s4 + $0x60] sm:$0xff] }
 0x6b3   : > { %v2638_v45 = vmul.f32 %v10982_v49, %v2539_v41  ;;  %v8625_v2 = vadd.f32 %v3181_v35, %v2940_v24  ;;  %v2639_v1 = vmul.f32 %v10982_v49, %v2540_v38  ;;  %v10987_v21 = vld [vmem:[#allocation9_spill] sm:$0xff]  ;;  %v2810_v52 = vmul.f32 %v8436_v39, %v2763_v44  ;;  %v10990_v38 = vld [vmem:[#allocation6_spill] sm:$0xff]  ;;  %v8662_v49 = vpop.permute.xlu1 %2475 }
 0x6b4   : > { %v3257_v24 = vld [vmem:[%s9941_s4 + $0x78] sm:$0xff] }
 0x6b5   : > { %2724 = vrot.lane.b32.xlu1 %v10764_v14, %s4768_s28  ;;  %v2939_v14 = vadd.f32 %v2907_v4, %v2666_v11  ;;  %v2779_v11 = vsel %vm2760_vm1, %v10978_v19, %v10979_v6  ;;  %v10984_v4 = vld [vmem:[#allocation85_spill] sm:$0xff]  ;;  %10985 = vst [vmem:[#allocation20_spill] sm:$0xff] %v8625_v2  ;;  %v10992_v19 = vld [vmem:[#allocation106_spill] sm:$0xff] }
 0x6b6   : > { %3325 = vperm.xlu0 %4378, %v3255_v57   ;;  %v3034_v22 = vsel %vm3033_vm2, %v10984_v4, %v10983_v23  ;;  %v3050_v46 = vsel %vm3033_vm2, %v10983_v23, %v10984_v4  ;;  %v10986_v57 = vld [vmem:[#allocation189_spill] sm:$0xff]  ;;  %v2811_v41 = vmul.f32 %v8439_v58, %v2779_v11  ;;  %v2399_v6 = vadd.f32 %v2367_v30, %v10992_v19 }
 0x6b7   : > { %v8611_v10 = vadd.f32 %v3180_v62, %v2939_v14  ;;  %v2220_v17 = vsel %vm2214_vm15, %v10987_v21, %v10986_v57  ;;  %v2236_v12 = vsel %vm2214_vm15, %v10986_v57, %v10987_v21  ;;  %v10989_v62 = vld [vmem:[#allocation84_spill] sm:$0xff]  ;;  %v10991_v14 = vld [vmem:[#allocation81_spill] sm:$0xff]  ;;  %v3079_v44 = vmul.f32 %v8457_v7, %v3034_v22 }
 0x6b8   : > { %v2492_v13 = vsel %vm2487_vm0, %v10989_v62, %v10988_v51  ;;  %v2508_v35 = vsel %vm2487_vm0, %v10988_v51, %v10989_v62  ;;  %v2764_v8 = vsel %vm2760_vm1, %v10991_v14, %v10990_v38  ;;  %v3080_v11 = vmul.f32 %v8460_v5, %v3050_v46  ;;  %v10993_v23 = vld [vmem:[#allocation113_spill] sm:$0xff]  ;;  %v8668_v51 = vpop.permute.xlu0 %2716 }
 0x6b9   : > { %2995 = vrot.lane.b32.xlu1 %v10980_v53, %s4769_s15  ;;  %10981 = vst [vmem:[#allocation78_spill] sm:$0xff] %v8611_v10  ;;  %v2780_v53 = vsel %vm2760_vm1, %v10990_v38, %v10991_v14  ;;  %v2400_v4 = vadd.f32 %v2368_v29, %v10993_v23  ;;  %v2270_v57 = vmul.f32 %v8349_v20, %v2220_v17  ;;  %10994 = vst [vmem:[#allocation39_spill] sm:$0xff] %v8668_v51  ;;  %v10995_v14 = vld [vmem:[#allocation135_spill] sm:$0xff]  ;;  %v10997_v23 = vld [vmem:[#allocation16_spill] sm:$0xff] }
 0x6ba   : > { %3031 = vrot.lane.b32.xlu0 %v10921_v0, %s4769_s15  ;;  %v2271_v21 = vmul.f32 %v8354_v36, %v2236_v12  ;;  %v2541_v30 = vmul.f32 %v8393_v34, %v2492_v13  ;;  %v2542_v22 = vmul.f32 %v8409_v56, %v2508_v35  ;;  %v2812_v46 = vmul.f32 %v8436_v39, %v2764_v8  ;;  %v10996_v17 = vld [vmem:[#allocation195_spill] sm:$0xff]  ;;  %v10998_v13 = vld [vmem:[#allocation206_spill] sm:$0xff] }
 0x6bb   : > { %v2670_v62 = vadd.f32 %v2638_v45, %v2397_v63  ;;  %v2671_v38 = vadd.f32 %v2639_v1, %v2398_v31  ;;  %v2909_v19 = vmul.f32 %v10995_v14, %v2810_v52  ;;  %v2813_v29 = vmul.f32 %v8439_v58, %v2780_v53  ;;  %v10999_v31 = vld [vmem:[#allocation161_spill] sm:$0xff]  ;;  %v11001_v52 = vld [vmem:[#allocation15_spill] sm:$0xff] }
 0x6bc   : > { %v3036_v12 = vsel %vm3033_vm2, %v10997_v23, %v10996_v17  ;;  %v3178_v28 = vmul.f32 %v10998_v13, %v3079_v44  ;;  %v3179_v35 = vmul.f32 %v10998_v13, %v3080_v11  ;;  %v3052_v63 = vsel %vm3033_vm2, %v10996_v17, %v10997_v23  ;;  %v11000_v45 = vld [vmem:[#allocation125_spill] sm:$0xff]  ;;  %v11004_v13 = vld [vmem:[#allocation162_spill] sm:$0xff] }
 0x6bd   : > { %3320 = vperm.xlu1 %4377, %v3254_v54   ;;  %v2910_v54 = vmul.f32 %v10995_v14, %v2811_v41  ;;  %v2221_v1 = vsel %vm2214_vm15, %v11000_v45, %v10999_v31  ;;  %v2369_v41 = vmul.f32 %v11001_v52, %v2270_v57  ;;  %v2370_v8 = vmul.f32 %v11001_v52, %v2271_v21  ;;  %v11003_v14 = vld [vmem:[#allocation172_spill] sm:$0xff]  ;;  %v8705_v57 = vpop.permute.xlu1 %2714 }
 0x6be   : > { %3335 = vperm.xlu0 %4378, %v3257_v24   ;;  %v11002_v24 = vld [vmem:[#allocation139_spill] sm:$0xff]  ;;  %v2237_v11 = vsel %vm2214_vm15, %v10999_v31, %v11000_v45  ;;  %v2911_v17 = vmul.f32 %v11003_v14, %v2812_v46  ;;  %v3083_v23 = vmul.f32 %v8457_v7, %v3036_v12  ;;  %v2912_v21 = vmul.f32 %v11003_v14, %v2813_v29  ;;  %v8710_v31 = vpop.permute.xlu0 %2987 }
 0x6bf   : > { %v2640_v44 = vmul.f32 %v11002_v24, %v2541_v30  ;;  %v2641_v53 = vmul.f32 %v11002_v24, %v2542_v22  ;;  %v3084_v30 = vmul.f32 %v8460_v5, %v3052_v63  ;;  %v2272_v52 = vmul.f32 %v8349_v20, %v2221_v1  ;;  %v11007_v14 = vld [vmem:[#allocation27_spill] sm:$0xff] }
 0x6c0   : > { %v2941_v22 = vadd.f32 %v2909_v19, %v2668_v43  ;;  %v2273_v46 = vmul.f32 %v8354_v36, %v2237_v11  ;;  %v3210_v12 = vadd.f32 %v3178_v28, %v8589_v26  ;;  %v3211_v45 = vadd.f32 %v3179_v35, %v8591_v9  ;;  %v11008_v43 = vld [vmem:[#allocation155_spill] sm:$0xff] }
 0x6c1   : > { %2758 = vrot.lane.b32.xlu1 %v10921_v0, %s4768_s28  ;;  %v2493_v0 = vsel %vm2487_vm0, %v11005_v50, %v11004_v13  ;;  %v2942_v24 = vadd.f32 %v2910_v54, %v8598_v55  ;;  %v2401_v29 = vadd.f32 %v2369_v41, %v11006_v48  ;;  %v8720_v63 = vadd.f32 %v2370_v8, %v11007_v14  ;;  %v11009_v55 = vld [vmem:[#allocation173_spill] sm:$0xff] }
 0x6c2   : > { %v2543_v1 = vmul.f32 %v8393_v34, %v2493_v0  ;;  %v8723_v61 = vadd.f32 %v2640_v44, %v2399_v6  ;;  %v3182_v28 = vmul.f32 %v11008_v43, %v3083_v23  ;;  %v8730_v26 = vadd.f32 %v2911_v17, %v2670_v62  ;;  %v11010_v48 = vld [vmem:[#allocation21_spill] sm:$0xff]  ;;  %v11014_v62 = vld [vmem:[#allocation146_spill] sm:$0xff]  ;;  %v8753_v17 = vpop.permute.xlu1 %2985  ;;  %v11016_v0 = vld [vmem:[#allocation164_spill] sm:$0xff] }
 0x6c3   : > { %v2673_v9 = vadd.f32 %v2641_v53, %v2400_v4  ;;  %v2371_v19 = vmul.f32 %v11009_v55, %v2272_v52  ;;  %v11011_v54 = vld [vmem:[#allocation5_spill] sm:$0xff]  ;;  %v3183_v6 = vmul.f32 %v11008_v43, %v3084_v30  ;;  %v2944_v8 = vadd.f32 %v2912_v21, %v2671_v38  ;;  %v11013_v4 = vld [vmem:[#allocation87_spill] sm:$0xff]  ;;  %v11017_v21 = vld [vmem:[#allocation122_spill] sm:$0xff] }
 0x6c4   : > { %v2765_v35 = vsel %vm2760_vm1, %v11011_v54, %v11010_v48  ;;  %v2372_v44 = vmul.f32 %v11009_v55, %v2273_v46  ;;  %v3037_v11 = vsel %vm3033_vm2, %v11014_v62, %v11013_v4  ;;  %v3053_v53 = vsel %vm3033_vm2, %v11013_v4, %v11014_v62  ;;  %v11015_v23 = vld [vmem:[#allocation185_spill] sm:$0xff]  ;;  %v3256_v46 = vld [vmem:[%s9941_s4 + $0x70] sm:$0xff] }
 0x6c5   : > { %3029 = vrot.lane.b32.xlu1 %v10766_v25, %s4769_s15  ;;  %v2509_v25 = vsel %vm2487_vm0, %v11004_v13, %v11005_v50  ;;  %v8737_v41 = vpop.xlane.xlu0 %3173  ;;  %v2781_v50 = vsel %vm2760_vm1, %v11010_v48, %v11011_v54  ;;  %v2642_v13 = vmul.f32 %v11015_v23, %v2543_v1  ;;  %v2222_v30 = vsel %vm2214_vm15, %v11017_v21, %v11016_v0  ;;  %v11018_v14 = vld [vmem:[#allocation165_spill] sm:$0xff] }
 0x6c6   : > { %11012 = vst [vmem:[#allocation37_spill] sm:$0xff] %v8737_v41  ;;  %v2544_v38 = vmul.f32 %v8409_v56, %v2509_v25  ;;  %v2238_v52 = vsel %vm2214_vm15, %v11016_v0, %v11017_v21  ;;  %v11019_v25 = vld [vmem:[#allocation80_spill] sm:$0xff]  ;;  %v8779_v55 = vadd.f32 %v3182_v28, %v2941_v22  ;;  %v2815_v48 = vmul.f32 %v8439_v58, %v2781_v50  ;;  %v11023_v21 = vld [vmem:[#allocation29_spill] sm:$0xff]  ;;  %v8790_v2 = vpop.xlane.xlu1 %2900 }
 0x6c7   : > { %v2494_v1 = vsel %vm2487_vm0, %v11019_v25, %v11018_v14  ;;  %v2510_v43 = vsel %vm2487_vm0, %v11018_v14, %v11019_v25  ;;  %v3085_v54 = vmul.f32 %v8457_v7, %v3037_v11  ;;  %v3086_v4 = vmul.f32 %v8460_v5, %v3053_v53  ;;  %11024 = vst [vmem:[#allocation38_spill] sm:$0xff] %v8790_v2  ;;  %v11026_v53 = vld [vmem:[#allocation4_spill] sm:$0xff]  ;;  %v11037_v2 = vld [vmem:[#allocation109_spill] sm:$0xff] }
 0x6c8   : > { %11020 = vst [vmem:[#allocation35_spill] sm:$0xff] %v8779_v55  ;;  %v8784_v62 = vadd.f32 %v3183_v6, %v2942_v24  ;;  %v2404_v41 = vadd.f32 %v2372_v44, %v11023_v21  ;;  %v2274_v18 = vmul.f32 %v8349_v20, %v2222_v30  ;;  %v2275_v32 = vmul.f32 %v8354_v36, %v2238_v52  ;;  %v11025_v6 = vld [vmem:[#allocation82_spill] sm:$0xff]  ;;  %v11027_v44 = vld [vmem:[#allocation11_spill] sm:$0xff] }
 0x6c9   : > { %2999 = vrot.lane.b32.xlu1 %v10962_v15, %s4769_s15  ;;  %v2814_v15 = vmul.f32 %v8436_v39, %v2765_v35  ;;  %v11022_v35 = vld [vmem:[#allocation107_spill] sm:$0xff]  ;;  %v2643_v22 = vmul.f32 %v11015_v23, %v2544_v38  ;;  %v2545_v28 = vmul.f32 %v8393_v34, %v2494_v1  ;;  %v2546_v50 = vmul.f32 %v8409_v56, %v2510_v43  ;;  %v11030_v43 = vld [vmem:[#allocation168_spill] sm:$0xff]  ;;  %s9916_s15 = scalar_lea.vmem %s9949_s12, %s4358_s29 }
 0x6ca   : > { %11021 = vst [vmem:[#allocation42_spill] sm:$0xff] %v8784_v62  ;;  %v2403_v0 = vadd.f32 %v2371_v19, %v11022_v35  ;;  %v8795_v24 = vadd.f32 %v2642_v13, %v2401_v29  ;;  %v2766_v30 = vsel %vm2760_vm1, %v11027_v44, %v11026_v53  ;;  %v2914_v38 = vmul.f32 %v11025_v6, %v2815_v48  ;;  %v11028_v29 = vld [vmem:[#allocation156_spill] sm:$0xff] }
 0x6cb   : > { %v2913_v19 = vmul.f32 %v11025_v6, %v2814_v15  ;;  %v2782_v23 = vsel %vm2760_vm1, %v11026_v53, %v11027_v44  ;;  %v3184_v13 = vmul.f32 %v11028_v29, %v3085_v54  ;;  %v11029_v15 = vld [vmem:[#allocation175_spill] sm:$0xff]  ;;  %v2644_v35 = vmul.f32 %v11030_v43, %v2545_v28  ;;  %v11032_v6 = vld [vmem:[#allocation33_spill] sm:$0xff]  ;;  %v8835_v44 = vpop.permute.xlu1 %2445 }
 0x6cc   : > { %v2373_v25 = vmul.f32 %v11029_v15, %v2274_v18  ;;  %v2374_v1 = vmul.f32 %v11029_v15, %v2275_v32  ;;  %v2645_v48 = vmul.f32 %v11030_v43, %v2546_v50  ;;  %v2816_v21 = vmul.f32 %v8436_v39, %v2766_v30  ;;  %v11033_v53 = vld [vmem:[#allocation147_spill] sm:$0xff] }
 0x6cd   : > { %3330 = vperm.xlu1 %4377, %v3256_v46   ;;  %v3261_v11 = vpop.permute.xlu0 %3260  ;;  %v3185_v46 = vmul.f32 %v11028_v29, %v3086_v4  ;;  %v2817_v18 = vmul.f32 %v8439_v58, %v2782_v23  ;;  %v11034_v28 = vld [vmem:[#allocation75_spill] sm:$0xff]  ;;  %v2945_v30 = vadd.f32 %v2913_v19, %v8723_v61  ;;  %v2946_v29 = vadd.f32 %v2914_v38, %v2673_v9 }
 0x6ce   : > { %v8802_v52 = vadd.f32 %v3261_v11, %v3210_v12  ;;  %v8804_v14 = vadd.f32 %v3261_v11, %v3211_v45  ;;  %v11031_v11 = vld [vmem:[#allocation182_spill] sm:$0xff]  ;;  %v2223_v50 = vsel %vm2214_vm15, %v11034_v28, %v11033_v53  ;;  %v2675_v15 = vadd.f32 %v2643_v22, %v8720_v63  ;;  %v11040_v22 = vld [vmem:[#allocation169_spill] sm:$0xff] }
 0x6cf   : > { %v3038_v54 = vsel %vm3033_vm2, %v11032_v6, %v11031_v11  ;;  %v3054_v32 = vsel %vm3033_vm2, %v11031_v11, %v11032_v6  ;;  %v2239_v43 = vsel %vm2214_vm15, %v11033_v53, %v11034_v28  ;;  %v8845_v11 = vadd.f32 %v3184_v13, %v8730_v26  ;;  %v11042_v13 = vld [vmem:[#allocation8_spill] sm:$0xff]  ;;  %v11047_v28 = vld [vmem:[#allocation143_spill] sm:$0xff] }
 0x6d0   : > { %v4305_v12 = vmul.f32 -1.442695, %v8802_v52  ;;  %v4306_v45 = vmul.f32 -1.442695, %v8804_v14  ;;  %v3087_v23 = vmul.f32 %v8457_v7, %v3038_v54  ;;  %v8847_v6 = vadd.f32 %v3185_v46, %v2944_v8  ;;  %v11041_v8 = vld [vmem:[#allocation100_spill] sm:$0xff] }
 0x6d1   : > { %v8824_v4 = vpop.permute.xlu0 %3300  ;;  %11035 = vst [vmem:[#allocation40_spill] sm:$0xff] %v8845_v11  ;;  %v3088_v61 = vmul.f32 %v8460_v5, %v3054_v32  ;;  %v2276_v63 = vmul.f32 %v8349_v20, %v2223_v50  ;;  %v2915_v19 = vmul.f32 %v11040_v22, %v2816_v21  ;;  %v2916_v38 = vmul.f32 %v11040_v22, %v2817_v18  ;;  %v8882_v32 = vpop.permute.xlu1 %2477  ;;  %v11049_v22 = vld [vmem:[#allocation24_spill] sm:$0xff]  ;;  %v11053_v11 = vld [vmem:[#allocation97_spill] sm:$0xff] }
 0x6d2   : > { %4517 = vpow2.f32 %v4305_v12  ;;  %11036 = vst [vmem:[#allocation43_spill] sm:$0xff] %v8847_v6  ;;  %v2405_v12 = vadd.f32 %v2373_v25, %v11037_v2  ;;  %v2676_v54 = vadd.f32 %v2644_v35, %v2403_v0  ;;  %v2677_v53 = vadd.f32 %v2645_v48, %v2404_v41  ;;  %v11043_v25 = vld [vmem:[#allocation89_spill] sm:$0xff]  ;;  %v11045_v0 = vld [vmem:[#allocation92_spill] sm:$0xff]  ;;  %v11046_v35 = vld [vmem:[#allocation167_spill] sm:$0xff] }
 0x6d3   : > { %4519 = vpow2.f32 %v4306_v45  ;;  %v11038_v45 = vld [vmem:[#allocation105_spill] sm:$0xff]  ;;  %v2277_v26 = vmul.f32 %v8354_v36, %v2239_v43  ;;  %v2495_v2 = vsel %vm2487_vm0, %v11042_v13, %v11041_v8  ;;  %v2511_v46 = vsel %vm2487_vm0, %v11041_v8, %v11042_v13  ;;  %v11050_v8 = vld [vmem:[#allocation127_spill] sm:$0xff]  ;;  %v11052_v6 = vld [vmem:[#allocation60_spill] sm:$0xff] }
 0x6d4   : > { %v2406_v62 = vadd.f32 %v2374_v1, %v11038_v45  ;;  %v11044_v1 = vld [vmem:[#allocation166_spill] sm:$0xff]  ;;  %v3039_v48 = vsel %vm3033_vm2, %v11046_v35, %v11045_v0  ;;  %v3055_v18 = vsel %vm3033_vm2, %v11045_v0, %v11046_v35  ;;  %v3186_v50 = vmul.f32 %v11047_v28, %v3087_v23  ;;  %v11048_v43 = vld [vmem:[#allocation141_spill] sm:$0xff] }
 0x6d5   : > { %v8853_v9 = vpop.permute.xlu0 %2208  ;;  %v2767_v21 = vsel %vm2760_vm1, %v11044_v1, %v11043_v25  ;;  %v2783_v41 = vsel %vm2760_vm1, %v11043_v25, %v11044_v1  ;;  %v2375_v45 = vmul.f32 %v11048_v43, %v2276_v63  ;;  %v2224_v13 = vsel %vm2214_vm15, %v11050_v8, %v11049_v22 }
 0x6d6   : > { %11039 = vst [vmem:[#allocation46_spill] sm:$0xff] %v8853_v9  ;;  %v2240_v25 = vsel %vm2214_vm15, %v11049_v22, %v11050_v8  ;;  %v3187_v0 = vmul.f32 %v11047_v28, %v3088_v61  ;;  %v2547_v35 = vmul.f32 %v8393_v34, %v2495_v2  ;;  %v2548_v23 = vmul.f32 %v8409_v56, %v2511_v46 }
 0x6d7   : > { %v2818_v63 = vmul.f32 %v8436_v39, %v2767_v21  ;;  %v2496_v55 = vsel %vm2487_vm0, %v11053_v11, %v11052_v6  ;;  %v2376_v10 = vmul.f32 %v11048_v43, %v2277_v26  ;;  %v2819_v9 = vmul.f32 %v8439_v58, %v2783_v41 }
 0x6d8   : > { %v3089_v22 = vmul.f32 %v8457_v7, %v3039_v48  ;;  %v3090_v8 = vmul.f32 %v8460_v5, %v3055_v18  ;;  %v2278_v61 = vmul.f32 %v8349_v20, %v2224_v13  ;;  %v2279_v2 = vmul.f32 %v8354_v36, %v2240_v25  ;;  %v11057_v18 = vld [vmem:[#allocation114_spill] sm:$0xff] }
 0x6d9   : > { %v8894_v1 = vpop.permute.xlu0 %2718  ;;  %v2947_v46 = vadd.f32 %v2915_v19, %v8795_v24  ;;  %v2948_v21 = vadd.f32 %v2916_v38, %v2675_v15  ;;  %v2512_v28 = vsel %vm2487_vm0, %v11052_v6, %v11053_v11  ;;  %v2549_v26 = vmul.f32 %v8393_v34, %v2496_v55  ;;  %v11059_v15 = vld [vmem:[#allocation187_spill] sm:$0xff]  ;;  %v8926_v38 = vpop.permute.xlu1 %2748 }
 0x6da   : > { %11051 = vst [vmem:[#allocation41_spill] sm:$0xff] %v8894_v1  ;;  %v8918_v41 = vadd.f32 %v3186_v50, %v2945_v30  ;;  %v8920_v48 = vadd.f32 %v3187_v0, %v2946_v29  ;;  %v2407_v13 = vadd.f32 %v2375_v45, %v11057_v18  ;;  %v11058_v1 = vld [vmem:[#allocation90_spill] sm:$0xff]  ;;  %v2917_v19 = vmul.f32 %v11059_v15, %v2818_v63  ;;  %v11060_v11 = vld [vmem:[#allocation31_spill] sm:$0xff]  ;;  %v11062_v0 = vld [vmem:[#allocation193_spill] sm:$0xff] }
 0x6db   : > { %v2646_v25 = vmul.f32 %v11058_v1, %v2547_v35  ;;  %v2647_v24 = vmul.f32 %v11058_v1, %v2548_v23  ;;  %v2408_v6 = vadd.f32 %v2376_v10, %v11060_v11  ;;  %v2918_v55 = vmul.f32 %v11059_v15, %v2819_v9  ;;  %v11063_v63 = vld [vmem:[#allocation76_spill] sm:$0xff]  ;;  %v11066_v15 = vld [vmem:[#allocation26_spill] sm:$0xff] }
 0x6dc   : > { %11055 = vst [vmem:[#allocation47_spill] sm:$0xff] %v8918_v41  ;;  %11056 = vst [vmem:[#allocation45_spill] sm:$0xff] %v8920_v48  ;;  %v2377_v45 = vmul.f32 %v11062_v0, %v2278_v61  ;;  %v2378_v35 = vmul.f32 %v11062_v0, %v2279_v2  ;;  %v2550_v1 = vmul.f32 %v8409_v56, %v2512_v28  ;;  %v11064_v48 = vld [vmem:[#allocation99_spill] sm:$0xff]  ;;  %v11065_v41 = vld [vmem:[#allocation148_spill] sm:$0xff] }
 0x6dd   : > { %v8916_v43 = vpop.permute.xlu0 %2989  ;;  %v2648_v18 = vmul.f32 %v11063_v63, %v2549_v26  ;;  %v2768_v10 = vsel %vm2760_vm1, %v11065_v41, %v11064_v48  ;;  %v2784_v9 = vsel %vm2760_vm1, %v11064_v48, %v11065_v41  ;;  %v8946_v61 = vadd.f32 %v2917_v19, %v2676_v54  ;;  %v3020_v54 = vpop.permute.xlu1 %3019  ;;  %v11067_v19 = vld [vmem:[#allocation112_spill] sm:$0xff]  ;;  %v11072_v0 = vld [vmem:[#allocation30_spill] sm:$0xff] }
 0x6de   : > { %11054 = vst [vmem:[#allocation44_spill] sm:$0xff] %v8916_v43  ;;  %v11061_v43 = vld [vmem:[#allocation79_spill] sm:$0xff]  ;;  %v2678_v2 = vadd.f32 %v2646_v25, %v2405_v12  ;;  %v8955_v11 = vadd.f32 %v2377_v45, %v11066_v15  ;;  %v2649_v41 = vmul.f32 %v11063_v63, %v2550_v1  ;;  %v2820_v48 = vmul.f32 %v8436_v39, %v2768_v10  ;;  %v11069_v25 = vld [vmem:[#allocation170_spill] sm:$0xff] }
 0x6df   : > { %v4518_v51 = vpop.eup %4517  ;;  %v3188_v30 = vmul.f32 %v11061_v43, %v3089_v22  ;;  %v3189_v29 = vmul.f32 %v11061_v43, %v3090_v8  ;;  %v8952_v43 = vadd.f32 %v2918_v55, %v2677_v53  ;;  %v8961_v12 = vadd.f32 %v2378_v35, %v11067_v19 }
 0x6e0   : > { %v4520_v50 = vpop.eup %4519  ;;  %v3466_v23 = vadd.f32 1.0, %v4518_v51  ;;  %v2679_v51 = vadd.f32 %v2647_v24, %v2406_v62  ;;  %v2680_v62 = vadd.f32 %v2648_v18, %v2407_v13  ;;  %v2681_v10 = vadd.f32 %v2649_v41, %v2408_v6 }
 0x6e1   : > { %v3467_v22 = vadd.f32 1.0, %v4520_v50  ;;  %v8944_v8 = vpop.permute.xlu0 %3305  ;;  %v8948_v28 = vadd.f32 %v3188_v30, %v2947_v46  ;;  %v8950_v26 = vadd.f32 %v3189_v29, %v2948_v21  ;;  %v2821_v50 = vmul.f32 %v8439_v58, %v2784_v9  ;;  %v11068_v46 = vld [vmem:[#allocation103_spill] sm:$0xff]  ;;  %v11070_v21 = vld [vmem:[#allocation101_spill] sm:$0xff]  ;;  %v11073_v9 = vld [vmem:[#allocation176_spill] sm:$0xff] }
 0x6e2   : > { %4521 = vrcp.f32 %v3466_v23  ;;  %v3040_v53 = vsel %vm3033_vm2, %v11069_v25, %v11068_v46  ;;  %v2769_v24 = vsel %vm2760_vm1, %v8441_v40, %v11070_v21  ;;  %v3056_v30 = vsel %vm3033_vm2, %v11068_v46, %v11069_v25  ;;  %v11071_v29 = vld [vmem:[#allocation13_spill] sm:$0xff]  ;;  %v8998_v46 = vpop.xlane.xlu1 %2903 }
 0x6e3   : > { %4523 = vrcp.f32 %v3467_v22  ;;  %v2497_v13 = vsel %vm2487_vm0, %v11071_v29, %v8395_v27  ;;  %v2785_v1 = vsel %vm2760_vm1, %v11070_v21, %v8441_v40  ;;  %v3042_v23 = vsel %vm3033_vm2, %v8753_v17, %v8449_v33  ;;  %11074 = vst [vmem:[#allocation50_spill] sm:$0xff] %v8998_v46  ;;  %v11075_v21 = vld [vmem:[#allocation96_spill] sm:$0xff] }
 0x6e4   : > { %v2919_v22 = vmul.f32 %v11073_v9, %v2820_v48  ;;  %v2920_v15 = vmul.f32 %v11073_v9, %v2821_v50  ;;  %v2822_v19 = vmul.f32 %v8436_v39, %v2769_v24  ;;  %v3091_v40 = vmul.f32 %v8457_v7, %v3040_v53 }
 0x6e5   : > { %v2211_v55 = vpop.permute.xlu0 %2210  ;;  %v3092_v25 = vmul.f32 %v8460_v5, %v3056_v30  ;;  %v2513_v6 = vsel %vm2487_vm0, %v8395_v27, %v11071_v29  ;;  %v2551_v41 = vmul.f32 %v8393_v34, %v2497_v13  ;;  %v2823_v48 = vmul.f32 %v8439_v58, %v2785_v1  ;;  %v11076_v30 = vld [vmem:[#allocation128_spill] sm:$0xff]  ;;  %v11078_v27 = vld [vmem:[#allocation133_spill] sm:$0xff]  ;;  %v11080_v13 = vld [vmem:[#allocation74_spill] sm:$0xff] }
 0x6e6   : > { %v2229_v45 = vsel %vm2214_vm15, %v11072_v0, %v2211_v55  ;;  %v2245_v35 = vsel %vm2214_vm15, %v2211_v55, %v11072_v0  ;;  %v3095_v50 = vmul.f32 %v8457_v7, %v3042_v23  ;;  %v2770_v53 = vsel %vm2760_vm1, %v8705_v57, %v8401_v59  ;;  %v11081_v23 = vld [vmem:[#allocation178_spill] sm:$0xff] }
 0x6e7   : > { %v2288_v63 = vmul.f32 %v8349_v20, %v2229_v45  ;;  %v2289_v18 = vmul.f32 %v8354_v36, %v2245_v35  ;;  %v3058_v24 = vsel %vm3033_vm2, %v8449_v33, %v8753_v17  ;;  %v2225_v1 = vsel %vm2214_vm15, %v11080_v13, %v8337_v47 }
 0x6e8   : > { %v9034_v9 = vadd.f32 %v2920_v15, %v2679_v51  ;;  %v2241_v33 = vsel %vm2214_vm15, %v8337_v47, %v11080_v13  ;;  %v2552_v17 = vmul.f32 %v8409_v56, %v2513_v6  ;;  %v2824_v51 = vmul.f32 %v8436_v39, %v2770_v53  ;;  %v11083_v47 = vld [vmem:[#allocation194_spill] sm:$0xff] }
 0x6e9   : > { %v2387_v55 = vmul.f32 %v11075_v21, %v2288_v63  ;;  %v2388_v0 = vmul.f32 %v11075_v21, %v2289_v18  ;;  %v9004_v45 = vpop.permute.xlu0 %2449  ;;  %v2921_v63 = vmul.f32 %v11081_v23, %v2822_v19  ;;  %v9032_v18 = vadd.f32 %v2919_v22, %v2678_v2  ;;  %v9054_v19 = vpop.permute.xlu1 %2447  ;;  %v11084_v13 = vld [vmem:[#allocation86_spill] sm:$0xff] }
 0x6ea   : > { %v3043_v21 = vsel %vm3033_vm2, %v8710_v31, %v3020_v54  ;;  %v2786_v2 = vsel %vm2760_vm1, %v8401_v59, %v8705_v57  ;;  %v3096_v22 = vmul.f32 %v8460_v5, %v3058_v24  ;;  %v3194_v15 = vmul.f32 %v11083_v47, %v3095_v50 }
 0x6eb   : > { %v9022_v35 = vadd.f32 %v2387_v55, %v11076_v30  ;;  %v9025_v29 = vadd.f32 %v2388_v0, %v11078_v27  ;;  %v11082_v0 = vld [vmem:[#allocation159_spill] sm:$0xff]  ;;  %v2280_v27 = vmul.f32 %v8349_v20, %v2225_v1  ;;  %v2650_v46 = vmul.f32 %v11084_v13, %v2551_v41 }
 0x6ec   : > { %v3190_v30 = vmul.f32 %v11082_v0, %v3091_v40  ;;  %v2922_v40 = vmul.f32 %v11081_v23, %v2823_v48  ;;  %v3059_v59 = vsel %vm3033_vm2, %v3020_v54, %v8710_v31  ;;  %v3097_v57 = vmul.f32 %v8457_v7, %v3043_v21  ;;  %v11087_v23 = vld [vmem:[#allocation17_spill] sm:$0xff] }
 0x6ed   : > { %11077 = vst [vmem:[#allocation48_spill] sm:$0xff] %v9022_v35  ;;  %11079 = vst [vmem:[#allocation51_spill] sm:$0xff] %v9025_v29  ;;  %v9044_v55 = vpop.permute.xlu0 %2481  ;;  %v3191_v29 = vmul.f32 %v11082_v0, %v3092_v25  ;;  %v2953_v53 = vadd.f32 %v2921_v63, %v2680_v62  ;;  %v2281_v24 = vmul.f32 %v8354_v36, %v2241_v33  ;;  %v11088_v54 = vld [vmem:[#allocation181_spill] sm:$0xff] }
 0x6ee   : > { %v2651_v1 = vmul.f32 %v11084_v13, %v2552_v17  ;;  %v2825_v41 = vmul.f32 %v8439_v58, %v2786_v2  ;;  %v3041_v31 = vsel %vm3033_vm2, %v8515_v60, %v11087_v23  ;;  %v3195_v62 = vmul.f32 %v11083_v47, %v3096_v22  ;;  %v11089_v21 = vld [vmem:[#allocation121_spill] sm:$0xff]  ;;  %v9093_v2 = vpop.permute.xlu1 %2479  ;;  %v11090_v47 = vld [vmem:[#allocation196_spill] sm:$0xff] }
 0x6ef   : > { %v4522_v6 = vpop.eup %4521  ;;  %v3226_v63 = vadd.f32 %v3194_v15, %v2953_v53  ;;  %v3057_v33 = vsel %vm3033_vm2, %v11087_v23, %v8515_v60  ;;  %v2226_v0 = vsel %vm2214_vm15, %v11089_v21, %v8587_v16  ;;  %v3196_v60 = vmul.f32 %v11090_v47, %v3097_v57  ;;  %v11091_v15 = vld [vmem:[#allocation144_spill] sm:$0xff] }
 0x6f0   : > { %v4524_v35 = vpop.eup %4523  ;;  %v9065_v50 = vmul.f32 %v4522_v6, %v8802_v52  ;;  %v2923_v52 = vmul.f32 %v11088_v54, %v2824_v51  ;;  %v2954_v51 = vadd.f32 %v2922_v40, %v2681_v10  ;;  %v2379_v6 = vmul.f32 %v11091_v15, %v2280_v27 }
 0x6f1   : > { %v9071_v48 = vmul.f32 %v4524_v35, %v8804_v14  ;;  %v9073_v25 = vpop.permute.xlu0 %2720  ;;  %v3098_v14 = vmul.f32 %v8460_v5, %v3059_v59  ;;  %v2682_v35 = vadd.f32 %v2650_v46, %v8955_v11  ;;  %v9096_v22 = vadd.f32 %v8824_v4, %v3226_v63 }
 0x6f2   : > { %11085 = vst [vmem:[#allocation54_spill] sm:$0xff] %v9065_v50  ;;  %v2380_v11 = vmul.f32 %v11091_v15, %v2281_v24  ;;  %v3093_v46 = vmul.f32 %v8457_v7, %v3041_v31  ;;  %v2924_v13 = vmul.f32 %v11088_v54, %v2825_v41  ;;  %v3094_v53 = vmul.f32 %v8460_v5, %v3057_v33 }
 0x6f3   : > { %11086 = vst [vmem:[#allocation49_spill] sm:$0xff] %v9071_v48  ;;  %v3594_v17 = vadd.f32 %v9071_v48, %v9065_v50  ;;  %v3227_v23 = vadd.f32 %v3195_v62, %v2954_v51  ;;  %v2683_v10 = vadd.f32 %v2651_v1, %v8961_v12  ;;  %v2955_v40 = vadd.f32 %v2923_v52, %v2682_v35  ;;  %v11092_v52 = vld [vmem:[#allocation124_spill] sm:$0xff]  ;;  %v11093_v35 = vld [vmem:[#allocation179_spill] sm:$0xff] }
 0x6f4   : > { %v2242_v27 = vsel %vm2214_vm15, %v8587_v16, %v11089_v21  ;;  %v2282_v57 = vmul.f32 %v8349_v20, %v2226_v0  ;;  %v2498_v24 = vsel %vm2487_vm0, %v8341_v42, %v8662_v49  ;;  %v3197_v41 = vmul.f32 %v11090_v47, %v3098_v14  ;;  %v11094_v0 = vld [vmem:[#allocation120_spill] sm:$0xff] }
 0x6f5   : > { %3595 = vadd.xlane.f32.xlu1 %v3594_v17  ;;  %v9103_v59 = vpop.permute.xlu0 %2752  ;;  %v9118_v31 = vadd.f32 %v8824_v4, %v3227_v23  ;;  %v4321_v12 = vmul.f32 -1.442695, %v9096_v22  ;;  %v3228_v1 = vadd.f32 %v3196_v60, %v2955_v40  ;;  %v9122_v54 = vadd.f32 %v3190_v30, %v8946_v61  ;;  %v9137_v30 = vpop.permute.xlu1 %2750 }
 0x6f6   : > { %v2411_v16 = vadd.f32 %v2379_v6, %v11092_v52  ;;  %v2956_v62 = vadd.f32 %v2924_v13, %v2683_v10  ;;  %v9128_v33 = vadd.f32 %v3191_v29, %v8952_v43  ;;  %v3192_v17 = vmul.f32 %v11093_v35, %v3093_v46  ;;  %v11095_v43 = vld [vmem:[#allocation180_spill] sm:$0xff] }
 0x6f7   : > { %v2283_v14 = vmul.f32 %v8354_v36, %v2242_v27  ;;  %v2514_v4 = vsel %vm2487_vm0, %v8662_v49, %v8341_v42  ;;  %v2553_v61 = vmul.f32 %v8393_v34, %v2498_v24  ;;  %v9140_v21 = vadd.f32 %v8944_v8, %v3228_v1 }
 0x6f8   : > { %v2412_v51 = vadd.f32 %v2380_v11, %v11094_v0  ;;  %v2381_v29 = vmul.f32 %v11095_v43, %v2282_v57  ;;  %v3229_v47 = vadd.f32 %v3197_v41, %v2956_v62  ;;  %v3193_v60 = vmul.f32 %v11093_v35, %v3094_v53  ;;  %v11096_v11 = vld [vmem:[#allocation126_spill] sm:$0xff]  ;;  %v11099_v62 = vld [vmem:[#allocation116_spill] sm:$0xff] }
 0x6f9   : > { %v9125_v63 = vpop.permute.xlu0 %2991  ;;  %v2499_v15 = vsel %vm2487_vm0, %v8835_v44, %v8882_v32  ;;  %v2515_v42 = vsel %vm2487_vm0, %v8882_v32, %v8835_v44  ;;  %4525 = vpow2.f32 %v4321_v12  ;;  %v4322_v49 = vmul.f32 -1.442695, %v9118_v31  ;;  %v11097_v32 = vld [vmem:[#allocation94_spill] sm:$0xff]  ;;  %v3022_v52 = vpop.permute.xlu1 %3021 }
 0x6fa   : > { %v2554_v6 = vmul.f32 %v8409_v56, %v2514_v4  ;;  %v2227_v46 = vsel %vm2214_vm15, %v11096_v11, %v8594_v37  ;;  %v2243_v13 = vsel %vm2214_vm15, %v8594_v37, %v11096_v11  ;;  %v9164_v53 = vadd.f32 %v8944_v8, %v3229_v47  ;;  %v11098_v37 = vld [vmem:[#allocation39_spill] sm:$0xff] }
 0x6fb   : > { %v2382_v44 = vmul.f32 %v11095_v43, %v2283_v14  ;;  %v2652_v10 = vmul.f32 %v11097_v32, %v2553_v61  ;;  %v4323_v40 = vmul.f32 -1.442695, %v9140_v21  ;;  %v9172_v27 = vadd.f32 %v3192_v17, %v9032_v18  ;;  %v11100_v43 = vld [vmem:[#allocation44_spill] sm:$0xff]  ;;  %v11103_v11 = vld [vmem:[#allocation183_spill] sm:$0xff] }
 0x6fc   : > { %v2555_v57 = vmul.f32 %v8393_v34, %v2499_v15  ;;  %v2556_v24 = vmul.f32 %v8409_v56, %v2515_v42  ;;  %v2771_v8 = vsel %vm2760_vm1, %v11098_v37, %v8926_v38  ;;  %v2787_v41 = vsel %vm2760_vm1, %v8926_v38, %v11098_v37  ;;  %v11101_v15 = vld [vmem:[#allocation25_spill] sm:$0xff] }
 0x6fd   : > { %v9166_v23 = vpop.permute.xlu0 %3023  ;;  %v2284_v12 = vmul.f32 %v8349_v20, %v2227_v46  ;;  %v2285_v1 = vmul.f32 %v8354_v36, %v2243_v13  ;;  %v2500_v18 = vsel %vm2487_vm0, %v9054_v19, %v9093_v2  ;;  %4527 = vpow2.f32 %v4322_v49 }
 0x6fe   : > { %v2413_v35 = vadd.f32 %v2381_v29, %v11099_v62  ;;  %v2653_v17 = vmul.f32 %v11097_v32, %v2554_v6  ;;  %v4324_v14 = vmul.f32 -1.442695, %v9164_v53  ;;  %v9196_v38 = vadd.f32 %v3193_v60, %v9034_v9  ;;  %v11102_v60 = vld [vmem:[#allocation110_spill] sm:$0xff]  ;;  %v11108_v62 = vld [vmem:[#allocation41_spill] sm:$0xff] }
 0x6ff   : > { %v2826_v61 = vmul.f32 %v8436_v39, %v2771_v8  ;;  %v2827_v0 = vmul.f32 %v8439_v58, %v2787_v41  ;;  %v3044_v47 = vsel %vm3033_vm2, %v11100_v43, %v3022_v52  ;;  %4529 = vpow2.f32 %v4323_v40  ;;  %v11104_v40 = vld [vmem:[#allocation46_spill] sm:$0xff]  ;;  %v11106_v8 = vld [vmem:[#allocation91_spill] sm:$0xff] }
 0x700   : > { %v2654_v29 = vmul.f32 %v11101_v15, %v2555_v57  ;;  %v2655_v42 = vmul.f32 %v11101_v15, %v2556_v24  ;;  %v2516_v49 = vsel %vm2487_vm0, %v9093_v2, %v9054_v19  ;;  %v2557_v9 = vmul.f32 %v8393_v34, %v2500_v18  ;;  %v11105_v57 = vld [vmem:[#allocation136_spill] sm:$0xff] }
 0x701   : > { %v9193_v4 = vpop.permute.xlu0 %3310  ;;  %v2414_v6 = vadd.f32 %v2382_v44, %v11102_v60  ;;  %v2383_v46 = vmul.f32 %v11103_v11, %v2284_v12  ;;  %v2384_v13 = vmul.f32 %v11103_v11, %v2285_v1  ;;  %v2684_v32 = vadd.f32 %v2652_v10, %v2411_v16  ;;  %v11107_v1 = vld [vmem:[#allocation12_spill] sm:$0xff]  ;;  %v11110_v60 = vld [vmem:[#allocation119_spill] sm:$0xff] }
 0x702   : > { %v2228_v24 = vsel %vm2214_vm15, %v11105_v57, %v11104_v40  ;;  %v3060_v19 = vsel %vm3033_vm2, %v3022_v52, %v11100_v43  ;;  %v3099_v2 = vmul.f32 %v8457_v7, %v3044_v47  ;;  %4531 = vpow2.f32 %v4324_v14  ;;  %v11109_v14 = vld [vmem:[#allocation123_spill] sm:$0xff]  ;;  %v11113_v11 = vld [vmem:[#allocation20_spill] sm:$0xff] }
 0x703   : > { %v2925_v41 = vmul.f32 %v11106_v8, %v2826_v61  ;;  %v2926_v16 = vmul.f32 %v11106_v8, %v2827_v0  ;;  %v2558_v10 = vmul.f32 %v8409_v56, %v2516_v49  ;;  %v2685_v12 = vadd.f32 %v2653_v17, %v2412_v51 }
 0x704   : > { %v2656_v18 = vmul.f32 %v11107_v1, %v2557_v9  ;;  %v2772_v15 = vsel %vm2760_vm1, %v11108_v62, %v9137_v30  ;;  %v9233_v52 = vadd.f32 %v2654_v29, %v2413_v35  ;;  %v9235_v43 = vadd.f32 %v2655_v42, %v2414_v6  ;;  %v11111_v35 = vld [vmem:[#allocation7_spill] sm:$0xff]  ;;  %v11112_v42 = vld [vmem:[#allocation78_spill] sm:$0xff] }
 0x705   : > { %v9213_v37 = vpop.xlane.xlu1 %3176  ;;  %v9223_v44 = vpop.permute.xlu0 %2212  ;;  %v2415_v47 = vadd.f32 %v2383_v46, %v11109_v14  ;;  %v9239_v61 = vadd.f32 %v2384_v13, %v11110_v60  ;;  %v2286_v0 = vmul.f32 %v8349_v20, %v2228_v24  ;;  %v3100_v51 = vmul.f32 %v8460_v5, %v3060_v19 }
 0x706   : > { %v4526_v49 = vpop.eup %4525  ;;  %v2244_v9 = vsel %vm2214_vm15, %v11104_v40, %v11105_v57  ;;  %v3198_v29 = vmul.f32 %v11111_v35, %v3099_v2  ;;  %v9257_v24 = vmul.f32 %v11107_v1, %v2558_v10  ;;  %v2828_v19 = vmul.f32 %v8436_v39, %v2772_v15  ;;  %v11114_v10 = vld [vmem:[#allocation88_spill] sm:$0xff] }
 0x707   : > { %v2957_v8 = vadd.f32 %v2925_v41, %v2684_v32  ;;  %v2958_v14 = vadd.f32 %v2926_v16, %v2685_v12  ;;  %v9260_v60 = vadd.f32 %v2656_v18, %v2415_v47  ;;  %v2788_v40 = vsel %vm2760_vm1, %v9137_v30, %v11108_v62  ;;  %v11115_v18 = vld [vmem:[#allocation35_spill] sm:$0xff]  ;;  %v11116_v30 = vld [vmem:[#allocation42_spill] sm:$0xff] }
 0x708   : > { %v9270_v1 = vmul.f32 %v11114_v10, %v2286_v0  ;;  %v3199_v32 = vmul.f32 %v11111_v35, %v3100_v51  ;;  %v3045_v0 = vsel %vm3033_vm2, %v9125_v63, %v9166_v23  ;;  %v3061_v35 = vsel %vm3033_vm2, %v9166_v23, %v9125_v63  ;;  %v11119_v63 = vld [vmem:[#allocation40_spill] sm:$0xff] }
 0x709   : > { %v3266_v17 = vpop.permute.xlu1 %3265  ;;  %v9254_v13 = vpop.permute.xlu0 %2483  ;;  %v3230_v12 = vadd.f32 %v3198_v29, %v2957_v8  ;;  %v2517_v50 = vsel %vm2487_vm0, %v9044_v55, %v9004_v45 }
 0x70a   : > { %v9249_v6 = vadd.f32 %v3266_v17, %v11112_v42  ;;  %v9252_v46 = vadd.f32 %v3266_v17, %v11113_v11  ;;  %v3482_v17 = vadd.f32 1.0, %v4526_v49  ;;  %v2287_v42 = vmul.f32 %v8354_v36, %v2244_v9  ;;  %v4528_v16 = vpop.eup %4527  ;;  %v11117_v9 = vld [vmem:[#allocation198_spill] sm:$0xff] }
 0x70b   : > { %v2829_v49 = vmul.f32 %v8439_v58, %v2788_v40  ;;  %v2927_v11 = vmul.f32 %v11117_v9, %v2828_v19  ;;  %v9292_v29 = vadd.f32 %v9193_v4, %v3230_v12  ;;  %v3483_v19 = vadd.f32 1.0, %v4528_v16  ;;  %v11120_v12 = vld [vmem:[#allocation43_spill] sm:$0xff] }
 0x70c   : > { %v4307_v57 = vmul.f32 -1.442695, %v9249_v6  ;;  %v4308_v2 = vmul.f32 -1.442695, %v9252_v46  ;;  %v4530_v51 = vpop.eup %4529 }
 0x70d   : > { %v3271_v41 = vpop.permute.xlu1 %3270  ;;  %v9279_v47 = vpop.permute.xlu0 %2722  ;;  %11118 = vst [vmem:[#allocation55_spill] sm:$0xff] %v9292_v29 }
 0x70e   : > { %4533 = vpow2.f32 %v4307_v57  ;;  %v9274_v15 = vadd.f32 %v3271_v41, %v11115_v18  ;;  %v9277_v62 = vadd.f32 %v3271_v41, %v11116_v30  ;;  %v2501_v57 = vsel %vm2487_vm0, %v9004_v45, %v9044_v55 }
 0x70f   : > { %4535 = vpow2.f32 %v4308_v2  ;;  %v3231_v2 = vadd.f32 %v3199_v32, %v2958_v14  ;;  %v3101_v18 = vmul.f32 %v8457_v7, %v3045_v0  ;;  %v4532_v16 = vpop.eup %4531  ;;  %v3102_v14 = vmul.f32 %v8460_v5, %v3061_v35 }
 0x710   : > { %v4309_v8 = vmul.f32 -1.442695, %v9274_v15  ;;  %v4310_v40 = vmul.f32 -1.442695, %v9277_v62  ;;  %4537 = vrcp.f32 %v3482_v17  ;;  %v3484_v17 = vadd.f32 1.0, %v4530_v51 }
 0x711   : > { %v3276_v41 = vpop.permute.xlu1 %3275  ;;  %v9307_v48 = vpop.permute.xlu0 %2754  ;;  %v2928_v32 = vmul.f32 %v11117_v9, %v2829_v49  ;;  %v2559_v0 = vmul.f32 %v8393_v34, %v2501_v57  ;;  %v9320_v51 = vadd.f32 %v9193_v4, %v3231_v2  ;;  %v3485_v55 = vadd.f32 1.0, %v4532_v16 }
 0x712   : > { %4539 = vpow2.f32 %v4309_v8  ;;  %v9302_v23 = vadd.f32 %v3276_v41, %v11119_v63  ;;  %v9305_v30 = vadd.f32 %v3276_v41, %v11120_v12  ;;  %v4325_v8 = vmul.f32 -1.442695, %v9292_v29 }
 0x713   : > { %4541 = vpow2.f32 %v4310_v40  ;;  %v2386_v63 = vmul.f32 %v11114_v10, %v2287_v42  ;;  %11121 = vst [vmem:[#allocation52_spill] sm:$0xff] %v9320_v51  ;;  %v2560_v35 = vmul.f32 %v8409_v56, %v2517_v50  ;;  %v11122_v40 = vld [vmem:[#allocation93_spill] sm:$0xff]  ;;  %v11125_v10 = vld [vmem:[#allocation95_spill] sm:$0xff]  ;;  %v2959_v16 = vadd.f32 %v2927_v11, %v9233_v52 }
 0x714   : > { %v4311_v41 = vmul.f32 -1.442695, %v9302_v23  ;;  %4543 = vrcp.f32 %v3483_v19  ;;  %v4312_v12 = vmul.f32 -1.442695, %v9305_v30  ;;  %v3200_v49 = vmul.f32 %v11122_v40, %v3101_v18  ;;  %v11123_v19 = vld [vmem:[#allocation47_spill] sm:$0xff]  ;;  %v11124_v42 = vld [vmem:[#allocation45_spill] sm:$0xff] }
 0x715   : > { %v3281_v45 = vpop.permute.xlu1 %3280  ;;  %v9325_v9 = vpop.permute.xlu0 %2993  ;;  %v3201_v57 = vmul.f32 %v11122_v40, %v3102_v14  ;;  %v2658_v2 = vmul.f32 %v11125_v10, %v2559_v0  ;;  %v2960_v50 = vadd.f32 %v2928_v32, %v9235_v43  ;;  %v4326_v18 = vmul.f32 -1.442695, %v9320_v51  ;;  %v11126_v11 = vld [vmem:[#allocation117_spill] sm:$0xff] }
 0x716   : > { %4545 = vpow2.f32 %v4311_v41  ;;  %v9329_v29 = vadd.f32 %v3281_v45, %v11123_v19  ;;  %v9332_v4 = vadd.f32 %v3281_v45, %v11124_v42  ;;  %v2417_v43 = vadd.f32 %v9270_v1, %v11126_v11 }
 0x717   : > { %4547 = vrcp.f32 %v3484_v17  ;;  %v2659_v32 = vmul.f32 %v11125_v10, %v2560_v35  ;;  %v9357_v1 = vadd.f32 %v9257_v24, %v9239_v61  ;;  %v11128_v35 = vld [vmem:[#allocation111_spill] sm:$0xff] }
 0x718   : > { %4549 = vpow2.f32 %v4325_v8  ;;  %v4313_v17 = vmul.f32 -1.442695, %v9329_v29  ;;  %v4314_v14 = vmul.f32 -1.442695, %v9332_v4  ;;  %v3232_v8 = vadd.f32 %v3200_v49, %v2959_v16 }
 0x719   : > { %4551 = vpow2.f32 %v4312_v12  ;;  %v3286_v41 = vpop.permute.xlu1 %3285  ;;  %v3316_v0 = vpop.permute.xlu0 %3315  ;;  %v3233_v12 = vadd.f32 %v3201_v57, %v2960_v50  ;;  %v2418_v57 = vadd.f32 %v2386_v63, %v11128_v35  ;;  %v9360_v10 = vadd.f32 %v2658_v2, %v2417_v43 }
 0x71a   : > { %4553 = vrcp.f32 %v3485_v55  ;;  %v9341_v40 = vadd.f32 %v3286_v41, %v8948_v28  ;;  %v9344_v45 = vadd.f32 %v3286_v41, %v8950_v26  ;;  %v9350_v28 = vadd.f32 %v3316_v0, %v3232_v8 }
 0x71b   : > { %v4534_v52 = vpop.eup %4533  ;;  %4555 = vpow2.f32 %v4313_v17  ;;  %v9353_v49 = vadd.f32 %v3316_v0, %v3233_v12  ;;  %v9379_v8 = vadd.f32 %v2659_v32, %v2418_v57  ;;  %v11129_v32 = vld [vmem:[#allocation130_spill] sm:$0xff]  ;;  %v2774_v35 = vsel %vm2760_vm1, %v9279_v47, %v9307_v48 }
 0x71c   : > { %v4536_v19 = vpop.eup %4535  ;;  %v3468_v42 = vadd.f32 1.0, %v4534_v52  ;;  %4557 = vpow2.f32 %v4314_v14  ;;  %v4315_v55 = vmul.f32 -1.442695, %v9341_v40  ;;  %v4316_v41 = vmul.f32 -1.442695, %v9344_v45 }
 0x71d   : > { %4559 = vpow2.f32 %v4326_v18  ;;  %v3469_v26 = vadd.f32 1.0, %v4536_v19  ;;  %11127 = vst [vmem:[#allocation58_spill] sm:$0xff] %v9353_v49  ;;  %v3291_v16 = vpop.permute.xlu1 %3290  ;;  %v4538_v51 = vpop.eup %4537  ;;  %v2773_v18 = vsel %vm2760_vm1, %v9073_v25, %v9103_v59  ;;  %v2789_v14 = vsel %vm2760_vm1, %v9103_v59, %v9073_v25 }
 0x71e   : > { %4561 = vrcp.f32 %v3468_v42  ;;  %v9362_v50 = vpop.permute.xlu0 %2485  ;;  %v9373_v61 = vadd.f32 %v3291_v16, %v9122_v54  ;;  %v4327_v2 = vmul.f32 -1.442695, %v9350_v28  ;;  %v9377_v0 = vadd.f32 %v3291_v16, %v9128_v33 }
 0x71f   : > { %v4540_v17 = vpop.eup %4539  ;;  %4563 = vrcp.f32 %v3469_v26  ;;  %v4328_v11 = vmul.f32 -1.442695, %v9353_v49  ;;  %v9383_v59 = vmul.f32 %v4538_v51, %v9096_v22  ;;  %v2830_v54 = vmul.f32 %v8436_v39, %v2773_v18 }
 0x720   : > { %v4542_v24 = vpop.eup %4541  ;;  %v3470_v63 = vadd.f32 1.0, %v4540_v17  ;;  %4565 = vpow2.f32 %v4315_v55  ;;  %v2831_v33 = vmul.f32 %v8439_v58, %v2789_v14  ;;  %v2230_v42 = vsel %vm2214_vm15, %v11129_v32, %v9223_v44 }
 0x721   : > { %v3471_v52 = vadd.f32 1.0, %v4542_v24  ;;  %4567 = vpow2.f32 %v4316_v41  ;;  %v3296_v43 = vpop.permute.xlu1 %3295  ;;  %v4544_v25 = vpop.eup %4543  ;;  %v4317_v55 = vmul.f32 -1.442695, %v9373_v61  ;;  %v2246_v22 = vsel %vm2214_vm15, %v9223_v44, %v11129_v32  ;;  %v11130_v24 = vld [vmem:[#allocation102_spill] sm:$0xff] }
 0x722   : > { %4569 = vrcp.f32 %v3470_v63  ;;  %v9387_v12 = vadd.f32 %v3296_v43, %v9172_v27  ;;  %v4318_v51 = vmul.f32 -1.442695, %v9377_v0  ;;  %v9402_v41 = vpop.permute.xlu0 %2756  ;;  %v2790_v57 = vsel %vm2760_vm1, %v9307_v48, %v9279_v47 }
 0x723   : > { %v4546_v19 = vpop.eup %4545  ;;  %4571 = vrcp.f32 %v3471_v52  ;;  %v9413_v44 = vadd.f32 %v3296_v43, %v9196_v38  ;;  %v9416_v14 = vmul.f32 %v4544_v25, %v9118_v31  ;;  %v2929_v63 = vmul.f32 %v11130_v24, %v2830_v54 }
 0x724   : > { %v9395_v26 = vpop.eup %4547  ;;  %v3472_v27 = vadd.f32 1.0, %v4546_v19  ;;  %4573 = vpow2.f32 %v4327_v2  ;;  %v4319_v2 = vmul.f32 -1.442695, %v9387_v12  ;;  %v2290_v19 = vmul.f32 %v8349_v20, %v2230_v42 }
 0x725   : > { %v4550_v16 = vpop.eup %4549  ;;  %4575 = vpow2.f32 %v4328_v11  ;;  %v2452_v17 = vpop.permute.xlu1 %2451  ;;  %v2291_v48 = vmul.f32 %v8354_v36, %v2246_v22  ;;  %v2930_v11 = vmul.f32 %v11130_v24, %v2831_v33  ;;  %v2832_v43 = vmul.f32 %v8436_v39, %v2774_v35 }
 0x726   : > { %v4552_v18 = vpop.eup %4551  ;;  %4577 = vrcp.f32 %v3472_v27  ;;  %v2833_v31 = vmul.f32 %v8439_v58, %v2790_v57  ;;  %v3486_v54 = vadd.f32 1.0, %v4550_v16  ;;  %v4320_v27 = vmul.f32 -1.442695, %v9413_v44  ;;  %v9428_v36 = vpop.permute.xlu0 %3027 }
 0x727   : > { %v9420_v52 = vpop.eup %4553  ;;  %v3473_v47 = vadd.f32 1.0, %v4552_v18  ;;  %4579 = vpow2.f32 %v4317_v55  ;;  %v2502_v57 = vsel %vm2487_vm0, %v2452_v17, %v9254_v13 }
 0x728   : > { %v4556_v38 = vpop.eup %4555  ;;  %4581 = vpow2.f32 %v4318_v51  ;;  %v11131_v51 = vld [vmem:[#allocation62_spill] sm:$0xff] }
 0x729   : > { %v4558_v25 = vpop.eup %4557  ;;  %4583 = vrcp.f32 %v3473_v47  ;;  %v3474_v32 = vadd.f32 1.0, %v4556_v38  ;;  %v3026_v49 = vpop.permute.xlu1 %3025  ;;  %v2389_v16 = vmul.f32 %v11131_v51, %v2290_v19  ;;  %v2390_v35 = vmul.f32 %v11131_v51, %v2291_v48 }
 0x72a   : > { %v4560_v20 = vpop.eup %4559  ;;  %v3475_v42 = vadd.f32 1.0, %v4558_v25  ;;  %4585 = vpow2.f32 %v4319_v2  ;;  %v3046_v33 = vsel %vm3033_vm2, %v9325_v9, %v3026_v49  ;;  %v3062_v55 = vsel %vm3033_vm2, %v3026_v49, %v9325_v9 }
 0x72b   : > { %v4562_v22 = vpop.eup %4561  ;;  %4587 = vrcp.f32 %v3474_v32  ;;  %v2518_v2 = vsel %vm2487_vm0, %v9254_v13, %v2452_v17  ;;  %v3103_v9 = vmul.f32 %v8457_v7, %v3046_v33  ;;  %v3487_v19 = vadd.f32 1.0, %v4560_v20 }
 0x72c   : > { %v4564_v18 = vpop.eup %4563  ;;  %v9442_v24 = vmul.f32 %v4562_v22, %v9249_v6  ;;  %4589 = vrcp.f32 %v3475_v42  ;;  %v3104_v47 = vmul.f32 %v8460_v5, %v3062_v55  ;;  %v11132_v6 = vld [vmem:[#allocation34_spill] sm:$0xff]  ;;  %v2561_v17 = vmul.f32 %v8393_v34, %v2502_v57 }
 0x72d   : > { %v4566_v49 = vpop.eup %4565  ;;  %v9449_v48 = vmul.f32 %v4564_v18, %v9252_v46  ;;  %4591 = vpow2.f32 %v4320_v27  ;;  %v2454_v38 = vpop.permute.xlu1 %2453  ;;  %v2931_v32 = vmul.f32 %v11132_v6, %v2832_v43  ;;  %v2932_v42 = vmul.f32 %v11132_v6, %v2833_v31 }
 0x72e   : > { %v4568_v25 = vpop.eup %4567  ;;  %4593 = vrcp.f32 %v3486_v54  ;;  %v3476_v22 = vadd.f32 1.0, %v4566_v49  ;;  %v2562_v20 = vmul.f32 %v8409_v56, %v2518_v2  ;;  %v11133_v54 = vld [vmem:[#allocation171_spill] sm:$0xff]  ;;  %v9462_v43 = vpop.permute.xlu0 %2726  ;;  %v2961_v31 = vadd.f32 %v2929_v63, %v9260_v60 }
 0x72f   : > { %v4570_v51 = vpop.eup %4569  ;;  %v3477_v13 = vadd.f32 1.0, %v4568_v25  ;;  %v3597_v46 = vadd.f32 %v9449_v48, %v9442_v24  ;;  %v3202_v55 = vmul.f32 %v11133_v54, %v3103_v9  ;;  %v3203_v57 = vmul.f32 %v11133_v54, %v3104_v47  ;;  %v11134_v9 = vld [vmem:[#allocation28_spill] sm:$0xff] }
 0x730   : > { %v4572_v27 = vpop.eup %4571  ;;  %v9459_v33 = vmul.f32 %v4570_v51, %v9274_v15  ;;  %4595 = vrcp.f32 %v3476_v22  ;;  %v2503_v2 = vsel %vm2487_vm0, %v2454_v38, %v9362_v50  ;;  %v9473_v6 = vadd.f32 %v2389_v16, %v11134_v9  ;;  %v11135_v22 = vld [vmem:[#allocation118_spill] sm:$0xff] }
 0x731   : > { %v4574_v18 = vpop.eup %4573  ;;  %v9466_v49 = vmul.f32 %v4572_v27, %v9277_v62  ;;  %4597 = vrcp.f32 %v3477_v13  ;;  %3598 = vadd.xlane.f32.xlu0 %v3597_v46  ;;  %v2725_v15 = vpop.permute.xlu1 %2724  ;;  %v9476_v60 = vadd.f32 %v2390_v35, %v11135_v22  ;;  %v2962_v62 = vadd.f32 %v2930_v11, %v9357_v1  ;;  %v11136_v13 = vld [vmem:[#allocation83_spill] sm:$0xff] }
 0x732   : > { %v4576_v25 = vpop.eup %4575  ;;  %4599 = vrcp.f32 %v3487_v19  ;;  %v2963_v51 = vadd.f32 %v2931_v32, %v9360_v10  ;;  %v2964_v47 = vadd.f32 %v2932_v42, %v9379_v8  ;;  %v9482_v27 = vmul.f32 %v11136_v13, %v2561_v17  ;;  %v9500_v22 = vpop.permute.xlu0 %2997 }
 0x733   : > { %v4578_v63 = vpop.eup %4577  ;;  %v9485_v46 = vmul.f32 %v11136_v13, %v2562_v20  ;;  %v9490_v16 = vsel %vm2487_vm0, %v9362_v50, %v2454_v38  ;;  %v9493_v35 = vmul.f32 %v8393_v34, %v2503_v2  ;;  %v3600_v1 = vadd.f32 %v9466_v49, %v9459_v33 }
 0x734   : > { %v4580_v19 = vpop.eup %4579  ;;  %v3234_v10 = vadd.f32 %v3202_v55, %v2961_v31  ;;  %v9498_v11 = vmul.f32 %v4578_v63, %v9302_v23  ;;  %v3488_v32 = vadd.f32 1.0, %v4574_v18  ;;  %v3235_v20 = vadd.f32 %v3203_v57, %v2962_v62 }
 0x735   : > { %v4582_v8 = vpop.eup %4581  ;;  %v3478_v42 = vadd.f32 1.0, %v4580_v19  ;;  %v2996_v17 = vpop.permute.xlu1 %2995  ;;  %v2775_v34 = vsel %vm2760_vm1, %v2725_v15, %v9402_v41  ;;  %3601 = vadd.xlane.f32.xlu0 %v3600_v1  ;;  %v3489_v2 = vadd.f32 1.0, %v4576_v25  ;;  %v2791_v63 = vsel %vm2760_vm1, %v9402_v41, %v2725_v15  ;;  %v11137_v19 = vld [vmem:[#allocation36_spill] sm:$0xff] }
 0x736   : > { %v4584_v54 = vpop.eup %4583  ;;  %v3479_v9 = vadd.f32 1.0, %v4582_v8  ;;  %v3047_v50 = vsel %vm3033_vm2, %v2996_v17, %v9428_v36  ;;  %v3063_v23 = vsel %vm3033_vm2, %v9428_v36, %v2996_v17 }
 0x737   : > { %v4586_v38 = vpop.eup %4585  ;;  %v9512_v55 = vmul.f32 %v4584_v54, %v9305_v30  ;;  %4601 = vrcp.f32 %v3478_v42  ;;  %v3105_v31 = vmul.f32 %v8457_v7, %v3047_v50  ;;  %v3106_v18 = vmul.f32 %v8460_v5, %v3063_v23 }
 0x738   : > { %v4588_v57 = vpop.eup %4587  ;;  %4603 = vrcp.f32 %v3479_v9  ;;  %v3480_v62 = vadd.f32 1.0, %v4586_v38  ;;  %v2834_v9 = vmul.f32 %v8436_v39, %v2775_v34  ;;  %v3326_v38 = vpop.permute.xlu0 %3325 }
 0x739   : > { %v4590_v13 = vpop.eup %4589  ;;  %v9520_v36 = vmul.f32 %v4588_v57, %v9329_v29  ;;  %v3204_v30 = vmul.f32 %v11137_v19, %v3105_v31  ;;  %v3205_v1 = vmul.f32 %v11137_v19, %v3106_v18  ;;  %v3603_v8 = vadd.f32 %v9512_v55, %v9498_v11  ;;  %v3321_v42 = vpop.permute.xlu1 %3320 }
 0x73a   : > { %v4592_v17 = vpop.eup %4591  ;;  %v9527_v25 = vmul.f32 %v4590_v13, %v9332_v4  ;;  %4605 = vrcp.f32 %v3480_v62  ;;  %v9529_v54 = vadd.f32 %v3321_v42, %v3234_v10  ;;  %v9531_v41 = vadd.f32 %v3321_v42, %v3235_v20 }
 0x73b   : > { %v9533_v15 = vpop.eup %4593  ;;  %v3481_v29 = vadd.f32 1.0, %v4592_v17  ;;  %v3236_v50 = vadd.f32 %v3204_v30, %v2963_v51  ;;  %v3237_v23 = vadd.f32 %v3205_v1, %v2964_v47  ;;  %3604 = vadd.xlane.f32.xlu1 %v3603_v8  ;;  %4607 = vrcp.f32 %v3488_v32  ;;  %v11139_v8 = vld [vmem:[#allocation38_spill] sm:$0xff] }
 0x73c   : > { %v4329_v31 = vmul.f32 -1.442695, %v9529_v54  ;;  %v4330_v4 = vmul.f32 -1.442695, %v9531_v41  ;;  %v3606_v10 = vadd.f32 %v9527_v25, %v9520_v36  ;;  %v2835_v20 = vmul.f32 %v8439_v58, %v2791_v63 }
 0x73d   : > { %v4596_v18 = vpop.eup %4595  ;;  %4609 = vrcp.f32 %v3481_v29  ;;  %v2759_v57 = vpop.permute.xlu1 %2758  ;;  %v9541_v62 = vadd.f32 %v3326_v38, %v3236_v50  ;;  %v9543_v34 = vadd.f32 %v3326_v38, %v3237_v23  ;;  %v2564_v30 = vmul.f32 %v8409_v56, %v9490_v16  ;;  %v11140_v23 = vld [vmem:[#allocation48_spill] sm:$0xff] }
 0x73e   : > { %v4598_v51 = vpop.eup %4597  ;;  %v9546_v47 = vmul.f32 %v4596_v18, %v9341_v40  ;;  %4611 = vpow2.f32 %v4329_v31  ;;  %3607 = vadd.xlane.f32.xlu0 %v3606_v10  ;;  %v2776_v32 = vsel %vm2760_vm1, %v9462_v43, %v2759_v57  ;;  %v2792_v13 = vsel %vm2760_vm1, %v2759_v57, %v9462_v43  ;;  %v11138_v40 = vld [vmem:[#allocation14_spill] sm:$0xff] }
 0x73f   : > { %v9554_v63 = vpop.eup %4599  ;;  %v9557_v19 = vmul.f32 %v4598_v51, %v9344_v45  ;;  %v2662_v1 = vmul.f32 %v11138_v40, %v9493_v35  ;;  %4613 = vpow2.f32 %v4330_v4  ;;  %v2933_v42 = vmul.f32 %v11139_v8, %v2834_v9  ;;  %v11142_v10 = vld [vmem:[#allocation50_spill] sm:$0xff] }
 0x740   : > { %v2836_v17 = vmul.f32 %v8436_v39, %v2776_v32  ;;  %v4331_v29 = vmul.f32 -1.442695, %v9541_v62  ;;  %v4332_v43 = vmul.f32 -1.442695, %v9543_v34  ;;  %4615 = vrcp.f32 %v3489_v2  ;;  %v11141_v2 = vld [vmem:[#allocation51_spill] sm:$0xff]  ;;  %v3032_v32 = vpop.permute.xlu0 %3031 }
 0x741   : > { %v2934_v50 = vmul.f32 %v11139_v8, %v2835_v20  ;;  %v2837_v45 = vmul.f32 %v8439_v58, %v2792_v13  ;;  %v3609_v56 = vadd.f32 %v9557_v19, %v9546_v47  ;;  %v3030_v16 = vpop.permute.xlu1 %3029  ;;  %v2692_v35 = vadd.f32 %v9482_v27, %v11140_v23  ;;  %v11143_v13 = vld [vmem:[#allocation37_spill] sm:$0xff] }
 0x742   : > { %v3048_v39 = vsel %vm3033_vm2, %v9500_v22, %v3030_v16  ;;  %v3064_v9 = vsel %vm3033_vm2, %v3030_v16, %v9500_v22  ;;  %4617 = vpow2.f32 %v4331_v29  ;;  %v2693_v38 = vadd.f32 %v9485_v46, %v11141_v2 }
 0x743   : > { %v2663_v58 = vmul.f32 %v11138_v40, %v2564_v30  ;;  %v2694_v31 = vadd.f32 %v2662_v1, %v9473_v6  ;;  %3610 = vadd.xlane.f32.xlu1 %v3609_v56  ;;  %v3107_v4 = vmul.f32 %v8457_v7, %v3048_v39  ;;  %v2935_v18 = vmul.f32 %v11142_v10, %v2836_v17 }
 0x744   : > { %v4602_v27 = vpop.eup %4601  ;;  %v3108_v20 = vmul.f32 %v8460_v5, %v3064_v9  ;;  %v2965_v57 = vadd.f32 %v2933_v42, %v2692_v35  ;;  %4619 = vpow2.f32 %v4332_v43  ;;  %v2936_v46 = vmul.f32 %v11142_v10, %v2837_v45 }
 0x745   : > { %v4604_v51 = vpop.eup %4603  ;;  %v9587_v22 = vmul.f32 %v4602_v27, %v9373_v61  ;;  %v3206_v30 = vmul.f32 %v11143_v13, %v3107_v4  ;;  %v3000_v6 = vpop.permute.xlu1 %2999  ;;  %v2966_v40 = vadd.f32 %v2934_v50, %v2693_v38  ;;  %v2695_v29 = vadd.f32 %v2663_v58, %v9476_v60  ;;  %v11144_v4 = vld [vmem:[#allocation55_spill] sm:$0xff] }
 0x746   : > { %v9592_v1 = vmul.f32 %v4604_v51, %v9377_v0  ;;  %v3207_v8 = vmul.f32 %v11143_v13, %v3108_v20  ;;  %v3049_v42 = vsel %vm3033_vm2, %v3000_v6, %v3032_v32  ;;  %v3065_v17 = vsel %vm3033_vm2, %v3032_v32, %v3000_v6  ;;  %v3336_v20 = vpop.permute.xlu0 %3335 }
 0x747   : > { %v4606_v61 = vpop.eup %4605  ;;  %v3109_v43 = vmul.f32 %v8457_v7, %v3049_v42  ;;  %v3110_v45 = vmul.f32 %v8460_v5, %v3065_v17  ;;  %v3238_v56 = vadd.f32 %v3206_v30, %v2965_v57  ;;  %v2967_v50 = vadd.f32 %v2935_v18, %v2694_v31  ;;  %v11145_v18 = vld [vmem:[#allocation52_spill] sm:$0xff] }
 0x748   : > { %v3612_v0 = vadd.f32 %v9592_v1, %v9587_v22  ;;  %v3618_v16 = vadd.f32 %v9416_v14, %v9383_v59  ;;  %v3239_v23 = vadd.f32 %v3207_v8, %v2966_v40  ;;  %v4608_v35 = vpop.eup %4607  ;;  %v9607_v3 = vmul.f32 %v4606_v61, %v9387_v12  ;;  %v11146_v61 = vld [vmem:[#allocation58_spill] sm:$0xff] }
 0x749   : > { %v2968_v39 = vadd.f32 %v2936_v46, %v2695_v29  ;;  %v3208_v60 = vmul.f32 %v9213_v37, %v3109_v43  ;;  %v3209_v7 = vmul.f32 %v9213_v37, %v3110_v45  ;;  %v3331_v9 = vpop.permute.xlu1 %3330  ;;  %v9613_v2 = vmul.f32 %v9395_v26, %v9140_v21 }
 0x74a   : > { %v4610_v5 = vpop.eup %4609  ;;  %v9617_v38 = vmul.f32 %v9420_v52, %v9164_v53  ;;  %3613 = vadd.xlane.f32.xlu0 %v3612_v0  ;;  %v9619_v58 = vadd.f32 %v3331_v9, %v3238_v56  ;;  %v9621_v12 = vadd.f32 %v3331_v9, %v3239_v23  ;;  %v9625_v27 = vmul.f32 %v9533_v15, %v11144_v4 }
 0x74b   : > { %v4612_v31 = vpop.eup %4611  ;;  %v9628_v37 = vmul.f32 %v4610_v5, %v9413_v44  ;;  %v3240_v10 = vadd.f32 %v3208_v60, %v2967_v50  ;;  %v3241_v21 = vadd.f32 %v3209_v7, %v2968_v39  ;;  %v9632_v53 = vmul.f32 %v9554_v63, %v11145_v18 }
 0x74c   : > { %v4614_v26 = vpop.eup %4613  ;;  %v3490_v52 = vadd.f32 1.0, %v4612_v31  ;;  %v4333_v57 = vmul.f32 -1.442695, %v9619_v58  ;;  %v4334_v51 = vmul.f32 -1.442695, %v9621_v12  ;;  %v3621_v40 = vadd.f32 %v9617_v38, %v9613_v2 }
 0x74d   : > { %v3491_v32 = vadd.f32 1.0, %v4614_v26  ;;  %v3615_v15 = vadd.f32 %v9628_v37, %v9607_v3  ;;  %v3368_v46 = vadd.f32 %v3336_v20, %v3240_v10  ;;  %v3369_v44 = vadd.f32 %v3336_v20, %v3241_v21  ;;  %v4616_v13 = vpop.eup %4615 }
 0x74e   : > { %4621 = vrcp.f32 %v3490_v52  ;;  %3619 = vadd.xlane.f32.xlu0 %v3618_v16  ;;  %v3624_v6 = vadd.f32 %v9632_v53, %v9625_v27  ;;  %v9643_v17 = vmul.f32 %v4608_v35, %v9350_v28  ;;  %v9646_v29 = vmul.f32 %v4616_v13, %v11146_v61 }
 0x74f   : > { %v4618_v30 = vpop.eup %4617  ;;  %4623 = vrcp.f32 %v3491_v32  ;;  %3616 = vadd.xlane.f32.xlu1 %v3615_v15  ;;  %v4335_v63 = vmul.f32 -1.442695, %v3368_v46  ;;  %v4336_v43 = vmul.f32 -1.442695, %v3369_v44 }
 0x750   : > { %4625 = vpow2.f32 %v4333_v57  ;;  %v3492_v8 = vadd.f32 1.0, %v4618_v30  ;;  %v3627_v56 = vadd.f32 %v9646_v29, %v9643_v17 }
 0x751   : > { %v4620_v42 = vpop.eup %4619  ;;  %4627 = vpow2.f32 %v4334_v51 }
 0x752   : > { %3625 = vadd.xlane.f32.xlu0 %v3624_v6  ;;  %v3493_v45 = vadd.f32 1.0, %v4620_v42  ;;  %4629 = vrcp.f32 %v3492_v8  ;;  %v3660_v42 = vld [vmem:[%s9943_s6 + $0x10] sm:$0xff] }
 0x753   : > { %3622 = vadd.xlane.f32.xlu1 %v3621_v40  ;;  %4631 = vpow2.f32 %v4335_v63 }
 0x754   : > { %4633 = vrcp.f32 %v3493_v45 }
 0x755   : > { %4635 = vpow2.f32 %v4336_v43 }
 0x757   : > { %3628 = vadd.xlane.f32.xlu1 %v3627_v56  ;;  %v3661_v56 = vld [vmem:[%s9943_s6 + $0x18] sm:$0xff] }
 0x75b   : > { %v4622_v50 = vpop.eup %4621 }
 0x75c   : > { %v4624_v0 = vpop.eup %4623  ;;  %v9651_v28 = vmul.f32 %v4622_v50, %v9529_v54 }
 0x75d   : > { %v4626_v16 = vpop.eup %4625  ;;  %v9654_v23 = vmul.f32 %v4624_v0, %v9531_v41 }
 0x75e   : > { %v4628_v35 = vpop.eup %4627  ;;  %v3494_v39 = vadd.f32 1.0, %v4626_v16 }
 0x75f   : > { %v4630_v60 = vpop.eup %4629  ;;  %v3495_v7 = vadd.f32 1.0, %v4628_v35  ;;  %v3630_v9 = vadd.f32 %v9654_v23, %v9651_v28 }
 0x760   : > { %v4632_v5 = vpop.eup %4631  ;;  %4637 = vrcp.f32 %v3494_v39  ;;  %v9659_v31 = vmul.f32 %v4630_v60, %v9541_v62  ;;  %v3662_v39 = vld [vmem:[%s9943_s6 + $0x20] sm:$0xff] }
 0x761   : > { %v4634_v4 = vpop.eup %4633  ;;  %4639 = vrcp.f32 %v3495_v7  ;;  %3631 = vadd.xlane.f32.xlu0 %v3630_v9  ;;  %v3496_v54 = vadd.f32 1.0, %v4632_v5 }
 0x762   : > { %v4636_v10 = vpop.eup %4635  ;;  %v9662_v41 = vmul.f32 %v4634_v4, %v9543_v34  ;;  %v3663_v4 = vld [vmem:[%s9943_s6 + $0x28] sm:$0xff] }
 0x763   : > { %v3497_v21 = vadd.f32 1.0, %v4636_v10  ;;  %4641 = vrcp.f32 %v3496_v54 }
 0x764   : > { %v3633_v26 = vadd.f32 %v9662_v41, %v9659_v31 }
 0x765   : > { %4643 = vrcp.f32 %v3497_v21 }
 0x766   : > { %3634 = vadd.xlane.f32.xlu1 %v3633_v26 }
 0x76d   : > { %v4638_v18 = vpop.eup %4637 }
 0x76e   : > { %v4640_v52 = vpop.eup %4639  ;;  %v9667_v62 = vmul.f32 %v4638_v18, %v9619_v58 }
 0x76f   : > { %v9670_v20 = vmul.f32 %v4640_v52, %v9621_v12  ;;  %v3659_v12 = vld [vmem:[%s9943_s6 + $0x8] sm:$0xff] }
 0x770   : > { %v4642_v57 = vpop.eup %4641 }
 0x771   : > { %v3636_v34 = vadd.f32 %v9670_v20, %v9667_v62  ;;  %v9674_v51 = vmul.f32 %v4642_v57, %v3368_v46  ;;  %v3664_v57 = vld [vmem:[%s9943_s6 + $0x30] sm:$0xff] }
 0x772   : > { %v4644_v32 = vpop.eup %4643 }
 0x773   : > { %3637 = vadd.xlane.f32.xlu0 %v3636_v34  ;;  %v9676_v15 = vmul.f32 %v4644_v32, %v3369_v44  ;;  %v3658_v44 = vld [vmem:[%s9943_s6] sm:$0xff] }
 0x775   : > { %v3639_v13 = vadd.f32 %v9676_v15, %v9674_v51 }
 0x777   : > { %3640 = vadd.xlane.f32.xlu1 %v3639_v13 }
 0x77e   : > { %v3596_v58 = vpop.xlane.xlu1 %3595 }
 0x77f   : > { %v3642_v8 = vmul.f32 0.00390625, %v3596_v58  ;;  %v3665_v58 = vld [vmem:[%s9943_s6 + $0x38] sm:$0xff] }
 0x781   : > { %v3674_v0 = vmul.f32 %v3658_v44, %v3642_v8 }
 0x783   : > { %v3691_v10 = vsel %vm3690_vm3, %v3674_v0, 0.0 }
 0x7ba   : > { %v3599_v30 = vpop.xlane.xlu0 %3598 }
 0x7bb   : > { %v3643_v6 = vmul.f32 0.00390625, %v3599_v30 }
 0x7bd   : > { %v3675_v43 = vmul.f32 %v3659_v12, %v3643_v6 }
 0x7be   : > { %v3602_v63 = vpop.xlane.xlu0 %3601 }
 0x7bf   : > { %v3644_v46 = vmul.f32 0.00390625, %v3602_v63  ;;  %v3692_v7 = vsel %vm3690_vm3, %v3675_v43, 0.0 }
 0x7c0   : > { %v3693_v52 = vadd.f32 %v3692_v7, %v3691_v10  ;;  %v3668_v10 = vld [vmem:[%s9943_s6 + $0x50] sm:$0xff] }
 0x7c1   : > { %v3676_v16 = vmul.f32 %v3660_v42, %v3644_v46 }
 0x7c3   : > { %v3694_v21 = vsel %vm3690_vm3, %v3676_v16, 0.0 }
 0x7c4   : > { %v3605_v40 = vpop.xlane.xlu1 %3604  ;;  %v3695_v30 = vadd.f32 %v3694_v21, %v3693_v52 }
 0x7c5   : > { %v3645_v45 = vmul.f32 0.00390625, %v3605_v40 }
 0x7c7   : > { %v3608_v61 = vpop.xlane.xlu0 %3607  ;;  %v3677_v9 = vmul.f32 %v3661_v56, %v3645_v45  ;;  %v3666_v56 = vld [vmem:[%s9943_s6 + $0x40] sm:$0xff] }
 0x7c8   : > { %v3646_v35 = vmul.f32 0.00390625, %v3608_v61 }
 0x7c9   : > { %v3696_v34 = vsel %vm3690_vm3, %v3677_v9, 0.0 }
 0x7ca   : > { %v3678_v26 = vmul.f32 %v3662_v39, %v3646_v35  ;;  %v3697_v12 = vadd.f32 %v3696_v34, %v3695_v30  ;;  %v3667_v35 = vld [vmem:[%s9943_s6 + $0x48] sm:$0xff]  ;;  %v3670_v30 = vld [vmem:[%s9943_s6 + $0x60] sm:$0xff] }
 0x7cc   : > { %v3611_v50 = vpop.xlane.xlu1 %3610  ;;  %v3698_v63 = vsel %vm3690_vm3, %v3678_v26, 0.0 }
 0x7cd   : > { %v3647_v5 = vmul.f32 0.00390625, %v3611_v50  ;;  %v3699_v44 = vadd.f32 %v3698_v63, %v3697_v12 }
 0x7cf   : > { %v3679_v32 = vmul.f32 %v3663_v4, %v3647_v5 }
 0x7d1   : > { %v3700_v8 = vsel %vm3690_vm3, %v3679_v32, 0.0 }
 0x7d2   : > { %v3701_v45 = vadd.f32 %v3700_v8, %v3699_v44 }
 0x7d3   : > { %v3614_v60 = vpop.xlane.xlu0 %3613 }
 0x7d4   : > { %v3648_v18 = vmul.f32 0.00390625, %v3614_v60 }
 0x7d6   : > { %v3680_v6 = vmul.f32 %v3664_v57, %v3648_v18  ;;  %v3669_v57 = vld [vmem:[%s9943_s6 + $0x58] sm:$0xff] }
 0x7d7   : > { %v3620_v40 = vpop.xlane.xlu0 %3619 }
 0x7d8   : > { %v3617_v54 = vpop.xlane.xlu1 %3616  ;;  %v3702_v61 = vsel %vm3690_vm3, %v3680_v6, 0.0  ;;  %v3650_v43 = vmul.f32 0.00390625, %v3620_v40 }
 0x7d9   : > { %v3649_v13 = vmul.f32 0.00390625, %v3617_v54  ;;  %v3703_v16 = vadd.f32 %v3702_v61, %v3701_v45 }
 0x7da   : > { %v3682_v39 = vmul.f32 %v3666_v56, %v3650_v43  ;;  %v3672_v56 = vld [vmem:[%s9943_s6 + $0x70] sm:$0xff] }
 0x7db   : > { %v3681_v46 = vmul.f32 %v3665_v58, %v3649_v13  ;;  %v3626_v7 = vpop.xlane.xlu0 %3625 }
 0x7dc   : > { %v3623_v42 = vpop.xlane.xlu1 %3622  ;;  %v3706_v4 = vsel %vm3690_vm3, %v3682_v39, 0.0  ;;  %v3652_v54 = vmul.f32 0.00390625, %v3626_v7 }
 0x7dd   : > { %v3704_v50 = vsel %vm3690_vm3, %v3681_v46, 0.0  ;;  %v3651_v0 = vmul.f32 0.00390625, %v3623_v42  ;;  %v3671_v46 = vld [vmem:[%s9943_s6 + $0x68] sm:$0xff] }
 0x7de   : > { %v3705_v60 = vadd.f32 %v3704_v50, %v3703_v16  ;;  %v3684_v34 = vmul.f32 %v3668_v10, %v3652_v54 }
 0x7df   : > { %v3683_v9 = vmul.f32 %v3667_v35, %v3651_v0 }
 0x7e0   : > { %v3629_v5 = vpop.xlane.xlu1 %3628  ;;  %v3707_v21 = vadd.f32 %v3706_v4, %v3705_v60  ;;  %v3710_v6 = vsel %vm3690_vm3, %v3684_v34, 0.0  ;;  %v3673_v60 = vld [vmem:[%s9943_s6 + $0x78] sm:$0xff] }
 0x7e1   : > { %v3708_v18 = vsel %vm3690_vm3, %v3683_v9, 0.0  ;;  %v3653_v52 = vmul.f32 0.00390625, %v3629_v5 }
 0x7e2   : > { %v3709_v13 = vadd.f32 %v3708_v18, %v3707_v21 }
 0x7e3   : > { %v3685_v63 = vmul.f32 %v3669_v57, %v3653_v52 }
 0x7e4   : > { %v3711_v8 = vadd.f32 %v3710_v6, %v3709_v13 }
 0x7e5   : > { %v3712_v44 = vsel %vm3690_vm3, %v3685_v63, 0.0 }
 0x7e6   : > { %v3713_v43 = vadd.f32 %v3712_v44, %v3711_v8  ;;  %v3752_v8 = vld [vmem:[%s9945_s8 + $0x78] sm:$0xff]  ;;  %v11147_v44 = vld [vmem:[#allocation151_spill] sm:$0xff] }
 0x7ea   : > { %v3632_v26 = vpop.xlane.xlu0 %3631 }
 0x7eb   : > { %v3654_v32 = vmul.f32 0.00390625, %v3632_v26 }
 0x7ed   : > { %v3686_v12 = vmul.f32 %v3670_v30, %v3654_v32  ;;  %v3728_v32 = vld [vmem:[%s9944_s7] sm:$0x1] }
 0x7ef   : > { %v3635_v58 = vpop.xlane.xlu1 %3634  ;;  %v3714_v42 = vsel %vm3690_vm3, %v3686_v12, 0.0 }
 0x7f0   : > { %v3655_v40 = vmul.f32 0.00390625, %v3635_v58  ;;  %v3715_v45 = vadd.f32 %v3714_v42, %v3713_v43  ;;  %v3749_v43 = vld [vmem:[%s9945_s8 + $0x60] sm:$0xff] }
 0x7f2   : > { %v3687_v61 = vmul.f32 %v3671_v46, %v3655_v40  ;;  %v3751_v46 = vld [vmem:[%s9945_s8 + $0x70] sm:$0xff] }
 0x7f4   : > { %v3716_v0 = vsel %vm3690_vm3, %v3687_v61, 0.0  ;;  %v3750_v61 = vld [vmem:[%s9945_s8 + $0x68] sm:$0xff] }
 0x7f5   : > { %v3717_v39 = vadd.f32 %v3716_v0, %v3715_v45 }
 0x7fc   : > { %v3638_v50 = vpop.xlane.xlu0 %3637 }
 0x7fd   : > { %v3656_v16 = vmul.f32 0.00390625, %v3638_v50 }
 0x7ff   : > { %v3688_v35 = vmul.f32 %v3672_v56, %v3656_v16 }
 0x800   : > { %v3641_v7 = vpop.xlane.xlu1 %3640 }
 0x801   : > { %v3718_v9 = vsel %vm3690_vm3, %v3688_v35, 0.0  ;;  %v3657_v5 = vmul.f32 0.00390625, %v3641_v7 }
 0x802   : > { %v3719_v4 = vadd.f32 %v3718_v9, %v3717_v39  ;;  %v3748_v39 = vld [vmem:[%s9945_s8 + $0x58] sm:$0xff] }
 0x803   : > { %v3689_v54 = vmul.f32 %v3673_v60, %v3657_v5  ;;  %v3747_v60 = vld [vmem:[%s9945_s8 + $0x50] sm:$0xff] }
 0x805   : > { %v3720_v10 = vsel %vm3690_vm3, %v3689_v54, 0.0  ;;  %v3746_v54 = vld [vmem:[%s9945_s8 + $0x48] sm:$0xff] }
 0x806   : > { %v3721_v21 = vadd.f32 %v3720_v10, %v3719_v4  ;;  %v3745_v10 = vld [vmem:[%s9945_s8 + $0x40] sm:$0xff] }
 0x808   : > { %v3722_v26 = vrot.slane %v3721_v21, 4 }
 0x80a   : > { %v3723_v18 = vadd.f32 %v3722_v26, %v3721_v21 }
 0x80c   : > { %v3724_v52 = vrot.slane %v3723_v18, 2 }
 0x80e   : > { %v3725_v57 = vadd.f32 %v3724_v52, %v3723_v18 }
 0x810   : > { %v3726_v34 = vrot.slane %v3725_v57, 1 }
 0x812   : > { %v3727_v13 = vadd.f32 %v3726_v34, %v3725_v57  ;;  %v3744_v57 = vld [vmem:[%s9945_s8 + $0x38] sm:$0xff]  ;;  %v3743_v34 = vld [vmem:[%s9945_s8 + $0x30] sm:$0xff] }
 0x814   : > { %v3729_v30 = vadd.f32 %v3728_v32, %v3727_v13 }
 0x816   : > { %v4337_v58 = vmul.f32 -1.442695, %v3729_v30 }
 0x818   : > { %4645 = vpow2.f32 %v4337_v58 }
 0x825   : > { %v4646_v63 = vpop.eup %4645 }
 0x826   : > { %v3733_v6 = vadd.f32 1.0, %v4646_v63  ;;  %v3742_v63 = vld [vmem:[%s9945_s8 + $0x28] sm:$0xff] }
 0x828   : > { %4647 = vrcp.f32 %v3733_v6  ;;  %v3741_v6 = vld [vmem:[%s9945_s8 + $0x20] sm:$0xff] }
 0x835   : > { %v4648_v12 = vpop.eup %4647 }
 0x836   : > { %v3736_v40 = vmul.f32 %v4648_v12, %v3729_v30 }
 0x838   : > { %v3756_v42 = vrot.slane %v3736_v40, %v11147_v44  ;;  %v3740_v44 = vld [vmem:[%s9945_s8 + $0x18] sm:$0xff] }
 0x83a   : > { %v3772_v45 = vmul.f32 %v3756_v42, %v3752_v8  ;;  %v3771_v56 = vmul.f32 %v3756_v42, %v3751_v46  ;;  %v3770_v16 = vmul.f32 %v3756_v42, %v3750_v61  ;;  %v3769_v35 = vmul.f32 %v3756_v42, %v3749_v43  ;;  %v3739_v61 = vld [vmem:[%s9945_s8 + $0x10] sm:$0xff] }
 0x83b   : > { %v3768_v5 = vmul.f32 %v3756_v42, %v3748_v39  ;;  %v3767_v4 = vmul.f32 %v3756_v42, %v3747_v60  ;;  %v3766_v18 = vmul.f32 %v3756_v42, %v3746_v54  ;;  %v3765_v52 = vmul.f32 %v3756_v42, %v3745_v10  ;;  %v3835_v54 = vld [vmem:[%s9946_s9 + $0x70] sm:$0xff] }
 0x83c   : > { %v3818_v50 = vsel %vm3690_vm3, %v3772_v45, 0.0  ;;  %v3815_v0 = vsel %vm3690_vm3, %v3771_v56, 0.0  ;;  %v3812_v7 = vsel %vm3690_vm3, %v3770_v16, 0.0  ;;  %v3809_v9 = vsel %vm3690_vm3, %v3769_v35, 0.0  ;;  %v3737_v16 = vld [vmem:[%s9945_s8] sm:$0xff] }
 0x83d   : > { %3819 = vadd.xlane.f32.xlu1 %v3818_v50  ;;  %3816 = vadd.xlane.f32.xlu0 %v3815_v0  ;;  %v3806_v21 = vsel %vm3690_vm3, %v3768_v5, 0.0  ;;  %v3803_v26 = vsel %vm3690_vm3, %v3767_v4, 0.0  ;;  %v3800_v32 = vsel %vm3690_vm3, %v3766_v18, 0.0  ;;  %v3797_v13 = vsel %vm3690_vm3, %v3765_v52, 0.0  ;;  %v3738_v0 = vld [vmem:[%s9945_s8 + $0x8] sm:$0xff]  ;;  %v3836_v4 = vld [vmem:[%s9946_s9 + $0x78] sm:$0xff] }
 0x83e   : > { %v3764_v30 = vmul.f32 %v3756_v42, %v3744_v57  ;;  %v3763_v58 = vmul.f32 %v3756_v42, %v3743_v34  ;;  %v3762_v8 = vmul.f32 %v3756_v42, %v3742_v63  ;;  %v3761_v46 = vmul.f32 %v3756_v42, %v3741_v6  ;;  %v3834_v18 = vld [vmem:[%s9946_s9 + $0x68] sm:$0xff]  ;;  %v3833_v52 = vld [vmem:[%s9946_s9 + $0x60] sm:$0xff]  ;;  %v3832_v63 = vld [vmem:[%s9946_s9 + $0x58] sm:$0xff] }
 0x83f   : > { %v3760_v56 = vmul.f32 %v3756_v42, %v3740_v44  ;;  %v3759_v50 = vmul.f32 %v3756_v42, %v3739_v61  ;;  %v3758_v60 = vmul.f32 %v3756_v42, %v3738_v0  ;;  %v3831_v6 = vld [vmem:[%s9946_s9 + $0x50] sm:$0xff] }
 0x840   : > { %v3794_v12 = vsel %vm3690_vm3, %v3764_v30, 0.0  ;;  %v3791_v40 = vsel %vm3690_vm3, %v3763_v58, 0.0  ;;  %v3788_v43 = vsel %vm3690_vm3, %v3762_v8, 0.0  ;;  %v3785_v45 = vsel %vm3690_vm3, %v3761_v46, 0.0 }
 0x841   : > { %3813 = vadd.xlane.f32.xlu1 %v3812_v7  ;;  %3810 = vadd.xlane.f32.xlu0 %v3809_v9  ;;  %v3782_v35 = vsel %vm3690_vm3, %v3760_v56, 0.0  ;;  %v3779_v39 = vsel %vm3690_vm3, %v3759_v50, 0.0  ;;  %v3757_v7 = vmul.f32 %v3756_v42, %v3737_v16  ;;  %v3776_v9 = vsel %vm3690_vm3, %v3758_v60, 0.0  ;;  %v3828_v60 = vld [vmem:[%s9946_s9 + $0x38] sm:$0xff] }
 0x843   : > { %v3773_v5 = vsel %vm3690_vm3, %v3757_v7, 0.0  ;;  %v3827_v7 = vld [vmem:[%s9946_s9 + $0x30] sm:$0xff] }
 0x845   : > { %3807 = vadd.xlane.f32.xlu1 %v3806_v21  ;;  %3804 = vadd.xlane.f32.xlu0 %v3803_v26 }
 0x849   : > { %3801 = vadd.xlane.f32.xlu1 %v3800_v32  ;;  %3798 = vadd.xlane.f32.xlu0 %v3797_v13 }
 0x84d   : > { %3795 = vadd.xlane.f32.xlu1 %v3794_v12  ;;  %3792 = vadd.xlane.f32.xlu0 %v3791_v40 }
 0x851   : > { %3789 = vadd.xlane.f32.xlu1 %v3788_v43  ;;  %3786 = vadd.xlane.f32.xlu0 %v3785_v45  ;;  %v3830_v43 = vld [vmem:[%s9946_s9 + $0x48] sm:$0xff]  ;;  %v3829_v45 = vld [vmem:[%s9946_s9 + $0x40] sm:$0xff] }
 0x855   : > { %3783 = vadd.xlane.f32.xlu1 %v3782_v35  ;;  %3780 = vadd.xlane.f32.xlu0 %v3779_v39 }
 0x859   : > { %3777 = vadd.xlane.f32.xlu1 %v3776_v9  ;;  %3774 = vadd.xlane.f32.xlu0 %v3773_v5 }
 0x8c6   : > { %v3820_v10 = vpop.xlane.xlu1 %3819  ;;  %v3817_v21 = vpop.xlane.xlu0 %3816 }
 0x8c7   : > { %v3852_v26 = vadd.f32 %v3836_v4, %v3820_v10  ;;  %v3851_v42 = vadd.f32 %v3835_v54, %v3817_v21 }
 0x8c9   : > { %v4353_v57 = vmul.f32 -1.442695, %v3852_v26  ;;  %v4352_v34 = vmul.f32 -1.442695, %v3851_v42  ;;  %v3826_v42 = vld [vmem:[%s9946_s9 + $0x28] sm:$0xff] }
 0x8ca   : > { %v3814_v32 = vpop.xlane.xlu1 %3813  ;;  %v3811_v13 = vpop.xlane.xlu0 %3810 }
 0x8cb   : > { %4649 = vpow2.f32 %v4353_v57  ;;  %v3850_v30 = vadd.f32 %v3834_v18, %v3814_v32  ;;  %v3849_v58 = vadd.f32 %v3833_v52, %v3811_v13  ;;  %v3825_v18 = vld [vmem:[%s9946_s9 + $0x20] sm:$0xff] }
 0x8cc   : > { %4651 = vpow2.f32 %v4352_v34 }
 0x8cd   : > { %v4351_v12 = vmul.f32 -1.442695, %v3850_v30  ;;  %v4350_v40 = vmul.f32 -1.442695, %v3849_v58 }
 0x8ce   : > { %v3808_v8 = vpop.xlane.xlu1 %3807  ;;  %v3805_v46 = vpop.xlane.xlu0 %3804 }
 0x8cf   : > { %4653 = vpow2.f32 %v4351_v12  ;;  %v3848_v44 = vadd.f32 %v3832_v63, %v3808_v8  ;;  %v3847_v61 = vadd.f32 %v3831_v6, %v3805_v46  ;;  %v3823_v8 = vld [vmem:[%s9946_s9 + $0x10] sm:$0xff] }
 0x8d0   : > { %4655 = vpow2.f32 %v4350_v40  ;;  %v3824_v40 = vld [vmem:[%s9946_s9 + $0x18] sm:$0xff] }
 0x8d1   : > { %v4349_v56 = vmul.f32 -1.442695, %v3848_v44  ;;  %v4348_v50 = vmul.f32 -1.442695, %v3847_v61 }
 0x8d2   : > { %v3802_v0 = vpop.xlane.xlu1 %3801  ;;  %v3799_v16 = vpop.xlane.xlu0 %3798 }
 0x8d3   : > { %4657 = vpow2.f32 %v4349_v56  ;;  %v3846_v35 = vadd.f32 %v3830_v43, %v3802_v0  ;;  %v3845_v39 = vadd.f32 %v3829_v45, %v3799_v16 }
 0x8d4   : > { %4659 = vpow2.f32 %v4348_v50 }
 0x8d5   : > { %v4347_v9 = vmul.f32 -1.442695, %v3846_v35  ;;  %v4346_v5 = vmul.f32 -1.442695, %v3845_v39  ;;  %v3822_v39 = vld [vmem:[%s9946_s9 + $0x8] sm:$0xff] }
 0x8d6   : > { %v3796_v4 = vpop.xlane.xlu1 %3795  ;;  %v3793_v54 = vpop.xlane.xlu0 %3792 }
 0x8d7   : > { %4661 = vpow2.f32 %v4347_v9  ;;  %v3844_v10 = vadd.f32 %v3828_v60, %v3796_v4  ;;  %v3843_v21 = vadd.f32 %v3827_v7, %v3793_v54  ;;  %v3821_v60 = vld [vmem:[%s9946_s9] sm:$0xff] }
 0x8d8   : > { %v4650_v26 = vpop.eup %4649  ;;  %4663 = vpow2.f32 %v4346_v5 }
 0x8d9   : > { %v4652_v52 = vpop.eup %4651  ;;  %v3916_v57 = vadd.f32 1.0, %v4650_v26  ;;  %v4345_v34 = vmul.f32 -1.442695, %v3844_v10  ;;  %v4344_v13 = vmul.f32 -1.442695, %v3843_v21 }
 0x8da   : > { %v3915_v32 = vadd.f32 1.0, %v4652_v52  ;;  %v3790_v30 = vpop.xlane.xlu1 %3789  ;;  %v3787_v58 = vpop.xlane.xlu0 %3786 }
 0x8db   : > { %4665 = vrcp.f32 %v3916_v57  ;;  %v3842_v63 = vadd.f32 %v3826_v42, %v3790_v30  ;;  %v3841_v6 = vadd.f32 %v3825_v18, %v3787_v58 }
 0x8dc   : > { %v4654_v12 = vpop.eup %4653  ;;  %4667 = vrcp.f32 %v3915_v32 }
 0x8dd   : > { %v4656_v46 = vpop.eup %4655  ;;  %v3914_v44 = vadd.f32 1.0, %v4654_v12  ;;  %4669 = vpow2.f32 %v4345_v34  ;;  %v4343_v61 = vmul.f32 -1.442695, %v3842_v63  ;;  %v4342_v45 = vmul.f32 -1.442695, %v3841_v6 }
 0x8de   : > { %v3913_v43 = vadd.f32 1.0, %v4656_v46  ;;  %4671 = vpow2.f32 %v4344_v13  ;;  %v3784_v56 = vpop.xlane.xlu1 %3783  ;;  %v3781_v50 = vpop.xlane.xlu0 %3780 }
 0x8df   : > { %4673 = vrcp.f32 %v3914_v44  ;;  %v3840_v0 = vadd.f32 %v3824_v40, %v3784_v56  ;;  %v3839_v16 = vadd.f32 %v3823_v8, %v3781_v50 }
 0x8e0   : > { %v4658_v35 = vpop.eup %4657  ;;  %4675 = vrcp.f32 %v3913_v43 }
 0x8e1   : > { %v4660_v7 = vpop.eup %4659  ;;  %v3912_v9 = vadd.f32 1.0, %v4658_v35  ;;  %4677 = vpow2.f32 %v4343_v61  ;;  %v4341_v5 = vmul.f32 -1.442695, %v3840_v0  ;;  %v4340_v54 = vmul.f32 -1.442695, %v3839_v16 }
 0x8e2   : > { %v3911_v4 = vadd.f32 1.0, %v4660_v7  ;;  %4679 = vpow2.f32 %v4342_v45  ;;  %v3778_v10 = vpop.xlane.xlu1 %3777  ;;  %v3775_v21 = vpop.xlane.xlu0 %3774 }
 0x8e3   : > { %4681 = vrcp.f32 %v3912_v9  ;;  %v3838_v26 = vadd.f32 %v3822_v39, %v3778_v10  ;;  %v3837_v42 = vadd.f32 %v3821_v60, %v3775_v21 }
 0x8e4   : > { %v4662_v18 = vpop.eup %4661  ;;  %4683 = vrcp.f32 %v3911_v4 }
 0x8e5   : > { %v4664_v52 = vpop.eup %4663  ;;  %v3910_v57 = vadd.f32 1.0, %v4662_v18  ;;  %4685 = vpow2.f32 %v4341_v5  ;;  %v4339_v34 = vmul.f32 -1.442695, %v3838_v26  ;;  %v4338_v13 = vmul.f32 -1.442695, %v3837_v42 }
 0x8e6   : > { %v3909_v32 = vadd.f32 1.0, %v4664_v52  ;;  %4687 = vpow2.f32 %v4340_v54 }
 0x8e7   : > { %4689 = vrcp.f32 %v3910_v57 }
 0x8e8   : > { %v4666_v30 = vpop.eup %4665  ;;  %4691 = vrcp.f32 %v3909_v32  ;;  %v4082_v32 = vld [vmem:[%s9948_s11 + $0x8] sm:$0xff] }
 0x8e9   : > { %v4668_v58 = vpop.eup %4667  ;;  %4693 = vpow2.f32 %v4339_v34  ;;  %4026 = vperm.xlu1 %4377, %v4666_v30   ;;  %v4084_v30 = vld [vmem:[%s9948_s11 + $0x18] sm:$0xff] }
 0x8ea   : > { %v4670_v63 = vpop.eup %4669  ;;  %4695 = vpow2.f32 %v4338_v13  ;;  %4021 = vperm.xlu0 %4378, %v4668_v58   ;;  %v4081_v13 = vld [vmem:[%s9948_s11] sm:$0xff]  ;;  %v4083_v58 = vld [vmem:[%s9948_s11 + $0x10] sm:$0xff] }
 0x8eb   : > { %v4672_v6 = vpop.eup %4671  ;;  %v3908_v12 = vadd.f32 1.0, %v4670_v63 }
 0x8ec   : > { %v4674_v40 = vpop.eup %4673  ;;  %v3907_v8 = vadd.f32 1.0, %v4672_v6 }
 0x8ed   : > { %v4676_v46 = vpop.eup %4675  ;;  %4697 = vrcp.f32 %v3908_v12 }
 0x8ee   : > { %v4678_v44 = vpop.eup %4677  ;;  %4699 = vrcp.f32 %v3907_v8  ;;  %4011 = vperm.xlu1 %4377, %v4676_v46   ;;  %4016 = vperm.xlu0 %4378, %v4674_v40  }
 0x8ef   : > { %v4680_v61 = vpop.eup %4679  ;;  %v3906_v43 = vadd.f32 1.0, %v4678_v44 }
 0x8f0   : > { %v4682_v45 = vpop.eup %4681  ;;  %v3905_v56 = vadd.f32 1.0, %v4680_v61 }
 0x8f1   : > { %v4684_v50 = vpop.eup %4683  ;;  %4701 = vrcp.f32 %v3906_v43 }
 0x8f2   : > { %v4686_v0 = vpop.eup %4685  ;;  %4703 = vrcp.f32 %v3905_v56  ;;  %4001 = vperm.xlu1 %4377, %v4684_v50   ;;  %4006 = vperm.xlu0 %4378, %v4682_v45  }
 0x8f3   : > { %v4688_v16 = vpop.eup %4687  ;;  %v3904_v35 = vadd.f32 1.0, %v4686_v0 }
 0x8f4   : > { %v4690_v39 = vpop.eup %4689  ;;  %v3903_v60 = vadd.f32 1.0, %v4688_v16 }
 0x8f5   : > { %v4692_v7 = vpop.eup %4691  ;;  %4705 = vrcp.f32 %v3904_v35 }
 0x8f6   : > { %v4694_v9 = vpop.eup %4693  ;;  %4707 = vrcp.f32 %v3903_v60  ;;  %3991 = vperm.xlu1 %4377, %v4692_v7   ;;  %3996 = vperm.xlu0 %4378, %v4690_v39  }
 0x8f7   : > { %v4696_v5 = vpop.eup %4695  ;;  %v3902_v4 = vadd.f32 1.0, %v4694_v9 }
 0x8f8   : > { %v3901_v54 = vadd.f32 1.0, %v4696_v5 }
 0x8f9   : > { %4709 = vrcp.f32 %v3902_v4 }
 0x8fa   : > { %v4698_v10 = vpop.eup %4697  ;;  %4711 = vrcp.f32 %v3901_v54 }
 0x8fb   : > { %v4700_v21 = vpop.eup %4699  ;;  %3986 = vperm.xlu0 %4378, %v4698_v10  }
 0x8fc   : > { %3981 = vperm.xlu1 %4377, %v4700_v21  }
 0x8fe   : > { %v4702_v26 = vpop.eup %4701 }
 0x8ff   : > { %v4704_v42 = vpop.eup %4703  ;;  %3976 = vperm.xlu0 %4378, %v4702_v26  }
 0x900   : > { %3971 = vperm.xlu1 %4377, %v4704_v42  }
 0x902   : > { %v4706_v18 = vpop.eup %4705 }
 0x903   : > { %v4708_v52 = vpop.eup %4707  ;;  %3966 = vperm.xlu0 %4378, %v4706_v18  }
 0x904   : > { %3961 = vperm.xlu1 %4377, %v4708_v52  }
 0x906   : > { %v4710_v57 = vpop.eup %4709 }
 0x907   : > { %v4712_v34 = vpop.eup %4711  ;;  %3956 = vperm.xlu0 %4378, %v4710_v57  }
 0x908   : > { %3951 = vperm.xlu1 %4377, %v4712_v34  }
 0x90b   : > { %4092 = vperm.xlu0 %4378, %v4082_v32  }
 0x90c   : > { %4087 = vperm.xlu1 %4377, %v4081_v13  }
 0x90f   : > { %4102 = vperm.xlu0 %4378, %v4084_v30  }
 0x910   : > { %4097 = vperm.xlu1 %4377, %v4083_v58  }
 0x964   : > { %v4027_v63 = vpop.permute.xlu1 %4026 }
 0x965   : > { %v4059_v6 = vmul.f32 %v4027_v63, %v9674_v51  ;;  %v4060_v12 = vmul.f32 %v4027_v63, %v9676_v15  ;;  %v4022_v40 = vpop.permute.xlu0 %4021 }
 0x966   : > { %v4057_v8 = vmul.f32 %v4022_v40, %v9667_v62  ;;  %v4058_v46 = vmul.f32 %v4022_v40, %v9670_v20 }
 0x968   : > { %v4080_v44 = vpack.c.bf16 %v4060_v12, %v4058_v46  ;;  %v4079_v61 = vpack.c.bf16 %v4059_v6, %v4057_v8  ;;  %v11148_v12 = vld [vmem:[#allocation54_spill] sm:$0xff]  ;;  %v11149_v8 = vld [vmem:[#allocation49_spill] sm:$0xff] }
 0x969   : > { %v4012_v43 = vpop.permute.xlu1 %4011  ;;  %v4017_v45 = vpop.permute.xlu0 %4016 }
 0x96a   : > { %v4053_v56 = vmul.f32 %v4012_v43, %v9651_v28  ;;  %v4054_v50 = vmul.f32 %v4012_v43, %v9654_v23  ;;  %v4055_v0 = vmul.f32 %v4017_v45, %v9659_v31  ;;  %v4056_v16 = vmul.f32 %v4017_v45, %v9662_v41  ;;  %4117 = vmatprep.subr.bf16.mxu1 %v4080_v44  ;;  %v4745_v45 = vld [vmem:[%s4882_s16] sm:$0xff] }
 0x96b   : > { %4118 = vmatpush1.bf16.msra.mxu1 %v4079_v61 }
 0x96c   : > { %v4077_v51 = vpack.c.bf16 %v4055_v0, %v4053_v56  ;;  %v4078_v15 = vpack.c.bf16 %v4056_v16, %v4054_v50 }
 0x96d   : > { %v4002_v35 = vpop.permute.xlu1 %4001  ;;  %v4007_v62 = vpop.permute.xlu0 %4006 }
 0x96e   : > { %v4049_v20 = vmul.f32 %v4002_v35, %v9625_v27  ;;  %v4050_v39 = vmul.f32 %v4002_v35, %v9632_v53  ;;  %v4051_v60 = vmul.f32 %v4007_v62, %v9643_v17  ;;  %v4052_v28 = vmul.f32 %v4007_v62, %v9646_v29  ;;  %4119 = vmatprep.subr.bf16.mxu1 %v4078_v15 }
 0x96f   : > { %4120 = vmatpush1.bf16.msra.mxu1 %v4077_v51  ;;  %v4746_v51 = vld [vmem:[%s4882_s16 + $0x8] sm:$0xff] }
 0x970   : > { %v4075_v23 = vpack.c.bf16 %v4051_v60, %v4049_v20  ;;  %v4076_v31 = vpack.c.bf16 %v4052_v28, %v4050_v39  ;;  %v4747_v20 = vld [vmem:[%s4882_s16 + $0x10] sm:$0xff] }
 0x971   : > { %v3992_v7 = vpop.permute.xlu1 %3991  ;;  %v3997_v41 = vpop.permute.xlu0 %3996 }
 0x972   : > { %v4045_v9 = vmul.f32 %v3992_v7, %v9383_v59  ;;  %v4046_v5 = vmul.f32 %v3992_v7, %v9416_v14  ;;  %v4047_v4 = vmul.f32 %v3997_v41, %v9613_v2  ;;  %v4048_v27 = vmul.f32 %v3997_v41, %v9617_v38  ;;  %4121 = vmatprep.subr.bf16.mxu1 %v4076_v31  ;;  %v4748_v31 = vld [vmem:[%s4882_s16 + $0x18] sm:$0xff] }
 0x973   : > { %4122 = vmatpush1.bf16.msra.mxu1 %v4075_v23 }
 0x974   : > { %v4073_v53 = vpack.c.bf16 %v4047_v4, %v4045_v9  ;;  %v4074_v17 = vpack.c.bf16 %v4048_v27, %v4046_v5  ;;  %v4749_v5 = vld [vmem:[%s4882_s16 + $0x20] sm:$0xff] }
 0x976   : > { %v3987_v54 = vpop.permute.xlu0 %3986  ;;  %4123 = vmatprep.subr.bf16.mxu1 %v4074_v17 }
 0x977   : > { %v3982_v29 = vpop.permute.xlu1 %3981  ;;  %v4043_v10 = vmul.f32 %v3987_v54, %v9607_v3  ;;  %v4044_v21 = vmul.f32 %v3987_v54, %v9628_v37  ;;  %4124 = vmatpush1.bf16.msra.mxu1 %v4073_v53  ;;  %v4750_v54 = vld [vmem:[%s4882_s16 + $0x28] sm:$0xff] }
 0x978   : > { %v4041_v59 = vmul.f32 %v3982_v29, %v9587_v22  ;;  %v4042_v14 = vmul.f32 %v3982_v29, %v9592_v1 }
 0x97a   : > { %v4071_v26 = vpack.c.bf16 %v4043_v10, %v4041_v59  ;;  %v4072_v2 = vpack.c.bf16 %v4044_v21, %v4042_v14  ;;  %v3977_v42 = vpop.permute.xlu0 %3976  ;;  %v4751_v59 = vld [vmem:[%s4882_s16 + $0x30] sm:$0xff] }
 0x97b   : > { %v3972_v38 = vpop.permute.xlu1 %3971  ;;  %v4039_v18 = vmul.f32 %v3977_v42, %v9546_v47  ;;  %v4040_v52 = vmul.f32 %v3977_v42, %v9557_v19 }
 0x97c   : > { %v4037_v57 = vmul.f32 %v3972_v38, %v9520_v36  ;;  %v4038_v34 = vmul.f32 %v3972_v38, %v9527_v25  ;;  %4125 = vmatprep.subr.bf16.mxu1 %v4072_v2  ;;  %v4752_v2 = vld [vmem:[%s4882_s16 + $0x38] sm:$0xff] }
 0x97d   : > { %4126 = vmatpush1.bf16.msra.mxu1 %v4071_v26 }
 0x97e   : > { %v4069_v3 = vpack.c.bf16 %v4039_v18, %v4037_v57  ;;  %v4070_v37 = vpack.c.bf16 %v4040_v52, %v4038_v34  ;;  %v3967_v32 = vpop.permute.xlu0 %3966 }
 0x97f   : > { %v3962_v22 = vpop.permute.xlu1 %3961  ;;  %v4035_v1 = vmul.f32 %v3967_v32, %v9498_v11  ;;  %v4036_v13 = vmul.f32 %v3967_v32, %v9512_v55  ;;  %v4387_v55 = vld [vmem:[%s9947_s10] sm:$0xff]  }
 0x980   : > { %v4033_v30 = vmul.f32 %v3962_v22, %v9459_v33  ;;  %v4034_v47 = vmul.f32 %v3962_v22, %v9466_v49  ;;  %4127 = vmatprep.subr.bf16.mxu1 %v4070_v37 }
 0x981   : > { %4128 = vmatpush1.bf16.msra.mxu1 %v4069_v3 }
 0x982   : > { %v4067_v19 = vpack.c.bf16 %v4035_v1, %v4033_v30  ;;  %v4068_v36 = vpack.c.bf16 %v4036_v13, %v4034_v47  ;;  %v3957_v58 = vpop.permute.xlu0 %3956 }
 0x983   : > { %v3952_v25 = vpop.permute.xlu1 %3951  ;;  %v4031_v63 = vmul.f32 %v3957_v58, %v9442_v24  ;;  %v4032_v6 = vmul.f32 %v3957_v58, %v9449_v48  ;;  %v11150_v24 = vmov 0   ;;  %v4388_v48 = vld [vmem:[%s9947_s10 + $0x8] sm:$0xff]  }
 0x984   : > { %v4029_v40 = vmul.f32 %v3952_v25, %v11148_v12  ;;  %v4030_v11 = vmul.f32 %v3952_v25, %v11149_v8  ;;  %4129 = vmatprep.subr.bf16.mxu1 %v4068_v36 }
 0x985   : > { %4130 = vmatpush1.bf16.msra.mxu1 %v4067_v19 }
 0x986   : > { %v4065_v33 = vpack.c.bf16 %v4031_v63, %v4029_v40  ;;  %v4066_v49 = vpack.c.bf16 %v4032_v6, %v4030_v11  ;;  %v4093_v0 = vpop.permute.xlu0 %4092 }
 0x987   : > { %v4088_v46 = vpop.permute.xlu1 %4087 }
 0x988   : > { %4131 = vmatprep.subr.bf16.mxu1 %v4066_v49 }
 0x989   : > { %4132 = vmatpush1.bf16.msra.mxu1 %v4065_v33 }
 0x98a   : > { %v4103_v53 = vpop.permute.xlu0 %4102 }
 0x98b   : > { %v4098_v28 = vpop.permute.xlu1 %4097 }
 0x98c   : > { %4150 = vmatmul.mubr.bf16.vlgmr.msra.gmra.mxu1 %v4387_v55 }
 0x98d   : > { %4159 = vmatprep.mubr.bf16.mxu1 %v11150_v24 }
 0x994   : > { %4160 = vmatmul.mubr.bf16.gmra.mxu1 %v4388_v48 }
 0xa4c   : > { %v4151_v44 = vpop.f32.mrf.mxu1 }
 0xa4d   : > { %v4152_v61 = vadd.f32 %v4151_v44, %v4088_v46 }
 0xa4e   : > { %v4153_v43 = vpop.f32.mrf.mxu1 }
 0xa4f   : > { %v4170_v56 = vadd.f32 %v4745_v45, %v4152_v61  ;;  %v4154_v50 = vadd.f32 %v4153_v43, %v4088_v46 }
 0xa50   : > { %v4155_v16 = vpop.f32.mrf.mxu1 }
 0xa51   : > { %4178 = vst [vmem:[%s9916_s15] sm:$0xff] %v4170_v56  ;;  %v4171_v15 = vadd.f32 %v4746_v51, %v4154_v50  ;;  %v4156_v35 = vadd.f32 %v4155_v16, %v4093_v0 }
 0xa52   : > { %v4157_v62 = vpop.f32.mrf.mxu1 }
 0xa53   : > { %4179 = vst [vmem:[%s9916_s15 + $0x8] sm:$0xff] %v4171_v15  ;;  %v4172_v39 = vadd.f32 %v4747_v20, %v4156_v35  ;;  %v4158_v60 = vadd.f32 %v4157_v62, %v4093_v0 }
 0xa54   : > { %v4161_v23 = vpop.f32.mrf.mxu1 }
 0xa55   : > { %4180 = vst [vmem:[%s9916_s15 + $0x10] sm:$0xff] %v4172_v39  ;;  %v4173_v7 = vadd.f32 %v4748_v31, %v4158_v60  ;;  %v4162_v41 = vadd.f32 %v4161_v23, %v4098_v28 }
 0xa56   : > { %v4163_v9 = vpop.f32.mrf.mxu1 }
 0xa57   : > { %4181 = vst [vmem:[%s9916_s15 + $0x18] sm:$0xff] %v4173_v7  ;;  %v4174_v4 = vadd.f32 %v4749_v5, %v4162_v41  ;;  %v4164_v27 = vadd.f32 %v4163_v9, %v4098_v28 }
 0xa58   : > { %v4165_v17 = vpop.f32.mrf.mxu1 }
 0xa59   : > { %4182 = vst [vmem:[%s9916_s15 + $0x20] sm:$0xff] %v4174_v4  ;;  %v4175_v29 = vadd.f32 %v4750_v54, %v4164_v27  ;;  %v4166_v10 = vadd.f32 %v4165_v17, %v4103_v53 }
 0xa5a   : > { %v4167_v21 = vpop.f32.mrf.mxu1 }
 0xa5b   : > { %4183 = vst [vmem:[%s9916_s15 + $0x28] sm:$0xff] %v4175_v29  ;;  %v4176_v14 = vadd.f32 %v4751_v59, %v4166_v10  ;;  %v4168_v26 = vadd.f32 %v4167_v21, %v4103_v53 }
 0xa5d   : > { %4184 = vst [vmem:[%s9916_s15 + $0x30] sm:$0xff] %v4176_v14  ;;  %v4177_v42 = vadd.f32 %v4752_v2, %v4168_v26 }
 0xa5f   : > { %4185 = vst [vmem:[%s9916_s15 + $0x38] sm:$0xff] %v4177_v42 }
 0xa60 PF: > { %s22_s21 = sadd.s32 1, %s4759_s21  }
 0xa61   : > { %p19_p4 = scmp.ge.s32.totalorder %s22_s21, 4  }
 0xa63   :  { %21 = sbr.rel (!%p19_p4) target bundleno = 1 (0x1), region = 105 }

</bundles_post_ra>
